<compile_context>
chip_gen: v7x
topology: tpu7x:2x2x1
jax: 0.10.0
libtpu: 0.0.40
codegen_flags: <defaults>
</compile_context>

<pallas_src>
import jax
import jax.numpy as jnp
from jax.experimental import pallas as pl
from jax.experimental.pallas import tpu as pltpu

DIMS = (128, 128, 64, 64, 64, 32, 32, 16, 16)   # bn0..bn8 feature dims
PAD = 128                                        # lane-dense padded width
N_BLOCKS = len(DIMS) - 1                         # 8 (bn -> relu -> fc) blocks
BN_EPS = 1e-5


def _embedding_kernel(*refs):
    """refs = (x_ref, [vec0, W0, vec1, W1, ..., vec7, W7, vec8], out_ref).

    vec_i is (8, PAD): row0 = folded BN scale (input dim), row1 = folded BN
    shift, row2 = fc bias (output dim); remaining rows are zero padding.
    W_i is (PAD, PAD), zero-padded. vec8 holds the final bn8 scale/shift.
    """
    x_ref, out_ref = refs[0], refs[-1]
    params = refs[1:-1]

    h = x_ref[...]                                   # (TN, 128) f32, lane-dense
    for layer in range(N_BLOCKS):                    # fully unrolled chain
        vec = params[2 * layer][...]                 # (8, PAD)
        w = params[2 * layer + 1][...]               # (PAD, PAD)
        h = jnp.maximum(h * vec[0:1, :] + vec[1:2, :], 0.0)       # VPU: BN+ReLU
        # MXU matmul, default precision (single-pass bf16), f32 accumulation.
        h = jnp.dot(h, w, preferred_element_type=jnp.float32) + vec[2:3, :]
    vec8 = params[-1][...]                           # final bn8
    h = h * vec8[0:1, :] + vec8[1:2, :]
    out_ref[...] = h[:, :DIMS[-1]].astype(out_ref.dtype)


def fold_bn(gamma, beta, mean, var, eps=BN_EPS):
    """Eval-mode BatchNorm1d folded into per-feature (scale, shift)."""
    scale = gamma / jnp.sqrt(var + eps)
    shift = beta - mean * scale
    return scale, shift


def pack_params(bn_params, fc_params):
    """Pad + pack module parameters host-side.

    bn_params: 9 tuples (gamma, beta, running_mean, running_var), dims DIMS[i].
    fc_params: 8 tuples (W, b) with torch Linear layout W:(c_out, c_in).
    Returns 17 arrays: [vec0, W0, ..., vec7, W7, vec8].
    """
    packed = []
    for i in range(N_BLOCKS):
        c_in, c_out = DIMS[i], DIMS[i + 1]
        scale, shift = fold_bn(*bn_params[i])
        w, b = fc_params[i]
        vec = jnp.zeros((8, PAD), jnp.float32)
        vec = vec.at[0, :c_in].set(scale.reshape(-1))
        vec = vec.at[1, :c_in].set(shift.reshape(-1))
        vec = vec.at[2, :c_out].set(b.reshape(-1))
        w_pad = jnp.zeros((PAD, PAD), jnp.float32)
        w_pad = w_pad.at[:c_in, :c_out].set(w.T)     # (c_in, c_out) layout
        packed += [vec, w_pad]
    scale8, shift8 = fold_bn(*bn_params[-1])
    vec8 = jnp.zeros((8, PAD), jnp.float32)
    vec8 = vec8.at[0, :DIMS[-1]].set(scale8.reshape(-1))
    vec8 = vec8.at[1, :DIMS[-1]].set(shift8.reshape(-1))
    packed.append(vec8)
    return packed


def embedding_net_forward(x, packed_params, *, block_n=512):
    """EmbeddingNet.forward(x):  x (N, 128) -> (N, 16)."""
    n, d = x.shape
    assert d == DIMS[0], f"expected {DIMS[0]} input features, got {d}"
    tn = min(block_n, n)                 # block_n is a multiple of 8; tn==n ok
    grid = (pl.cdiv(n, tn),)

    in_specs = [pl.BlockSpec((tn, d), lambda i: (i, 0))]
    # Parameters: full blocks, constant index map -> VMEM-resident across tiles.
    in_specs += [pl.BlockSpec(p.shape, lambda i: (0, 0)) for p in packed_params]
    out_spec = pl.BlockSpec((tn, DIMS[-1]), lambda i: (i, 0))

    return pl.pallas_call(
        _embedding_kernel,
        out_shape=jax.ShapeDtypeStruct((n, DIMS[-1]), jnp.float32),
        grid_spec=pltpu.PrefetchScalarGridSpec(
            num_scalar_prefetch=0,
            grid=grid,
            in_specs=in_specs,
            out_specs=out_spec,
        ),
        compiler_params=pltpu.CompilerParams(
            dimension_semantics=("parallel",),       # batch tiles independent
            vmem_limit_bytes=32 * 1024 * 1024,       # covers v5e's 16 MiB default
        ),
    )(x, *packed_params)


def _reference(x, bn_params, fc_params):
    """Pure-JAX f32 reference of eval-mode EmbeddingNet.forward."""
    h = x
    for i in range(N_BLOCKS):
        gamma, beta, mean, var = bn_params[i]
        w, b = fc_params[i]
        h = (h - mean) / jnp.sqrt(var + BN_EPS) * gamma + beta
        h = jnp.maximum(h, 0.0)
        h = jnp.dot(h, w.T, precision=jax.lax.Precision.HIGHEST) + b
    gamma, beta, mean, var = bn_params[-1]
    return (h - mean) / jnp.sqrt(var + BN_EPS) * gamma + beta


if __name__ == "__main__":
    N = 1024                                  # 2 batch tiles of 512 rows
    key = jax.random.PRNGKey(0)
    keys = iter(jax.random.split(key, 128))

    x = jax.random.normal(next(keys), (N, DIMS[0]), dtype=jnp.float32)

    def make_bn(c):
        gamma = 1.0 + 0.1 * jax.random.normal(next(keys), (c,), jnp.float32)
        beta = 0.1 * jax.random.normal(next(keys), (c,), jnp.float32)
        mean = 0.1 * jax.random.normal(next(keys), (c,), jnp.float32)
        var = jax.random.uniform(next(keys), (c,), jnp.float32,
                                 minval=0.5, maxval=1.5)
        return gamma, beta, mean, var

    bn_params = [make_bn(DIMS[i]) for i in range(len(DIMS))]
    fc_params = []
    for i in range(N_BLOCKS):
        c_in, c_out = DIMS[i], DIMS[i + 1]
        w = jax.random.normal(next(keys), (c_out, c_in), jnp.float32) / jnp.sqrt(c_in)
        b = 0.01 * jax.random.normal(next(keys), (c_out,), jnp.float32)
        fc_params.append((w, b))

    packed = pack_params(bn_params, fc_params)

    out = embedding_net_forward(x, packed)
    out = jax.block_until_ready(out)

    ref = _reference(x, bn_params, fc_params)
    assert out.shape == (N, DIMS[-1]), out.shape
    # Default-precision (bf16) MXU vs f32 reference: relative max-error check.
    max_err = float(jnp.max(jnp.abs(out - ref)))
    denom = max(float(jnp.max(jnp.abs(ref))), 1.0)
    assert max_err <= 0.05 * denom, (max_err, denom)

    print("KERNEL_OK")
</pallas_src>

<mosaic_0001>
module attributes {stable_mosaic.version = 11 : i64} {
  func.func @_embedding_kernel(%arg0: i32, %arg1: memref<512x128xf32, #tpu.memory_space<vmem>>, %arg2: memref<8x128xf32, #tpu.memory_space<vmem>>, %arg3: memref<128x128xf32, #tpu.memory_space<vmem>>, %arg4: memref<8x128xf32, #tpu.memory_space<vmem>>, %arg5: memref<128x128xf32, #tpu.memory_space<vmem>>, %arg6: memref<8x128xf32, #tpu.memory_space<vmem>>, %arg7: memref<128x128xf32, #tpu.memory_space<vmem>>, %arg8: memref<8x128xf32, #tpu.memory_space<vmem>>, %arg9: memref<128x128xf32, #tpu.memory_space<vmem>>, %arg10: memref<8x128xf32, #tpu.memory_space<vmem>>, %arg11: memref<128x128xf32, #tpu.memory_space<vmem>>, %arg12: memref<8x128xf32, #tpu.memory_space<vmem>>, %arg13: memref<128x128xf32, #tpu.memory_space<vmem>>, %arg14: memref<8x128xf32, #tpu.memory_space<vmem>>, %arg15: memref<128x128xf32, #tpu.memory_space<vmem>>, %arg16: memref<8x128xf32, #tpu.memory_space<vmem>>, %arg17: memref<128x128xf32, #tpu.memory_space<vmem>>, %arg18: memref<8x128xf32, #tpu.memory_space<vmem>>, %arg19: memref<512x16xf32, #tpu.memory_space<vmem>>) attributes {dimension_semantics = [#tpu.dimension_semantics<parallel>], iteration_bounds = array<i64: 2>, scalar_prefetch = 0 : i64, scratch_operands = 0 : i64, tpu.core_type = #tpu.core_type<tc>, window_params = [{transform_indices = @transform_0, window_bounds = array<i64: 512, 128>}, {pipeline_mode = #tpu.pipeline_mode<synchronous>, transform_indices = @transform_1, window_bounds = array<i64: 8, 128>}, {pipeline_mode = #tpu.pipeline_mode<synchronous>, transform_indices = @transform_2, window_bounds = array<i64: 128, 128>}, {pipeline_mode = #tpu.pipeline_mode<synchronous>, transform_indices = @transform_3, window_bounds = array<i64: 8, 128>}, {pipeline_mode = #tpu.pipeline_mode<synchronous>, transform_indices = @transform_4, window_bounds = array<i64: 128, 128>}, {pipeline_mode = #tpu.pipeline_mode<synchronous>, transform_indices = @transform_5, window_bounds = array<i64: 8, 128>}, {pipeline_mode = #tpu.pipeline_mode<synchronous>, transform_indices = @transform_6, window_bounds = array<i64: 128, 128>}, {pipeline_mode = #tpu.pipeline_mode<synchronous>, transform_indices = @transform_7, window_bounds = array<i64: 8, 128>}, {pipeline_mode = #tpu.pipeline_mode<synchronous>, transform_indices = @transform_8, window_bounds = array<i64: 128, 128>}, {pipeline_mode = #tpu.pipeline_mode<synchronous>, transform_indices = @transform_9, window_bounds = array<i64: 8, 128>}, {pipeline_mode = #tpu.pipeline_mode<synchronous>, transform_indices = @transform_10, window_bounds = array<i64: 128, 128>}, {pipeline_mode = #tpu.pipeline_mode<synchronous>, transform_indices = @transform_11, window_bounds = array<i64: 8, 128>}, {pipeline_mode = #tpu.pipeline_mode<synchronous>, transform_indices = @transform_12, window_bounds = array<i64: 128, 128>}, {pipeline_mode = #tpu.pipeline_mode<synchronous>, transform_indices = @transform_13, window_bounds = array<i64: 8, 128>}, {pipeline_mode = #tpu.pipeline_mode<synchronous>, transform_indices = @transform_14, window_bounds = array<i64: 128, 128>}, {pipeline_mode = #tpu.pipeline_mode<synchronous>, transform_indices = @transform_15, window_bounds = array<i64: 8, 128>}, {pipeline_mode = #tpu.pipeline_mode<synchronous>, transform_indices = @transform_16, window_bounds = array<i64: 128, 128>}, {pipeline_mode = #tpu.pipeline_mode<synchronous>, transform_indices = @transform_17, window_bounds = array<i64: 8, 128>}, {transform_indices = @transform_18, window_bounds = array<i64: 512, 16>}]} {
    %c0 = arith.constant 0 : index
    %c0_0 = arith.constant 0 : index
    %0 = vector.load %arg1[%c0, %c0_0] : memref<512x128xf32, #tpu.memory_space<vmem>>, vector<512x128xf32>
    %c0_1 = arith.constant 0 : index
    %c0_2 = arith.constant 0 : index
    %1 = vector.load %arg2[%c0_1, %c0_2] : memref<8x128xf32, #tpu.memory_space<vmem>>, vector<8x128xf32>
    %c0_3 = arith.constant 0 : index
    %c0_4 = arith.constant 0 : index
    %2 = vector.load %arg3[%c0_3, %c0_4] : memref<128x128xf32, #tpu.memory_space<vmem>>, vector<128x128xf32>
    %3 = vector.extract_strided_slice %1 {offsets = [0, 0], sizes = [1, 128], strides = [1, 1]} : vector<8x128xf32> to vector<1x128xf32>
    %4 = vector.broadcast %3 : vector<1x128xf32> to vector<512x128xf32>
    %5 = arith.mulf %0, %4 : vector<512x128xf32>
    %6 = vector.extract_strided_slice %1 {offsets = [1, 0], sizes = [1, 128], strides = [1, 1]} : vector<8x128xf32> to vector<1x128xf32>
    %7 = vector.broadcast %6 : vector<1x128xf32> to vector<512x128xf32>
    %8 = arith.addf %5, %7 : vector<512x128xf32>
    %cst = arith.constant 0.000000e+00 : f32
    %9 = vector.broadcast %cst : f32 to vector<512x128xf32>
    %10 = arith.maximumf %8, %9 : vector<512x128xf32>
    %cst_5 = arith.constant dense<0.000000e+00> : vector<512x128xf32>
    %11 = tpu.matmul %10, %2, %cst_5 {dimension_numbers = #tpu.dot_dimension_numbers<[1], [0], [0], [1], [0, 0, 1, 1], [], []>} : vector<512x128xf32>, vector<128x128xf32>, vector<512x128xf32> -> vector<512x128xf32>
    %12 = vector.extract_strided_slice %1 {offsets = [2, 0], sizes = [1, 128], strides = [1, 1]} : vector<8x128xf32> to vector<1x128xf32>
    %13 = vector.broadcast %12 : vector<1x128xf32> to vector<512x128xf32>
    %14 = arith.addf %11, %13 : vector<512x128xf32>
    %c0_6 = arith.constant 0 : index
    %c0_7 = arith.constant 0 : index
    %15 = vector.load %arg4[%c0_6, %c0_7] : memref<8x128xf32, #tpu.memory_space<vmem>>, vector<8x128xf32>
    %c0_8 = arith.constant 0 : index
    %c0_9 = arith.constant 0 : index
    %16 = vector.load %arg5[%c0_8, %c0_9] : memref<128x128xf32, #tpu.memory_space<vmem>>, vector<128x128xf32>
    %17 = vector.extract_strided_slice %15 {offsets = [0, 0], sizes = [1, 128], strides = [1, 1]} : vector<8x128xf32> to vector<1x128xf32>
    %18 = vector.broadcast %17 : vector<1x128xf32> to vector<512x128xf32>
    %19 = arith.mulf %14, %18 : vector<512x128xf32>
    %20 = vector.extract_strided_slice %15 {offsets = [1, 0], sizes = [1, 128], strides = [1, 1]} : vector<8x128xf32> to vector<1x128xf32>
    %21 = vector.broadcast %20 : vector<1x128xf32> to vector<512x128xf32>
    %22 = arith.addf %19, %21 : vector<512x128xf32>
    %cst_10 = arith.constant 0.000000e+00 : f32
    %23 = vector.broadcast %cst_10 : f32 to vector<512x128xf32>
    %24 = arith.maximumf %22, %23 : vector<512x128xf32>
    %cst_11 = arith.constant dense<0.000000e+00> : vector<512x128xf32>
    %25 = tpu.matmul %24, %16, %cst_11 {dimension_numbers = #tpu.dot_dimension_numbers<[1], [0], [0], [1], [0, 0, 1, 1], [], []>} : vector<512x128xf32>, vector<128x128xf32>, vector<512x128xf32> -> vector<512x128xf32>
    %26 = vector.extract_strided_slice %15 {offsets = [2, 0], sizes = [1, 128], strides = [1, 1]} : vector<8x128xf32> to vector<1x128xf32>
    %27 = vector.broadcast %26 : vector<1x128xf32> to vector<512x128xf32>
    %28 = arith.addf %25, %27 : vector<512x128xf32>
    %c0_12 = arith.constant 0 : index
    %c0_13 = arith.constant 0 : index
    %29 = vector.load %arg6[%c0_12, %c0_13] : memref<8x128xf32, #tpu.memory_space<vmem>>, vector<8x128xf32>
    %c0_14 = arith.constant 0 : index
    %c0_15 = arith.constant 0 : index
    %30 = vector.load %arg7[%c0_14, %c0_15] : memref<128x128xf32, #tpu.memory_space<vmem>>, vector<128x128xf32>
    %31 = vector.extract_strided_slice %29 {offsets = [0, 0], sizes = [1, 128], strides = [1, 1]} : vector<8x128xf32> to vector<1x128xf32>
    %32 = vector.broadcast %31 : vector<1x128xf32> to vector<512x128xf32>
    %33 = arith.mulf %28, %32 : vector<512x128xf32>
    %34 = vector.extract_strided_slice %29 {offsets = [1, 0], sizes = [1, 128], strides = [1, 1]} : vector<8x128xf32> to vector<1x128xf32>
    %35 = vector.broadcast %34 : vector<1x128xf32> to vector<512x128xf32>
    %36 = arith.addf %33, %35 : vector<512x128xf32>
    %cst_16 = arith.constant 0.000000e+00 : f32
    %37 = vector.broadcast %cst_16 : f32 to vector<512x128xf32>
    %38 = arith.maximumf %36, %37 : vector<512x128xf32>
    %cst_17 = arith.constant dense<0.000000e+00> : vector<512x128xf32>
    %39 = tpu.matmul %38, %30, %cst_17 {dimension_numbers = #tpu.dot_dimension_numbers<[1], [0], [0], [1], [0, 0, 1, 1], [], []>} : vector<512x128xf32>, vector<128x128xf32>, vector<512x128xf32> -> vector<512x128xf32>
    %40 = vector.extract_strided_slice %29 {offsets = [2, 0], sizes = [1, 128], strides = [1, 1]} : vector<8x128xf32> to vector<1x128xf32>
    %41 = vector.broadcast %40 : vector<1x128xf32> to vector<512x128xf32>
    %42 = arith.addf %39, %41 : vector<512x128xf32>
    %c0_18 = arith.constant 0 : index
    %c0_19 = arith.constant 0 : index
    %43 = vector.load %arg8[%c0_18, %c0_19] : memref<8x128xf32, #tpu.memory_space<vmem>>, vector<8x128xf32>
    %c0_20 = arith.constant 0 : index
    %c0_21 = arith.constant 0 : index
    %44 = vector.load %arg9[%c0_20, %c0_21] : memref<128x128xf32, #tpu.memory_space<vmem>>, vector<128x128xf32>
    %45 = vector.extract_strided_slice %43 {offsets = [0, 0], sizes = [1, 128], strides = [1, 1]} : vector<8x128xf32> to vector<1x128xf32>
    %46 = vector.broadcast %45 : vector<1x128xf32> to vector<512x128xf32>
    %47 = arith.mulf %42, %46 : vector<512x128xf32>
    %48 = vector.extract_strided_slice %43 {offsets = [1, 0], sizes = [1, 128], strides = [1, 1]} : vector<8x128xf32> to vector<1x128xf32>
    %49 = vector.broadcast %48 : vector<1x128xf32> to vector<512x128xf32>
    %50 = arith.addf %47, %49 : vector<512x128xf32>
    %cst_22 = arith.constant 0.000000e+00 : f32
    %51 = vector.broadcast %cst_22 : f32 to vector<512x128xf32>
    %52 = arith.maximumf %50, %51 : vector<512x128xf32>
    %cst_23 = arith.constant dense<0.000000e+00> : vector<512x128xf32>
    %53 = tpu.matmul %52, %44, %cst_23 {dimension_numbers = #tpu.dot_dimension_numbers<[1], [0], [0], [1], [0, 0, 1, 1], [], []>} : vector<512x128xf32>, vector<128x128xf32>, vector<512x128xf32> -> vector<512x128xf32>
    %54 = vector.extract_strided_slice %43 {offsets = [2, 0], sizes = [1, 128], strides = [1, 1]} : vector<8x128xf32> to vector<1x128xf32>
    %55 = vector.broadcast %54 : vector<1x128xf32> to vector<512x128xf32>
    %56 = arith.addf %53, %55 : vector<512x128xf32>
    %c0_24 = arith.constant 0 : index
    %c0_25 = arith.constant 0 : index
    %57 = vector.load %arg10[%c0_24, %c0_25] : memref<8x128xf32, #tpu.memory_space<vmem>>, vector<8x128xf32>
    %c0_26 = arith.constant 0 : index
    %c0_27 = arith.constant 0 : index
    %58 = vector.load %arg11[%c0_26, %c0_27] : memref<128x128xf32, #tpu.memory_space<vmem>>, vector<128x128xf32>
    %59 = vector.extract_strided_slice %57 {offsets = [0, 0], sizes = [1, 128], strides = [1, 1]} : vector<8x128xf32> to vector<1x128xf32>
    %60 = vector.broadcast %59 : vector<1x128xf32> to vector<512x128xf32>
    %61 = arith.mulf %56, %60 : vector<512x128xf32>
    %62 = vector.extract_strided_slice %57 {offsets = [1, 0], sizes = [1, 128], strides = [1, 1]} : vector<8x128xf32> to vector<1x128xf32>
    %63 = vector.broadcast %62 : vector<1x128xf32> to vector<512x128xf32>
    %64 = arith.addf %61, %63 : vector<512x128xf32>
    %cst_28 = arith.constant 0.000000e+00 : f32
    %65 = vector.broadcast %cst_28 : f32 to vector<512x128xf32>
    %66 = arith.maximumf %64, %65 : vector<512x128xf32>
    %cst_29 = arith.constant dense<0.000000e+00> : vector<512x128xf32>
    %67 = tpu.matmul %66, %58, %cst_29 {dimension_numbers = #tpu.dot_dimension_numbers<[1], [0], [0], [1], [0, 0, 1, 1], [], []>} : vector<512x128xf32>, vector<128x128xf32>, vector<512x128xf32> -> vector<512x128xf32>
    %68 = vector.extract_strided_slice %57 {offsets = [2, 0], sizes = [1, 128], strides = [1, 1]} : vector<8x128xf32> to vector<1x128xf32>
    %69 = vector.broadcast %68 : vector<1x128xf32> to vector<512x128xf32>
    %70 = arith.addf %67, %69 : vector<512x128xf32>
    %c0_30 = arith.constant 0 : index
    %c0_31 = arith.constant 0 : index
    %71 = vector.load %arg12[%c0_30, %c0_31] : memref<8x128xf32, #tpu.memory_space<vmem>>, vector<8x128xf32>
    %c0_32 = arith.constant 0 : index
    %c0_33 = arith.constant 0 : index
    %72 = vector.load %arg13[%c0_32, %c0_33] : memref<128x128xf32, #tpu.memory_space<vmem>>, vector<128x128xf32>
    %73 = vector.extract_strided_slice %71 {offsets = [0, 0], sizes = [1, 128], strides = [1, 1]} : vector<8x128xf32> to vector<1x128xf32>
    %74 = vector.broadcast %73 : vector<1x128xf32> to vector<512x128xf32>
    %75 = arith.mulf %70, %74 : vector<512x128xf32>
    %76 = vector.extract_strided_slice %71 {offsets = [1, 0], sizes = [1, 128], strides = [1, 1]} : vector<8x128xf32> to vector<1x128xf32>
    %77 = vector.broadcast %76 : vector<1x128xf32> to vector<512x128xf32>
    %78 = arith.addf %75, %77 : vector<512x128xf32>
    %cst_34 = arith.constant 0.000000e+00 : f32
    %79 = vector.broadcast %cst_34 : f32 to vector<512x128xf32>
    %80 = arith.maximumf %78, %79 : vector<512x128xf32>
    %cst_35 = arith.constant dense<0.000000e+00> : vector<512x128xf32>
    %81 = tpu.matmul %80, %72, %cst_35 {dimension_numbers = #tpu.dot_dimension_numbers<[1], [0], [0], [1], [0, 0, 1, 1], [], []>} : vector<512x128xf32>, vector<128x128xf32>, vector<512x128xf32> -> vector<512x128xf32>
    %82 = vector.extract_strided_slice %71 {offsets = [2, 0], sizes = [1, 128], strides = [1, 1]} : vector<8x128xf32> to vector<1x128xf32>
    %83 = vector.broadcast %82 : vector<1x128xf32> to vector<512x128xf32>
    %84 = arith.addf %81, %83 : vector<512x128xf32>
    %c0_36 = arith.constant 0 : index
    %c0_37 = arith.constant 0 : index
    %85 = vector.load %arg14[%c0_36, %c0_37] : memref<8x128xf32, #tpu.memory_space<vmem>>, vector<8x128xf32>
    %c0_38 = arith.constant 0 : index
    %c0_39 = arith.constant 0 : index
    %86 = vector.load %arg15[%c0_38, %c0_39] : memref<128x128xf32, #tpu.memory_space<vmem>>, vector<128x128xf32>
    %87 = vector.extract_strided_slice %85 {offsets = [0, 0], sizes = [1, 128], strides = [1, 1]} : vector<8x128xf32> to vector<1x128xf32>
    %88 = vector.broadcast %87 : vector<1x128xf32> to vector<512x128xf32>
    %89 = arith.mulf %84, %88 : vector<512x128xf32>
    %90 = vector.extract_strided_slice %85 {offsets = [1, 0], sizes = [1, 128], strides = [1, 1]} : vector<8x128xf32> to vector<1x128xf32>
    %91 = vector.broadcast %90 : vector<1x128xf32> to vector<512x128xf32>
    %92 = arith.addf %89, %91 : vector<512x128xf32>
    %cst_40 = arith.constant 0.000000e+00 : f32
    %93 = vector.broadcast %cst_40 : f32 to vector<512x128xf32>
    %94 = arith.maximumf %92, %93 : vector<512x128xf32>
    %cst_41 = arith.constant dense<0.000000e+00> : vector<512x128xf32>
    %95 = tpu.matmul %94, %86, %cst_41 {dimension_numbers = #tpu.dot_dimension_numbers<[1], [0], [0], [1], [0, 0, 1, 1], [], []>} : vector<512x128xf32>, vector<128x128xf32>, vector<512x128xf32> -> vector<512x128xf32>
    %96 = vector.extract_strided_slice %85 {offsets = [2, 0], sizes = [1, 128], strides = [1, 1]} : vector<8x128xf32> to vector<1x128xf32>
    %97 = vector.broadcast %96 : vector<1x128xf32> to vector<512x128xf32>
    %98 = arith.addf %95, %97 : vector<512x128xf32>
    %c0_42 = arith.constant 0 : index
    %c0_43 = arith.constant 0 : index
    %99 = vector.load %arg16[%c0_42, %c0_43] : memref<8x128xf32, #tpu.memory_space<vmem>>, vector<8x128xf32>
    %c0_44 = arith.constant 0 : index
    %c0_45 = arith.constant 0 : index
    %100 = vector.load %arg17[%c0_44, %c0_45] : memref<128x128xf32, #tpu.memory_space<vmem>>, vector<128x128xf32>
    %101 = vector.extract_strided_slice %99 {offsets = [0, 0], sizes = [1, 128], strides = [1, 1]} : vector<8x128xf32> to vector<1x128xf32>
    %102 = vector.broadcast %101 : vector<1x128xf32> to vector<512x128xf32>
    %103 = arith.mulf %98, %102 : vector<512x128xf32>
    %104 = vector.extract_strided_slice %99 {offsets = [1, 0], sizes = [1, 128], strides = [1, 1]} : vector<8x128xf32> to vector<1x128xf32>
    %105 = vector.broadcast %104 : vector<1x128xf32> to vector<512x128xf32>
    %106 = arith.addf %103, %105 : vector<512x128xf32>
    %cst_46 = arith.constant 0.000000e+00 : f32
    %107 = vector.broadcast %cst_46 : f32 to vector<512x128xf32>
    %108 = arith.maximumf %106, %107 : vector<512x128xf32>
    %cst_47 = arith.constant dense<0.000000e+00> : vector<512x128xf32>
    %109 = tpu.matmul %108, %100, %cst_47 {dimension_numbers = #tpu.dot_dimension_numbers<[1], [0], [0], [1], [0, 0, 1, 1], [], []>} : vector<512x128xf32>, vector<128x128xf32>, vector<512x128xf32> -> vector<512x128xf32>
    %110 = vector.extract_strided_slice %99 {offsets = [2, 0], sizes = [1, 128], strides = [1, 1]} : vector<8x128xf32> to vector<1x128xf32>
    %111 = vector.broadcast %110 : vector<1x128xf32> to vector<512x128xf32>
    %112 = arith.addf %109, %111 : vector<512x128xf32>
    %c0_48 = arith.constant 0 : index
    %c0_49 = arith.constant 0 : index
    %113 = vector.load %arg18[%c0_48, %c0_49] : memref<8x128xf32, #tpu.memory_space<vmem>>, vector<8x128xf32>
    %114 = vector.extract_strided_slice %113 {offsets = [0, 0], sizes = [1, 128], strides = [1, 1]} : vector<8x128xf32> to vector<1x128xf32>
    %115 = vector.broadcast %114 : vector<1x128xf32> to vector<512x128xf32>
    %116 = arith.mulf %112, %115 : vector<512x128xf32>
    %117 = vector.extract_strided_slice %113 {offsets = [1, 0], sizes = [1, 128], strides = [1, 1]} : vector<8x128xf32> to vector<1x128xf32>
    %118 = vector.broadcast %117 : vector<1x128xf32> to vector<512x128xf32>
    %119 = arith.addf %116, %118 : vector<512x128xf32>
    %120 = vector.extract_strided_slice %119 {offsets = [0, 0], sizes = [512, 16], strides = [1, 1]} : vector<512x128xf32> to vector<512x16xf32>
    %c0_50 = arith.constant 0 : index
    %c0_51 = arith.constant 0 : index
    %121 = vector.load %arg19[%c0_50, %c0_51] : memref<512x16xf32, #tpu.memory_space<vmem>>, vector<512x16xf32>
    tpu.vector_store %arg19[%c0_50, %c0_51], %120 {strides = array<i32>} : memref<512x16xf32, #tpu.memory_space<vmem>>, vector<512x16xf32>,
    return
  }
  func.func @transform_0(%arg0: i32) -> (i32, i32) {
    %c0_i32 = arith.constant 0 : i32
    %c0_i32_0 = arith.constant 0 : i32
    return %arg0, %c0_i32 : i32, i32
  }
  func.func @transform_1(%arg0: i32) -> (i32, i32) {
    %c0_i32 = arith.constant 0 : i32
    %c0_i32_0 = arith.constant 0 : i32
    %c0_i32_1 = arith.constant 0 : i32
    return %c0_i32, %c0_i32_0 : i32, i32
  }
  func.func @transform_2(%arg0: i32) -> (i32, i32) {
    %c0_i32 = arith.constant 0 : i32
    %c0_i32_0 = arith.constant 0 : i32
    %c0_i32_1 = arith.constant 0 : i32
    return %c0_i32, %c0_i32_0 : i32, i32
  }
  func.func @transform_3(%arg0: i32) -> (i32, i32) {
    %c0_i32 = arith.constant 0 : i32
    %c0_i32_0 = arith.constant 0 : i32
    %c0_i32_1 = arith.constant 0 : i32
    return %c0_i32, %c0_i32_0 : i32, i32
  }
  func.func @transform_4(%arg0: i32) -> (i32, i32) {
    %c0_i32 = arith.constant 0 : i32
    %c0_i32_0 = arith.constant 0 : i32
    %c0_i32_1 = arith.constant 0 : i32
    return %c0_i32, %c0_i32_0 : i32, i32
  }
  func.func @transform_5(%arg0: i32) -> (i32, i32) {
    %c0_i32 = arith.constant 0 : i32
    %c0_i32_0 = arith.constant 0 : i32
    %c0_i32_1 = arith.constant 0 : i32
    return %c0_i32, %c0_i32_0 : i32, i32
  }
  func.func @transform_6(%arg0: i32) -> (i32, i32) {
    %c0_i32 = arith.constant 0 : i32
    %c0_i32_0 = arith.constant 0 : i32
    %c0_i32_1 = arith.constant 0 : i32
    return %c0_i32, %c0_i32_0 : i32, i32
  }
  func.func @transform_7(%arg0: i32) -> (i32, i32) {
    %c0_i32 = arith.constant 0 : i32
    %c0_i32_0 = arith.constant 0 : i32
    %c0_i32_1 = arith.constant 0 : i32
    return %c0_i32, %c0_i32_0 : i32, i32
  }
  func.func @transform_8(%arg0: i32) -> (i32, i32) {
    %c0_i32 = arith.constant 0 : i32
    %c0_i32_0 = arith.constant 0 : i32
    %c0_i32_1 = arith.constant 0 : i32
    return %c0_i32, %c0_i32_0 : i32, i32
  }
  func.func @transform_9(%arg0: i32) -> (i32, i32) {
    %c0_i32 = arith.constant 0 : i32
    %c0_i32_0 = arith.constant 0 : i32
    %c0_i32_1 = arith.constant 0 : i32
    return %c0_i32, %c0_i32_0 : i32, i32
  }
  func.func @transform_10(%arg0: i32) -> (i32, i32) {
    %c0_i32 = arith.constant 0 : i32
    %c0_i32_0 = arith.constant 0 : i32
    %c0_i32_1 = arith.constant 0 : i32
    return %c0_i32, %c0_i32_0 : i32, i32
  }
  func.func @transform_11(%arg0: i32) -> (i32, i32) {
    %c0_i32 = arith.constant 0 : i32
    %c0_i32_0 = arith.constant 0 : i32
    %c0_i32_1 = arith.constant 0 : i32
    return %c0_i32, %c0_i32_0 : i32, i32
  }
  func.func @transform_12(%arg0: i32) -> (i32, i32) {
    %c0_i32 = arith.constant 0 : i32
    %c0_i32_0 = arith.constant 0 : i32
    %c0_i32_1 = arith.constant 0 : i32
    return %c0_i32, %c0_i32_0 : i32, i32
  }
  func.func @transform_13(%arg0: i32) -> (i32, i32) {
    %c0_i32 = arith.constant 0 : i32
    %c0_i32_0 = arith.constant 0 : i32
    %c0_i32_1 = arith.constant 0 : i32
    return %c0_i32, %c0_i32_0 : i32, i32
  }
  func.func @transform_14(%arg0: i32) -> (i32, i32) {
    %c0_i32 = arith.constant 0 : i32
    %c0_i32_0 = arith.constant 0 : i32
    %c0_i32_1 = arith.constant 0 : i32
    return %c0_i32, %c0_i32_0 : i32, i32
  }
  func.func @transform_15(%arg0: i32) -> (i32, i32) {
    %c0_i32 = arith.constant 0 : i32
    %c0_i32_0 = arith.constant 0 : i32
    %c0_i32_1 = arith.constant 0 : i32
    return %c0_i32, %c0_i32_0 : i32, i32
  }
  func.func @transform_16(%arg0: i32) -> (i32, i32) {
    %c0_i32 = arith.constant 0 : i32
    %c0_i32_0 = arith.constant 0 : i32
    %c0_i32_1 = arith.constant 0 : i32
    return %c0_i32, %c0_i32_0 : i32, i32
  }
  func.func @transform_17(%arg0: i32) -> (i32, i32) {
    %c0_i32 = arith.constant 0 : i32
    %c0_i32_0 = arith.constant 0 : i32
    %c0_i32_1 = arith.constant 0 : i32
    return %c0_i32, %c0_i32_0 : i32, i32
  }
  func.func @transform_18(%arg0: i32) -> (i32, i32) {
    %c0_i32 = arith.constant 0 : i32
    %c0_i32_0 = arith.constant 0 : i32
    return %arg0, %c0_i32 : i32, i32
  }
}

</mosaic_0001>

<bundles_post_ra>
// kernel: tpu_custom_call.1
= control target key start
LH: loop header
LB: loop body
LE: loop exit
PB: predicated region body
PF: predicated region fallthrough
CT: control target
= control target key end

     0   :  { %s11043_s0 = inlined_call_operand.hbm [shape: f32[1024,128], index: 0, kind: input, shape index: {}]   ;;  %s11044_s1 = inlined_call_operand.hbm [shape: f32[8,128], index: 1, kind: input, shape index: {}]   ;;  %s11045_s2 = inlined_call_operand.hbm [shape: f32[128,128], index: 2, kind: input, shape index: {}]   ;;  %s11046_s3 = inlined_call_operand.vmem [shape: f32[8,128], index: 3, kind: input, shape index: {}]   ;;  %s11047_s4 = inlined_call_operand.hbm [shape: f32[128,128], index: 4, kind: input, shape index: {}]   ;;  %s11048_s5 = inlined_call_operand.vmem [shape: f32[8,128], index: 5, kind: input, shape index: {}]   ;;  %s11049_s6 = inlined_call_operand.hbm [shape: f32[128,128], index: 6, kind: input, shape index: {}]   ;;  %s11050_s7 = inlined_call_operand.vmem [shape: f32[8,128], index: 7, kind: input, shape index: {}]   ;;  %s11051_s8 = inlined_call_operand.hbm [shape: f32[128,128], index: 8, kind: input, shape index: {}]   ;;  %s11052_s9 = inlined_call_operand.vmem [shape: f32[8,128], index: 9, kind: input, shape index: {}]   ;;  %s11053_s10 = inlined_call_operand.hbm [shape: f32[128,128], index: 10, kind: input, shape index: {}]   ;;  %s11054_s11 = inlined_call_operand.vmem [shape: f32[8,128], index: 11, kind: input, shape index: {}]   ;;  %s11055_s12 = inlined_call_operand.hbm [shape: f32[128,128], index: 12, kind: input, shape index: {}]   ;;  %s11056_s13 = inlined_call_operand.vmem [shape: f32[8,128], index: 13, kind: input, shape index: {}]   ;;  %s11057_s14 = inlined_call_operand.hbm [shape: f32[128,128], index: 14, kind: input, shape index: {}]   ;;  %s11058_s15 = inlined_call_operand.vmem [shape: f32[8,128], index: 15, kind: input, shape index: {}]   ;;  %s11059_s16 = inlined_call_operand.hbm [shape: f32[128,128], index: 16, kind: input, shape index: {}]   ;;  %s11060_s17 = inlined_call_operand.vmem [shape: f32[8,128], index: 17, kind: input, shape index: {}]   ;;  %s11061_s18 = inlined_call_operand.vmem [shape: f32[1024,16], index: 18, kind: output, shape index: {}]  }
   0x1   :  { %11076 = sst [smem:[#allocation31_spill]] %s11043_s0 }
   0x2   :  { %11077 = sst [smem:[#allocation32_spill]] %s11044_s1 }
   0x3   :  { %11078 = sst [smem:[#allocation33_spill]] %s11045_s2 }
   0x4   :  { %11079 = sst [smem:[#allocation34_spill]] %s11047_s4 }
   0x5   :  { %11080 = sst [smem:[#allocation35_spill]] %s11050_s7 }
   0x6   :  { %11081 = sst [smem:[#allocation36_spill]] %s11051_s8 }
   0x7   :  { %11082 = sst [smem:[#allocation37_spill]] %s11052_s9 }
   0x8   :  { %11083 = sst [smem:[#allocation38_spill]] %s11054_s11 }
   0x9   :  { %11084 = sst [smem:[#allocation39_spill]] %s11056_s13 }
   0xa   :  { %11085 = sst [smem:[#allocation40_spill]] %s11058_s15 }
   0xb   :  { %11086 = sst [smem:[#allocation41_spill]] %s11060_s17 }
   0xc   :  { %11087 = sst [smem:[#allocation42_spill]] %s11061_s18 }
   0xd   :  { %23 = vsyncpa [#allocation3], 0 }
   0xe   :  { %25 = vsyncpa [#allocation3 + $0x1], 0 }
   0xf   :  { %26 = vsyncpa [#allocation5], 0 }
  0x10   :  { %27 = vsyncpa [#allocation8], 0 }
  0x11   :  { %28 = vsyncpa [#allocation11], 0 }
  0x12   :  { %29 = vsyncpa [#allocation14], 0 }
  0x13   :  { %30 = vsyncpa [#allocation17], 0  ;;  %s8523_s27 = smov 0   ;;  %s8525_s28 = smov 0  }
  0x14   :  { %s8527_s29 = smov 0   ;;  %s8529_s30 = smov 0  }
  0x15 LB: > { %s8416_s0 = smov [#allocation4]   ;;  %s11065_s1 = sadd.s32 4294967295, %s8414_s30   ;;  %s8414_s30 = sphi %s8529_s30, %s11127_s30   ;;  %s8410_s29 = sphi %s8527_s29, %s11126_s29   ;;  %s8406_s28 = sphi %s8525_s28, %s11125_s28   ;;  %s8402_s27 = sphi %s8523_s27, %s11124_s27  }
  0x16   : > { %s463_s19 = sshll.u32 %s8416_s0, 4  ;;  %p5996_p0 = scmp.ge.s32.totalorder %s8414_s30, 1  ;;  %s464_s19 = int_to_ptr.vmem [resolvable:$true] %s463_s19 }
  0x17   : > { %p8547_p1 = scmp.eq.s32.totalorder %s11065_s1, 0  ;;  %p450_p2 = scmp.lt.s32.totalorder %s8414_s30, 3 }
  0x18   : > { %s8417_s22 = smov [#allocation7]   ;;  %s8418_s24 = smov [#allocation10]  }
  0x19   : > { %s11088_s20 = scalar_select %p8547_p1, 1, 0 }
  0x1a   : > { %p8552_p3 = pnand %p5996_p0, %p450_p2  ;;  %s489_s2 = sshll.u32 %s8417_s22, 4  ;;  %s8564_s2 = int_to_ptr.vmem [resolvable:$true] %s489_s2 }
  0x1b   : > { %s521_s25 = sshll.u32 %s8418_s24, 4  ;;  %s11091_s1 = sld [smem:[#allocation32_spill]]  ;;  %s8566_s25 = int_to_ptr.vmem [resolvable:$true] %s521_s25 }
  0x1c   : > { %s11089_s21 = scalar_select %p8552_p3, 1, 0 }
  0x1d   : > { %p7984_p4 = pneg %p8552_p3 }
  0x1f   : > { %p8560_p5 = pnand %p7984_p4, %p8547_p1 }
  0x21   : > { %s8078_s18 = scalar_lea.hbm %s11091_s1, 128  ;;  %p8576_p7 = pneg %p8560_p5 }
  0x22   : > { %p8079_p6 = scmp.ne.s32.totalorder %s11091_s1, %s8078_s18  ;;  %p8085_p10 = scmp.lt.u32.totalorder %s8078_s18, %s11091_s1 }
  0x24   : > { %p8081_p8 = pnand %p8576_p7, %p8079_p6 }
  0x26   : > { %p8082_p9 = pneg %p8081_p8 }
  0x28   : > { %p8087_p11 = pnand %p8085_p10, %p8082_p9 }
  0x2a   : > { %8090 = shalt.err (!%p8087_p11)
}
  0x2b   : > { %s8091_s26 = scalar_lea.vmem %s464_s19, 128  ;;  %p8099_p2 = scmp.lt.s32.totalorder %s464_s19, %s464_s19 }
  0x2c   : > { %p8092_p12 = scmp.ne.s32.totalorder %s464_s19, %s8091_s26  ;;  %p8100_p4 = scmp.lt.s32.totalorder %s8091_s26, %s8091_s26 }
  0x2e   : > { %p8094_p13 = pnand %p8092_p12, %p8576_p7  ;;  %p8101_p3 = por %p8100_p4, %p8099_p2 }
  0x30   : > { %p8095_p0 = pneg %p8094_p13 }
  0x32   : > { %p8102_p1 = pnand %p8101_p3, %p8095_p0 }
  0x34   : > { %8105 = shalt.err (!%p8102_p1)
}
  0x35   : > { %7987 = dma.hbm_to_vmem [thread:$0]  (!%p8560_p5), %s11091_s1, 128, %s464_s19, [#allocation5]  }
  0x36   : > { %s11093_s4 = sld [smem:[#allocation34_spill]] }
  0x3c   : > { %s8106_s0 = scalar_lea.hbm %s11093_s4, 2048 }
  0x3d   : > { %p8107_p6 = scmp.ne.s32.totalorder %s11093_s4, %s8106_s0  ;;  %p8113_p1 = scmp.lt.u32.totalorder %s8106_s0, %s11093_s4 }
  0x3f   : > { %p8109_p8 = pnand %p8107_p6, %p8576_p7 }
  0x41   : > { %p8110_p9 = pneg %p8109_p8 }
  0x43   : > { %p8115_p3 = pnand %p8113_p1, %p8110_p9 }
  0x45   : > { %8118 = shalt.err (!%p8115_p3)
}
  0x46   : > { %s8119_s19 = scalar_lea.vmem %s8564_s2, 2048  ;;  %p8127_p13 = scmp.lt.s32.totalorder %s8564_s2, %s8564_s2 }
  0x47   : > { %p8120_p10 = scmp.ne.s32.totalorder %s8564_s2, %s8119_s19  ;;  %p8128_p0 = scmp.lt.s32.totalorder %s8119_s19, %s8119_s19 }
  0x49   : > { %p8122_p11 = pnand %p8120_p10, %p8576_p7  ;;  %p8129_p2 = por %p8128_p0, %p8127_p13 }
  0x4b   : > { %p8123_p12 = pneg %p8122_p11 }
  0x4d   : > { %p8130_p4 = pnand %p8129_p2, %p8123_p12 }
  0x4f   : > { %8133 = shalt.err (!%p8130_p4)
}
  0x50   : > { %s8419_s11 = smov 128   ;;  %s8420_s9 = smov 8  }
  0x51   : > { %7993 = dma.hbm_to_vmem [thread:$0]  (!%p8560_p5), %s11093_s4, 2048, %s8564_s2, [#allocation8], %s8419_s11, %s8419_s11, %s8420_s9  }
  0x52   : > { %s11094_s8 = sld [smem:[#allocation36_spill]] }
  0x58   : > { %s8134_s0 = scalar_lea.hbm %s11094_s8, 2048 }
  0x59   : > { %p8135_p6 = scmp.ne.s32.totalorder %s11094_s8, %s8134_s0  ;;  %p8141_p1 = scmp.lt.u32.totalorder %s8134_s0, %s11094_s8 }
  0x5b   : > { %p8137_p8 = pnand %p8135_p6, %p8576_p7 }
  0x5d   : > { %p8138_p9 = pneg %p8137_p8 }
  0x5f   : > { %p8143_p3 = pnand %p8141_p1, %p8138_p9 }
  0x61   : > { %8146 = shalt.err (!%p8143_p3)
}
  0x62   : > { %s8147_s2 = scalar_lea.vmem %s8566_s25, 2048  ;;  %p8155_p13 = scmp.lt.s32.totalorder %s8566_s25, %s8566_s25 }
  0x63   : > { %p8148_p10 = scmp.ne.s32.totalorder %s8566_s25, %s8147_s2  ;;  %p8156_p0 = scmp.lt.s32.totalorder %s8147_s2, %s8147_s2 }
  0x65   : > { %p8150_p11 = pnand %p8148_p10, %p8576_p7  ;;  %p8157_p2 = por %p8156_p0, %p8155_p13 }
  0x67   : > { %p8151_p12 = pneg %p8150_p11 }
  0x69   : > { %p8158_p4 = pnand %p8157_p2, %p8151_p12 }
  0x6b   : > { %8161 = shalt.err (!%p8158_p4)
}
  0x6c   : > { %7999 = dma.hbm_to_vmem [thread:$0]  (!%p8560_p5), %s11094_s8, 2048, %s8566_s25, [#allocation11], %s8419_s11, %s8419_s11, %s8420_s9  }
  0x6d   : > { %s8421_s17 = smov [#allocation13]   ;;  %s8422_s18 = smov [#allocation6]  }
  0x6e   : > { %s553_s13 = sshll.u32 %s8421_s17, 4  ;;  %s473_s0 = sshll.u32 %s8422_s18, 4  ;;  %s554_s13 = int_to_ptr.vmem [resolvable:$true] %s553_s13  ;;  %s474_s0 = int_to_ptr.vmem [resolvable:$true] %s473_s0 }
  0x6f   : > { %s8162_s19 = scalar_lea.hbm %s11055_s12, 2048 }
  0x70   : > { %p8163_p6 = scmp.ne.s32.totalorder %s11055_s12, %s8162_s19  ;;  %p8169_p1 = scmp.lt.u32.totalorder %s8162_s19, %s11055_s12 }
  0x72   : > { %p8165_p8 = pnand %p8163_p6, %p8576_p7 }
  0x74   : > { %p8166_p9 = pneg %p8165_p8 }
  0x76   : > { %p8171_p3 = pnand %p8169_p1, %p8166_p9 }
  0x78   : > { %8174 = shalt.err (!%p8171_p3)
}
  0x79   : > { %s8175_s25 = scalar_lea.vmem %s554_s13, 2048  ;;  %p8183_p13 = scmp.lt.s32.totalorder %s554_s13, %s554_s13 }
  0x7a   : > { %p8176_p10 = scmp.ne.s32.totalorder %s554_s13, %s8175_s25  ;;  %p8184_p0 = scmp.lt.s32.totalorder %s8175_s25, %s8175_s25 }
  0x7c   : > { %p8178_p11 = pnand %p8176_p10, %p8576_p7  ;;  %p8185_p2 = por %p8184_p0, %p8183_p13 }
  0x7e   : > { %p8179_p12 = pneg %p8178_p11 }
  0x80   : > { %p8186_p4 = pnand %p8185_p2, %p8179_p12 }
  0x82   : > { %8189 = shalt.err (!%p8186_p4)
}
  0x83   : > { %8005 = dma.hbm_to_vmem [thread:$0]  (!%p8560_p5), %s11055_s12, 2048, %s554_s13, [#allocation14], %s8419_s11, %s8419_s11, %s8420_s9  }
  0x84   : > { %s11095_s18 = sld [smem:[#allocation33_spill]] }
  0x8a   : > { %s8190_s24 = scalar_lea.hbm %s11095_s18, 2048 }
  0x8b   : > { %p8191_p6 = scmp.ne.s32.totalorder %s11095_s18, %s8190_s24  ;;  %p8197_p1 = scmp.lt.u32.totalorder %s8190_s24, %s11095_s18 }
  0x8d   : > { %p8193_p8 = pnand %p8191_p6, %p8576_p7 }
  0x8f   : > { %p8194_p9 = pneg %p8193_p8 }
  0x91   : > { %p8199_p3 = pnand %p8197_p1, %p8194_p9 }
  0x93   : > { %8202 = shalt.err (!%p8199_p3)
}
  0x94   : > { %s8203_s25 = scalar_lea.vmem %s474_s0, 2048  ;;  %p8211_p13 = scmp.lt.s32.totalorder %s474_s0, %s474_s0 }
  0x95   : > { %p8204_p10 = scmp.ne.s32.totalorder %s474_s0, %s8203_s25  ;;  %p8212_p0 = scmp.lt.s32.totalorder %s8203_s25, %s8203_s25 }
  0x97   : > { %p8206_p11 = pnand %p8204_p10, %p8576_p7  ;;  %p8213_p2 = por %p8212_p0, %p8211_p13 }
  0x99   : > { %p8207_p12 = pneg %p8206_p11 }
  0x9b   : > { %p8214_p4 = pnand %p8213_p2, %p8207_p12 }
  0x9d   : > { %8217 = shalt.err (!%p8214_p4)
}
  0x9e   : > { %7990 = dma.hbm_to_vmem [thread:$0]  (!%p8560_p5), %s11095_s18, 2048, %s474_s0, [#allocation5], %s8419_s11, %s8419_s11, %s8420_s9  }
  0x9f   : > { %s8423_s7 = smov [#allocation9]   ;;  %s8424_s17 = smov [#allocation12]  }
  0xa0   : > { %s505_s15 = sshll.u32 %s8423_s7, 4  ;;  %s537_s24 = sshll.u32 %s8424_s17, 4  ;;  %s506_s15 = int_to_ptr.vmem [resolvable:$true] %s505_s15  ;;  %s538_s24 = int_to_ptr.vmem [resolvable:$true] %s537_s24 }
  0xa1   : > { %s8218_s2 = scalar_lea.hbm %s11049_s6, 2048 }
  0xa2   : > { %p8219_p6 = scmp.ne.s32.totalorder %s11049_s6, %s8218_s2  ;;  %p8225_p1 = scmp.lt.u32.totalorder %s8218_s2, %s11049_s6 }
  0xa4   : > { %p8221_p8 = pnand %p8219_p6, %p8576_p7 }
  0xa6   : > { %p8222_p9 = pneg %p8221_p8 }
  0xa8   : > { %p8227_p3 = pnand %p8225_p1, %p8222_p9 }
  0xaa   : > { %8230 = shalt.err (!%p8227_p3)
}
  0xab   : > { %s8231_s0 = scalar_lea.vmem %s506_s15, 2048  ;;  %p8239_p13 = scmp.lt.s32.totalorder %s506_s15, %s506_s15 }
  0xac   : > { %p8232_p10 = scmp.ne.s32.totalorder %s506_s15, %s8231_s0  ;;  %p8240_p0 = scmp.lt.s32.totalorder %s8231_s0, %s8231_s0 }
  0xae   : > { %p8234_p11 = pnand %p8232_p10, %p8576_p7  ;;  %p8241_p2 = por %p8240_p0, %p8239_p13 }
  0xb0   : > { %p8235_p12 = pneg %p8234_p11 }
  0xb2   : > { %p8242_p4 = pnand %p8241_p2, %p8235_p12 }
  0xb4   : > { %8245 = shalt.err (!%p8242_p4)
}
  0xb5   : > { %7996 = dma.hbm_to_vmem [thread:$0]  (!%p8560_p5), %s11049_s6, 2048, %s506_s15, [#allocation8], %s8419_s11, %s8419_s11, %s8420_s9  }
  0xb6   : > { %s8246_s26 = scalar_lea.hbm %s11053_s10, 2048 }
  0xb7   : > { %p8247_p6 = scmp.ne.s32.totalorder %s11053_s10, %s8246_s26  ;;  %p8253_p1 = scmp.lt.u32.totalorder %s8246_s26, %s11053_s10 }
  0xb9   : > { %p8249_p8 = pnand %p8247_p6, %p8576_p7 }
  0xbb   : > { %p8250_p9 = pneg %p8249_p8 }
  0xbd   : > { %p8255_p3 = pnand %p8253_p1, %p8250_p9 }
  0xbf   : > { %8258 = shalt.err (!%p8255_p3)
}
  0xc0   : > { %s8259_s13 = scalar_lea.vmem %s538_s24, 2048  ;;  %p8267_p13 = scmp.lt.s32.totalorder %s538_s24, %s538_s24 }
  0xc1   : > { %p8260_p10 = scmp.ne.s32.totalorder %s538_s24, %s8259_s13  ;;  %p8268_p0 = scmp.lt.s32.totalorder %s8259_s13, %s8259_s13 }
  0xc3   : > { %p8262_p11 = pnand %p8260_p10, %p8576_p7  ;;  %p8269_p2 = por %p8268_p0, %p8267_p13 }
  0xc5   : > { %p8263_p12 = pneg %p8262_p11 }
  0xc7   : > { %p8270_p4 = pnand %p8269_p2, %p8263_p12 }
  0xc9   : > { %8273 = shalt.err (!%p8270_p4)
}
  0xca   : > { %8002 = dma.hbm_to_vmem [thread:$0]  (!%p8560_p5), %s11053_s10, 2048, %s538_s24, [#allocation11], %s8419_s11, %s8419_s11, %s8420_s9  }
  0xcb   : > { %s8425_s8 = smov [#allocation15]   ;;  %s8426_s7 = smov [#allocation16]  }
  0xcc   : > { %s569_s4 = sshll.u32 %s8425_s8, 4  ;;  %s585_s17 = sshll.u32 %s8426_s7, 4  ;;  %s570_s4 = int_to_ptr.vmem [resolvable:$true] %s569_s4  ;;  %s586_s17 = int_to_ptr.vmem [resolvable:$true] %s585_s17 }
  0xcd   : > { %s8274_s2 = scalar_lea.hbm %s11057_s14, 2048 }
  0xce   : > { %p8275_p6 = scmp.ne.s32.totalorder %s11057_s14, %s8274_s2  ;;  %p8281_p1 = scmp.lt.u32.totalorder %s8274_s2, %s11057_s14 }
  0xd0   : > { %p8277_p8 = pnand %p8275_p6, %p8576_p7 }
  0xd2   : > { %p8278_p9 = pneg %p8277_p8 }
  0xd4   : > { %p8283_p3 = pnand %p8281_p1, %p8278_p9 }
  0xd6   : > { %8286 = shalt.err (!%p8283_p3)
}
  0xd7   : > { %s8287_s24 = scalar_lea.vmem %s570_s4, 2048  ;;  %p8295_p13 = scmp.lt.s32.totalorder %s570_s4, %s570_s4 }
  0xd8   : > { %p8288_p10 = scmp.ne.s32.totalorder %s570_s4, %s8287_s24  ;;  %p8296_p0 = scmp.lt.s32.totalorder %s8287_s24, %s8287_s24 }
  0xda   : > { %p8290_p11 = pnand %p8288_p10, %p8576_p7  ;;  %p8297_p2 = por %p8296_p0, %p8295_p13 }
  0xdc   : > { %p8291_p12 = pneg %p8290_p11 }
  0xde   : > { %p8298_p4 = pnand %p8297_p2, %p8291_p12 }
  0xe0   : > { %8301 = shalt.err (!%p8298_p4)
}
  0xe1   : > { %8008 = dma.hbm_to_vmem [thread:$0]  (!%p8560_p5), %s11057_s14, 2048, %s570_s4, [#allocation14], %s8419_s11, %s8419_s11, %s8420_s9  }
  0xe2   : > { %s8302_s19 = scalar_lea.hbm %s11059_s16, 2048 }
  0xe3   : > { %p8303_p6 = scmp.ne.s32.totalorder %s11059_s16, %s8302_s19  ;;  %p8309_p1 = scmp.lt.u32.totalorder %s8302_s19, %s11059_s16 }
  0xe5   : > { %p8305_p8 = pnand %p8303_p6, %p8576_p7 }
  0xe7   : > { %p8306_p9 = pneg %p8305_p8 }
  0xe9   : > { %p8311_p3 = pnand %p8309_p1, %p8306_p9 }
  0xeb   : > { %8314 = shalt.err (!%p8311_p3)
}
  0xec   : > { %s8315_s15 = scalar_lea.vmem %s586_s17, 2048  ;;  %p8323_p13 = scmp.lt.s32.totalorder %s586_s17, %s586_s17 }
  0xed   : > { %p8316_p10 = scmp.ne.s32.totalorder %s586_s17, %s8315_s15  ;;  %p8324_p0 = scmp.lt.s32.totalorder %s8315_s15, %s8315_s15 }
  0xef   : > { %p8318_p11 = pnand %p8316_p10, %p8576_p7  ;;  %p8325_p2 = por %p8324_p0, %p8323_p13 }
  0xf1   : > { %p8319_p12 = pneg %p8318_p11 }
  0xf3   : > { %p8326_p4 = pnand %p8325_p2, %p8319_p12 }
  0xf5   : > { %8329 = shalt.err (!%p8326_p4)
}
  0xf6   : > { %8011 = dma.hbm_to_vmem [thread:$0]  (!%p8560_p5), %s11059_s16, 2048, %s586_s17, [#allocation17], %s8419_s11, %s8419_s11, %s8420_s9  }
  0xf7   : > { %s8771_s23 = sadd.s32 1, %s8414_s30   ;;  %s43_s0 = sadd.s32 1, %s8410_s29 }
  0xf8   : > { %s40_s22 = ssub.s32 %s8414_s30, %s8771_s23  ;;  %p50_p6 = scmp.ne.s32.totalorder %s8410_s29, %s8406_s28 }
  0xf9   : > { %p41_p7 = scmp.eq.s32.totalorder %s40_s22, 0  ;;  %p51_p8 = scmp.eq.s32.totalorder %s8414_s30, 0 }
  0xfa   : > { %p56_p9 = scmp.ne.s32.totalorder %s8406_s28, %s8402_s27  ;;  %p11096_p3 = scmp.ne.s32.totalorder %s11088_s20, 0 }
  0xfb   : > { %s8782_s8 = scalar_select %p41_p7, %s8410_s29, %s43_s0  }
  0xfc   : > { %p52_p1 = por %p51_p8, %p50_p6  ;;  %p8786_p10 = por %p11096_p3, %p56_p9 }
  0xfd   : > { %p8025_p11 = scmp.lt.s32.totalorder %s8414_s30, 2  ;;  %s602_s26 = sand.u32 1, %s8410_s29  }
  0xfe   : > { %s6007_s17 = sshll.u32 %s602_s26, 9  ;;  %s6025_s19 = sshll.u32 %s8414_s30, 13 }
  0xff   : > { %s11098_s25 = sld [smem:[#allocation31_spill]]  ;;  %s606_s27 = scalar_lea.vmem [#allocation2], %s6007_s17 }
 0x100   : > { %s613_s15 = sshll.u32 %s606_s27, 4  ;;  %p8800_p5 = pnand %p8025_p11, %p52_p1  ;;  %s8798_s15 = int_to_ptr.vmem [resolvable:$true] %s613_s15 }
 0x101   : > { %s8804_s24 = scalar_lea.sflag [#allocation3], %s602_s26 }
 0x102   : > { %p8332_p13 = pneg %p8800_p5 }
 0x105   : > { %s8796_s13 = scalar_lea.hbm %s11098_s25, %s6025_s19  ;;  %s8335_s19 = scalar_lea.hbm %s11098_s25, 16384 }
 0x106   : > { %s8330_s22 = scalar_lea.hbm %s8796_s13, 8192  ;;  %p8336_p4 = scmp.lt.u32.totalorder %s8796_s13, %s11098_s25 }
 0x107   : > { %p8331_p12 = scmp.ne.s32.totalorder %s8796_s13, %s8330_s22  ;;  %p8337_p7 = scmp.lt.u32.totalorder %s8335_s19, %s8330_s22 }
 0x108   : > { %p8339_p8 = scmp.lt.u32.totalorder %s8330_s22, %s8796_s13 }
 0x109   : > { %p8333_p0 = pnand %p8332_p13, %p8331_p12  ;;  %p8338_p6 = por %p8337_p7, %p8336_p4 }
 0x10b   : > { %p8334_p2 = pneg %p8333_p0  ;;  %p8340_p9 = por %p8339_p8, %p8338_p6 }
 0x10d   : > { %p8341_p1 = pnand %p8340_p9, %p8334_p2 }
 0x10f   : > { %8344 = shalt.err (!%p8341_p1)
}
 0x110   : > { %s8345_s26 = scalar_lea.vmem %s8798_s15, 8192  ;;  %s8427_s27 = smov [#allocation2]  }
 0x111   : > { %p8346_p3 = scmp.ne.s32.totalorder %s8798_s15, %s8345_s26  ;;  %s8350_s0 = sshll.u32 %s8427_s27, 4  ;;  %s8351_s0 = int_to_ptr.vmem [resolvable:$false] %s8350_s0 }
 0x112   : > { %s8352_s17 = scalar_lea.vmem %s8351_s0, 16384  ;;  %p8353_p0 = scmp.lt.s32.totalorder %s8798_s15, %s8351_s0 }
 0x113   : > { %p8348_p11 = pnand %p8346_p3, %p8332_p13  ;;  %p8354_p4 = scmp.lt.s32.totalorder %s8352_s17, %s8345_s26 }
 0x115   : > { %p8349_p12 = pneg %p8348_p11  ;;  %p8355_p7 = por %p8354_p4, %p8353_p0 }
 0x117   : > { %p8356_p6 = pnand %p8355_p7, %p8349_p12 }
 0x119   : > { %8359 = shalt.err (!%p8356_p6)
}
 0x11a   : > { %8015 = dma.hbm_to_vmem [thread:$0]  (!%p8800_p5), %s8796_s13, 8192, %s8798_s15, %s8804_s24, %s8419_s11, %s8419_s11, %s8420_s9  }
 0x11b   : > { %p11100_p13 = scmp.ne.s32.totalorder %s11089_s21, 0 }
 0x11d   : > { %625 = sbr.rel (%p11100_p13) target bundleno = 2240 (0x8c0), region = 92 }
 0x124   : > { %s627_s22 = sand.u32 1, %s8406_s28  }
 0x125   : > { %s6011_s19 = sshll.u32 %s627_s22, 9  ;;  %s628_s2 = scalar_lea.sflag [#allocation3], %s627_s22 }
 0x126   : > { %s8838_s1 = scalar_lea.vmem [#allocation2], %s6011_s19 }
 0x127   : > { %8377 = dma.done.wait (%p8786_p10), %s628_s2, 8192  }
 0x128   : > { %8379 = vsyncadd (%p8786_p10), %s628_s2, 4294959104  ;;  %p11101_p2 = scmp.ne.s32.totalorder %s11088_s20, 0 }
 0x12a   : > { %8381 = dma.done.wait (%p11101_p2), [#allocation5], 2176  }
 0x12b   : > { %8383 = vsyncadd (%p11101_p2), [#allocation5], 4294965120 }
 0x12c   : > { %8385 = dma.done.wait (%p11101_p2), [#allocation8], 4096  }
 0x12d   : > { %8387 = vsyncadd (%p11101_p2), [#allocation8], 4294963200 }
 0x12e   : > { %8389 = dma.done.wait (%p11101_p2), [#allocation11], 4096  }
 0x12f   : > { %8391 = vsyncadd (%p11101_p2), [#allocation11], 4294963200 }
 0x130   : > { %8393 = dma.done.wait (%p11101_p2), [#allocation14], 4096  }
 0x131   : > { %8395 = vsyncadd (%p11101_p2), [#allocation14], 4294963200 }
 0x132   : > { %8397 = dma.done.wait (%p11101_p2), [#allocation17], 2048  }
 0x133   : > { %8399 = vsyncadd (%p11101_p2), [#allocation17], 4294965248  ;;  %v808_v0 = vlaneseq  ;;  %v792_v2 = vld [vmem:[#allocation6] sm:$0xff]  ;;  %v793_v3 = vld [vmem:[#allocation6 + $0x8] sm:$0xff]  ;;  %s11116_s15 = sld [smem:[#allocation35_spill]]  ;;  %s11117_s26 = sld [smem:[#allocation37_spill]] }
 0x134   : > { %v794_v4 = vld [vmem:[#allocation6 + $0x10] sm:$0xff]  ;;  %v7690_v5 = vpack.c.bf16 %v793_v3, %v792_v2  ;;  %v795_v6 = vld [vmem:[#allocation6 + $0x18] sm:$0xff]  ;;  %v796_v8 = vld [vmem:[#allocation6 + $0x20] sm:$0xff]  ;;  %s11118_s17 = sld [smem:[#allocation38_spill]]  ;;  %s11119_s2 = sld [smem:[#allocation39_spill]]  ;;  %vm5776_vm0 = vcmask 130048  }
 0x135   : > { %v8864_v1 = vshrl.u32 %v808_v0, 7  ;;  %v7694_v7 = vpack.c.bf16 %v795_v6, %v794_v4  ;;  %v797_v9 = vld [vmem:[#allocation6 + $0x28] sm:$0xff]  ;;  %v727_v13 = vld [vmem:[%s8838_s1] sm:$0xff]  ;;  %v798_v15 = vld [vmem:[#allocation6 + $0x30] sm:$0xff]  ;;  %s11120_s21 = sld [smem:[#allocation40_spill]]  ;;  %s11121_s11 = sadd.s32 4294967295, %s8414_s30  }
 0x136   : > { %7691 = vmatprep.subr.bf16.mxu0 %v7690_v5  ;;  %v7698_v12 = vpack.c.bf16 %v797_v9, %v796_v8  ;;  %v8873_v14 = vld [vmem:[#allocation4] sm:$0xff]  ;;  %v800_v21 = vld [vmem:[#allocation6 + $0x40] sm:$0xff]  ;;  %v801_v22 = vld [vmem:[#allocation6 + $0x48] sm:$0xff]  ;;  %s6021_s9 = sshll.u32 %s11121_s11, 6 }
 0x137   : > { %11102 = vst [vmem:[#allocation24_spill] sm:$0xff] %v8864_v1  ;;  %v8867_v10 = vsub.s32 0, %v8864_v1  ;;  %v8870_v11 = vsub.s32 1, %v8864_v1  ;;  %7693 = vmatpush3.bf16.msra.mxu0 %v7690_v5  ;;  %11105 = vst [vmem:[#allocation27_spill] sm:$0xff] %v8873_v14  ;;  %v799_v16 = vld [vmem:[#allocation6 + $0x38] sm:$0xff]  ;;  %v7706_v25 = vpack.c.bf16 %v801_v22, %v800_v21  ;;  %v802_v26 = vld [vmem:[#allocation6 + $0x50] sm:$0xff] }
 0x138   : > { %7695 = vmatprep.subr.bf16.mxu0 %v7694_v7  ;;  %v7702_v20 = vpack.c.bf16 %v799_v16, %v798_v15  ;;  %v803_v27 = vld [vmem:[#allocation6 + $0x58] sm:$0xff]  ;;  %v804_v28 = vld [vmem:[#allocation6 + $0x60] sm:$0xff]  ;;  %v805_v30 = vld [vmem:[#allocation6 + $0x68] sm:$0xff]  ;;  %p722_p10 = scmp.lt.s32.totalorder %s6021_s9, 127 }
 0x139   : > { %11103 = vst [vmem:[#allocation25_spill] sm:$0xff] %v8867_v10  ;;  %11104 = vst [vmem:[#allocation26_spill] sm:$0xff] %v8870_v11  ;;  %v8877_v17 = vrot.slane %v8873_v14, %v8867_v10  ;;  %v8881_v18 = vrot.slane %v8873_v14, %v8870_v11  ;;  %v7710_v29 = vpack.c.bf16 %v803_v27, %v802_v26  ;;  %v728_v31 = vld [vmem:[%s8838_s1 + $0x8] sm:$0xff]  ;;  %v729_v32 = vld [vmem:[%s8838_s1 + $0x10] sm:$0xff] }
 0x13a   : > { %v730_v33 = vld [vmem:[%s8838_s1 + $0x18] sm:$0xff]  ;;  %v731_v34 = vld [vmem:[%s8838_s1 + $0x20] sm:$0xff]  ;;  %v7714_v36 = vpack.c.bf16 %v805_v30, %v804_v28  ;;  %v732_v43 = vld [vmem:[%s8838_s1 + $0x28] sm:$0xff]  ;;  %s11129_s9 = smov (!%p722_p10, %s6021_s9), 127 }
 0x13b   : > { %7697 = vmatpush3.bf16.msra.mxu0 %v7694_v7  ;;  %v812_v19 = vmul.f32 %v8877_v17, %v727_v13  ;;  %v750_v35 = vld [vmem:[%s8838_s1 + $0xb8] sm:$0xff]  ;;  %v807_v38 = vld [vmem:[#allocation6 + $0x78] sm:$0xff]  ;;  %v813_v39 = vmul.f32 %v8877_v17, %v728_v31  ;;  %v814_v40 = vmul.f32 %v8877_v17, %v729_v32  ;;  %v815_v41 = vmul.f32 %v8877_v17, %v730_v33  ;;  %v733_v44 = vld [vmem:[%s8838_s1 + $0x30] sm:$0xff]  ;;  %s6022_s4 = sshll.u32 %s11129_s9, 3 }
 0x13c   : > { %7699 = vmatprep.subr.bf16.mxu0 %v7698_v12  ;;  %v806_v37 = vld [vmem:[#allocation6 + $0x70] sm:$0xff]  ;;  %v816_v42 = vmul.f32 %v8877_v17, %v731_v34  ;;  %v835_v46 = vmul.f32 %v8877_v17, %v750_v35  ;;  %v751_v47 = vld [vmem:[%s8838_s1 + $0xc0] sm:$0xff]  ;;  %v752_v48 = vld [vmem:[%s8838_s1 + $0xc8] sm:$0xff]  ;;  %v817_v54 = vmul.f32 %v8877_v17, %v732_v43  ;;  %v818_v55 = vmul.f32 %v8877_v17, %v733_v44 }
 0x13d   : > { %v880_v23 = vadd.f32 %v8881_v18, %v812_v19  ;;  %v734_v45 = vld [vmem:[%s8838_s1 + $0x38] sm:$0xff]  ;;  %v753_v50 = vld [vmem:[%s8838_s1 + $0xd0] sm:$0xff]  ;;  %v755_v52 = vld [vmem:[%s8838_s1 + $0xe0] sm:$0xff]  ;;  %v7718_v53 = vpack.c.bf16 %v807_v38, %v806_v37  ;;  %v881_v60 = vadd.f32 %v8881_v18, %v813_v39  ;;  %v8914_v61 = vadd.f32 %v8881_v18, %v814_v40 }
 0x13e   : > { %v8901_v49 = vadd.f32 %v8881_v18, %v835_v46  ;;  %v754_v51 = vld [vmem:[%s8838_s1 + $0xd8] sm:$0xff]  ;;  %v819_v56 = vmul.f32 %v8877_v17, %v734_v45  ;;  %v756_v57 = vld [vmem:[%s8838_s1 + $0xe8] sm:$0xff]  ;;  %v757_v58 = vld [vmem:[%s8838_s1 + $0xf0] sm:$0xff]  ;;  %v8917_v62 = vadd.f32 %v8881_v18, %v815_v41  ;;  %v8920_v63 = vadd.f32 %v8881_v18, %v816_v42 }
 0x13f   : > { %7701 = vmatpush3.bf16.msra.mxu0 %v7698_v12  ;;  %v944_v24 = vmax.f32 %v880_v23, 0.0  ;;  %v758_v59 = vld [vmem:[%s8838_s1 + $0xf8] sm:$0xff]  ;;  %v836_v0 = vmul.f32 %v8877_v17, %v751_v47  ;;  %v837_v2 = vmul.f32 %v8877_v17, %v752_v48  ;;  %v838_v3 = vmul.f32 %v8877_v17, %v753_v50  ;;  %v735_v5 = vld [vmem:[%s8838_s1 + $0x40] sm:$0xff]  ;;  %v736_v12 = vld [vmem:[%s8838_s1 + $0x48] sm:$0xff] }
 0x140   : > { %7703 = vmatprep.subr.bf16.mxu0 %v7702_v20  ;;  %v839_v4 = vmul.f32 %v8877_v17, %v754_v51  ;;  %v840_v6 = vmul.f32 %v8877_v17, %v755_v52  ;;  %v841_v7 = vmul.f32 %v8877_v17, %v756_v57  ;;  %v842_v8 = vmul.f32 %v8877_v17, %v757_v58  ;;  %v760_v21 = vld [vmem:[%s8838_s1 + $0x108] sm:$0xff]  ;;  %v761_v26 = vld [vmem:[%s8838_s1 + $0x110] sm:$0xff]  ;;  %v762_v27 = vld [vmem:[%s8838_s1 + $0x118] sm:$0xff] }
 0x141   : > { %6698 = vmatprep.mubr.f32.mxu0 %v944_v24  ;;  %v843_v9 = vmul.f32 %v8877_v17, %v758_v59  ;;  %v8933_v13 = vadd.f32 %v8881_v18, %v836_v0  ;;  %v8936_v15 = vadd.f32 %v8881_v18, %v837_v2  ;;  %v8939_v16 = vadd.f32 %v8881_v18, %v838_v3  ;;  %v763_v28 = vld [vmem:[%s8838_s1 + $0x120] sm:$0xff]  ;;  %v764_v33 = vld [vmem:[%s8838_s1 + $0x128] sm:$0xff]  ;;  %v765_v34 = vld [vmem:[%s8838_s1 + $0x130] sm:$0xff] }
 0x142   : > { %v8942_v19 = vadd.f32 %v8881_v18, %v839_v4  ;;  %v8947_v22 = vadd.f32 %v8881_v18, %v840_v6  ;;  %v8950_v23 = vadd.f32 %v8881_v18, %v841_v7  ;;  %v8953_v24 = vadd.f32 %v8881_v18, %v842_v8  ;;  %v766_v35 = vld [vmem:[%s8838_s1 + $0x138] sm:$0xff]  ;;  %v737_v44 = vld [vmem:[%s8838_s1 + $0x50] sm:$0xff]  ;;  %v739_v51 = vld [vmem:[%s8838_s1 + $0x60] sm:$0xff] }
 0x143   : > { %7705 = vmatpush3.bf16.msra.mxu0 %v7702_v20  ;;  %v759_v20 = vld [vmem:[%s8838_s1 + $0x100] sm:$0xff]  ;;  %v8962_v30 = vadd.f32 %v8881_v18, %v817_v54  ;;  %v8965_v31 = vadd.f32 %v8881_v18, %v818_v55  ;;  %v8968_v32 = vadd.f32 %v8881_v18, %v819_v56  ;;  %v947_v37 = vmax.f32 %v8917_v62, 0.0  ;;  %v738_v45 = vld [vmem:[%s8838_s1 + $0x58] sm:$0xff]  ;;  %v768_v57 = vld [vmem:[%s8838_s1 + $0x148] sm:$0xff] }
 0x144   : > { %7707 = vmatprep.subr.bf16.mxu0 %v7706_v25  ;;  %v820_v38 = vmul.f32 %v8877_v17, %v735_v5  ;;  %v821_v39 = vmul.f32 %v8877_v17, %v736_v12  ;;  %v844_v40 = vmul.f32 %v8877_v17, %v759_v20  ;;  %v845_v41 = vmul.f32 %v8877_v17, %v760_v21  ;;  %v767_v56 = vld [vmem:[%s8838_s1 + $0x140] sm:$0xff]  ;;  %v769_v62 = vld [vmem:[%s8838_s1 + $0x150] sm:$0xff]  ;;  %v770_v0 = vld [vmem:[%s8838_s1 + $0x158] sm:$0xff] }
 0x145   : > { %v846_v42 = vmul.f32 %v8877_v17, %v761_v26  ;;  %v847_v43 = vmul.f32 %v8877_v17, %v762_v27  ;;  %v848_v46 = vmul.f32 %v8877_v17, %v763_v28  ;;  %v849_v47 = vmul.f32 %v8877_v17, %v764_v33  ;;  %v771_v2 = vld [vmem:[%s8838_s1 + $0x160] sm:$0xff]  ;;  %v772_v7 = vld [vmem:[%s8838_s1 + $0x168] sm:$0xff]  ;;  %v773_v8 = vld [vmem:[%s8838_s1 + $0x170] sm:$0xff] }
 0x146   : > { %v850_v48 = vmul.f32 %v8877_v17, %v765_v34  ;;  %v851_v50 = vmul.f32 %v8877_v17, %v766_v35  ;;  %v8989_v52 = vadd.f32 %v8881_v18, %v844_v40  ;;  %v948_v3 = vmax.f32 %v8920_v63, 0.0  ;;  %v746_v14 = vld [vmem:[%s8838_s1 + $0x98] sm:$0xff] }
 0x147   : > { %7709 = vmatpush3.bf16.msra.mxu0 %v7706_v25  ;;  %v8956_v25 = vadd.f32 %v8881_v18, %v843_v9  ;;  %v8995_v54 = vadd.f32 %v8881_v18, %v846_v42  ;;  %v8998_v55 = vadd.f32 %v8881_v18, %v847_v43  ;;  %v9003_v58 = vadd.f32 %v8881_v18, %v848_v46  ;;  %v774_v9 = vld [vmem:[%s8838_s1 + $0x178] sm:$0xff]  ;;  %v776_v42 = vld [vmem:[%s8838_s1 + $0x188] sm:$0xff] }
 0x148   : > { %7711 = vmatprep.subr.bf16.mxu0 %v7710_v29  ;;  %v9006_v59 = vadd.f32 %v8881_v18, %v849_v47  ;;  %v949_v4 = vmax.f32 %v8962_v30, 0.0  ;;  %v950_v5 = vmax.f32 %v8965_v31, 0.0  ;;  %v822_v6 = vmul.f32 %v8877_v17, %v737_v44  ;;  %v740_v30 = vld [vmem:[%s8838_s1 + $0x68] sm:$0xff]  ;;  %v741_v31 = vld [vmem:[%s8838_s1 + $0x70] sm:$0xff] }
 0x149   : > { %v9025_v12 = vadd.f32 %v8881_v18, %v820_v38  ;;  %v9028_v20 = vadd.f32 %v8881_v18, %v821_v39  ;;  %v823_v21 = vmul.f32 %v8877_v17, %v738_v45  ;;  %v824_v63 = vmul.f32 %v8877_v17, %v739_v51  ;;  %v777_v47 = vld [vmem:[%s8838_s1 + $0x190] sm:$0xff] }
 0x14a   : > { %v852_v26 = vmul.f32 %v8877_v17, %v767_v56  ;;  %v853_v27 = vmul.f32 %v8877_v17, %v768_v57  ;;  %v854_v28 = vmul.f32 %v8877_v17, %v769_v62  ;;  %v856_v33 = vmul.f32 %v8877_v17, %v771_v2  ;;  %v781_v2 = vld [vmem:[%s8838_s1 + $0x1b0] sm:$0xff] }
 0x14b   : > { %7713 = vmatpush3.bf16.msra.mxu0 %v7710_v29  ;;  %v945_v29 = vmax.f32 %v881_v60, 0.0  ;;  %v9009_v60 = vadd.f32 %v8881_v18, %v850_v48  ;;  %v857_v34 = vmul.f32 %v8877_v17, %v772_v7  ;;  %v858_v35 = vmul.f32 %v8877_v17, %v773_v8  ;;  %v778_v48 = vld [vmem:[%s8838_s1 + $0x198] sm:$0xff] }
 0x14c   : > { %7715 = vmatprep.subr.bf16.mxu0 %v7714_v36  ;;  %v9043_v38 = vadd.f32 %v8881_v18, %v852_v26  ;;  %v9046_v39 = vadd.f32 %v8881_v18, %v853_v27  ;;  %v9057_v43 = vadd.f32 %v8881_v18, %v856_v33  ;;  %v951_v51 = vmax.f32 %v8968_v32, 0.0 }
 0x14d   : > { %v9060_v44 = vadd.f32 %v8881_v18, %v857_v34  ;;  %v9063_v45 = vadd.f32 %v8881_v18, %v858_v35  ;;  %v890_v56 = vadd.f32 %v8881_v18, %v822_v6  ;;  %v825_v57 = vmul.f32 %v8877_v17, %v740_v30  ;;  %v783_v34 = vld [vmem:[%s8838_s1 + $0x1c0] sm:$0xff]  ;;  %v784_v35 = vld [vmem:[%s8838_s1 + $0x1c8] sm:$0xff] }
 0x14e   : > { %v826_v62 = vmul.f32 %v8877_v17, %v741_v31  ;;  %v952_v7 = vmax.f32 %v9025_v12, 0.0  ;;  %v953_v8 = vmax.f32 %v9028_v20, 0.0  ;;  %v9082_v32 = vadd.f32 %v8881_v18, %v824_v63  ;;  %v743_v63 = vld [vmem:[%s8838_s1 + $0x80] sm:$0xff] }
 0x14f   : > { %7717 = vmatpush3.bf16.msra.mxu0 %v7714_v36  ;;  %v946_v36 = vmax.f32 %v8914_v61, 0.0  ;;  %v9012_v61 = vadd.f32 %v8881_v18, %v851_v50  ;;  %v779_v50 = vld [vmem:[%s8838_s1 + $0x1a0] sm:$0xff]  ;;  %v861_v26 = vmul.f32 %v8877_v17, %v776_v42  ;;  %v862_v27 = vmul.f32 %v8877_v17, %v777_v47 }
 0x150   : > { %7719 = vmatprep.subr.bf16.mxu0 %v7718_v53  ;;  %v864_v12 = vmul.f32 %v8877_v17, %v779_v50  ;;  %v786_v50 = vld [vmem:[%s8838_s1 + $0x1d8] sm:$0xff] }
 0x151   : > { %v9098_v30 = vadd.f32 %v8881_v18, %v861_v26  ;;  %v9101_v31 = vadd.f32 %v8881_v18, %v862_v27  ;;  %v789_v26 = vld [vmem:[%s8838_s1 + $0x1f0] sm:$0xff]  ;;  %v790_v27 = vld [vmem:[%s8838_s1 + $0x1f8] sm:$0xff] }
 0x153   : > { %7721 = vmatpush3.bf16.msra.mxu0 %v7718_v53  ;;  %v8992_v53 = vadd.f32 %v8881_v18, %v845_v41  ;;  %v775_v41 = vld [vmem:[%s8838_s1 + $0x180] sm:$0xff] }
 0x154   : > { %v860_v6 = vmul.f32 %v8877_v17, %v775_v41 }
 0x156   : > { %6699 = vmatmul.mubr.f32.vlgmr.msra.gmra.mrb[0].mxu0 %v945_v29  ;;  %v855_v29 = vmul.f32 %v8877_v17, %v770_v0  ;;  %v780_v0 = vld [vmem:[%s8838_s1 + $0x1a8] sm:$0xff] }
 0x157   : > { %6701 = vmatprep.mubr.f32.mxu0 %v946_v36  ;;  %v859_v36 = vmul.f32 %v8877_v17, %v774_v9  ;;  %v891_v9 = vadd.f32 %v8881_v18, %v823_v21  ;;  %v865_v20 = vmul.f32 %v8877_v17, %v780_v0  ;;  %v866_v21 = vmul.f32 %v8877_v17, %v781_v2  ;;  %v787_v0 = vld [vmem:[%s8838_s1 + $0x1e0] sm:$0xff] }
 0x158   : > { %v9052_v40 = vadd.f32 %v8881_v18, %v855_v29  ;;  %v9095_v29 = vadd.f32 %v8881_v18, %v860_v6  ;;  %v954_v2 = vmax.f32 %v890_v56, 0.0  ;;  %v788_v6 = vld [vmem:[%s8838_s1 + $0x1e8] sm:$0xff]  ;;  %v869_v56 = vmul.f32 %v8877_v17, %v784_v35 }
 0x159   : > { %v9066_v46 = vadd.f32 %v8881_v18, %v859_v36  ;;  %v9109_v36 = vadd.f32 %v8881_v18, %v864_v12  ;;  %v9112_v41 = vadd.f32 %v8881_v18, %v865_v20  ;;  %v9115_v42 = vadd.f32 %v8881_v18, %v866_v21 }
 0x15a   : > { %6702 = vmatmul.mubr.f32.gmra.mrb[2].mxu0 %v947_v37  ;;  %v9049_v37 = vadd.f32 %v8881_v18, %v854_v28  ;;  %v742_v28 = vld [vmem:[%s8838_s1 + $0x78] sm:$0xff]  ;;  %v956_v12 = vmax.f32 %v9082_v32, 0.0  ;;  %v894_v20 = vadd.f32 %v8881_v18, %v826_v62  ;;  %v828_v21 = vmul.f32 %v8877_v17, %v743_v63  ;;  %v744_v62 = vld [vmem:[%s8838_s1 + $0x88] sm:$0xff]  ;;  %v745_v63 = vld [vmem:[%s8838_s1 + $0x90] sm:$0xff] }
 0x15b   : > { %6704 = vmatprep.mubr.f32.mxu0 %v948_v3  ;;  %v782_v3 = vld [vmem:[%s8838_s1 + $0x1b8] sm:$0xff]  ;;  %v873_v11 = vmul.f32 %v8877_v17, %v788_v6  ;;  %v875_v32 = vmul.f32 %v8877_v17, %v790_v27  ;;  %v9145_v35 = vadd.f32 %v8881_v18, %v869_v56  ;;  %v1399_v27 = vld [vmem:[#allocation7 + $0x8] sm:$0xff]  ;;  %v1401_v56 = vld [vmem:[#allocation7 + $0x18] sm:$0xff] }
 0x15e   : > { %6705 = vmatmul.mubr.f32.gmra.mrb[4].mxu0 %v949_v4  ;;  %v863_v4 = vmul.f32 %v8877_v17, %v778_v48  ;;  %v785_v48 = vld [vmem:[%s8838_s1 + $0x1d0] sm:$0xff] }
 0x15f   : > { %6707 = vmatprep.mubr.f32.mxu0 %v950_v5  ;;  %v867_v5 = vmul.f32 %v8877_v17, %v782_v3  ;;  %v893_v3 = vadd.f32 %v8881_v18, %v825_v57  ;;  %v870_v57 = vmul.f32 %v8877_v17, %v785_v48 }
 0x160   : > { %v9104_v33 = vadd.f32 %v8881_v18, %v863_v4  ;;  %v955_v4 = vmax.f32 %v891_v9, 0.0  ;;  %v874_v9 = vmul.f32 %v8877_v17, %v789_v26  ;;  %v9163_v26 = vadd.f32 %v8881_v18, %v875_v32 }
 0x161   : > { %v9118_v47 = vadd.f32 %v8881_v18, %v867_v5  ;;  %v868_v5 = vmul.f32 %v8877_v17, %v783_v34  ;;  %v9148_v48 = vadd.f32 %v8881_v18, %v870_v57  ;;  %v957_v57 = vmax.f32 %v893_v3, 0.0 }
 0x162   : > { %6708 = vmatmul.mubr.f32.gmra.mrb[6].mxu0 %v951_v51  ;;  %v827_v51 = vmul.f32 %v8877_v17, %v742_v28  ;;  %v872_v28 = vmul.f32 %v8877_v17, %v787_v0  ;;  %v9160_v6 = vadd.f32 %v8881_v18, %v874_v9  ;;  %11108 = vst [vmem:[#allocation30_spill] sm:$0xff] %v9163_v26  ;;  %v747_v26 = vld [vmem:[%s8838_s1 + $0xa0] sm:$0xff] }
 0x163   : > { %6710 = vmatprep.mubr.f32.mxu0 %v952_v7  ;;  %v871_v7 = vmul.f32 %v8877_v17, %v786_v50  ;;  %v9142_v34 = vadd.f32 %v8881_v18, %v868_v5  ;;  %v1398_v50 = vld [vmem:[#allocation7] sm:$0xff]  ;;  %v1400_v5 = vld [vmem:[#allocation7 + $0x10] sm:$0xff]  ;;  %v830_v9 = vmul.f32 %v8877_v17, %v745_v63 }
 0x164   : > { %v9154_v0 = vadd.f32 %v8881_v18, %v872_v28  ;;  %11107 = vst [vmem:[#allocation29_spill] sm:$0xff] %v9160_v6  ;;  %v895_v10 = vadd.f32 %v8881_v18, %v827_v51  ;;  %v829_v28 = vmul.f32 %v8877_v17, %v744_v62  ;;  %v7722_v1 = vpack.c.bf16 %v1399_v27, %v1398_v50  ;;  %v1402_v6 = vld [vmem:[#allocation7 + $0x20] sm:$0xff]  ;;  %v749_v50 = vld [vmem:[%s8838_s1 + $0xb0] sm:$0xff]  ;;  %v1404_v27 = vld [vmem:[#allocation7 + $0x30] sm:$0xff] }
 0x165   : > { %v7726_v32 = vpack.c.bf16 %v1401_v56, %v1400_v5  ;;  %v748_v62 = vld [vmem:[%s8838_s1 + $0xa8] sm:$0xff]  ;;  %v1405_v5 = vld [vmem:[#allocation7 + $0x38] sm:$0xff] }
 0x166   : > { %6711 = vmatmul.mubr.f32.gmra.mrb[8].mxu0 %v953_v8  ;;  %v9151_v8 = vadd.f32 %v8881_v18, %v871_v7  ;;  %v958_v7 = vmax.f32 %v894_v20, 0.0  ;;  %7723 = vmatprep.subr.bf16.mxu1 %v7722_v1  ;;  %v959_v3 = vmax.f32 %v895_v10, 0.0  ;;  %v897_v51 = vadd.f32 %v8881_v18, %v829_v28  ;;  %v1406_v28 = vld [vmem:[#allocation7 + $0x40] sm:$0xff] }
 0x167   : > { %6713 = vmatprep.mubr.f32.mxu0 %v954_v2  ;;  %v9157_v2 = vadd.f32 %v8881_v18, %v873_v11  ;;  %v896_v11 = vadd.f32 %v8881_v18, %v828_v21  ;;  %7725 = vmatpush3.bf16.msra.mxu1 %v7722_v1  ;;  %v898_v20 = vadd.f32 %v8881_v18, %v830_v9 }
 0x168   : > { %v832_v21 = vmul.f32 %v8877_v17, %v747_v26  ;;  %7727 = vmatprep.subr.bf16.mxu1 %v7726_v32  ;;  %v961_v56 = vmax.f32 %v897_v51, 0.0  ;;  %v7734_v26 = vpack.c.bf16 %v1405_v5, %v1404_v27  ;;  %v1408_v51 = vld [vmem:[#allocation7 + $0x50] sm:$0xff]  ;;  %v972_v27 = vmax.f32 %v8947_v22, 0.0 }
 0x169   : > { %11106 = vst [vmem:[#allocation28_spill] sm:$0xff] %v9157_v2  ;;  %v1403_v2 = vld [vmem:[#allocation7 + $0x28] sm:$0xff]  ;;  %v962_v1 = vmax.f32 %v898_v20, 0.0  ;;  %v975_v5 = vmax.f32 %v8956_v25, 0.0  ;;  %v979_v22 = vmax.f32 %v8998_v55, 0.0  ;;  %v982_v25 = vmax.f32 %v9009_v60, 0.0 }
 0x16a   : > { %6714 = vmatmul.mubr.f32.gmra.mrb[10].mxu0 %v955_v4  ;;  %v831_v4 = vmul.f32 %v8877_v17, %v746_v14  ;;  %v7730_v63 = vpack.c.bf16 %v1403_v2, %v1402_v6  ;;  %v900_v14 = vadd.f32 %v8881_v18, %v832_v21  ;;  %v1407_v2 = vld [vmem:[#allocation7 + $0x48] sm:$0xff]  ;;  %v967_v21 = vmax.f32 %v8901_v49, 0.0 }
 0x16b   : > { %6716 = vmatprep.mubr.f32.mxu0 %v956_v12  ;;  %v960_v12 = vmax.f32 %v896_v11, 0.0  ;;  %7729 = vmatpush3.bf16.msra.mxu1 %v7726_v32  ;;  %v7738_v32 = vpack.c.bf16 %v1407_v2, %v1406_v28  ;;  %v973_v49 = vmax.f32 %v8950_v23, 0.0  ;;  %v980_v23 = vmax.f32 %v9003_v58, 0.0  ;;  %v1411_v60 = vld [vmem:[#allocation7 + $0x68] sm:$0xff] }
 0x16c   : > { %v899_v10 = vadd.f32 %v8881_v18, %v831_v4  ;;  %7731 = vmatprep.subr.bf16.mxu1 %v7730_v63  ;;  %v964_v9 = vmax.f32 %v900_v14, 0.0  ;;  %v1409_v4 = vld [vmem:[#allocation7 + $0x58] sm:$0xff]  ;;  %v986_v55 = vmax.f32 %v9049_v37, 0.0  ;;  %v987_v58 = vmax.f32 %v9052_v40, 0.0 }
 0x16d   : > { %v7742_v20 = vpack.c.bf16 %v1409_v4, %v1408_v51  ;;  %v991_v37 = vmax.f32 %v9066_v46, 0.0  ;;  %v996_v14 = vmax.f32 %v9109_v36, 0.0  ;;  %v997_v46 = vmax.f32 %v9112_v41, 0.0  ;;  %v11113_v51 = vld [vmem:[#allocation27_spill] sm:$0xff] }
 0x16e   : > { %6717 = vmatmul.mubr.f32.gmra.mrb[12].mxu0 %v957_v57  ;;  %v833_v57 = vmul.f32 %v8877_v17, %v748_v62  ;;  %v963_v6 = vmax.f32 %v899_v10, 0.0  ;;  %v968_v62 = vmax.f32 %v8933_v13, 0.0  ;;  %v974_v13 = vmax.f32 %v8953_v24, 0.0 }
 0x16f   : > { %6719 = vmatprep.mubr.f32.mxu0 %v958_v7  ;;  %v834_v7 = vmul.f32 %v8877_v17, %v749_v50  ;;  %7733 = vmatpush3.bf16.msra.mxu1 %v7730_v63  ;;  %v970_v63 = vmax.f32 %v8939_v16, 0.0  ;;  %v971_v50 = vmax.f32 %v8942_v19, 0.0  ;;  %v977_v16 = vmax.f32 %v8992_v53, 0.0 }
 0x170   : > { %v901_v11 = vadd.f32 %v8881_v18, %v833_v57  ;;  %7735 = vmatprep.subr.bf16.mxu1 %v7734_v26  ;;  %v978_v19 = vmax.f32 %v8995_v54, 0.0  ;;  %v981_v24 = vmax.f32 %v9006_v59, 0.0  ;;  %v984_v53 = vmax.f32 %v9043_v38, 0.0  ;;  %v1413_v57 = vld [vmem:[#allocation7 + $0x78] sm:$0xff] }
 0x171   : > { %v985_v54 = vmax.f32 %v9046_v39, 0.0  ;;  %v988_v59 = vmax.f32 %v9057_v43, 0.0  ;;  %v990_v38 = vmax.f32 %v9063_v45, 0.0  ;;  %v1412_v39 = vld [vmem:[#allocation7 + $0x70] sm:$0xff]  ;;  %v992_v43 = vmax.f32 %v9095_v29, 0.0 }
 0x172   : > { %6720 = vmatmul.mubr.f32.gmra.mrb[14].mxu0 %v959_v3  ;;  %v902_v3 = vadd.f32 %v8881_v18, %v834_v7  ;;  %v969_v18 = vmax.f32 %v8936_v15, 0.0  ;;  %v976_v15 = vmax.f32 %v8989_v52, 0.0  ;;  %v983_v52 = vmax.f32 %v9012_v61, 0.0 }
 0x173   : > { %6722 = vmatprep.mubr.f32.mxu0 %v960_v12  ;;  %v965_v12 = vmax.f32 %v901_v11, 0.0  ;;  %7737 = vmatpush3.bf16.msra.mxu1 %v7734_v26  ;;  %v989_v61 = vmax.f32 %v9060_v44, 0.0  ;;  %v7750_v40 = vpack.c.bf16 %v1413_v57, %v1412_v39  ;;  %v993_v44 = vmax.f32 %v9098_v30, 0.0  ;;  %v2012_v39 = vld [vmem:[#allocation9 + $0x40] sm:$0xff]  ;;  %v2013_v57 = vld [vmem:[#allocation9 + $0x48] sm:$0xff] }
 0x174   : > { %v966_v17 = vmax.f32 %v902_v3, 0.0  ;;  %7739 = vmatprep.subr.bf16.mxu1 %v7738_v32  ;;  %v995_v45 = vmax.f32 %v9104_v33, 0.0  ;;  %v998_v29 = vmax.f32 %v9115_v42, 0.0  ;;  %v999_v7 = vmax.f32 %v9118_v47, 0.0  ;;  %v11109_v42 = vld [vmem:[#allocation28_spill] sm:$0xff]  ;;  %v11110_v47 = vld [vmem:[#allocation29_spill] sm:$0xff] }
 0x175   : > { %v1000_v30 = vmax.f32 %v9142_v34, 0.0  ;;  %v1002_v33 = vmax.f32 %v9148_v48, 0.0  ;;  %v1003_v36 = vmax.f32 %v9151_v8, 0.0  ;;  %v1004_v41 = vmax.f32 %v9154_v0, 0.0  ;;  %v11111_v34 = vld [vmem:[#allocation30_spill] sm:$0xff]  ;;  %v11112_v8 = vld [vmem:[#allocation24_spill] sm:$0xff] }
 0x176   : > { %6723 = vmatmul.mubr.f32.gmra.mrb[16].mxu0 %v961_v56  ;;  %v1410_v56 = vld [vmem:[#allocation7 + $0x60] sm:$0xff]  ;;  %v1005_v26 = vmax.f32 %v11109_v42, 0.0  ;;  %v1006_v28 = vmax.f32 %v11110_v47, 0.0  ;;  %v1007_v2 = vmax.f32 %v11111_v34, 0.0  ;;  %v9225_v11 = vsub.s32 2, %v11112_v8  ;;  %v2006_v0 = vld [vmem:[#allocation9 + $0x10] sm:$0xff] }
 0x177   : > { %6725 = vmatprep.mubr.f32.mxu0 %v962_v1  ;;  %7741 = vmatpush3.bf16.msra.mxu1 %v7738_v32  ;;  %v7746_v10 = vpack.c.bf16 %v1411_v60, %v1410_v56  ;;  %v994_v1 = vmax.f32 %v9101_v31, 0.0  ;;  %v1001_v31 = vmax.f32 %v9145_v35, 0.0  ;;  %v2004_v35 = vld [vmem:[#allocation9] sm:$0xff]  ;;  %v9230_v3 = vld [vmem:[%s11046_s3] sm:$0xff] }
 0x178   : > { %7743 = vmatprep.subr.bf16.mxu1 %v7742_v20  ;;  %v9234_v4 = vrot.slane %v11113_v51, %v9225_v11  ;;  %v2016_v8 = vld [vmem:[#allocation9 + $0x60] sm:$0xff] }
 0x17a   : > { %6726 = vmatmul.mubr.f32.gmra.mrb[18].mxu0 %v963_v6  ;;  %v2005_v6 = vld [vmem:[#allocation9 + $0x8] sm:$0xff] }
 0x17b   : > { %6728 = vmatprep.mubr.f32.mxu0 %v964_v9  ;;  %7745 = vmatpush3.bf16.msra.mxu1 %v7742_v20  ;;  %v7754_v48 = vpack.c.bf16 %v2005_v6, %v2004_v35  ;;  %v2007_v9 = vld [vmem:[#allocation9 + $0x18] sm:$0xff] }
 0x17c   : > { %7747 = vmatprep.subr.bf16.mxu1 %v7746_v10  ;;  %v7758_v32 = vpack.c.bf16 %v2007_v9, %v2006_v0  ;;  %v2017_v0 = vld [vmem:[#allocation9 + $0x68] sm:$0xff] }
 0x17d   : > { %7755 = vmatprep.subr.bf16.mxu0 %v7754_v48 }
 0x17e   : > { %6729 = vmatmul.mubr.f32.gmra.mrb[20].mxu0 %v965_v12  ;;  %v11114_v12 = vld [vmem:[#allocation25_spill] sm:$0xff] }
 0x17f   : > { %6731 = vmatprep.mubr.f32.mxu0 %v966_v17  ;;  %7749 = vmatpush3.bf16.msra.mxu1 %v7746_v10  ;;  %v9238_v17 = vrot.slane %v9230_v3, %v11114_v12 }
 0x180   : > { %7751 = vmatprep.subr.bf16.mxu1 %v7750_v40  ;;  %7757 = vmatpush3.bf16.msra.mxu0 %v7754_v48 }
 0x181   : > { %7759 = vmatprep.subr.bf16.mxu0 %v7758_v32 }
 0x182   : > { %6732 = vmatmul.mubr.f32.gmra.mrb[22].mxu0 %v967_v21 }
 0x183   : > { %6734 = vmatprep.mubr.f32.mxu0 %v968_v62  ;;  %7753 = vmatpush3.bf16.msra.mxu1 %v7750_v40 }
 0x184   : > { %7761 = vmatpush3.bf16.msra.mxu0 %v7758_v32 }
 0x186   : > { %6735 = vmatmul.mubr.f32.gmra.mrb[24].mxu0 %v969_v18  ;;  %v11115_v18 = vld [vmem:[#allocation26_spill] sm:$0xff] }
 0x187   : > { %6737 = vmatprep.mubr.f32.mxu0 %v970_v63  ;;  %v9243_v63 = vrot.slane %v9230_v3, %v11115_v18 }
 0x18a   : > { %6738 = vmatmul.mubr.f32.gmra.mrb[26].mxu0 %v971_v50 }
 0x18b   : > { %6740 = vmatprep.mubr.f32.mxu0 %v972_v27 }
 0x18e   : > { %6741 = vmatmul.mubr.f32.gmra.mrb[28].mxu0 %v973_v49 }
 0x18f   : > { %6743 = vmatprep.mubr.f32.mxu0 %v974_v13 }
 0x192   : > { %6744 = vmatmul.mubr.f32.gmra.mrb[30].mxu0 %v975_v5 }
 0x193   : > { %6746 = vmatprep.mubr.f32.mxu0 %v976_v15 }
 0x196   : > { %6747 = vmatmul.mubr.f32.gmra.mrb[32].mxu0 %v977_v16 }
 0x197   : > { %6749 = vmatprep.mubr.f32.mxu0 %v978_v19 }
 0x19a   : > { %6750 = vmatmul.mubr.f32.gmra.mrb[34].mxu0 %v979_v22 }
 0x19b   : > { %6752 = vmatprep.mubr.f32.mxu0 %v980_v23 }
 0x19e   : > { %6753 = vmatmul.mubr.f32.gmra.mrb[36].mxu0 %v981_v24  ;;  %v2008_v24 = vld [vmem:[#allocation9 + $0x20] sm:$0xff] }
 0x19f   : > { %6755 = vmatprep.mubr.f32.mxu0 %v982_v25  ;;  %v2009_v25 = vld [vmem:[#allocation9 + $0x28] sm:$0xff] }
 0x1a2   : > { %6756 = vmatmul.mubr.f32.gmra.mrb[38].mxu0 %v983_v52  ;;  %v2010_v52 = vld [vmem:[#allocation9 + $0x30] sm:$0xff] }
 0x1a3   : > { %6758 = vmatprep.mubr.f32.mxu0 %v984_v53 }
 0x1a6   : > { %6759 = vmatmul.mubr.f32.gmra.mrb[40].mxu0 %v985_v54 }
 0x1a7   : > { %6761 = vmatprep.mubr.f32.mxu0 %v986_v55 }
 0x1aa   : > { %6762 = vmatmul.mubr.f32.gmra.mrb[42].mxu0 %v987_v58  ;;  %v7762_v58 = vpack.c.bf16 %v2009_v25, %v2008_v24 }
 0x1ab   : > { %6764 = vmatprep.mubr.f32.mxu0 %v988_v59  ;;  %v2011_v59 = vld [vmem:[#allocation9 + $0x38] sm:$0xff] }
 0x1ac   : > { %7763 = vmatprep.subr.bf16.mxu0 %v7762_v58 }
 0x1ad   : > { %7765 = vmatpush3.bf16.msra.mxu0 %v7762_v58 }
 0x1ae   : > { %6765 = vmatmul.mubr.f32.gmra.mrb[44].mxu0 %v989_v61 }
 0x1af   : > { %6767 = vmatprep.mubr.f32.mxu0 %v990_v38  ;;  %v7766_v38 = vpack.c.bf16 %v2011_v59, %v2010_v52 }
 0x1b1   : > { %7767 = vmatprep.subr.bf16.mxu0 %v7766_v38 }
 0x1b2   : > { %6768 = vmatmul.mubr.f32.gmra.mrb[46].mxu0 %v991_v37 }
 0x1b3   : > { %6770 = vmatprep.mubr.f32.mxu0 %v992_v43  ;;  %7769 = vmatpush3.bf16.msra.mxu0 %v7766_v38 }
 0x1b6   : > { %6771 = vmatmul.mubr.f32.gmra.mrb[48].mxu0 %v993_v44 }
 0x1b7   : > { %6773 = vmatprep.mubr.f32.mxu0 %v994_v1 }
 0x1ba   : > { %6774 = vmatmul.mubr.f32.gmra.mrb[50].mxu0 %v995_v45 }
 0x1bb   : > { %6776 = vmatprep.mubr.f32.mxu0 %v996_v14  ;;  %v7770_v14 = vpack.c.bf16 %v2013_v57, %v2012_v39 }
 0x1bd   : > { %7771 = vmatprep.subr.bf16.mxu0 %v7770_v14 }
 0x1be   : > { %6777 = vmatmul.mubr.f32.gmra.mrb[52].mxu0 %v997_v46 }
 0x1bf   : > { %6779 = vmatprep.mubr.f32.mxu0 %v998_v29  ;;  %7773 = vmatpush3.bf16.msra.mxu0 %v7770_v14 }
 0x1c2   : > { %6780 = vmatmul.mubr.f32.gmra.mrb[54].mxu0 %v999_v7 }
 0x1c3   : > { %6782 = vmatprep.mubr.f32.mxu0 %v1000_v30 }
 0x1c6   : > { %6783 = vmatmul.mubr.f32.gmra.mrb[56].mxu0 %v1001_v31  ;;  %v2014_v31 = vld [vmem:[#allocation9 + $0x50] sm:$0xff] }
 0x1c7   : > { %6785 = vmatprep.mubr.f32.mxu0 %v1002_v33  ;;  %v2015_v33 = vld [vmem:[#allocation9 + $0x58] sm:$0xff] }
 0x1c8   : > { %v7774_v34 = vpack.c.bf16 %v2015_v33, %v2014_v31 }
 0x1ca   : > { %6786 = vmatmul.mubr.f32.gmra.mrb[58].mxu0 %v1003_v36  ;;  %7775 = vmatprep.subr.bf16.mxu0 %v7774_v34 }
 0x1cb   : > { %6788 = vmatprep.mubr.f32.mxu0 %v1004_v41  ;;  %7777 = vmatpush3.bf16.msra.mxu0 %v7774_v34 }
 0x1ce   : > { %6789 = vmatmul.mubr.f32.gmra.mrb[60].mxu0 %v1005_v26 }
 0x1cf   : > { %6791 = vmatprep.mubr.f32.mxu0 %v1006_v28 }
 0x1d2   : > { %6792 = vmatmul.mubr.f32.gmra.mrb[62].mxu0 %v1007_v2 }
 0x229   : > { %v6700_v20 = vpop.f32.mrb[0].mxu0 }
 0x22a   : > { %v1084_v21 = vadd.f32 %v6700_v20, %v9234_v4  ;;  %v1078_v62 = vpop.f32.mrb[1].mxu0 }
 0x22b   : > { %v1079_v50 = vadd.f32 %v1078_v62, %v9234_v4 }
 0x22c   : > { %v1419_v27 = vmul.f32 %v9238_v17, %v1084_v21 }
 0x22d   : > { %v6703_v49 = vpop.f32.mrb[2].mxu0  ;;  %v1418_v13 = vmul.f32 %v9238_v17, %v1079_v50  ;;  %v7778_v50 = vpack.c.bf16 %v2017_v0, %v2016_v8 }
 0x22e   : > { %v1094_v5 = vadd.f32 %v6703_v49, %v9234_v4  ;;  %v1088_v15 = vpop.f32.mrb[3].mxu0  ;;  %v1487_v16 = vadd.f32 %v9243_v63, %v1419_v27 }
 0x22f   : > { %v1089_v19 = vadd.f32 %v1088_v15, %v9234_v4  ;;  %v1486_v22 = vadd.f32 %v9243_v63, %v1418_v13  ;;  %v2018_v15 = vld [vmem:[#allocation9 + $0x70] sm:$0xff]  ;;  %7779 = vmatprep.subr.bf16.mxu0 %v7778_v50 }
 0x230   : > { %v1421_v23 = vmul.f32 %v9238_v17, %v1094_v5  ;;  %v1551_v61 = vmax.f32 %v1487_v16, 0.0  ;;  %v2019_v16 = vld [vmem:[#allocation9 + $0x78] sm:$0xff]  ;;  %7781 = vmatpush3.bf16.msra.mxu0 %v7778_v50 }
 0x231   : > { %v1420_v53 = vmul.f32 %v9238_v17, %v1089_v19  ;;  %v6706_v54 = vpop.f32.mrb[4].mxu0  ;;  %v1550_v55 = vmax.f32 %v1486_v22, 0.0 }
 0x232   : > { %v1104_v56 = vadd.f32 %v6706_v54, %v9234_v4  ;;  %v1098_v60 = vpop.f32.mrb[5].mxu0  ;;  %v1489_v10 = vadd.f32 %v9243_v63, %v1421_v23 }
 0x233   : > { %v1099_v37 = vadd.f32 %v1098_v60, %v9234_v4  ;;  %6826 = vmatprep.mubr.f32.mxu1 %v1550_v55  ;;  %v1488_v40 = vadd.f32 %v9243_v63, %v1420_v53  ;;  %v7782_v53 = vpack.c.bf16 %v2019_v16, %v2018_v15 }
 0x234   : > { %v1423_v43 = vmul.f32 %v9238_v17, %v1104_v56  ;;  %6827 = vmatmul.mubr.f32.vlgmr.msra.gmra.mrb[0].mxu1 %v1551_v61  ;;  %v1553_v7 = vmax.f32 %v1489_v10, 0.0 }
 0x235   : > { %v1422_v44 = vmul.f32 %v9238_v17, %v1099_v37  ;;  %v6709_v1 = vpop.f32.mrb[6].mxu0  ;;  %v1552_v45 = vmax.f32 %v1488_v40, 0.0  ;;  %7783 = vmatprep.subr.bf16.mxu0 %v7782_v53 }
 0x236   : > { %v1114_v46 = vadd.f32 %v6709_v1, %v9234_v4  ;;  %v1108_v29 = vpop.f32.mrb[7].mxu0  ;;  %v1491_v30 = vadd.f32 %v9243_v63, %v1423_v43  ;;  %7785 = vmatpush3.bf16.msra.mxu0 %v7782_v53 }
 0x237   : > { %v1109_v36 = vadd.f32 %v1108_v29, %v9234_v4  ;;  %6829 = vmatprep.mubr.f32.mxu1 %v1552_v45  ;;  %v1490_v41 = vadd.f32 %v9243_v63, %v1422_v44 }
 0x238   : > { %v1425_v42 = vmul.f32 %v9238_v17, %v1114_v46  ;;  %6830 = vmatmul.mubr.f32.gmra.mrb[2].mxu1 %v1553_v7  ;;  %v1555_v6 = vmax.f32 %v1491_v30, 0.0 }
 0x239   : > { %v1424_v26 = vmul.f32 %v9238_v17, %v1109_v36  ;;  %v6712_v47 = vpop.f32.mrb[8].mxu0  ;;  %v1554_v28 = vmax.f32 %v1490_v41, 0.0 }
 0x23a   : > { %v1124_v2 = vadd.f32 %v6712_v47, %v9234_v4  ;;  %v1118_v35 = vpop.f32.mrb[9].mxu0  ;;  %v1493_v48 = vadd.f32 %v9243_v63, %v1425_v42 }
 0x23b   : > { %v1119_v9 = vadd.f32 %v1118_v35, %v9234_v4  ;;  %6832 = vmatprep.mubr.f32.mxu1 %v1554_v28  ;;  %v1492_v32 = vadd.f32 %v9243_v63, %v1424_v26 }
 0x23c   : > { %v1427_v51 = vmul.f32 %v9238_v17, %v1124_v2  ;;  %6833 = vmatmul.mubr.f32.gmra.mrb[4].mxu1 %v1555_v6  ;;  %v1557_v13 = vmax.f32 %v1493_v48, 0.0 }
 0x23d   : > { %v1426_v20 = vmul.f32 %v9238_v17, %v1119_v9  ;;  %v6715_v21 = vpop.f32.mrb[10].mxu0  ;;  %v1556_v62 = vmax.f32 %v1492_v32, 0.0 }
 0x23e   : > { %v1134_v27 = vadd.f32 %v6715_v21, %v9234_v4  ;;  %v1128_v49 = vpop.f32.mrb[11].mxu0  ;;  %v1495_v5 = vadd.f32 %v9243_v63, %v1427_v51 }
 0x23f   : > { %v1129_v19 = vadd.f32 %v1128_v49, %v9234_v4  ;;  %6835 = vmatprep.mubr.f32.mxu1 %v1556_v62  ;;  %v1494_v22 = vadd.f32 %v9243_v63, %v1426_v20 }
 0x240   : > { %v1429_v23 = vmul.f32 %v9238_v17, %v1134_v27  ;;  %6836 = vmatmul.mubr.f32.gmra.mrb[6].mxu1 %v1557_v13  ;;  %v1559_v58 = vmax.f32 %v1495_v5, 0.0 }
 0x241   : > { %v1428_v24 = vmul.f32 %v9238_v17, %v1129_v19  ;;  %v6718_v25 = vpop.f32.mrb[12].mxu0  ;;  %v1558_v52 = vmax.f32 %v1494_v22, 0.0 }
 0x242   : > { %v1144_v54 = vadd.f32 %v6718_v25, %v9234_v4  ;;  %v1138_v55 = vpop.f32.mrb[13].mxu0  ;;  %v1497_v59 = vadd.f32 %v9243_v63, %v1429_v23 }
 0x243   : > { %v1139_v56 = vadd.f32 %v1138_v55, %v9234_v4  ;;  %6838 = vmatprep.mubr.f32.mxu1 %v1558_v52  ;;  %v1496_v60 = vadd.f32 %v9243_v63, %v1428_v24 }
 0x244   : > { %v1431_v61 = vmul.f32 %v9238_v17, %v1144_v54  ;;  %6839 = vmatmul.mubr.f32.gmra.mrb[8].mxu1 %v1559_v58  ;;  %v1561_v40 = vmax.f32 %v1497_v59, 0.0 }
 0x245   : > { %v1430_v10 = vmul.f32 %v9238_v17, %v1139_v56  ;;  %v6721_v38 = vpop.f32.mrb[14].mxu0  ;;  %v1560_v39 = vmax.f32 %v1496_v60, 0.0 }
 0x246   : > { %v1154_v57 = vadd.f32 %v6721_v38, %v9234_v4  ;;  %v1148_v37 = vpop.f32.mrb[15].mxu0  ;;  %v1499_v43 = vadd.f32 %v9243_v63, %v1431_v61 }
 0x247   : > { %v1149_v44 = vadd.f32 %v1148_v37, %v9234_v4  ;;  %6841 = vmatprep.mubr.f32.mxu1 %v1560_v39  ;;  %v1498_v1 = vadd.f32 %v9243_v63, %v1430_v10 }
 0x248   : > { %v1433_v45 = vmul.f32 %v9238_v17, %v1154_v57  ;;  %6842 = vmatmul.mubr.f32.gmra.mrb[10].mxu1 %v1561_v40  ;;  %v1563_v31 = vmax.f32 %v1499_v43, 0.0 }
 0x249   : > { %v1432_v14 = vmul.f32 %v9238_v17, %v1149_v44  ;;  %v6724_v46 = vpop.f32.mrb[16].mxu0  ;;  %v1562_v29 = vmax.f32 %v1498_v1, 0.0 }
 0x24a   : > { %v1164_v7 = vadd.f32 %v6724_v46, %v9234_v4  ;;  %v1158_v30 = vpop.f32.mrb[17].mxu0  ;;  %v1501_v33 = vadd.f32 %v9243_v63, %v1433_v45 }
 0x24b   : > { %v1159_v36 = vadd.f32 %v1158_v30, %v9234_v4  ;;  %6844 = vmatprep.mubr.f32.mxu1 %v1562_v29  ;;  %v1500_v41 = vadd.f32 %v9243_v63, %v1432_v14 }
 0x24c   : > { %v1435_v42 = vmul.f32 %v9238_v17, %v1164_v7  ;;  %6845 = vmatmul.mubr.f32.gmra.mrb[12].mxu1 %v1563_v31  ;;  %v1565_v35 = vmax.f32 %v1501_v33, 0.0 }
 0x24d   : > { %v1434_v26 = vmul.f32 %v9238_v17, %v1159_v36  ;;  %v6727_v47 = vpop.f32.mrb[18].mxu0  ;;  %v1564_v28 = vmax.f32 %v1500_v41, 0.0 }
 0x24e   : > { %v1174_v34 = vadd.f32 %v6727_v47, %v9234_v4  ;;  %v1168_v2 = vpop.f32.mrb[19].mxu0  ;;  %v1503_v6 = vadd.f32 %v9243_v63, %v1435_v42 }
 0x24f   : > { %v1169_v48 = vadd.f32 %v1168_v2, %v9234_v4  ;;  %6847 = vmatprep.mubr.f32.mxu1 %v1564_v28  ;;  %v1502_v8 = vadd.f32 %v9243_v63, %v1434_v26 }
 0x250   : > { %v1437_v0 = vmul.f32 %v9238_v17, %v1174_v34  ;;  %6848 = vmatmul.mubr.f32.gmra.mrb[14].mxu1 %v1565_v35  ;;  %v1567_v62 = vmax.f32 %v1503_v6, 0.0 }
 0x251   : > { %v1436_v9 = vmul.f32 %v9238_v17, %v1169_v48  ;;  %v6730_v32 = vpop.f32.mrb[20].mxu0  ;;  %v1566_v51 = vmax.f32 %v1502_v8, 0.0 }
 0x252   : > { %v1184_v20 = vadd.f32 %v6730_v32, %v9234_v4  ;;  %v1178_v21 = vpop.f32.mrb[21].mxu0  ;;  %v1505_v50 = vadd.f32 %v9243_v63, %v1437_v0 }
 0x253   : > { %v1179_v27 = vadd.f32 %v1178_v21, %v9234_v4  ;;  %6850 = vmatprep.mubr.f32.mxu1 %v1566_v51  ;;  %v1504_v49 = vadd.f32 %v9243_v63, %v1436_v9 }
 0x254   : > { %v1439_v13 = vmul.f32 %v9238_v17, %v1184_v20  ;;  %6851 = vmatmul.mubr.f32.gmra.mrb[16].mxu1 %v1567_v62  ;;  %v1569_v23 = vmax.f32 %v1505_v50, 0.0 }
 0x255   : > { %v1438_v5 = vmul.f32 %v9238_v17, %v1179_v27  ;;  %v6733_v15 = vpop.f32.mrb[22].mxu0  ;;  %v1568_v16 = vmax.f32 %v1504_v49, 0.0 }
 0x256   : > { %v1194_v19 = vadd.f32 %v6733_v15, %v9234_v4  ;;  %v1188_v22 = vpop.f32.mrb[23].mxu0  ;;  %v1507_v24 = vadd.f32 %v9243_v63, %v1439_v13 }
 0x257   : > { %v1189_v25 = vadd.f32 %v1188_v22, %v9234_v4  ;;  %6853 = vmatprep.mubr.f32.mxu1 %v1568_v16  ;;  %v1506_v52 = vadd.f32 %v9243_v63, %v1438_v5 }
 0x258   : > { %v1441_v53 = vmul.f32 %v9238_v17, %v1194_v19  ;;  %6854 = vmatmul.mubr.f32.gmra.mrb[18].mxu1 %v1569_v23  ;;  %v1571_v60 = vmax.f32 %v1507_v24, 0.0 }
 0x259   : > { %v1440_v54 = vmul.f32 %v9238_v17, %v1189_v25  ;;  %v6736_v55 = vpop.f32.mrb[24].mxu0  ;;  %v1570_v58 = vmax.f32 %v1506_v52, 0.0 }
 0x25a   : > { %v1204_v59 = vadd.f32 %v6736_v55, %v9234_v4  ;;  %v1198_v56 = vpop.f32.mrb[25].mxu0  ;;  %v1509_v61 = vadd.f32 %v9243_v63, %v1441_v53 }
 0x25b   : > { %v1199_v10 = vadd.f32 %v1198_v56, %v9234_v4  ;;  %6856 = vmatprep.mubr.f32.mxu1 %v1570_v58  ;;  %v1508_v38 = vadd.f32 %v9243_v63, %v1440_v54 }
 0x25c   : > { %v1443_v39 = vmul.f32 %v9238_v17, %v1204_v59  ;;  %6857 = vmatmul.mubr.f32.gmra.mrb[20].mxu1 %v1571_v60  ;;  %v1573_v1 = vmax.f32 %v1509_v61, 0.0 }
 0x25d   : > { %v1442_v57 = vmul.f32 %v9238_v17, %v1199_v10  ;;  %v6739_v37 = vpop.f32.mrb[26].mxu0  ;;  %v1572_v40 = vmax.f32 %v1508_v38, 0.0 }
 0x25e   : > { %v1214_v43 = vadd.f32 %v6739_v37, %v9234_v4  ;;  %v1208_v44 = vpop.f32.mrb[27].mxu0  ;;  %v1511_v45 = vadd.f32 %v9243_v63, %v1443_v39 }
 0x25f   : > { %v1209_v14 = vadd.f32 %v1208_v44, %v9234_v4  ;;  %6859 = vmatprep.mubr.f32.mxu1 %v1572_v40  ;;  %v1510_v46 = vadd.f32 %v9243_v63, %v1442_v57 }
 0x260   : > { %v1445_v29 = vmul.f32 %v9238_v17, %v1214_v43  ;;  %6860 = vmatmul.mubr.f32.gmra.mrb[22].mxu1 %v1573_v1  ;;  %v1575_v41 = vmax.f32 %v1511_v45, 0.0 }
 0x261   : > { %v1444_v7 = vmul.f32 %v9238_v17, %v1209_v14  ;;  %v6742_v30 = vpop.f32.mrb[28].mxu0  ;;  %v1574_v31 = vmax.f32 %v1510_v46, 0.0 }
 0x262   : > { %v1224_v33 = vadd.f32 %v6742_v30, %v9234_v4  ;;  %v1218_v36 = vpop.f32.mrb[29].mxu0  ;;  %v1513_v42 = vadd.f32 %v9243_v63, %v1445_v29 }
 0x263   : > { %v1219_v26 = vadd.f32 %v1218_v36, %v9234_v4  ;;  %6862 = vmatprep.mubr.f32.mxu1 %v1574_v31  ;;  %v1512_v47 = vadd.f32 %v9243_v63, %v1444_v7 }
 0x264   : > { %v1447_v28 = vmul.f32 %v9238_v17, %v1224_v33  ;;  %6863 = vmatmul.mubr.f32.gmra.mrb[24].mxu1 %v1575_v41  ;;  %v1577_v8 = vmax.f32 %v1513_v42, 0.0 }
 0x265   : > { %v1446_v34 = vmul.f32 %v9238_v17, %v1219_v26  ;;  %v6745_v2 = vpop.f32.mrb[30].mxu0  ;;  %v1576_v35 = vmax.f32 %v1512_v47, 0.0 }
 0x266   : > { %v1234_v6 = vadd.f32 %v6745_v2, %v9234_v4  ;;  %v1228_v48 = vpop.f32.mrb[31].mxu0  ;;  %v1515_v0 = vadd.f32 %v9243_v63, %v1447_v28 }
 0x267   : > { %v1229_v9 = vadd.f32 %v1228_v48, %v9234_v4  ;;  %6865 = vmatprep.mubr.f32.mxu1 %v1576_v35  ;;  %v1514_v32 = vadd.f32 %v9243_v63, %v1446_v34 }
 0x268   : > { %v1449_v51 = vmul.f32 %v9238_v17, %v1234_v6  ;;  %6866 = vmatmul.mubr.f32.gmra.mrb[26].mxu1 %v1577_v8  ;;  %v1579_v49 = vmax.f32 %v1515_v0, 0.0 }
 0x269   : > { %v1448_v20 = vmul.f32 %v9238_v17, %v1229_v9  ;;  %v6748_v21 = vpop.f32.mrb[32].mxu0  ;;  %v1578_v62 = vmax.f32 %v1514_v32, 0.0 }
 0x26a   : > { %v1244_v50 = vadd.f32 %v6748_v21, %v9234_v4  ;;  %v1238_v27 = vpop.f32.mrb[33].mxu0  ;;  %v1517_v13 = vadd.f32 %v9243_v63, %v1449_v51 }
 0x26b   : > { %v1239_v5 = vadd.f32 %v1238_v27, %v9234_v4  ;;  %6868 = vmatprep.mubr.f32.mxu1 %v1578_v62  ;;  %v1516_v15 = vadd.f32 %v9243_v63, %v1448_v20 }
 0x26c   : > { %v1451_v16 = vmul.f32 %v9238_v17, %v1244_v50  ;;  %6869 = vmatmul.mubr.f32.gmra.mrb[28].mxu1 %v1579_v49  ;;  %v1581_v52 = vmax.f32 %v1517_v13, 0.0 }
 0x26d   : > { %v1450_v19 = vmul.f32 %v9238_v17, %v1239_v5  ;;  %v6751_v22 = vpop.f32.mrb[34].mxu0  ;;  %v1580_v23 = vmax.f32 %v1516_v15, 0.0 }
 0x26e   : > { %v1254_v24 = vadd.f32 %v6751_v22, %v9234_v4  ;;  %v1248_v25 = vpop.f32.mrb[35].mxu0  ;;  %v1519_v53 = vadd.f32 %v9243_v63, %v1451_v16 }
 0x26f   : > { %v1249_v54 = vadd.f32 %v1248_v25, %v9234_v4  ;;  %6871 = vmatprep.mubr.f32.mxu1 %v1580_v23  ;;  %v1518_v55 = vadd.f32 %v9243_v63, %v1450_v19 }
 0x270   : > { %v1453_v58 = vmul.f32 %v9238_v17, %v1254_v24  ;;  %6872 = vmatmul.mubr.f32.gmra.mrb[30].mxu1 %v1581_v52  ;;  %v1583_v38 = vmax.f32 %v1519_v53, 0.0 }
 0x271   : > { %v1452_v59 = vmul.f32 %v9238_v17, %v1249_v54  ;;  %v6754_v56 = vpop.f32.mrb[36].mxu0  ;;  %v1582_v60 = vmax.f32 %v1518_v55, 0.0 }
 0x272   : > { %v1264_v61 = vadd.f32 %v6754_v56, %v9234_v4  ;;  %v1258_v10 = vpop.f32.mrb[37].mxu0  ;;  %v1521_v39 = vadd.f32 %v9243_v63, %v1453_v58 }
 0x273   : > { %v1259_v57 = vadd.f32 %v1258_v10, %v9234_v4  ;;  %6874 = vmatprep.mubr.f32.mxu1 %v1582_v60  ;;  %v1520_v37 = vadd.f32 %v9243_v63, %v1452_v59 }
 0x274   : > { %v1455_v40 = vmul.f32 %v9238_v17, %v1264_v61  ;;  %6875 = vmatmul.mubr.f32.gmra.mrb[32].mxu1 %v1583_v38  ;;  %v1585_v46 = vmax.f32 %v1521_v39, 0.0 }
 0x275   : > { %v1454_v43 = vmul.f32 %v9238_v17, %v1259_v57  ;;  %v6757_v44 = vpop.f32.mrb[38].mxu0  ;;  %v1584_v1 = vmax.f32 %v1520_v37, 0.0 }
 0x276   : > { %v1274_v45 = vadd.f32 %v6757_v44, %v9234_v4  ;;  %v1268_v14 = vpop.f32.mrb[39].mxu0  ;;  %v1523_v29 = vadd.f32 %v9243_v63, %v1455_v40 }
 0x277   : > { %v1269_v7 = vadd.f32 %v1268_v14, %v9234_v4  ;;  %6877 = vmatprep.mubr.f32.mxu1 %v1584_v1  ;;  %v1522_v30 = vadd.f32 %v9243_v63, %v1454_v43 }
 0x278   : > { %v1457_v31 = vmul.f32 %v9238_v17, %v1274_v45  ;;  %6878 = vmatmul.mubr.f32.gmra.mrb[34].mxu1 %v1585_v46  ;;  %v1587_v47 = vmax.f32 %v1523_v29, 0.0 }
 0x279   : > { %v1456_v33 = vmul.f32 %v9238_v17, %v1269_v7  ;;  %v6760_v36 = vpop.f32.mrb[40].mxu0  ;;  %v1586_v41 = vmax.f32 %v1522_v30, 0.0 }
 0x27a   : > { %v1284_v42 = vadd.f32 %v6760_v36, %v9234_v4  ;;  %v1278_v26 = vpop.f32.mrb[41].mxu0  ;;  %v1525_v28 = vadd.f32 %v9243_v63, %v1457_v31 }
 0x27b   : > { %v1279_v34 = vadd.f32 %v1278_v26, %v9234_v4  ;;  %6880 = vmatprep.mubr.f32.mxu1 %v1586_v41  ;;  %v1524_v2 = vadd.f32 %v9243_v63, %v1456_v33 }
 0x27c   : > { %v1459_v35 = vmul.f32 %v9238_v17, %v1284_v42  ;;  %6881 = vmatmul.mubr.f32.gmra.mrb[36].mxu1 %v1587_v47  ;;  %v1589_v32 = vmax.f32 %v1525_v28, 0.0 }
 0x27d   : > { %v1458_v6 = vmul.f32 %v9238_v17, %v1279_v34  ;;  %v6763_v48 = vpop.f32.mrb[42].mxu0  ;;  %v1588_v8 = vmax.f32 %v1524_v2, 0.0 }
 0x27e   : > { %v1294_v0 = vadd.f32 %v6763_v48, %v9234_v4  ;;  %v1288_v9 = vpop.f32.mrb[43].mxu0  ;;  %v1527_v51 = vadd.f32 %v9243_v63, %v1459_v35 }
 0x27f   : > { %v1289_v20 = vadd.f32 %v1288_v9, %v9234_v4  ;;  %6883 = vmatprep.mubr.f32.mxu1 %v1588_v8  ;;  %v1526_v21 = vadd.f32 %v9243_v63, %v1458_v6 }
 0x280   : > { %v1461_v62 = vmul.f32 %v9238_v17, %v1294_v0  ;;  %6884 = vmatmul.mubr.f32.gmra.mrb[38].mxu1 %v1589_v32  ;;  %v1591_v15 = vmax.f32 %v1527_v51, 0.0 }
 0x281   : > { %v1460_v50 = vmul.f32 %v9238_v17, %v1289_v20  ;;  %v6766_v27 = vpop.f32.mrb[44].mxu0  ;;  %v1590_v49 = vmax.f32 %v1526_v21, 0.0 }
 0x282   : > { %v1304_v13 = vadd.f32 %v6766_v27, %v9234_v4  ;;  %v1298_v5 = vpop.f32.mrb[45].mxu0  ;;  %v1529_v16 = vadd.f32 %v9243_v63, %v1461_v62 }
 0x283   : > { %v1299_v19 = vadd.f32 %v1298_v5, %v9234_v4  ;;  %6886 = vmatprep.mubr.f32.mxu1 %v1590_v49  ;;  %v1528_v22 = vadd.f32 %v9243_v63, %v1460_v50 }
 0x284   : > { %v1463_v23 = vmul.f32 %v9238_v17, %v1304_v13  ;;  %6887 = vmatmul.mubr.f32.gmra.mrb[40].mxu1 %v1591_v15  ;;  %v1593_v55 = vmax.f32 %v1529_v16, 0.0 }
 0x285   : > { %v1462_v24 = vmul.f32 %v9238_v17, %v1299_v19  ;;  %v6769_v25 = vpop.f32.mrb[46].mxu0  ;;  %v1592_v52 = vmax.f32 %v1528_v22, 0.0 }
 0x286   : > { %v1314_v53 = vadd.f32 %v6769_v25, %v9234_v4  ;;  %v1308_v54 = vpop.f32.mrb[47].mxu0  ;;  %v1531_v58 = vadd.f32 %v9243_v63, %v1463_v23 }
 0x287   : > { %v1309_v59 = vadd.f32 %v1308_v54, %v9234_v4  ;;  %6889 = vmatprep.mubr.f32.mxu1 %v1592_v52  ;;  %v1530_v56 = vadd.f32 %v9243_v63, %v1462_v24 }
 0x288   : > { %v1465_v60 = vmul.f32 %v9238_v17, %v1314_v53  ;;  %6890 = vmatmul.mubr.f32.gmra.mrb[42].mxu1 %v1593_v55  ;;  %v1595_v37 = vmax.f32 %v1531_v58, 0.0 }
 0x289   : > { %v1464_v61 = vmul.f32 %v9238_v17, %v1309_v59  ;;  %v6772_v10 = vpop.f32.mrb[48].mxu0  ;;  %v1594_v38 = vmax.f32 %v1530_v56, 0.0 }
 0x28a   : > { %v1324_v39 = vadd.f32 %v6772_v10, %v9234_v4  ;;  %v1318_v57 = vpop.f32.mrb[49].mxu0  ;;  %v1533_v40 = vadd.f32 %v9243_v63, %v1465_v60 }
 0x28b   : > { %v1319_v43 = vadd.f32 %v1318_v57, %v9234_v4  ;;  %6892 = vmatprep.mubr.f32.mxu1 %v1594_v38  ;;  %v1532_v44 = vadd.f32 %v9243_v63, %v1464_v61 }
 0x28c   : > { %v1467_v1 = vmul.f32 %v9238_v17, %v1324_v39  ;;  %6893 = vmatmul.mubr.f32.gmra.mrb[44].mxu1 %v1595_v37  ;;  %v1597_v30 = vmax.f32 %v1533_v40, 0.0 }
 0x28d   : > { %v1466_v45 = vmul.f32 %v9238_v17, %v1319_v43  ;;  %v6775_v14 = vpop.f32.mrb[50].mxu0  ;;  %v1596_v46 = vmax.f32 %v1532_v44, 0.0 }
 0x28e   : > { %v1334_v29 = vadd.f32 %v6775_v14, %v9234_v4  ;;  %v1328_v7 = vpop.f32.mrb[51].mxu0  ;;  %v1535_v31 = vadd.f32 %v9243_v63, %v1467_v1 }
 0x28f   : > { %v1329_v33 = vadd.f32 %v1328_v7, %v9234_v4  ;;  %6895 = vmatprep.mubr.f32.mxu1 %v1596_v46  ;;  %v1534_v36 = vadd.f32 %v9243_v63, %v1466_v45 }
 0x290   : > { %v1469_v41 = vmul.f32 %v9238_v17, %v1334_v29  ;;  %6896 = vmatmul.mubr.f32.gmra.mrb[46].mxu1 %v1597_v30  ;;  %v1599_v2 = vmax.f32 %v1535_v31, 0.0 }
 0x291   : > { %v1468_v42 = vmul.f32 %v9238_v17, %v1329_v33  ;;  %v6778_v26 = vpop.f32.mrb[52].mxu0  ;;  %v1598_v47 = vmax.f32 %v1534_v36, 0.0 }
 0x292   : > { %v1344_v28 = vadd.f32 %v6778_v26, %v9234_v4  ;;  %v1338_v34 = vpop.f32.mrb[53].mxu0  ;;  %v1537_v35 = vadd.f32 %v9243_v63, %v1469_v41 }
 0x293   : > { %v1339_v6 = vadd.f32 %v1338_v34, %v9234_v4  ;;  %6898 = vmatprep.mubr.f32.mxu1 %v1598_v47  ;;  %v1536_v48 = vadd.f32 %v9243_v63, %v1468_v42 }
 0x294   : > { %v1471_v8 = vmul.f32 %v9238_v17, %v1344_v28  ;;  %6899 = vmatmul.mubr.f32.gmra.mrb[48].mxu1 %v1599_v2  ;;  %v1601_v21 = vmax.f32 %v1537_v35, 0.0 }
 0x295   : > { %v1470_v0 = vmul.f32 %v9238_v17, %v1339_v6  ;;  %v6781_v9 = vpop.f32.mrb[54].mxu0  ;;  %v1600_v32 = vmax.f32 %v1536_v48, 0.0 }
 0x296   : > { %v1354_v51 = vadd.f32 %v6781_v9, %v9234_v4  ;;  %v1348_v20 = vpop.f32.mrb[55].mxu0  ;;  %v1539_v62 = vadd.f32 %v9243_v63, %v1471_v8 }
 0x297   : > { %v1349_v50 = vadd.f32 %v1348_v20, %v9234_v4  ;;  %6901 = vmatprep.mubr.f32.mxu1 %v1600_v32  ;;  %v1538_v27 = vadd.f32 %v9243_v63, %v1470_v0  ;;  %v2611_v0 = vld [vmem:[#allocation10 + $0x8] sm:$0xff]  ;;  %v2612_v32 = vld [vmem:[#allocation10 + $0x10] sm:$0xff] }
 0x298   : > { %v1473_v49 = vmul.f32 %v9238_v17, %v1354_v51  ;;  %6902 = vmatmul.mubr.f32.gmra.mrb[50].mxu1 %v1601_v21  ;;  %v1603_v22 = vmax.f32 %v1539_v62, 0.0  ;;  %v2613_v51 = vld [vmem:[#allocation10 + $0x18] sm:$0xff] }
 0x299   : > { %v1472_v13 = vmul.f32 %v9238_v17, %v1349_v50  ;;  %v6784_v5 = vpop.f32.mrb[56].mxu0  ;;  %v1602_v15 = vmax.f32 %v1538_v27, 0.0  ;;  %v7790_v20 = vpack.c.bf16 %v2613_v51, %v2612_v32 }
 0x29a   : > { %v1364_v16 = vadd.f32 %v6784_v5, %v9234_v4  ;;  %v1358_v19 = vpop.f32.mrb[57].mxu0  ;;  %v1541_v23 = vadd.f32 %v9243_v63, %v1473_v49 }
 0x29b   : > { %v1359_v24 = vadd.f32 %v1358_v19, %v9234_v4  ;;  %6904 = vmatprep.mubr.f32.mxu1 %v1602_v15  ;;  %v1540_v25 = vadd.f32 %v9243_v63, %v1472_v13 }
 0x29c   : > { %v1475_v52 = vmul.f32 %v9238_v17, %v1364_v16  ;;  %6905 = vmatmul.mubr.f32.gmra.mrb[52].mxu1 %v1603_v22  ;;  %v1605_v56 = vmax.f32 %v1541_v23, 0.0 }
 0x29d   : > { %v1474_v53 = vmul.f32 %v9238_v17, %v1359_v24  ;;  %v6787_v54 = vpop.f32.mrb[58].mxu0  ;;  %v1604_v55 = vmax.f32 %v1540_v25, 0.0 }
 0x29e   : > { %v1374_v58 = vadd.f32 %v6787_v54, %v9234_v4  ;;  %v1368_v59 = vpop.f32.mrb[59].mxu0  ;;  %v1543_v60 = vadd.f32 %v9243_v63, %v1475_v52  ;;  %v2614_v52 = vld [vmem:[#allocation10 + $0x20] sm:$0xff]  ;;  %v2616_v54 = vld [vmem:[#allocation10 + $0x30] sm:$0xff] }
 0x29f   : > { %v1369_v61 = vadd.f32 %v1368_v59, %v9234_v4  ;;  %6907 = vmatprep.mubr.f32.mxu1 %v1604_v55  ;;  %v1542_v10 = vadd.f32 %v9243_v63, %v1474_v53  ;;  %v2615_v53 = vld [vmem:[#allocation10 + $0x28] sm:$0xff] }
 0x2a0   : > { %v1477_v38 = vmul.f32 %v9238_v17, %v1374_v58  ;;  %6908 = vmatmul.mubr.f32.gmra.mrb[54].mxu1 %v1605_v56  ;;  %v1607_v44 = vmax.f32 %v1543_v60, 0.0  ;;  %v7794_v56 = vpack.c.bf16 %v2615_v53, %v2614_v52  ;;  %v2617_v60 = vld [vmem:[#allocation10 + $0x38] sm:$0xff] }
 0x2a1   : > { %v1476_v39 = vmul.f32 %v9238_v17, %v1369_v61  ;;  %v6790_v57 = vpop.f32.mrb[60].mxu0  ;;  %v1606_v37 = vmax.f32 %v1542_v10, 0.0 }
 0x2a2   : > { %v1384_v40 = vadd.f32 %v6790_v57, %v9234_v4  ;;  %v1378_v43 = vpop.f32.mrb[61].mxu0  ;;  %v1545_v1 = vadd.f32 %v9243_v63, %v1477_v38  ;;  %v7798_v57 = vpack.c.bf16 %v2617_v60, %v2616_v54 }
 0x2a3   : > { %v1379_v45 = vadd.f32 %v1378_v43, %v9234_v4  ;;  %6910 = vmatprep.mubr.f32.mxu1 %v1606_v37  ;;  %v1544_v14 = vadd.f32 %v9243_v63, %v1476_v39  ;;  %v2618_v37 = vld [vmem:[#allocation10 + $0x40] sm:$0xff] }
 0x2a4   : > { %v1479_v46 = vmul.f32 %v9238_v17, %v1384_v40  ;;  %6911 = vmatmul.mubr.f32.gmra.mrb[56].mxu1 %v1607_v44  ;;  %v1609_v36 = vmax.f32 %v1545_v1, 0.0  ;;  %v2619_v40 = vld [vmem:[#allocation10 + $0x48] sm:$0xff] }
 0x2a5   : > { %v1478_v29 = vmul.f32 %v9238_v17, %v1379_v45  ;;  %v6793_v7 = vpop.f32.mrb[62].mxu0  ;;  %v1608_v30 = vmax.f32 %v1544_v14, 0.0 }
 0x2a6   : > { %v1394_v31 = vadd.f32 %v6793_v7, %v9234_v4  ;;  %v1388_v33 = vpop.f32.mrb[63].mxu0  ;;  %v1547_v41 = vadd.f32 %v9243_v63, %v1479_v46 }
 0x2a7   : > { %v1389_v42 = vadd.f32 %v1388_v33, %v9234_v4  ;;  %6913 = vmatprep.mubr.f32.mxu1 %v1608_v30  ;;  %v1546_v26 = vadd.f32 %v9243_v63, %v1478_v29  ;;  %v2610_v4 = vld [vmem:[#allocation10] sm:$0xff]  ;;  %v7802_v29 = vpack.c.bf16 %v2619_v40, %v2618_v37 }
 0x2a8   : > { %v1481_v47 = vmul.f32 %v9238_v17, %v1394_v31  ;;  %6914 = vmatmul.mubr.f32.gmra.mrb[58].mxu1 %v1609_v36  ;;  %v1611_v2 = vmax.f32 %v1547_v41, 0.0  ;;  %v7786_v9 = vpack.c.bf16 %v2611_v0, %v2610_v4  ;;  %v2620_v36 = vld [vmem:[#allocation10 + $0x50] sm:$0xff]  ;;  %v2621_v41 = vld [vmem:[#allocation10 + $0x58] sm:$0xff]  ;;  %v2622_v0 = vld [vmem:[#allocation10 + $0x60] sm:$0xff] }
 0x2a9   : > { %v1480_v28 = vmul.f32 %v9238_v17, %v1389_v42  ;;  %v1610_v34 = vmax.f32 %v1546_v26, 0.0  ;;  %v9439_v17 = vld [vmem:[%s11048_s5] sm:$0xff] }
 0x2aa   : > { %v1549_v35 = vadd.f32 %v9243_v63, %v1481_v47  ;;  %7787 = vmatprep.subr.bf16.mxu1 %v7786_v9  ;;  %v9447_v21 = vrot.slane %v9439_v17, %v11114_v12  ;;  %v9452_v27 = vrot.slane %v9439_v17, %v11115_v18 }
 0x2ab   : > { %6916 = vmatprep.mubr.f32.mxu1 %v1610_v34  ;;  %v1548_v6 = vadd.f32 %v9243_v63, %v1480_v28  ;;  %7789 = vmatpush3.bf16.msra.mxu1 %v7786_v9  ;;  %v9443_v63 = vrot.slane %v9230_v3, %v9225_v11  ;;  %v2623_v9 = vld [vmem:[#allocation10 + $0x68] sm:$0xff] }
 0x2ac   : > { %6917 = vmatmul.mubr.f32.gmra.mrb[60].mxu1 %v1611_v2  ;;  %v1613_v8 = vmax.f32 %v1549_v35, 0.0  ;;  %7791 = vmatprep.subr.bf16.mxu1 %v7790_v20  ;;  %v7806_v35 = vpack.c.bf16 %v2621_v41, %v2620_v36 }
 0x2ad   : > { %v1612_v48 = vmax.f32 %v1548_v6, 0.0 }
 0x2af   : > { %6919 = vmatprep.mubr.f32.mxu1 %v1612_v48  ;;  %7793 = vmatpush3.bf16.msra.mxu1 %v7790_v20 }
 0x2b0   : > { %6920 = vmatmul.mubr.f32.gmra.mrb[62].mxu1 %v1613_v8  ;;  %7795 = vmatprep.subr.bf16.mxu1 %v7794_v56 }
 0x2b3   : > { %7797 = vmatpush3.bf16.msra.mxu1 %v7794_v56 }
 0x2b4   : > { %7799 = vmatprep.subr.bf16.mxu1 %v7798_v57 }
 0x2b7   : > { %7801 = vmatpush3.bf16.msra.mxu1 %v7798_v57 }
 0x2b8   : > { %7803 = vmatprep.subr.bf16.mxu1 %v7802_v29 }
 0x2bb   : > { %7805 = vmatpush3.bf16.msra.mxu1 %v7802_v29 }
 0x2bc   : > { %7807 = vmatprep.subr.bf16.mxu1 %v7806_v35 }
 0x2bf   : > { %7809 = vmatpush3.bf16.msra.mxu1 %v7806_v35 }
 0x307   : > { %v6828_v62 = vpop.f32.mrb[0].mxu1 }
 0x308   : > { %v1690_v50 = vadd.f32 %v6828_v62, %v9443_v63  ;;  %v1684_v49 = vpop.f32.mrb[1].mxu1 }
 0x309   : > { %v1685_v13 = vadd.f32 %v1684_v49, %v9443_v63 }
 0x30a   : > { %v2025_v5 = vmul.f32 %v9447_v21, %v1690_v50 }
 0x30b   : > { %v2024_v3 = vmul.f32 %v9447_v21, %v1685_v13  ;;  %v6831_v15 = vpop.f32.mrb[2].mxu1  ;;  %v7810_v13 = vpack.c.bf16 %v2623_v9, %v2622_v0 }
 0x30c   : > { %v2093_v16 = vadd.f32 %v9452_v27, %v2025_v5  ;;  %v1700_v19 = vadd.f32 %v6831_v15, %v9443_v63  ;;  %v1694_v22 = vpop.f32.mrb[3].mxu1 }
 0x30d   : > { %v1695_v23 = vadd.f32 %v1694_v22, %v9443_v63  ;;  %v2092_v24 = vadd.f32 %v9452_v27, %v2024_v3  ;;  %v2625_v22 = vld [vmem:[#allocation10 + $0x78] sm:$0xff]  ;;  %7811 = vmatprep.subr.bf16.mxu1 %v7810_v13 }
 0x30e   : > { %v2027_v25 = vmul.f32 %v9447_v21, %v1700_v19  ;;  %v2157_v61 = vmax.f32 %v2093_v16, 0.0  ;;  %v2624_v19 = vld [vmem:[#allocation10 + $0x70] sm:$0xff]  ;;  %7813 = vmatpush3.bf16.msra.mxu1 %v7810_v13 }
 0x30f   : > { %v2026_v55 = vmul.f32 %v9447_v21, %v1695_v23  ;;  %v6834_v58 = vpop.f32.mrb[4].mxu1  ;;  %v2156_v59 = vmax.f32 %v2092_v24, 0.0 }
 0x310   : > { %v1710_v10 = vadd.f32 %v6834_v58, %v9443_v63  ;;  %v1704_v38 = vpop.f32.mrb[5].mxu1  ;;  %v2095_v39 = vadd.f32 %v9452_v27, %v2027_v25 }
 0x311   : > { %v1705_v43 = vadd.f32 %v1704_v38, %v9443_v63  ;;  %6954 = vmatprep.mubr.f32.mxu0 %v2156_v59  ;;  %v2094_v44 = vadd.f32 %v9452_v27, %v2026_v55  ;;  %v7814_v55 = vpack.c.bf16 %v2625_v22, %v2624_v19 }
 0x312   : > { %v2029_v1 = vmul.f32 %v9447_v21, %v1710_v10  ;;  %6955 = vmatmul.mubr.f32.vlgmr.msra.gmra.mrb[64].mxu0 %v2157_v61  ;;  %v2159_v31 = vmax.f32 %v2095_v39, 0.0 }
 0x313   : > { %v2028_v45 = vmul.f32 %v9447_v21, %v1705_v43  ;;  %v6837_v14 = vpop.f32.mrb[6].mxu1  ;;  %v2158_v46 = vmax.f32 %v2094_v44, 0.0  ;;  %7815 = vmatprep.subr.bf16.mxu1 %v7814_v55 }
 0x314   : > { %v1720_v7 = vadd.f32 %v6837_v14, %v9443_v63  ;;  %v1714_v30 = vpop.f32.mrb[7].mxu1  ;;  %v2097_v33 = vadd.f32 %v9452_v27, %v2029_v1  ;;  %7817 = vmatpush3.bf16.msra.mxu1 %v7814_v55 }
 0x315   : > { %v1715_v42 = vadd.f32 %v1714_v30, %v9443_v63  ;;  %6957 = vmatprep.mubr.f32.mxu0 %v2158_v46  ;;  %v2096_v26 = vadd.f32 %v9452_v27, %v2028_v45 }
 0x316   : > { %v2031_v47 = vmul.f32 %v9447_v21, %v1720_v7  ;;  %6958 = vmatmul.mubr.f32.gmra.mrb[66].mxu0 %v2159_v31  ;;  %v2161_v8 = vmax.f32 %v2097_v33, 0.0 }
 0x317   : > { %v2030_v28 = vmul.f32 %v9447_v21, %v1715_v42  ;;  %v6840_v34 = vpop.f32.mrb[8].mxu1  ;;  %v2160_v2 = vmax.f32 %v2096_v26, 0.0 }
 0x318   : > { %v1730_v6 = vadd.f32 %v6840_v34, %v9443_v63  ;;  %v1724_v48 = vpop.f32.mrb[9].mxu1  ;;  %v2099_v4 = vadd.f32 %v9452_v27, %v2031_v47 }
 0x319   : > { %v1725_v32 = vadd.f32 %v1724_v48, %v9443_v63  ;;  %6960 = vmatprep.mubr.f32.mxu0 %v2160_v2  ;;  %v2098_v51 = vadd.f32 %v9452_v27, %v2030_v28 }
 0x31a   : > { %v2033_v20 = vmul.f32 %v9447_v21, %v1730_v6  ;;  %6961 = vmatmul.mubr.f32.gmra.mrb[68].mxu0 %v2161_v8  ;;  %v2163_v15 = vmax.f32 %v2099_v4, 0.0 }
 0x31b   : > { %v2032_v62 = vmul.f32 %v9447_v21, %v1725_v32  ;;  %v6843_v50 = vpop.f32.mrb[10].mxu1  ;;  %v2162_v49 = vmax.f32 %v2098_v51, 0.0 }
 0x31c   : > { %v1740_v5 = vadd.f32 %v6843_v50, %v9443_v63  ;;  %v1734_v3 = vpop.f32.mrb[11].mxu1  ;;  %v2101_v16 = vadd.f32 %v9452_v27, %v2033_v20 }
 0x31d   : > { %v1735_v23 = vadd.f32 %v1734_v3, %v9443_v63  ;;  %6963 = vmatprep.mubr.f32.mxu0 %v2162_v49  ;;  %v2100_v24 = vadd.f32 %v9452_v27, %v2032_v62 }
 0x31e   : > { %v2035_v25 = vmul.f32 %v9447_v21, %v1740_v5  ;;  %6964 = vmatmul.mubr.f32.gmra.mrb[70].mxu0 %v2163_v15  ;;  %v2165_v56 = vmax.f32 %v2101_v16, 0.0 }
 0x31f   : > { %v2034_v52 = vmul.f32 %v9447_v21, %v1735_v23  ;;  %v6846_v53 = vpop.f32.mrb[12].mxu1  ;;  %v2164_v54 = vmax.f32 %v2100_v24, 0.0 }
 0x320   : > { %v1750_v58 = vadd.f32 %v6846_v53, %v9443_v63  ;;  %v1744_v59 = vpop.f32.mrb[13].mxu1  ;;  %v2103_v60 = vadd.f32 %v9452_v27, %v2035_v25 }
 0x321   : > { %v1745_v61 = vadd.f32 %v1744_v59, %v9443_v63  ;;  %6966 = vmatprep.mubr.f32.mxu0 %v2164_v54  ;;  %v2102_v10 = vadd.f32 %v9452_v27, %v2034_v52 }
 0x322   : > { %v2037_v38 = vmul.f32 %v9447_v21, %v1750_v58  ;;  %6967 = vmatmul.mubr.f32.gmra.mrb[72].mxu0 %v2165_v56  ;;  %v2167_v44 = vmax.f32 %v2103_v60, 0.0 }
 0x323   : > { %v2036_v39 = vmul.f32 %v9447_v21, %v1745_v61  ;;  %v6849_v57 = vpop.f32.mrb[14].mxu1  ;;  %v2166_v37 = vmax.f32 %v2102_v10, 0.0 }
 0x324   : > { %v1760_v40 = vadd.f32 %v6849_v57, %v9443_v63  ;;  %v1754_v43 = vpop.f32.mrb[15].mxu1  ;;  %v2105_v1 = vadd.f32 %v9452_v27, %v2037_v38 }
 0x325   : > { %v1755_v45 = vadd.f32 %v1754_v43, %v9443_v63  ;;  %6969 = vmatprep.mubr.f32.mxu0 %v2166_v37  ;;  %v2104_v14 = vadd.f32 %v9452_v27, %v2036_v39 }
 0x326   : > { %v2039_v46 = vmul.f32 %v9447_v21, %v1760_v40  ;;  %6970 = vmatmul.mubr.f32.gmra.mrb[74].mxu0 %v2167_v44  ;;  %v2169_v36 = vmax.f32 %v2105_v1, 0.0 }
 0x327   : > { %v2038_v29 = vmul.f32 %v9447_v21, %v1755_v45  ;;  %v6852_v7 = vpop.f32.mrb[16].mxu1  ;;  %v2168_v30 = vmax.f32 %v2104_v14, 0.0 }
 0x328   : > { %v1770_v31 = vadd.f32 %v6852_v7, %v9443_v63  ;;  %v1764_v33 = vpop.f32.mrb[17].mxu1  ;;  %v2107_v41 = vadd.f32 %v9452_v27, %v2039_v46 }
 0x329   : > { %v1765_v42 = vadd.f32 %v1764_v33, %v9443_v63  ;;  %6972 = vmatprep.mubr.f32.mxu0 %v2168_v30  ;;  %v2106_v26 = vadd.f32 %v9452_v27, %v2038_v29 }
 0x32a   : > { %v2041_v47 = vmul.f32 %v9447_v21, %v1770_v31  ;;  %6973 = vmatmul.mubr.f32.gmra.mrb[76].mxu0 %v2169_v36  ;;  %v2171_v48 = vmax.f32 %v2107_v41, 0.0 }
 0x32b   : > { %v2040_v28 = vmul.f32 %v9447_v21, %v1765_v42  ;;  %v6855_v34 = vpop.f32.mrb[18].mxu1  ;;  %v2170_v2 = vmax.f32 %v2106_v26, 0.0 }
 0x32c   : > { %v1780_v35 = vadd.f32 %v6855_v34, %v9443_v63  ;;  %v1774_v6 = vpop.f32.mrb[19].mxu1  ;;  %v2109_v8 = vadd.f32 %v9452_v27, %v2041_v47 }
 0x32d   : > { %v1775_v4 = vadd.f32 %v1774_v6, %v9443_v63  ;;  %6975 = vmatprep.mubr.f32.mxu0 %v2170_v2  ;;  %v2108_v0 = vadd.f32 %v9452_v27, %v2040_v28 }
 0x32e   : > { %v2043_v9 = vmul.f32 %v9447_v21, %v1780_v35  ;;  %6976 = vmatmul.mubr.f32.gmra.mrb[78].mxu0 %v2171_v48  ;;  %v2173_v49 = vmax.f32 %v2109_v8, 0.0 }
 0x32f   : > { %v2042_v32 = vmul.f32 %v9447_v21, %v1775_v4  ;;  %v6858_v51 = vpop.f32.mrb[20].mxu1  ;;  %v2172_v20 = vmax.f32 %v2108_v0, 0.0 }
 0x330   : > { %v1790_v62 = vadd.f32 %v6858_v51, %v9443_v63  ;;  %v1784_v50 = vpop.f32.mrb[21].mxu1  ;;  %v2111_v13 = vadd.f32 %v9452_v27, %v2043_v9 }
 0x331   : > { %v1785_v5 = vadd.f32 %v1784_v50, %v9443_v63  ;;  %6978 = vmatprep.mubr.f32.mxu0 %v2172_v20  ;;  %v2110_v3 = vadd.f32 %v9452_v27, %v2042_v32 }
 0x332   : > { %v2045_v15 = vmul.f32 %v9447_v21, %v1790_v62  ;;  %6979 = vmatmul.mubr.f32.gmra.mrb[80].mxu0 %v2173_v49  ;;  %v2175_v25 = vmax.f32 %v2111_v13, 0.0 }
 0x333   : > { %v2044_v16 = vmul.f32 %v9447_v21, %v1785_v5  ;;  %v6861_v19 = vpop.f32.mrb[22].mxu1  ;;  %v2174_v22 = vmax.f32 %v2110_v3, 0.0 }
 0x334   : > { %v1800_v23 = vadd.f32 %v6861_v19, %v9443_v63  ;;  %v1794_v24 = vpop.f32.mrb[23].mxu1  ;;  %v2113_v52 = vadd.f32 %v9452_v27, %v2045_v15 }
 0x335   : > { %v1795_v53 = vadd.f32 %v1794_v24, %v9443_v63  ;;  %6981 = vmatprep.mubr.f32.mxu0 %v2174_v22  ;;  %v2112_v54 = vadd.f32 %v9452_v27, %v2044_v16 }
 0x336   : > { %v2047_v55 = vmul.f32 %v9447_v21, %v1800_v23  ;;  %6982 = vmatmul.mubr.f32.gmra.mrb[82].mxu0 %v2175_v25  ;;  %v2177_v10 = vmax.f32 %v2113_v52, 0.0 }
 0x337   : > { %v2046_v58 = vmul.f32 %v9447_v21, %v1795_v53  ;;  %v6864_v59 = vpop.f32.mrb[24].mxu1  ;;  %v2176_v56 = vmax.f32 %v2112_v54, 0.0 }
 0x338   : > { %v1810_v60 = vadd.f32 %v6864_v59, %v9443_v63  ;;  %v1804_v61 = vpop.f32.mrb[25].mxu1  ;;  %v2115_v38 = vadd.f32 %v9452_v27, %v2047_v55 }
 0x339   : > { %v1805_v39 = vadd.f32 %v1804_v61, %v9443_v63  ;;  %6984 = vmatprep.mubr.f32.mxu0 %v2176_v56  ;;  %v2114_v57 = vadd.f32 %v9452_v27, %v2046_v58 }
 0x33a   : > { %v2049_v37 = vmul.f32 %v9447_v21, %v1810_v60  ;;  %6985 = vmatmul.mubr.f32.gmra.mrb[84].mxu0 %v2177_v10  ;;  %v2179_v14 = vmax.f32 %v2115_v38, 0.0 }
 0x33b   : > { %v2048_v40 = vmul.f32 %v9447_v21, %v1805_v39  ;;  %v6867_v43 = vpop.f32.mrb[26].mxu1  ;;  %v2178_v44 = vmax.f32 %v2114_v57, 0.0 }
 0x33c   : > { %v1820_v1 = vadd.f32 %v6867_v43, %v9443_v63  ;;  %v1814_v45 = vpop.f32.mrb[27].mxu1  ;;  %v2117_v46 = vadd.f32 %v9452_v27, %v2049_v37 }
 0x33d   : > { %v1815_v29 = vadd.f32 %v1814_v45, %v9443_v63  ;;  %6987 = vmatprep.mubr.f32.mxu0 %v2178_v44  ;;  %v2116_v7 = vadd.f32 %v9452_v27, %v2048_v40 }
 0x33e   : > { %v2051_v30 = vmul.f32 %v9447_v21, %v1820_v1  ;;  %6988 = vmatmul.mubr.f32.gmra.mrb[86].mxu0 %v2179_v14  ;;  %v2181_v26 = vmax.f32 %v2117_v46, 0.0 }
 0x33f   : > { %v2050_v31 = vmul.f32 %v9447_v21, %v1815_v29  ;;  %v6870_v33 = vpop.f32.mrb[28].mxu1  ;;  %v2180_v36 = vmax.f32 %v2116_v7, 0.0 }
 0x340   : > { %v1830_v41 = vadd.f32 %v6870_v33, %v9443_v63  ;;  %v1824_v42 = vpop.f32.mrb[29].mxu1  ;;  %v2119_v47 = vadd.f32 %v9452_v27, %v2051_v30 }
 0x341   : > { %v1825_v28 = vadd.f32 %v1824_v42, %v9443_v63  ;;  %6990 = vmatprep.mubr.f32.mxu0 %v2180_v36  ;;  %v2118_v34 = vadd.f32 %v9452_v27, %v2050_v31 }
 0x342   : > { %v2053_v2 = vmul.f32 %v9447_v21, %v1830_v41  ;;  %6991 = vmatmul.mubr.f32.gmra.mrb[88].mxu0 %v2181_v26  ;;  %v2183_v0 = vmax.f32 %v2119_v47, 0.0 }
 0x343   : > { %v2052_v35 = vmul.f32 %v9447_v21, %v1825_v28  ;;  %v6873_v6 = vpop.f32.mrb[30].mxu1  ;;  %v2182_v48 = vmax.f32 %v2118_v34, 0.0 }
 0x344   : > { %v1840_v8 = vadd.f32 %v6873_v6, %v9443_v63  ;;  %v1834_v4 = vpop.f32.mrb[31].mxu1  ;;  %v2121_v9 = vadd.f32 %v9452_v27, %v2053_v2 }
 0x345   : > { %v1835_v32 = vadd.f32 %v1834_v4, %v9443_v63  ;;  %6993 = vmatprep.mubr.f32.mxu0 %v2182_v48  ;;  %v2120_v51 = vadd.f32 %v9452_v27, %v2052_v35 }
 0x346   : > { %v2055_v20 = vmul.f32 %v9447_v21, %v1840_v8  ;;  %6994 = vmatmul.mubr.f32.gmra.mrb[90].mxu0 %v2183_v0  ;;  %v2185_v3 = vmax.f32 %v2121_v9, 0.0 }
 0x347   : > { %v2054_v62 = vmul.f32 %v9447_v21, %v1835_v32  ;;  %v6876_v50 = vpop.f32.mrb[32].mxu1  ;;  %v2184_v49 = vmax.f32 %v2120_v51, 0.0 }
 0x348   : > { %v1850_v13 = vadd.f32 %v6876_v50, %v9443_v63  ;;  %v1844_v5 = vpop.f32.mrb[33].mxu1  ;;  %v2123_v15 = vadd.f32 %v9452_v27, %v2055_v20 }
 0x349   : > { %v1845_v16 = vadd.f32 %v1844_v5, %v9443_v63  ;;  %6996 = vmatprep.mubr.f32.mxu0 %v2184_v49  ;;  %v2122_v19 = vadd.f32 %v9452_v27, %v2054_v62 }
 0x34a   : > { %v2057_v22 = vmul.f32 %v9447_v21, %v1850_v13  ;;  %6997 = vmatmul.mubr.f32.gmra.mrb[92].mxu0 %v2185_v3  ;;  %v2187_v54 = vmax.f32 %v2123_v15, 0.0 }
 0x34b   : > { %v2056_v23 = vmul.f32 %v9447_v21, %v1845_v16  ;;  %v6879_v24 = vpop.f32.mrb[34].mxu1  ;;  %v2186_v25 = vmax.f32 %v2122_v19, 0.0 }
 0x34c   : > { %v1860_v52 = vadd.f32 %v6879_v24, %v9443_v63  ;;  %v1854_v53 = vpop.f32.mrb[35].mxu1  ;;  %v2125_v55 = vadd.f32 %v9452_v27, %v2057_v22 }
 0x34d   : > { %v1855_v58 = vadd.f32 %v1854_v53, %v9443_v63  ;;  %6999 = vmatprep.mubr.f32.mxu0 %v2186_v25  ;;  %v2124_v59 = vadd.f32 %v9452_v27, %v2056_v23 }
 0x34e   : > { %v2059_v56 = vmul.f32 %v9447_v21, %v1860_v52  ;;  %7000 = vmatmul.mubr.f32.gmra.mrb[94].mxu0 %v2187_v54  ;;  %v2189_v57 = vmax.f32 %v2125_v55, 0.0 }
 0x34f   : > { %v2058_v60 = vmul.f32 %v9447_v21, %v1855_v58  ;;  %v6882_v61 = vpop.f32.mrb[36].mxu1  ;;  %v2188_v10 = vmax.f32 %v2124_v59, 0.0 }
 0x350   : > { %v1870_v38 = vadd.f32 %v6882_v61, %v9443_v63  ;;  %v1864_v39 = vpop.f32.mrb[37].mxu1  ;;  %v2127_v37 = vadd.f32 %v9452_v27, %v2059_v56 }
 0x351   : > { %v1865_v40 = vadd.f32 %v1864_v39, %v9443_v63  ;;  %7002 = vmatprep.mubr.f32.mxu0 %v2188_v10  ;;  %v2126_v43 = vadd.f32 %v9452_v27, %v2058_v60 }
 0x352   : > { %v2061_v44 = vmul.f32 %v9447_v21, %v1870_v38  ;;  %7003 = vmatmul.mubr.f32.gmra.mrb[96].mxu0 %v2189_v57  ;;  %v2191_v7 = vmax.f32 %v2127_v37, 0.0 }
 0x353   : > { %v2060_v1 = vmul.f32 %v9447_v21, %v1865_v40  ;;  %v6885_v45 = vpop.f32.mrb[38].mxu1  ;;  %v2190_v14 = vmax.f32 %v2126_v43, 0.0 }
 0x354   : > { %v1880_v46 = vadd.f32 %v6885_v45, %v9443_v63  ;;  %v1874_v29 = vpop.f32.mrb[39].mxu1  ;;  %v2129_v30 = vadd.f32 %v9452_v27, %v2061_v44 }
 0x355   : > { %v1875_v31 = vadd.f32 %v1874_v29, %v9443_v63  ;;  %7005 = vmatprep.mubr.f32.mxu0 %v2190_v14  ;;  %v2128_v33 = vadd.f32 %v9452_v27, %v2060_v1 }
 0x356   : > { %v2063_v36 = vmul.f32 %v9447_v21, %v1880_v46  ;;  %7006 = vmatmul.mubr.f32.gmra.mrb[98].mxu0 %v2191_v7  ;;  %v2193_v34 = vmax.f32 %v2129_v30, 0.0 }
 0x357   : > { %v2062_v41 = vmul.f32 %v9447_v21, %v1875_v31  ;;  %v6888_v42 = vpop.f32.mrb[40].mxu1  ;;  %v2192_v26 = vmax.f32 %v2128_v33, 0.0 }
 0x358   : > { %v1890_v47 = vadd.f32 %v6888_v42, %v9443_v63  ;;  %v1884_v28 = vpop.f32.mrb[41].mxu1  ;;  %v2131_v2 = vadd.f32 %v9452_v27, %v2063_v36 }
 0x359   : > { %v1885_v35 = vadd.f32 %v1884_v28, %v9443_v63  ;;  %7008 = vmatprep.mubr.f32.mxu0 %v2192_v26  ;;  %v2130_v6 = vadd.f32 %v9452_v27, %v2062_v41 }
 0x35a   : > { %v2065_v48 = vmul.f32 %v9447_v21, %v1890_v47  ;;  %7009 = vmatmul.mubr.f32.gmra.mrb[100].mxu0 %v2193_v34  ;;  %v2195_v51 = vmax.f32 %v2131_v2, 0.0 }
 0x35b   : > { %v2064_v8 = vmul.f32 %v9447_v21, %v1885_v35  ;;  %v6891_v4 = vpop.f32.mrb[42].mxu1  ;;  %v2194_v0 = vmax.f32 %v2130_v6, 0.0 }
 0x35c   : > { %v1900_v9 = vadd.f32 %v6891_v4, %v9443_v63  ;;  %v1894_v32 = vpop.f32.mrb[43].mxu1  ;;  %v2133_v20 = vadd.f32 %v9452_v27, %v2065_v48 }
 0x35d   : > { %v1895_v62 = vadd.f32 %v1894_v32, %v9443_v63  ;;  %7011 = vmatprep.mubr.f32.mxu0 %v2194_v0  ;;  %v2132_v50 = vadd.f32 %v9452_v27, %v2064_v8 }
 0x35e   : > { %v2067_v49 = vmul.f32 %v9447_v21, %v1900_v9  ;;  %7012 = vmatmul.mubr.f32.gmra.mrb[102].mxu0 %v2195_v51  ;;  %v2197_v19 = vmax.f32 %v2133_v20, 0.0 }
 0x35f   : > { %v2066_v13 = vmul.f32 %v9447_v21, %v1895_v62  ;;  %v6894_v5 = vpop.f32.mrb[44].mxu1  ;;  %v2196_v3 = vmax.f32 %v2132_v50, 0.0 }
 0x360   : > { %v1910_v15 = vadd.f32 %v6894_v5, %v9443_v63  ;;  %v1904_v16 = vpop.f32.mrb[45].mxu1  ;;  %v2135_v22 = vadd.f32 %v9452_v27, %v2067_v49 }
 0x361   : > { %v1905_v23 = vadd.f32 %v1904_v16, %v9443_v63  ;;  %7014 = vmatprep.mubr.f32.mxu0 %v2196_v3  ;;  %v2134_v24 = vadd.f32 %v9452_v27, %v2066_v13 }
 0x362   : > { %v2069_v25 = vmul.f32 %v9447_v21, %v1910_v15  ;;  %7015 = vmatmul.mubr.f32.gmra.mrb[104].mxu0 %v2197_v19  ;;  %v2199_v59 = vmax.f32 %v2135_v22, 0.0 }
 0x363   : > { %v2068_v52 = vmul.f32 %v9447_v21, %v1905_v23  ;;  %v6897_v53 = vpop.f32.mrb[46].mxu1  ;;  %v2198_v54 = vmax.f32 %v2134_v24, 0.0 }
 0x364   : > { %v1920_v55 = vadd.f32 %v6897_v53, %v9443_v63  ;;  %v1914_v58 = vpop.f32.mrb[47].mxu1  ;;  %v2137_v56 = vadd.f32 %v9452_v27, %v2069_v25 }
 0x365   : > { %v1915_v60 = vadd.f32 %v1914_v58, %v9443_v63  ;;  %7017 = vmatprep.mubr.f32.mxu0 %v2198_v54  ;;  %v2136_v61 = vadd.f32 %v9452_v27, %v2068_v52 }
 0x366   : > { %v2071_v10 = vmul.f32 %v9447_v21, %v1920_v55  ;;  %7018 = vmatmul.mubr.f32.gmra.mrb[106].mxu0 %v2199_v59  ;;  %v2201_v43 = vmax.f32 %v2137_v56, 0.0 }
 0x367   : > { %v2070_v38 = vmul.f32 %v9447_v21, %v1915_v60  ;;  %v6900_v39 = vpop.f32.mrb[48].mxu1  ;;  %v2200_v57 = vmax.f32 %v2136_v61, 0.0 }
 0x368   : > { %v1930_v37 = vadd.f32 %v6900_v39, %v9443_v63  ;;  %v1924_v40 = vpop.f32.mrb[49].mxu1  ;;  %v2139_v44 = vadd.f32 %v9452_v27, %v2071_v10 }
 0x369   : > { %v1925_v1 = vadd.f32 %v1924_v40, %v9443_v63  ;;  %7020 = vmatprep.mubr.f32.mxu0 %v2200_v57  ;;  %v2138_v45 = vadd.f32 %v9452_v27, %v2070_v38 }
 0x36a   : > { %v2073_v14 = vmul.f32 %v9447_v21, %v1930_v37  ;;  %7021 = vmatmul.mubr.f32.gmra.mrb[108].mxu0 %v2201_v43  ;;  %v2203_v33 = vmax.f32 %v2139_v44, 0.0 }
 0x36b   : > { %v2072_v46 = vmul.f32 %v9447_v21, %v1925_v1  ;;  %v6903_v29 = vpop.f32.mrb[50].mxu1  ;;  %v2202_v7 = vmax.f32 %v2138_v45, 0.0 }
 0x36c   : > { %v1940_v30 = vadd.f32 %v6903_v29, %v9443_v63  ;;  %v1934_v31 = vpop.f32.mrb[51].mxu1  ;;  %v2141_v36 = vadd.f32 %v9452_v27, %v2073_v14 }
 0x36d   : > { %v1935_v41 = vadd.f32 %v1934_v31, %v9443_v63  ;;  %7023 = vmatprep.mubr.f32.mxu0 %v2202_v7  ;;  %v2140_v42 = vadd.f32 %v9452_v27, %v2072_v46 }
 0x36e   : > { %v2075_v26 = vmul.f32 %v9447_v21, %v1940_v30  ;;  %7024 = vmatmul.mubr.f32.gmra.mrb[110].mxu0 %v2203_v33  ;;  %v2205_v6 = vmax.f32 %v2141_v36, 0.0 }
 0x36f   : > { %v2074_v47 = vmul.f32 %v9447_v21, %v1935_v41  ;;  %v6906_v28 = vpop.f32.mrb[52].mxu1  ;;  %v2204_v34 = vmax.f32 %v2140_v42, 0.0 }
 0x370   : > { %v1950_v2 = vadd.f32 %v6906_v28, %v9443_v63  ;;  %v1944_v35 = vpop.f32.mrb[53].mxu1  ;;  %v2143_v48 = vadd.f32 %v9452_v27, %v2075_v26 }
 0x371   : > { %v1945_v8 = vadd.f32 %v1944_v35, %v9443_v63  ;;  %7026 = vmatprep.mubr.f32.mxu0 %v2204_v34  ;;  %v2142_v4 = vadd.f32 %v9452_v27, %v2074_v47 }
 0x372   : > { %v2077_v0 = vmul.f32 %v9447_v21, %v1950_v2  ;;  %7027 = vmatmul.mubr.f32.gmra.mrb[112].mxu0 %v2205_v6  ;;  %v2207_v50 = vmax.f32 %v2143_v48, 0.0 }
 0x373   : > { %v2076_v9 = vmul.f32 %v9447_v21, %v1945_v8  ;;  %v6909_v32 = vpop.f32.mrb[54].mxu1  ;;  %v2206_v51 = vmax.f32 %v2142_v4, 0.0 }
 0x374   : > { %v1960_v20 = vadd.f32 %v6909_v32, %v9443_v63  ;;  %v1954_v62 = vpop.f32.mrb[55].mxu1  ;;  %v2145_v49 = vadd.f32 %v9452_v27, %v2077_v0 }
 0x375   : > { %v1955_v13 = vadd.f32 %v1954_v62, %v9443_v63  ;;  %7029 = vmatprep.mubr.f32.mxu0 %v2206_v51  ;;  %v2144_v5 = vadd.f32 %v9452_v27, %v2076_v9  ;;  %v3217_v9 = vld [vmem:[#allocation12 + $0x8] sm:$0xff]  ;;  %v3218_v51 = vld [vmem:[#allocation12 + $0x10] sm:$0xff] }
 0x376   : > { %v2079_v3 = vmul.f32 %v9447_v21, %v1960_v20  ;;  %7030 = vmatmul.mubr.f32.gmra.mrb[114].mxu0 %v2207_v50  ;;  %v2209_v24 = vmax.f32 %v2145_v49, 0.0  ;;  %v3219_v20 = vld [vmem:[#allocation12 + $0x18] sm:$0xff] }
 0x377   : > { %v2078_v15 = vmul.f32 %v9447_v21, %v1955_v13  ;;  %v6912_v16 = vpop.f32.mrb[56].mxu1  ;;  %v2208_v19 = vmax.f32 %v2144_v5, 0.0  ;;  %v7822_v62 = vpack.c.bf16 %v3219_v20, %v3218_v51 }
 0x378   : > { %v1970_v22 = vadd.f32 %v6912_v16, %v9443_v63  ;;  %v1964_v23 = vpop.f32.mrb[57].mxu1  ;;  %v2147_v25 = vadd.f32 %v9452_v27, %v2079_v3 }
 0x379   : > { %v1965_v52 = vadd.f32 %v1964_v23, %v9443_v63  ;;  %7032 = vmatprep.mubr.f32.mxu0 %v2208_v19  ;;  %v2146_v53 = vadd.f32 %v9452_v27, %v2078_v15 }
 0x37a   : > { %v2081_v54 = vmul.f32 %v9447_v21, %v1970_v22  ;;  %7033 = vmatmul.mubr.f32.gmra.mrb[116].mxu0 %v2209_v24  ;;  %v2211_v61 = vmax.f32 %v2147_v25, 0.0 }
 0x37b   : > { %v2080_v55 = vmul.f32 %v9447_v21, %v1965_v52  ;;  %v6915_v58 = vpop.f32.mrb[58].mxu1  ;;  %v2210_v59 = vmax.f32 %v2146_v53, 0.0 }
 0x37c   : > { %v1980_v56 = vadd.f32 %v6915_v58, %v9443_v63  ;;  %v1974_v60 = vpop.f32.mrb[59].mxu1  ;;  %v2149_v10 = vadd.f32 %v9452_v27, %v2081_v54  ;;  %v3220_v54 = vld [vmem:[#allocation12 + $0x20] sm:$0xff]  ;;  %v3222_v58 = vld [vmem:[#allocation12 + $0x30] sm:$0xff] }
 0x37d   : > { %v1975_v38 = vadd.f32 %v1974_v60, %v9443_v63  ;;  %7035 = vmatprep.mubr.f32.mxu0 %v2210_v59  ;;  %v2148_v39 = vadd.f32 %v9452_v27, %v2080_v55  ;;  %v3221_v55 = vld [vmem:[#allocation12 + $0x28] sm:$0xff] }
 0x37e   : > { %v2083_v57 = vmul.f32 %v9447_v21, %v1980_v56  ;;  %7036 = vmatmul.mubr.f32.gmra.mrb[118].mxu0 %v2211_v61  ;;  %v2213_v45 = vmax.f32 %v2149_v10, 0.0  ;;  %v7826_v61 = vpack.c.bf16 %v3221_v55, %v3220_v54  ;;  %v3223_v10 = vld [vmem:[#allocation12 + $0x38] sm:$0xff] }
 0x37f   : > { %v2082_v37 = vmul.f32 %v9447_v21, %v1975_v38  ;;  %v6918_v40 = vpop.f32.mrb[60].mxu1  ;;  %v2212_v43 = vmax.f32 %v2148_v39, 0.0 }
 0x380   : > { %v1990_v44 = vadd.f32 %v6918_v40, %v9443_v63  ;;  %v1984_v1 = vpop.f32.mrb[61].mxu1  ;;  %v2151_v14 = vadd.f32 %v9452_v27, %v2083_v57  ;;  %v7830_v40 = vpack.c.bf16 %v3223_v10, %v3222_v58 }
 0x381   : > { %v1985_v46 = vadd.f32 %v1984_v1, %v9443_v63  ;;  %7038 = vmatprep.mubr.f32.mxu0 %v2212_v43  ;;  %v2150_v29 = vadd.f32 %v9452_v27, %v2082_v37  ;;  %v3224_v43 = vld [vmem:[#allocation12 + $0x40] sm:$0xff] }
 0x382   : > { %v2085_v7 = vmul.f32 %v9447_v21, %v1990_v44  ;;  %7039 = vmatmul.mubr.f32.gmra.mrb[120].mxu0 %v2213_v45  ;;  %v2215_v42 = vmax.f32 %v2151_v14, 0.0  ;;  %v3225_v44 = vld [vmem:[#allocation12 + $0x48] sm:$0xff] }
 0x383   : > { %v2084_v30 = vmul.f32 %v9447_v21, %v1985_v46  ;;  %v6921_v31 = vpop.f32.mrb[62].mxu1  ;;  %v2214_v33 = vmax.f32 %v2150_v29, 0.0 }
 0x384   : > { %v2000_v36 = vadd.f32 %v6921_v31, %v9443_v63  ;;  %v1994_v41 = vpop.f32.mrb[63].mxu1  ;;  %v2153_v26 = vadd.f32 %v9452_v27, %v2085_v7 }
 0x385   : > { %v1995_v47 = vadd.f32 %v1994_v41, %v9443_v63  ;;  %7041 = vmatprep.mubr.f32.mxu0 %v2214_v33  ;;  %v2152_v28 = vadd.f32 %v9452_v27, %v2084_v30  ;;  %v3216_v63 = vld [vmem:[#allocation12] sm:$0xff]  ;;  %v7834_v30 = vpack.c.bf16 %v3225_v44, %v3224_v43 }
 0x386   : > { %v2087_v34 = vmul.f32 %v9447_v21, %v2000_v36  ;;  %7042 = vmatmul.mubr.f32.gmra.mrb[122].mxu0 %v2215_v42  ;;  %v2217_v6 = vmax.f32 %v2153_v26, 0.0  ;;  %v7818_v32 = vpack.c.bf16 %v3217_v9, %v3216_v63  ;;  %v3226_v42 = vld [vmem:[#allocation12 + $0x50] sm:$0xff]  ;;  %v3227_v26 = vld [vmem:[#allocation12 + $0x58] sm:$0xff]  ;;  %v3228_v9 = vld [vmem:[#allocation12 + $0x60] sm:$0xff] }
 0x387   : > { %v2086_v2 = vmul.f32 %v9447_v21, %v1995_v47  ;;  %v2216_v35 = vmax.f32 %v2152_v28, 0.0  ;;  %v9648_v21 = vld [vmem:[%s11116_s15] sm:$0xff]  ;;  %s11122_s15 = sld [smem:[#allocation41_spill]] }
 0x388   : > { %v2155_v48 = vadd.f32 %v9452_v27, %v2087_v34  ;;  %7819 = vmatprep.subr.bf16.mxu0 %v7818_v32  ;;  %v9656_v50 = vrot.slane %v9648_v21, %v11114_v12  ;;  %v9661_v5 = vrot.slane %v9648_v21, %v11115_v18 }
 0x389   : > { %7044 = vmatprep.mubr.f32.mxu0 %v2216_v35  ;;  %v2154_v8 = vadd.f32 %v9452_v27, %v2086_v2  ;;  %7821 = vmatpush3.bf16.msra.mxu0 %v7818_v32  ;;  %v9652_v27 = vrot.slane %v9439_v17, %v9225_v11  ;;  %v3229_v32 = vld [vmem:[#allocation12 + $0x68] sm:$0xff] }
 0x38a   : > { %7045 = vmatmul.mubr.f32.gmra.mrb[124].mxu0 %v2217_v6  ;;  %v2219_v0 = vmax.f32 %v2155_v48, 0.0  ;;  %7823 = vmatprep.subr.bf16.mxu0 %v7822_v62  ;;  %v7838_v48 = vpack.c.bf16 %v3227_v26, %v3226_v42 }
 0x38b   : > { %v2218_v4 = vmax.f32 %v2154_v8, 0.0 }
 0x38d   : > { %7047 = vmatprep.mubr.f32.mxu0 %v2218_v4  ;;  %7825 = vmatpush3.bf16.msra.mxu0 %v7822_v62 }
 0x38e   : > { %7048 = vmatmul.mubr.f32.gmra.mrb[126].mxu0 %v2219_v0  ;;  %7827 = vmatprep.subr.bf16.mxu0 %v7826_v61 }
 0x391   : > { %7829 = vmatpush3.bf16.msra.mxu0 %v7826_v61 }
 0x392   : > { %7831 = vmatprep.subr.bf16.mxu0 %v7830_v40 }
 0x395   : > { %7833 = vmatpush3.bf16.msra.mxu0 %v7830_v40 }
 0x396   : > { %7835 = vmatprep.subr.bf16.mxu0 %v7834_v30 }
 0x399   : > { %7837 = vmatpush3.bf16.msra.mxu0 %v7834_v30 }
 0x39a   : > { %7839 = vmatprep.subr.bf16.mxu0 %v7838_v48 }
 0x39d   : > { %7841 = vmatpush3.bf16.msra.mxu0 %v7838_v48 }
 0x3e5   : > { %v6956_v49 = vpop.f32.mrb[64].mxu0 }
 0x3e6   : > { %v2296_v13 = vadd.f32 %v6956_v49, %v9652_v27  ;;  %v2290_v3 = vpop.f32.mrb[65].mxu0 }
 0x3e7   : > { %v2291_v15 = vadd.f32 %v2290_v3, %v9652_v27 }
 0x3e8   : > { %v2631_v16 = vmul.f32 %v9656_v50, %v2296_v13 }
 0x3e9   : > { %v2630_v17 = vmul.f32 %v9656_v50, %v2291_v15  ;;  %v6959_v19 = vpop.f32.mrb[66].mxu0  ;;  %v7842_v15 = vpack.c.bf16 %v3229_v32, %v3228_v9 }
 0x3ea   : > { %v2699_v22 = vadd.f32 %v9661_v5, %v2631_v16  ;;  %v2306_v23 = vadd.f32 %v6959_v19, %v9652_v27  ;;  %v2300_v24 = vpop.f32.mrb[67].mxu0 }
 0x3eb   : > { %v2301_v25 = vadd.f32 %v2300_v24, %v9652_v27  ;;  %v2698_v52 = vadd.f32 %v9661_v5, %v2630_v17  ;;  %v3231_v24 = vld [vmem:[#allocation12 + $0x78] sm:$0xff]  ;;  %7843 = vmatprep.subr.bf16.mxu0 %v7842_v15 }
 0x3ec   : > { %v2633_v53 = vmul.f32 %v9656_v50, %v2306_v23  ;;  %v2763_v38 = vmax.f32 %v2699_v22, 0.0  ;;  %v3230_v23 = vld [vmem:[#allocation12 + $0x70] sm:$0xff]  ;;  %7845 = vmatpush3.bf16.msra.mxu0 %v7842_v15 }
 0x3ed   : > { %v2632_v59 = vmul.f32 %v9656_v50, %v2301_v25  ;;  %v6962_v56 = vpop.f32.mrb[68].mxu0  ;;  %v2762_v60 = vmax.f32 %v2698_v52, 0.0 }
 0x3ee   : > { %v2316_v39 = vadd.f32 %v6962_v56, %v9652_v27  ;;  %v2310_v57 = vpop.f32.mrb[69].mxu0  ;;  %v2701_v37 = vadd.f32 %v9661_v5, %v2633_v53 }
 0x3ef   : > { %v2311_v1 = vadd.f32 %v2310_v57, %v9652_v27  ;;  %7082 = vmatprep.mubr.f32.mxu1 %v2762_v60  ;;  %v2700_v45 = vadd.f32 %v9661_v5, %v2632_v59  ;;  %v7846_v59 = vpack.c.bf16 %v3231_v24, %v3230_v23 }
 0x3f0   : > { %v2635_v14 = vmul.f32 %v9656_v50, %v2316_v39  ;;  %7083 = vmatmul.mubr.f32.vlgmr.msra.gmra.mrb[64].mxu1 %v2763_v38  ;;  %v2765_v36 = vmax.f32 %v2701_v37, 0.0 }
 0x3f1   : > { %v2634_v46 = vmul.f32 %v9656_v50, %v2311_v1  ;;  %v6965_v29 = vpop.f32.mrb[70].mxu0  ;;  %v2764_v7 = vmax.f32 %v2700_v45, 0.0  ;;  %7847 = vmatprep.subr.bf16.mxu0 %v7846_v59 }
 0x3f2   : > { %v2326_v31 = vadd.f32 %v6965_v29, %v9652_v27  ;;  %v2320_v33 = vpop.f32.mrb[71].mxu0  ;;  %v2703_v41 = vadd.f32 %v9661_v5, %v2635_v14  ;;  %7849 = vmatpush3.bf16.msra.mxu0 %v7846_v59 }
 0x3f3   : > { %v2321_v47 = vadd.f32 %v2320_v33, %v9652_v27  ;;  %7085 = vmatprep.mubr.f32.mxu1 %v2764_v7  ;;  %v2702_v28 = vadd.f32 %v9661_v5, %v2634_v46 }
 0x3f4   : > { %v2637_v34 = vmul.f32 %v9656_v50, %v2326_v31  ;;  %7086 = vmatmul.mubr.f32.gmra.mrb[66].mxu1 %v2765_v36  ;;  %v2767_v0 = vmax.f32 %v2703_v41, 0.0 }
 0x3f5   : > { %v2636_v2 = vmul.f32 %v9656_v50, %v2321_v47  ;;  %v6968_v35 = vpop.f32.mrb[72].mxu0  ;;  %v2766_v6 = vmax.f32 %v2702_v28, 0.0 }
 0x3f6   : > { %v2336_v8 = vadd.f32 %v6968_v35, %v9652_v27  ;;  %v2330_v4 = vpop.f32.mrb[73].mxu0  ;;  %v2705_v63 = vadd.f32 %v9661_v5, %v2637_v34 }
 0x3f7   : > { %v2331_v51 = vadd.f32 %v2330_v4, %v9652_v27  ;;  %7088 = vmatprep.mubr.f32.mxu1 %v2766_v6  ;;  %v2704_v20 = vadd.f32 %v9661_v5, %v2636_v2 }
 0x3f8   : > { %v2639_v62 = vmul.f32 %v9656_v50, %v2336_v8  ;;  %7089 = vmatmul.mubr.f32.gmra.mrb[68].mxu1 %v2767_v0  ;;  %v2769_v19 = vmax.f32 %v2705_v63, 0.0 }
 0x3f9   : > { %v2638_v49 = vmul.f32 %v9656_v50, %v2331_v51  ;;  %v6971_v13 = vpop.f32.mrb[74].mxu0  ;;  %v2768_v3 = vmax.f32 %v2704_v20, 0.0 }
 0x3fa   : > { %v2346_v16 = vadd.f32 %v6971_v13, %v9652_v27  ;;  %v2340_v17 = vpop.f32.mrb[75].mxu0  ;;  %v2707_v22 = vadd.f32 %v9661_v5, %v2639_v62 }
 0x3fb   : > { %v2341_v25 = vadd.f32 %v2340_v17, %v9652_v27  ;;  %7091 = vmatprep.mubr.f32.mxu1 %v2768_v3  ;;  %v2706_v52 = vadd.f32 %v9661_v5, %v2638_v49 }
 0x3fc   : > { %v2641_v53 = vmul.f32 %v9656_v50, %v2346_v16  ;;  %7092 = vmatmul.mubr.f32.gmra.mrb[70].mxu1 %v2769_v19  ;;  %v2771_v61 = vmax.f32 %v2707_v22, 0.0 }
 0x3fd   : > { %v2640_v54 = vmul.f32 %v9656_v50, %v2341_v25  ;;  %v6974_v55 = vpop.f32.mrb[76].mxu0  ;;  %v2770_v58 = vmax.f32 %v2706_v52, 0.0 }
 0x3fe   : > { %v2356_v56 = vadd.f32 %v6974_v55, %v9652_v27  ;;  %v2350_v60 = vpop.f32.mrb[77].mxu0  ;;  %v2709_v10 = vadd.f32 %v9661_v5, %v2641_v53 }
 0x3ff   : > { %v2351_v38 = vadd.f32 %v2350_v60, %v9652_v27  ;;  %7094 = vmatprep.mubr.f32.mxu1 %v2770_v58  ;;  %v2708_v39 = vadd.f32 %v9661_v5, %v2640_v54 }
 0x400   : > { %v2643_v57 = vmul.f32 %v9656_v50, %v2356_v56  ;;  %7095 = vmatmul.mubr.f32.gmra.mrb[72].mxu1 %v2771_v61  ;;  %v2773_v45 = vmax.f32 %v2709_v10, 0.0 }
 0x401   : > { %v2642_v37 = vmul.f32 %v9656_v50, %v2351_v38  ;;  %v6977_v40 = vpop.f32.mrb[78].mxu0  ;;  %v2772_v43 = vmax.f32 %v2708_v39, 0.0 }
 0x402   : > { %v2366_v44 = vadd.f32 %v6977_v40, %v9652_v27  ;;  %v2360_v1 = vpop.f32.mrb[79].mxu0  ;;  %v2711_v14 = vadd.f32 %v9661_v5, %v2643_v57 }
 0x403   : > { %v2361_v46 = vadd.f32 %v2360_v1, %v9652_v27  ;;  %7097 = vmatprep.mubr.f32.mxu1 %v2772_v43  ;;  %v2710_v29 = vadd.f32 %v9661_v5, %v2642_v37 }
 0x404   : > { %v2645_v7 = vmul.f32 %v9656_v50, %v2366_v44  ;;  %7098 = vmatmul.mubr.f32.gmra.mrb[74].mxu1 %v2773_v45  ;;  %v2775_v42 = vmax.f32 %v2711_v14, 0.0 }
 0x405   : > { %v2644_v30 = vmul.f32 %v9656_v50, %v2361_v46  ;;  %v6980_v31 = vpop.f32.mrb[80].mxu0  ;;  %v2774_v33 = vmax.f32 %v2710_v29, 0.0 }
 0x406   : > { %v2376_v36 = vadd.f32 %v6980_v31, %v9652_v27  ;;  %v2370_v41 = vpop.f32.mrb[81].mxu0  ;;  %v2713_v26 = vadd.f32 %v9661_v5, %v2645_v7 }
 0x407   : > { %v2371_v47 = vadd.f32 %v2370_v41, %v9652_v27  ;;  %7100 = vmatprep.mubr.f32.mxu1 %v2774_v33  ;;  %v2712_v28 = vadd.f32 %v9661_v5, %v2644_v30 }
 0x408   : > { %v2647_v34 = vmul.f32 %v9656_v50, %v2376_v36  ;;  %7101 = vmatmul.mubr.f32.gmra.mrb[76].mxu1 %v2775_v42  ;;  %v2777_v4 = vmax.f32 %v2713_v26, 0.0 }
 0x409   : > { %v2646_v2 = vmul.f32 %v9656_v50, %v2371_v47  ;;  %v6983_v35 = vpop.f32.mrb[82].mxu0  ;;  %v2776_v6 = vmax.f32 %v2712_v28, 0.0 }
 0x40a   : > { %v2386_v48 = vadd.f32 %v6983_v35, %v9652_v27  ;;  %v2380_v8 = vpop.f32.mrb[83].mxu0  ;;  %v2715_v0 = vadd.f32 %v9661_v5, %v2647_v34 }
 0x40b   : > { %v2381_v63 = vadd.f32 %v2380_v8, %v9652_v27  ;;  %7103 = vmatprep.mubr.f32.mxu1 %v2776_v6  ;;  %v2714_v9 = vadd.f32 %v9661_v5, %v2646_v2 }
 0x40c   : > { %v2649_v32 = vmul.f32 %v9656_v50, %v2386_v48  ;;  %7104 = vmatmul.mubr.f32.gmra.mrb[78].mxu1 %v2777_v4  ;;  %v2779_v3 = vmax.f32 %v2715_v0, 0.0 }
 0x40d   : > { %v2648_v51 = vmul.f32 %v9656_v50, %v2381_v63  ;;  %v6986_v20 = vpop.f32.mrb[84].mxu0  ;;  %v2778_v62 = vmax.f32 %v2714_v9, 0.0 }
 0x40e   : > { %v2396_v49 = vadd.f32 %v6986_v20, %v9652_v27  ;;  %v2390_v13 = vpop.f32.mrb[85].mxu0  ;;  %v2717_v15 = vadd.f32 %v9661_v5, %v2649_v32 }
 0x40f   : > { %v2391_v16 = vadd.f32 %v2390_v13, %v9652_v27  ;;  %7106 = vmatprep.mubr.f32.mxu1 %v2778_v62  ;;  %v2716_v17 = vadd.f32 %v9661_v5, %v2648_v51 }
 0x410   : > { %v2651_v19 = vmul.f32 %v9656_v50, %v2396_v49  ;;  %7107 = vmatmul.mubr.f32.gmra.mrb[80].mxu1 %v2779_v3  ;;  %v2781_v53 = vmax.f32 %v2717_v15, 0.0 }
 0x411   : > { %v2650_v22 = vmul.f32 %v9656_v50, %v2391_v16  ;;  %v6989_v23 = vpop.f32.mrb[86].mxu0  ;;  %v2780_v24 = vmax.f32 %v2716_v17, 0.0 }
 0x412   : > { %v2406_v25 = vadd.f32 %v6989_v23, %v9652_v27  ;;  %v2400_v52 = vpop.f32.mrb[87].mxu0  ;;  %v2719_v54 = vadd.f32 %v9661_v5, %v2651_v19 }
 0x413   : > { %v2401_v55 = vadd.f32 %v2400_v52, %v9652_v27  ;;  %7109 = vmatprep.mubr.f32.mxu1 %v2780_v24  ;;  %v2718_v58 = vadd.f32 %v9661_v5, %v2650_v22 }
 0x414   : > { %v2653_v59 = vmul.f32 %v9656_v50, %v2406_v25  ;;  %7110 = vmatmul.mubr.f32.gmra.mrb[82].mxu1 %v2781_v53  ;;  %v2783_v39 = vmax.f32 %v2719_v54, 0.0 }
 0x415   : > { %v2652_v56 = vmul.f32 %v9656_v50, %v2401_v55  ;;  %v6992_v60 = vpop.f32.mrb[88].mxu0  ;;  %v2782_v61 = vmax.f32 %v2718_v58, 0.0 }
 0x416   : > { %v2416_v10 = vadd.f32 %v6992_v60, %v9652_v27  ;;  %v2410_v38 = vpop.f32.mrb[89].mxu0  ;;  %v2721_v57 = vadd.f32 %v9661_v5, %v2653_v59 }
 0x417   : > { %v2411_v37 = vadd.f32 %v2410_v38, %v9652_v27  ;;  %7112 = vmatprep.mubr.f32.mxu1 %v2782_v61  ;;  %v2720_v40 = vadd.f32 %v9661_v5, %v2652_v56 }
 0x418   : > { %v2655_v43 = vmul.f32 %v9656_v50, %v2416_v10  ;;  %7113 = vmatmul.mubr.f32.gmra.mrb[84].mxu1 %v2783_v39  ;;  %v2785_v29 = vmax.f32 %v2721_v57, 0.0 }
 0x419   : > { %v2654_v44 = vmul.f32 %v9656_v50, %v2411_v37  ;;  %v6995_v1 = vpop.f32.mrb[90].mxu0  ;;  %v2784_v45 = vmax.f32 %v2720_v40, 0.0 }
 0x41a   : > { %v2426_v14 = vadd.f32 %v6995_v1, %v9652_v27  ;;  %v2420_v46 = vpop.f32.mrb[91].mxu0  ;;  %v2723_v7 = vadd.f32 %v9661_v5, %v2655_v43 }
 0x41b   : > { %v2421_v30 = vadd.f32 %v2420_v46, %v9652_v27  ;;  %7115 = vmatprep.mubr.f32.mxu1 %v2784_v45  ;;  %v2722_v31 = vadd.f32 %v9661_v5, %v2654_v44 }
 0x41c   : > { %v2657_v33 = vmul.f32 %v9656_v50, %v2426_v14  ;;  %7116 = vmatmul.mubr.f32.gmra.mrb[86].mxu1 %v2785_v29  ;;  %v2787_v28 = vmax.f32 %v2723_v7, 0.0 }
 0x41d   : > { %v2656_v36 = vmul.f32 %v9656_v50, %v2421_v30  ;;  %v6998_v41 = vpop.f32.mrb[92].mxu0  ;;  %v2786_v42 = vmax.f32 %v2722_v31, 0.0 }
 0x41e   : > { %v2436_v26 = vadd.f32 %v6998_v41, %v9652_v27  ;;  %v2430_v47 = vpop.f32.mrb[93].mxu0  ;;  %v2725_v34 = vadd.f32 %v9661_v5, %v2657_v33 }
 0x41f   : > { %v2431_v2 = vadd.f32 %v2430_v47, %v9652_v27  ;;  %7118 = vmatprep.mubr.f32.mxu1 %v2786_v42  ;;  %v2724_v35 = vadd.f32 %v9661_v5, %v2656_v36 }
 0x420   : > { %v2659_v6 = vmul.f32 %v9656_v50, %v2436_v26  ;;  %7119 = vmatmul.mubr.f32.gmra.mrb[88].mxu1 %v2787_v28  ;;  %v2789_v9 = vmax.f32 %v2725_v34, 0.0 }
 0x421   : > { %v2658_v48 = vmul.f32 %v9656_v50, %v2431_v2  ;;  %v7001_v8 = vpop.f32.mrb[94].mxu0  ;;  %v2788_v4 = vmax.f32 %v2724_v35, 0.0 }
 0x422   : > { %v2446_v0 = vadd.f32 %v7001_v8, %v9652_v27  ;;  %v2440_v63 = vpop.f32.mrb[95].mxu0  ;;  %v2727_v32 = vadd.f32 %v9661_v5, %v2659_v6 }
 0x423   : > { %v2441_v51 = vadd.f32 %v2440_v63, %v9652_v27  ;;  %7121 = vmatprep.mubr.f32.mxu1 %v2788_v4  ;;  %v2726_v20 = vadd.f32 %v9661_v5, %v2658_v48 }
 0x424   : > { %v2661_v62 = vmul.f32 %v9656_v50, %v2446_v0  ;;  %7122 = vmatmul.mubr.f32.gmra.mrb[90].mxu1 %v2789_v9  ;;  %v2791_v17 = vmax.f32 %v2727_v32, 0.0 }
 0x425   : > { %v2660_v49 = vmul.f32 %v9656_v50, %v2441_v51  ;;  %v7004_v13 = vpop.f32.mrb[96].mxu0  ;;  %v2790_v3 = vmax.f32 %v2726_v20, 0.0 }
 0x426   : > { %v2456_v15 = vadd.f32 %v7004_v13, %v9652_v27  ;;  %v2450_v16 = vpop.f32.mrb[97].mxu0  ;;  %v2729_v19 = vadd.f32 %v9661_v5, %v2661_v62 }
 0x427   : > { %v2451_v22 = vadd.f32 %v2450_v16, %v9652_v27  ;;  %7124 = vmatprep.mubr.f32.mxu1 %v2790_v3  ;;  %v2728_v23 = vadd.f32 %v9661_v5, %v2660_v49 }
 0x428   : > { %v2663_v24 = vmul.f32 %v9656_v50, %v2456_v15  ;;  %7125 = vmatmul.mubr.f32.gmra.mrb[92].mxu1 %v2791_v17  ;;  %v2793_v58 = vmax.f32 %v2729_v19, 0.0 }
 0x429   : > { %v2662_v25 = vmul.f32 %v9656_v50, %v2451_v22  ;;  %v7007_v52 = vpop.f32.mrb[98].mxu0  ;;  %v2792_v53 = vmax.f32 %v2728_v23, 0.0 }
 0x42a   : > { %v2466_v54 = vadd.f32 %v7007_v52, %v9652_v27  ;;  %v2460_v55 = vpop.f32.mrb[99].mxu0  ;;  %v2731_v59 = vadd.f32 %v9661_v5, %v2663_v24 }
 0x42b   : > { %v2461_v56 = vadd.f32 %v2460_v55, %v9652_v27  ;;  %7127 = vmatprep.mubr.f32.mxu1 %v2792_v53  ;;  %v2730_v60 = vadd.f32 %v9661_v5, %v2662_v25 }
 0x42c   : > { %v2665_v61 = vmul.f32 %v9656_v50, %v2466_v54  ;;  %7128 = vmatmul.mubr.f32.gmra.mrb[94].mxu1 %v2793_v58  ;;  %v2795_v40 = vmax.f32 %v2731_v59, 0.0 }
 0x42d   : > { %v2664_v10 = vmul.f32 %v9656_v50, %v2461_v56  ;;  %v7010_v38 = vpop.f32.mrb[100].mxu0  ;;  %v2794_v39 = vmax.f32 %v2730_v60, 0.0 }
 0x42e   : > { %v2476_v57 = vadd.f32 %v7010_v38, %v9652_v27  ;;  %v2470_v37 = vpop.f32.mrb[101].mxu0  ;;  %v2733_v43 = vadd.f32 %v9661_v5, %v2665_v61 }
 0x42f   : > { %v2471_v44 = vadd.f32 %v2470_v37, %v9652_v27  ;;  %7130 = vmatprep.mubr.f32.mxu1 %v2794_v39  ;;  %v2732_v1 = vadd.f32 %v9661_v5, %v2664_v10 }
 0x430   : > { %v2667_v45 = vmul.f32 %v9656_v50, %v2476_v57  ;;  %7131 = vmatmul.mubr.f32.gmra.mrb[96].mxu1 %v2795_v40  ;;  %v2797_v31 = vmax.f32 %v2733_v43, 0.0 }
 0x431   : > { %v2666_v14 = vmul.f32 %v9656_v50, %v2471_v44  ;;  %v7013_v46 = vpop.f32.mrb[102].mxu0  ;;  %v2796_v29 = vmax.f32 %v2732_v1, 0.0 }
 0x432   : > { %v2486_v7 = vadd.f32 %v7013_v46, %v9652_v27  ;;  %v2480_v30 = vpop.f32.mrb[103].mxu0  ;;  %v2735_v33 = vadd.f32 %v9661_v5, %v2667_v45 }
 0x433   : > { %v2481_v36 = vadd.f32 %v2480_v30, %v9652_v27  ;;  %7133 = vmatprep.mubr.f32.mxu1 %v2796_v29  ;;  %v2734_v41 = vadd.f32 %v9661_v5, %v2666_v14 }
 0x434   : > { %v2669_v42 = vmul.f32 %v9656_v50, %v2486_v7  ;;  %7134 = vmatmul.mubr.f32.gmra.mrb[98].mxu1 %v2797_v31  ;;  %v2799_v35 = vmax.f32 %v2735_v33, 0.0 }
 0x435   : > { %v2668_v26 = vmul.f32 %v9656_v50, %v2481_v36  ;;  %v7016_v47 = vpop.f32.mrb[104].mxu0  ;;  %v2798_v28 = vmax.f32 %v2734_v41, 0.0 }
 0x436   : > { %v2496_v34 = vadd.f32 %v7016_v47, %v9652_v27  ;;  %v2490_v2 = vpop.f32.mrb[105].mxu0  ;;  %v2737_v6 = vadd.f32 %v9661_v5, %v2669_v42 }
 0x437   : > { %v2491_v48 = vadd.f32 %v2490_v2, %v9652_v27  ;;  %7136 = vmatprep.mubr.f32.mxu1 %v2798_v28  ;;  %v2736_v8 = vadd.f32 %v9661_v5, %v2668_v26 }
 0x438   : > { %v2671_v4 = vmul.f32 %v9656_v50, %v2496_v34  ;;  %7137 = vmatmul.mubr.f32.gmra.mrb[100].mxu1 %v2799_v35  ;;  %v2801_v20 = vmax.f32 %v2737_v6, 0.0 }
 0x439   : > { %v2670_v0 = vmul.f32 %v9656_v50, %v2491_v48  ;;  %v7019_v63 = vpop.f32.mrb[106].mxu0  ;;  %v2800_v9 = vmax.f32 %v2736_v8, 0.0 }
 0x43a   : > { %v2506_v32 = vadd.f32 %v7019_v63, %v9652_v27  ;;  %v2500_v51 = vpop.f32.mrb[107].mxu0  ;;  %v2739_v62 = vadd.f32 %v9661_v5, %v2671_v4 }
 0x43b   : > { %v2501_v49 = vadd.f32 %v2500_v51, %v9652_v27  ;;  %7139 = vmatprep.mubr.f32.mxu1 %v2800_v9  ;;  %v2738_v13 = vadd.f32 %v9661_v5, %v2670_v0 }
 0x43c   : > { %v2673_v3 = vmul.f32 %v9656_v50, %v2506_v32  ;;  %7140 = vmatmul.mubr.f32.gmra.mrb[102].mxu1 %v2801_v20  ;;  %v2803_v23 = vmax.f32 %v2739_v62, 0.0 }
 0x43d   : > { %v2672_v15 = vmul.f32 %v9656_v50, %v2501_v49  ;;  %v7022_v16 = vpop.f32.mrb[108].mxu0  ;;  %v2802_v17 = vmax.f32 %v2738_v13, 0.0 }
 0x43e   : > { %v2516_v19 = vadd.f32 %v7022_v16, %v9652_v27  ;;  %v2510_v22 = vpop.f32.mrb[109].mxu0  ;;  %v2741_v24 = vadd.f32 %v9661_v5, %v2673_v3 }
 0x43f   : > { %v2511_v25 = vadd.f32 %v2510_v22, %v9652_v27  ;;  %7142 = vmatprep.mubr.f32.mxu1 %v2802_v17  ;;  %v2740_v52 = vadd.f32 %v9661_v5, %v2672_v15 }
 0x440   : > { %v2675_v53 = vmul.f32 %v9656_v50, %v2516_v19  ;;  %7143 = vmatmul.mubr.f32.gmra.mrb[104].mxu1 %v2803_v23  ;;  %v2805_v60 = vmax.f32 %v2741_v24, 0.0 }
 0x441   : > { %v2674_v54 = vmul.f32 %v9656_v50, %v2511_v25  ;;  %v7025_v55 = vpop.f32.mrb[110].mxu0  ;;  %v2804_v58 = vmax.f32 %v2740_v52, 0.0 }
 0x442   : > { %v2526_v59 = vadd.f32 %v7025_v55, %v9652_v27  ;;  %v2520_v56 = vpop.f32.mrb[111].mxu0  ;;  %v2743_v61 = vadd.f32 %v9661_v5, %v2675_v53 }
 0x443   : > { %v2521_v10 = vadd.f32 %v2520_v56, %v9652_v27  ;;  %7145 = vmatprep.mubr.f32.mxu1 %v2804_v58  ;;  %v2742_v38 = vadd.f32 %v9661_v5, %v2674_v54 }
 0x444   : > { %v2677_v39 = vmul.f32 %v9656_v50, %v2526_v59  ;;  %7146 = vmatmul.mubr.f32.gmra.mrb[106].mxu1 %v2805_v60  ;;  %v2807_v1 = vmax.f32 %v2743_v61, 0.0 }
 0x445   : > { %v2676_v57 = vmul.f32 %v9656_v50, %v2521_v10  ;;  %v7028_v37 = vpop.f32.mrb[112].mxu0  ;;  %v2806_v40 = vmax.f32 %v2742_v38, 0.0 }
 0x446   : > { %v2536_v43 = vadd.f32 %v7028_v37, %v9652_v27  ;;  %v2530_v44 = vpop.f32.mrb[113].mxu0  ;;  %v2745_v45 = vadd.f32 %v9661_v5, %v2677_v39 }
 0x447   : > { %v2531_v14 = vadd.f32 %v2530_v44, %v9652_v27  ;;  %7148 = vmatprep.mubr.f32.mxu1 %v2806_v40  ;;  %v2744_v46 = vadd.f32 %v9661_v5, %v2676_v57 }
 0x448   : > { %v2679_v29 = vmul.f32 %v9656_v50, %v2536_v43  ;;  %7149 = vmatmul.mubr.f32.gmra.mrb[108].mxu1 %v2807_v1  ;;  %v2809_v41 = vmax.f32 %v2745_v45, 0.0 }
 0x449   : > { %v2678_v7 = vmul.f32 %v9656_v50, %v2531_v14  ;;  %v7031_v30 = vpop.f32.mrb[114].mxu0  ;;  %v2808_v31 = vmax.f32 %v2744_v46, 0.0 }
 0x44a   : > { %v2546_v33 = vadd.f32 %v7031_v30, %v9652_v27  ;;  %v2540_v36 = vpop.f32.mrb[115].mxu0  ;;  %v2747_v42 = vadd.f32 %v9661_v5, %v2679_v29 }
 0x44b   : > { %v2541_v26 = vadd.f32 %v2540_v36, %v9652_v27  ;;  %7151 = vmatprep.mubr.f32.mxu1 %v2808_v31  ;;  %v2746_v47 = vadd.f32 %v9661_v5, %v2678_v7 }
 0x44c   : > { %v2681_v28 = vmul.f32 %v9656_v50, %v2546_v33  ;;  %7152 = vmatmul.mubr.f32.gmra.mrb[110].mxu1 %v2809_v41  ;;  %v2811_v8 = vmax.f32 %v2747_v42, 0.0 }
 0x44d   : > { %v2680_v34 = vmul.f32 %v9656_v50, %v2541_v26  ;;  %v7034_v2 = vpop.f32.mrb[116].mxu0  ;;  %v2810_v35 = vmax.f32 %v2746_v47, 0.0 }
 0x44e   : > { %v2556_v6 = vadd.f32 %v7034_v2, %v9652_v27  ;;  %v2550_v48 = vpop.f32.mrb[117].mxu0  ;;  %v2749_v4 = vadd.f32 %v9661_v5, %v2681_v28 }
 0x44f   : > { %v2551_v0 = vadd.f32 %v2550_v48, %v9652_v27  ;;  %7154 = vmatprep.mubr.f32.mxu1 %v2810_v35  ;;  %v2748_v63 = vadd.f32 %v9661_v5, %v2680_v34 }
 0x450   : > { %v2683_v9 = vmul.f32 %v9656_v50, %v2556_v6  ;;  %7155 = vmatmul.mubr.f32.gmra.mrb[112].mxu1 %v2811_v8  ;;  %v2813_v13 = vmax.f32 %v2749_v4, 0.0 }
 0x451   : > { %v2682_v32 = vmul.f32 %v9656_v50, %v2551_v0  ;;  %v7037_v51 = vpop.f32.mrb[118].mxu0  ;;  %v2812_v20 = vmax.f32 %v2748_v63, 0.0 }
 0x452   : > { %v2566_v62 = vadd.f32 %v7037_v51, %v9652_v27  ;;  %v2560_v49 = vpop.f32.mrb[119].mxu0  ;;  %v2751_v3 = vadd.f32 %v9661_v5, %v2683_v9 }
 0x453   : > { %v2561_v15 = vadd.f32 %v2560_v49, %v9652_v27  ;;  %7157 = vmatprep.mubr.f32.mxu1 %v2812_v20  ;;  %v2750_v16 = vadd.f32 %v9661_v5, %v2682_v32  ;;  %v3823_v32 = vld [vmem:[#allocation13 + $0x8] sm:$0xff]  ;;  %v3824_v20 = vld [vmem:[#allocation13 + $0x10] sm:$0xff] }
 0x454   : > { %v2685_v17 = vmul.f32 %v9656_v50, %v2566_v62  ;;  %7158 = vmatmul.mubr.f32.gmra.mrb[114].mxu1 %v2813_v13  ;;  %v2815_v52 = vmax.f32 %v2751_v3, 0.0  ;;  %v3825_v62 = vld [vmem:[#allocation13 + $0x18] sm:$0xff] }
 0x455   : > { %v2684_v19 = vmul.f32 %v9656_v50, %v2561_v15  ;;  %v7040_v22 = vpop.f32.mrb[120].mxu0  ;;  %v2814_v23 = vmax.f32 %v2750_v16, 0.0  ;;  %v7854_v49 = vpack.c.bf16 %v3825_v62, %v3824_v20 }
 0x456   : > { %v2576_v24 = vadd.f32 %v7040_v22, %v9652_v27  ;;  %v2570_v25 = vpop.f32.mrb[121].mxu0  ;;  %v2753_v53 = vadd.f32 %v9661_v5, %v2685_v17 }
 0x457   : > { %v2571_v54 = vadd.f32 %v2570_v25, %v9652_v27  ;;  %7160 = vmatprep.mubr.f32.mxu1 %v2814_v23  ;;  %v2752_v55 = vadd.f32 %v9661_v5, %v2684_v19 }
 0x458   : > { %v2687_v58 = vmul.f32 %v9656_v50, %v2576_v24  ;;  %7161 = vmatmul.mubr.f32.gmra.mrb[116].mxu1 %v2815_v52  ;;  %v2817_v38 = vmax.f32 %v2753_v53, 0.0 }
 0x459   : > { %v2686_v59 = vmul.f32 %v9656_v50, %v2571_v54  ;;  %v7043_v56 = vpop.f32.mrb[122].mxu0  ;;  %v2816_v60 = vmax.f32 %v2752_v55, 0.0 }
 0x45a   : > { %v2586_v61 = vadd.f32 %v7043_v56, %v9652_v27  ;;  %v2580_v10 = vpop.f32.mrb[123].mxu0  ;;  %v2755_v39 = vadd.f32 %v9661_v5, %v2687_v58  ;;  %v3826_v58 = vld [vmem:[#allocation13 + $0x20] sm:$0xff]  ;;  %v3828_v56 = vld [vmem:[#allocation13 + $0x30] sm:$0xff] }
 0x45b   : > { %v2581_v57 = vadd.f32 %v2580_v10, %v9652_v27  ;;  %7163 = vmatprep.mubr.f32.mxu1 %v2816_v60  ;;  %v2754_v37 = vadd.f32 %v9661_v5, %v2686_v59  ;;  %v3827_v59 = vld [vmem:[#allocation13 + $0x28] sm:$0xff] }
 0x45c   : > { %v2689_v40 = vmul.f32 %v9656_v50, %v2586_v61  ;;  %7164 = vmatmul.mubr.f32.gmra.mrb[118].mxu1 %v2817_v38  ;;  %v2819_v46 = vmax.f32 %v2755_v39, 0.0  ;;  %v7858_v38 = vpack.c.bf16 %v3827_v59, %v3826_v58  ;;  %v3829_v39 = vld [vmem:[#allocation13 + $0x38] sm:$0xff] }
 0x45d   : > { %v2688_v43 = vmul.f32 %v9656_v50, %v2581_v57  ;;  %v7046_v44 = vpop.f32.mrb[124].mxu0  ;;  %v2818_v1 = vmax.f32 %v2754_v37, 0.0 }
 0x45e   : > { %v2596_v45 = vadd.f32 %v7046_v44, %v9652_v27  ;;  %v2590_v14 = vpop.f32.mrb[125].mxu0  ;;  %v2757_v29 = vadd.f32 %v9661_v5, %v2689_v40  ;;  %v7862_v44 = vpack.c.bf16 %v3829_v39, %v3828_v56 }
 0x45f   : > { %v2591_v7 = vadd.f32 %v2590_v14, %v9652_v27  ;;  %7166 = vmatprep.mubr.f32.mxu1 %v2818_v1  ;;  %v2756_v30 = vadd.f32 %v9661_v5, %v2688_v43  ;;  %v3830_v1 = vld [vmem:[#allocation13 + $0x40] sm:$0xff] }
 0x460   : > { %v2691_v31 = vmul.f32 %v9656_v50, %v2596_v45  ;;  %7167 = vmatmul.mubr.f32.gmra.mrb[120].mxu1 %v2819_v46  ;;  %v2821_v47 = vmax.f32 %v2757_v29, 0.0  ;;  %v3831_v45 = vld [vmem:[#allocation13 + $0x48] sm:$0xff] }
 0x461   : > { %v2690_v33 = vmul.f32 %v9656_v50, %v2591_v7  ;;  %v7049_v36 = vpop.f32.mrb[126].mxu0  ;;  %v2820_v41 = vmax.f32 %v2756_v30, 0.0 }
 0x462   : > { %v2606_v42 = vadd.f32 %v7049_v36, %v9652_v27  ;;  %v2600_v26 = vpop.f32.mrb[127].mxu0  ;;  %v2759_v28 = vadd.f32 %v9661_v5, %v2691_v31 }
 0x463   : > { %v2601_v34 = vadd.f32 %v2600_v26, %v9652_v27  ;;  %7169 = vmatprep.mubr.f32.mxu1 %v2820_v41  ;;  %v2758_v2 = vadd.f32 %v9661_v5, %v2690_v33  ;;  %v3822_v27 = vld [vmem:[#allocation13] sm:$0xff]  ;;  %v7866_v33 = vpack.c.bf16 %v3831_v45, %v3830_v1 }
 0x464   : > { %v2693_v35 = vmul.f32 %v9656_v50, %v2606_v42  ;;  %7170 = vmatmul.mubr.f32.gmra.mrb[122].mxu1 %v2821_v47  ;;  %v2823_v8 = vmax.f32 %v2759_v28, 0.0  ;;  %v7850_v51 = vpack.c.bf16 %v3823_v32, %v3822_v27  ;;  %v3832_v47 = vld [vmem:[#allocation13 + $0x50] sm:$0xff]  ;;  %v3833_v28 = vld [vmem:[#allocation13 + $0x58] sm:$0xff]  ;;  %v3834_v32 = vld [vmem:[#allocation13 + $0x60] sm:$0xff] }
 0x465   : > { %v2692_v6 = vmul.f32 %v9656_v50, %v2601_v34  ;;  %v2822_v48 = vmax.f32 %v2758_v2, 0.0  ;;  %v9857_v50 = vld [vmem:[%s11117_s26] sm:$0xff]  ;;  %s11123_s26 = sld [smem:[#allocation42_spill]] }
 0x466   : > { %v2761_v4 = vadd.f32 %v9661_v5, %v2693_v35  ;;  %7851 = vmatprep.subr.bf16.mxu1 %v7850_v51  ;;  %v9865_v13 = vrot.slane %v9857_v50, %v11114_v12  ;;  %v9870_v16 = vrot.slane %v9857_v50, %v11115_v18 }
 0x467   : > { %7172 = vmatprep.mubr.f32.mxu1 %v2822_v48  ;;  %v2760_v0 = vadd.f32 %v9661_v5, %v2692_v6  ;;  %7853 = vmatpush3.bf16.msra.mxu1 %v7850_v51  ;;  %v9861_v5 = vrot.slane %v9648_v21, %v9225_v11  ;;  %v3835_v51 = vld [vmem:[#allocation13 + $0x68] sm:$0xff] }
 0x468   : > { %7173 = vmatmul.mubr.f32.gmra.mrb[124].mxu1 %v2823_v8  ;;  %v2825_v9 = vmax.f32 %v2761_v4, 0.0  ;;  %7855 = vmatprep.subr.bf16.mxu1 %v7854_v49  ;;  %v7870_v4 = vpack.c.bf16 %v3833_v28, %v3832_v47 }
 0x469   : > { %v2824_v63 = vmax.f32 %v2760_v0, 0.0 }
 0x46b   : > { %7175 = vmatprep.mubr.f32.mxu1 %v2824_v63  ;;  %7857 = vmatpush3.bf16.msra.mxu1 %v7854_v49  ;;  %s10711_s27 = scalar_lea.vmem %s11123_s26, %s6022_s4 }
 0x46c   : > { %7176 = vmatmul.mubr.f32.gmra.mrb[126].mxu1 %v2825_v9  ;;  %7859 = vmatprep.subr.bf16.mxu1 %v7858_v38 }
 0x46f   : > { %7861 = vmatpush3.bf16.msra.mxu1 %v7858_v38 }
 0x470   : > { %7863 = vmatprep.subr.bf16.mxu1 %v7862_v44 }
 0x473   : > { %7865 = vmatpush3.bf16.msra.mxu1 %v7862_v44 }
 0x474   : > { %7867 = vmatprep.subr.bf16.mxu1 %v7866_v33 }
 0x477   : > { %7869 = vmatpush3.bf16.msra.mxu1 %v7866_v33 }
 0x478   : > { %7871 = vmatprep.subr.bf16.mxu1 %v7870_v4 }
 0x47b   : > { %7873 = vmatpush3.bf16.msra.mxu1 %v7870_v4 }
 0x4c3   : > { %v7084_v3 = vpop.f32.mrb[64].mxu1 }
 0x4c4   : > { %v2902_v15 = vadd.f32 %v7084_v3, %v9861_v5  ;;  %v2896_v17 = vpop.f32.mrb[65].mxu1 }
 0x4c5   : > { %v2897_v19 = vadd.f32 %v2896_v17, %v9861_v5 }
 0x4c6   : > { %v3237_v22 = vmul.f32 %v9865_v13, %v2902_v15 }
 0x4c7   : > { %v3236_v21 = vmul.f32 %v9865_v13, %v2897_v19  ;;  %v7087_v23 = vpop.f32.mrb[66].mxu1  ;;  %v7874_v19 = vpack.c.bf16 %v3835_v51, %v3834_v32 }
 0x4c8   : > { %v3305_v24 = vadd.f32 %v9870_v16, %v3237_v22  ;;  %v2912_v25 = vadd.f32 %v7087_v23, %v9861_v5  ;;  %v2906_v52 = vpop.f32.mrb[67].mxu1 }
 0x4c9   : > { %v2907_v53 = vadd.f32 %v2906_v52, %v9861_v5  ;;  %v3304_v54 = vadd.f32 %v9870_v16, %v3236_v21  ;;  %v3837_v52 = vld [vmem:[#allocation13 + $0x78] sm:$0xff]  ;;  %7875 = vmatprep.subr.bf16.mxu1 %v7874_v19 }
 0x4ca   : > { %v3239_v55 = vmul.f32 %v9865_v13, %v2912_v25  ;;  %v3369_v57 = vmax.f32 %v3305_v24, 0.0  ;;  %v3836_v25 = vld [vmem:[#allocation13 + $0x70] sm:$0xff]  ;;  %7877 = vmatpush3.bf16.msra.mxu1 %v7874_v19 }
 0x4cb   : > { %v3238_v60 = vmul.f32 %v9865_v13, %v2907_v53  ;;  %v7090_v61 = vpop.f32.mrb[68].mxu1  ;;  %v3368_v10 = vmax.f32 %v3304_v54, 0.0 }
 0x4cc   : > { %v2922_v37 = vadd.f32 %v7090_v61, %v9861_v5  ;;  %v2916_v40 = vpop.f32.mrb[69].mxu1  ;;  %v3307_v43 = vadd.f32 %v9870_v16, %v3239_v55 }
 0x4cd   : > { %v2917_v14 = vadd.f32 %v2916_v40, %v9861_v5  ;;  %7210 = vmatprep.mubr.f32.mxu0 %v3368_v10  ;;  %v3306_v46 = vadd.f32 %v9870_v16, %v3238_v60  ;;  %v7878_v60 = vpack.c.bf16 %v3837_v52, %v3836_v25 }
 0x4ce   : > { %v3241_v29 = vmul.f32 %v9865_v13, %v2922_v37  ;;  %7211 = vmatmul.mubr.f32.vlgmr.msra.gmra.mrb[128].mxu0 %v3369_v57  ;;  %v3371_v42 = vmax.f32 %v3307_v43, 0.0 }
 0x4cf   : > { %v3240_v7 = vmul.f32 %v9865_v13, %v2917_v14  ;;  %v7093_v30 = vpop.f32.mrb[70].mxu1  ;;  %v3370_v31 = vmax.f32 %v3306_v46, 0.0  ;;  %7879 = vmatprep.subr.bf16.mxu1 %v7878_v60 }
 0x4d0   : > { %v2932_v36 = vadd.f32 %v7093_v30, %v9861_v5  ;;  %v2926_v41 = vpop.f32.mrb[71].mxu1  ;;  %v3309_v26 = vadd.f32 %v9870_v16, %v3241_v29  ;;  %7881 = vmatpush3.bf16.msra.mxu1 %v7878_v60 }
 0x4d1   : > { %v2927_v34 = vadd.f32 %v2926_v41, %v9861_v5  ;;  %7213 = vmatprep.mubr.f32.mxu0 %v3370_v31  ;;  %v3308_v2 = vadd.f32 %v9870_v16, %v3240_v7 }
 0x4d2   : > { %v3243_v35 = vmul.f32 %v9865_v13, %v2932_v36  ;;  %7214 = vmatmul.mubr.f32.gmra.mrb[130].mxu0 %v3371_v42  ;;  %v3373_v9 = vmax.f32 %v3309_v26, 0.0 }
 0x4d3   : > { %v3242_v6 = vmul.f32 %v9865_v13, %v2927_v34  ;;  %v7096_v48 = vpop.f32.mrb[72].mxu1  ;;  %v3372_v8 = vmax.f32 %v3308_v2, 0.0 }
 0x4d4   : > { %v2942_v0 = vadd.f32 %v7096_v48, %v9861_v5  ;;  %v2936_v63 = vpop.f32.mrb[73].mxu1  ;;  %v3311_v27 = vadd.f32 %v9870_v16, %v3243_v35 }
 0x4d5   : > { %v2937_v20 = vadd.f32 %v2936_v63, %v9861_v5  ;;  %7216 = vmatprep.mubr.f32.mxu0 %v3372_v8  ;;  %v3310_v62 = vadd.f32 %v9870_v16, %v3242_v6 }
 0x4d6   : > { %v3245_v49 = vmul.f32 %v9865_v13, %v2942_v0  ;;  %7217 = vmatmul.mubr.f32.gmra.mrb[132].mxu0 %v3373_v9  ;;  %v3375_v23 = vmax.f32 %v3311_v27, 0.0 }
 0x4d7   : > { %v3244_v3 = vmul.f32 %v9865_v13, %v2937_v20  ;;  %v7099_v15 = vpop.f32.mrb[74].mxu1  ;;  %v3374_v17 = vmax.f32 %v3310_v62, 0.0 }
 0x4d8   : > { %v2952_v22 = vadd.f32 %v7099_v15, %v9861_v5  ;;  %v2946_v21 = vpop.f32.mrb[75].mxu1  ;;  %v3313_v24 = vadd.f32 %v9870_v16, %v3245_v49 }
 0x4d9   : > { %v2947_v53 = vadd.f32 %v2946_v21, %v9861_v5  ;;  %7219 = vmatprep.mubr.f32.mxu0 %v3374_v17  ;;  %v3312_v54 = vadd.f32 %v9870_v16, %v3244_v3 }
 0x4da   : > { %v3247_v55 = vmul.f32 %v9865_v13, %v2952_v22  ;;  %7220 = vmatmul.mubr.f32.gmra.mrb[134].mxu0 %v3375_v23  ;;  %v3377_v38 = vmax.f32 %v3313_v24, 0.0 }
 0x4db   : > { %v3246_v58 = vmul.f32 %v9865_v13, %v2947_v53  ;;  %v7102_v59 = vpop.f32.mrb[76].mxu1  ;;  %v3376_v56 = vmax.f32 %v3312_v54, 0.0 }
 0x4dc   : > { %v2962_v61 = vadd.f32 %v7102_v59, %v9861_v5  ;;  %v2956_v10 = vpop.f32.mrb[77].mxu1  ;;  %v3315_v39 = vadd.f32 %v9870_v16, %v3247_v55 }
 0x4dd   : > { %v2957_v57 = vadd.f32 %v2956_v10, %v9861_v5  ;;  %7222 = vmatprep.mubr.f32.mxu0 %v3376_v56  ;;  %v3314_v37 = vadd.f32 %v9870_v16, %v3246_v58 }
 0x4de   : > { %v3249_v40 = vmul.f32 %v9865_v13, %v2962_v61  ;;  %7223 = vmatmul.mubr.f32.gmra.mrb[136].mxu0 %v3377_v38  ;;  %v3379_v46 = vmax.f32 %v3315_v39, 0.0 }
 0x4df   : > { %v3248_v43 = vmul.f32 %v9865_v13, %v2957_v57  ;;  %v7105_v44 = vpop.f32.mrb[78].mxu1  ;;  %v3378_v1 = vmax.f32 %v3314_v37, 0.0 }
 0x4e0   : > { %v2972_v45 = vadd.f32 %v7105_v44, %v9861_v5  ;;  %v2966_v14 = vpop.f32.mrb[79].mxu1  ;;  %v3317_v29 = vadd.f32 %v9870_v16, %v3249_v40 }
 0x4e1   : > { %v2967_v7 = vadd.f32 %v2966_v14, %v9861_v5  ;;  %7225 = vmatprep.mubr.f32.mxu0 %v3378_v1  ;;  %v3316_v30 = vadd.f32 %v9870_v16, %v3248_v43 }
 0x4e2   : > { %v3251_v31 = vmul.f32 %v9865_v13, %v2972_v45  ;;  %7226 = vmatmul.mubr.f32.gmra.mrb[138].mxu0 %v3379_v46  ;;  %v3381_v47 = vmax.f32 %v3317_v29, 0.0 }
 0x4e3   : > { %v3250_v33 = vmul.f32 %v9865_v13, %v2967_v7  ;;  %v7108_v36 = vpop.f32.mrb[80].mxu1  ;;  %v3380_v41 = vmax.f32 %v3316_v30, 0.0 }
 0x4e4   : > { %v2982_v42 = vadd.f32 %v7108_v36, %v9861_v5  ;;  %v2976_v26 = vpop.f32.mrb[81].mxu1  ;;  %v3319_v28 = vadd.f32 %v9870_v16, %v3251_v31 }
 0x4e5   : > { %v2977_v34 = vadd.f32 %v2976_v26, %v9861_v5  ;;  %7228 = vmatprep.mubr.f32.mxu0 %v3380_v41  ;;  %v3318_v2 = vadd.f32 %v9870_v16, %v3250_v33 }
 0x4e6   : > { %v3253_v35 = vmul.f32 %v9865_v13, %v2982_v42  ;;  %7229 = vmatmul.mubr.f32.gmra.mrb[140].mxu0 %v3381_v47  ;;  %v3383_v63 = vmax.f32 %v3319_v28, 0.0 }
 0x4e7   : > { %v3252_v6 = vmul.f32 %v9865_v13, %v2977_v34  ;;  %v7111_v48 = vpop.f32.mrb[82].mxu1  ;;  %v3382_v8 = vmax.f32 %v3318_v2, 0.0 }
 0x4e8   : > { %v2992_v4 = vadd.f32 %v7111_v48, %v9861_v5  ;;  %v2986_v0 = vpop.f32.mrb[83].mxu1  ;;  %v3321_v9 = vadd.f32 %v9870_v16, %v3253_v35 }
 0x4e9   : > { %v2987_v27 = vadd.f32 %v2986_v0, %v9861_v5  ;;  %7231 = vmatprep.mubr.f32.mxu0 %v3382_v8  ;;  %v3320_v32 = vadd.f32 %v9870_v16, %v3252_v6 }
 0x4ea   : > { %v3255_v51 = vmul.f32 %v9865_v13, %v2992_v4  ;;  %7232 = vmatmul.mubr.f32.gmra.mrb[142].mxu0 %v3383_v63  ;;  %v3385_v17 = vmax.f32 %v3321_v9, 0.0 }
 0x4eb   : > { %v3254_v20 = vmul.f32 %v9865_v13, %v2987_v27  ;;  %v7114_v62 = vpop.f32.mrb[84].mxu1  ;;  %v3384_v49 = vmax.f32 %v3320_v32, 0.0 }
 0x4ec   : > { %v3002_v3 = vadd.f32 %v7114_v62, %v9861_v5  ;;  %v2996_v15 = vpop.f32.mrb[85].mxu1  ;;  %v3323_v19 = vadd.f32 %v9870_v16, %v3255_v51 }
 0x4ed   : > { %v2997_v22 = vadd.f32 %v2996_v15, %v9861_v5  ;;  %7234 = vmatprep.mubr.f32.mxu0 %v3384_v49  ;;  %v3322_v21 = vadd.f32 %v9870_v16, %v3254_v20 }
 0x4ee   : > { %v3257_v23 = vmul.f32 %v9865_v13, %v3002_v3  ;;  %7235 = vmatmul.mubr.f32.gmra.mrb[144].mxu0 %v3385_v17  ;;  %v3387_v55 = vmax.f32 %v3323_v19, 0.0 }
 0x4ef   : > { %v3256_v24 = vmul.f32 %v9865_v13, %v2997_v22  ;;  %v7117_v25 = vpop.f32.mrb[86].mxu1  ;;  %v3386_v52 = vmax.f32 %v3322_v21, 0.0 }
 0x4f0   : > { %v3012_v53 = vadd.f32 %v7117_v25, %v9861_v5  ;;  %v3006_v54 = vpop.f32.mrb[87].mxu1  ;;  %v3325_v58 = vadd.f32 %v9870_v16, %v3257_v23 }
 0x4f1   : > { %v3007_v59 = vadd.f32 %v3006_v54, %v9861_v5  ;;  %7237 = vmatprep.mubr.f32.mxu0 %v3386_v52  ;;  %v3324_v56 = vadd.f32 %v9870_v16, %v3256_v24 }
 0x4f2   : > { %v3259_v60 = vmul.f32 %v9865_v13, %v3012_v53  ;;  %7238 = vmatmul.mubr.f32.gmra.mrb[146].mxu0 %v3387_v55  ;;  %v3389_v37 = vmax.f32 %v3325_v58, 0.0 }
 0x4f3   : > { %v3258_v61 = vmul.f32 %v9865_v13, %v3007_v59  ;;  %v7120_v10 = vpop.f32.mrb[88].mxu1  ;;  %v3388_v38 = vmax.f32 %v3324_v56, 0.0 }
 0x4f4   : > { %v3022_v39 = vadd.f32 %v7120_v10, %v9861_v5  ;;  %v3016_v57 = vpop.f32.mrb[89].mxu1  ;;  %v3327_v40 = vadd.f32 %v9870_v16, %v3259_v60 }
 0x4f5   : > { %v3017_v43 = vadd.f32 %v3016_v57, %v9861_v5  ;;  %7240 = vmatprep.mubr.f32.mxu0 %v3388_v38  ;;  %v3326_v44 = vadd.f32 %v9870_v16, %v3258_v61 }
 0x4f6   : > { %v3261_v1 = vmul.f32 %v9865_v13, %v3022_v39  ;;  %7241 = vmatmul.mubr.f32.gmra.mrb[148].mxu0 %v3389_v37  ;;  %v3391_v30 = vmax.f32 %v3327_v40, 0.0 }
 0x4f7   : > { %v3260_v45 = vmul.f32 %v9865_v13, %v3017_v43  ;;  %v7123_v14 = vpop.f32.mrb[90].mxu1  ;;  %v3390_v46 = vmax.f32 %v3326_v44, 0.0 }
 0x4f8   : > { %v3032_v29 = vadd.f32 %v7123_v14, %v9861_v5  ;;  %v3026_v7 = vpop.f32.mrb[91].mxu1  ;;  %v3329_v31 = vadd.f32 %v9870_v16, %v3261_v1 }
 0x4f9   : > { %v3027_v33 = vadd.f32 %v3026_v7, %v9861_v5  ;;  %7243 = vmatprep.mubr.f32.mxu0 %v3390_v46  ;;  %v3328_v36 = vadd.f32 %v9870_v16, %v3260_v45 }
 0x4fa   : > { %v3263_v41 = vmul.f32 %v9865_v13, %v3032_v29  ;;  %7244 = vmatmul.mubr.f32.gmra.mrb[150].mxu0 %v3391_v30  ;;  %v3393_v2 = vmax.f32 %v3329_v31, 0.0 }
 0x4fb   : > { %v3262_v42 = vmul.f32 %v9865_v13, %v3027_v33  ;;  %v7126_v26 = vpop.f32.mrb[92].mxu1  ;;  %v3392_v47 = vmax.f32 %v3328_v36, 0.0 }
 0x4fc   : > { %v3042_v28 = vadd.f32 %v7126_v26, %v9861_v5  ;;  %v3036_v34 = vpop.f32.mrb[93].mxu1  ;;  %v3331_v35 = vadd.f32 %v9870_v16, %v3263_v41 }
 0x4fd   : > { %v3037_v6 = vadd.f32 %v3036_v34, %v9861_v5  ;;  %7246 = vmatprep.mubr.f32.mxu0 %v3392_v47  ;;  %v3330_v48 = vadd.f32 %v9870_v16, %v3262_v42 }
 0x4fe   : > { %v3265_v8 = vmul.f32 %v9865_v13, %v3042_v28  ;;  %7247 = vmatmul.mubr.f32.gmra.mrb[152].mxu0 %v3393_v2  ;;  %v3395_v32 = vmax.f32 %v3331_v35, 0.0 }
 0x4ff   : > { %v3264_v4 = vmul.f32 %v9865_v13, %v3037_v6  ;;  %v7129_v0 = vpop.f32.mrb[94].mxu1  ;;  %v3394_v63 = vmax.f32 %v3330_v48, 0.0 }
 0x500   : > { %v3052_v9 = vadd.f32 %v7129_v0, %v9861_v5  ;;  %v3046_v27 = vpop.f32.mrb[95].mxu1  ;;  %v3333_v51 = vadd.f32 %v9870_v16, %v3265_v8 }
 0x501   : > { %v3047_v20 = vadd.f32 %v3046_v27, %v9861_v5  ;;  %7249 = vmatprep.mubr.f32.mxu0 %v3394_v63  ;;  %v3332_v62 = vadd.f32 %v9870_v16, %v3264_v4 }
 0x502   : > { %v3267_v49 = vmul.f32 %v9865_v13, %v3052_v9  ;;  %7250 = vmatmul.mubr.f32.gmra.mrb[154].mxu0 %v3395_v32  ;;  %v3397_v21 = vmax.f32 %v3333_v51, 0.0 }
 0x503   : > { %v3266_v3 = vmul.f32 %v9865_v13, %v3047_v20  ;;  %v7132_v15 = vpop.f32.mrb[96].mxu1  ;;  %v3396_v17 = vmax.f32 %v3332_v62, 0.0 }
 0x504   : > { %v3062_v19 = vadd.f32 %v7132_v15, %v9861_v5  ;;  %v3056_v22 = vpop.f32.mrb[97].mxu1  ;;  %v3335_v23 = vadd.f32 %v9870_v16, %v3267_v49 }
 0x505   : > { %v3057_v24 = vadd.f32 %v3056_v22, %v9861_v5  ;;  %7252 = vmatprep.mubr.f32.mxu0 %v3396_v17  ;;  %v3334_v25 = vadd.f32 %v9870_v16, %v3266_v3 }
 0x506   : > { %v3269_v52 = vmul.f32 %v9865_v13, %v3062_v19  ;;  %7253 = vmatmul.mubr.f32.gmra.mrb[156].mxu0 %v3397_v21  ;;  %v3399_v56 = vmax.f32 %v3335_v23, 0.0 }
 0x507   : > { %v3268_v53 = vmul.f32 %v9865_v13, %v3057_v24  ;;  %v7135_v54 = vpop.f32.mrb[98].mxu1  ;;  %v3398_v55 = vmax.f32 %v3334_v25, 0.0 }
 0x508   : > { %v3072_v58 = vadd.f32 %v7135_v54, %v9861_v5  ;;  %v3066_v59 = vpop.f32.mrb[99].mxu1  ;;  %v3337_v60 = vadd.f32 %v9870_v16, %v3269_v52 }
 0x509   : > { %v3067_v61 = vadd.f32 %v3066_v59, %v9861_v5  ;;  %7255 = vmatprep.mubr.f32.mxu0 %v3398_v55  ;;  %v3336_v10 = vadd.f32 %v9870_v16, %v3268_v53 }
 0x50a   : > { %v3271_v38 = vmul.f32 %v9865_v13, %v3072_v58  ;;  %7256 = vmatmul.mubr.f32.gmra.mrb[158].mxu0 %v3399_v56  ;;  %v3401_v44 = vmax.f32 %v3337_v60, 0.0 }
 0x50b   : > { %v3270_v39 = vmul.f32 %v9865_v13, %v3067_v61  ;;  %v7138_v57 = vpop.f32.mrb[100].mxu1  ;;  %v3400_v37 = vmax.f32 %v3336_v10, 0.0 }
 0x50c   : > { %v3082_v40 = vadd.f32 %v7138_v57, %v9861_v5  ;;  %v3076_v43 = vpop.f32.mrb[101].mxu1  ;;  %v3339_v1 = vadd.f32 %v9870_v16, %v3271_v38 }
 0x50d   : > { %v3077_v45 = vadd.f32 %v3076_v43, %v9861_v5  ;;  %7258 = vmatprep.mubr.f32.mxu0 %v3400_v37  ;;  %v3338_v14 = vadd.f32 %v9870_v16, %v3270_v39 }
 0x50e   : > { %v3273_v46 = vmul.f32 %v9865_v13, %v3082_v40  ;;  %7259 = vmatmul.mubr.f32.gmra.mrb[160].mxu0 %v3401_v44  ;;  %v3403_v36 = vmax.f32 %v3339_v1, 0.0 }
 0x50f   : > { %v3272_v29 = vmul.f32 %v9865_v13, %v3077_v45  ;;  %v7141_v7 = vpop.f32.mrb[102].mxu1  ;;  %v3402_v30 = vmax.f32 %v3338_v14, 0.0 }
 0x510   : > { %v3092_v31 = vadd.f32 %v7141_v7, %v9861_v5  ;;  %v3086_v33 = vpop.f32.mrb[103].mxu1  ;;  %v3341_v41 = vadd.f32 %v9870_v16, %v3273_v46 }
 0x511   : > { %v3087_v42 = vadd.f32 %v3086_v33, %v9861_v5  ;;  %7261 = vmatprep.mubr.f32.mxu0 %v3402_v30  ;;  %v3340_v26 = vadd.f32 %v9870_v16, %v3272_v29 }
 0x512   : > { %v3275_v47 = vmul.f32 %v9865_v13, %v3092_v31  ;;  %7262 = vmatmul.mubr.f32.gmra.mrb[162].mxu0 %v3403_v36  ;;  %v3405_v48 = vmax.f32 %v3341_v41, 0.0 }
 0x513   : > { %v3274_v28 = vmul.f32 %v9865_v13, %v3087_v42  ;;  %v7144_v34 = vpop.f32.mrb[104].mxu1  ;;  %v3404_v2 = vmax.f32 %v3340_v26, 0.0 }
 0x514   : > { %v3102_v35 = vadd.f32 %v7144_v34, %v9861_v5  ;;  %v3096_v6 = vpop.f32.mrb[105].mxu1  ;;  %v3343_v8 = vadd.f32 %v9870_v16, %v3275_v47 }
 0x515   : > { %v3097_v4 = vadd.f32 %v3096_v6, %v9861_v5  ;;  %7264 = vmatprep.mubr.f32.mxu0 %v3404_v2  ;;  %v3342_v0 = vadd.f32 %v9870_v16, %v3274_v28 }
 0x516   : > { %v3277_v63 = vmul.f32 %v9865_v13, %v3102_v35  ;;  %7265 = vmatmul.mubr.f32.gmra.mrb[164].mxu0 %v3405_v48  ;;  %v3407_v62 = vmax.f32 %v3343_v8, 0.0 }
 0x517   : > { %v3276_v9 = vmul.f32 %v9865_v13, %v3097_v4  ;;  %v7147_v27 = vpop.f32.mrb[106].mxu1  ;;  %v3406_v32 = vmax.f32 %v3342_v0, 0.0 }
 0x518   : > { %v3112_v51 = vadd.f32 %v7147_v27, %v9861_v5  ;;  %v3106_v20 = vpop.f32.mrb[107].mxu1  ;;  %v3345_v49 = vadd.f32 %v9870_v16, %v3277_v63 }
 0x519   : > { %v3107_v3 = vadd.f32 %v3106_v20, %v9861_v5  ;;  %7267 = vmatprep.mubr.f32.mxu0 %v3406_v32  ;;  %v3344_v15 = vadd.f32 %v9870_v16, %v3276_v9 }
 0x51a   : > { %v3279_v17 = vmul.f32 %v9865_v13, %v3112_v51  ;;  %7268 = vmatmul.mubr.f32.gmra.mrb[166].mxu0 %v3407_v62  ;;  %v3409_v25 = vmax.f32 %v3345_v49, 0.0 }
 0x51b   : > { %v3278_v19 = vmul.f32 %v9865_v13, %v3107_v3  ;;  %v7150_v22 = vpop.f32.mrb[108].mxu1  ;;  %v3408_v21 = vmax.f32 %v3344_v15, 0.0 }
 0x51c   : > { %v3122_v23 = vadd.f32 %v7150_v22, %v9861_v5  ;;  %v3116_v24 = vpop.f32.mrb[109].mxu1  ;;  %v3347_v52 = vadd.f32 %v9870_v16, %v3279_v17 }
 0x51d   : > { %v3117_v53 = vadd.f32 %v3116_v24, %v9861_v5  ;;  %7270 = vmatprep.mubr.f32.mxu0 %v3408_v21  ;;  %v3346_v54 = vadd.f32 %v9870_v16, %v3278_v19 }
 0x51e   : > { %v3281_v55 = vmul.f32 %v9865_v13, %v3122_v23  ;;  %7271 = vmatmul.mubr.f32.gmra.mrb[168].mxu0 %v3409_v25  ;;  %v3411_v10 = vmax.f32 %v3347_v52, 0.0 }
 0x51f   : > { %v3280_v58 = vmul.f32 %v9865_v13, %v3117_v53  ;;  %v7153_v59 = vpop.f32.mrb[110].mxu1  ;;  %v3410_v56 = vmax.f32 %v3346_v54, 0.0 }
 0x520   : > { %v3132_v60 = vadd.f32 %v7153_v59, %v9861_v5  ;;  %v3126_v61 = vpop.f32.mrb[111].mxu1  ;;  %v3349_v38 = vadd.f32 %v9870_v16, %v3281_v55 }
 0x521   : > { %v3127_v39 = vadd.f32 %v3126_v61, %v9861_v5  ;;  %7273 = vmatprep.mubr.f32.mxu0 %v3410_v56  ;;  %v3348_v57 = vadd.f32 %v9870_v16, %v3280_v58 }
 0x522   : > { %v3283_v37 = vmul.f32 %v9865_v13, %v3132_v60  ;;  %7274 = vmatmul.mubr.f32.gmra.mrb[170].mxu0 %v3411_v10  ;;  %v3413_v14 = vmax.f32 %v3349_v38, 0.0 }
 0x523   : > { %v3282_v40 = vmul.f32 %v9865_v13, %v3127_v39  ;;  %v7156_v43 = vpop.f32.mrb[112].mxu1  ;;  %v3412_v44 = vmax.f32 %v3348_v57, 0.0 }
 0x524   : > { %v3142_v1 = vadd.f32 %v7156_v43, %v9861_v5  ;;  %v3136_v45 = vpop.f32.mrb[113].mxu1  ;;  %v3351_v46 = vadd.f32 %v9870_v16, %v3283_v37 }
 0x525   : > { %v3137_v29 = vadd.f32 %v3136_v45, %v9861_v5  ;;  %7276 = vmatprep.mubr.f32.mxu0 %v3412_v44  ;;  %v3350_v7 = vadd.f32 %v9870_v16, %v3282_v40 }
 0x526   : > { %v3285_v30 = vmul.f32 %v9865_v13, %v3142_v1  ;;  %7277 = vmatmul.mubr.f32.gmra.mrb[172].mxu0 %v3413_v14  ;;  %v3415_v26 = vmax.f32 %v3351_v46, 0.0 }
 0x527   : > { %v3284_v31 = vmul.f32 %v9865_v13, %v3137_v29  ;;  %v7159_v33 = vpop.f32.mrb[114].mxu1  ;;  %v3414_v36 = vmax.f32 %v3350_v7, 0.0 }
 0x528   : > { %v3152_v41 = vadd.f32 %v7159_v33, %v9861_v5  ;;  %v3146_v42 = vpop.f32.mrb[115].mxu1  ;;  %v3353_v47 = vadd.f32 %v9870_v16, %v3285_v30 }
 0x529   : > { %v3147_v28 = vadd.f32 %v3146_v42, %v9861_v5  ;;  %7279 = vmatprep.mubr.f32.mxu0 %v3414_v36  ;;  %v3352_v34 = vadd.f32 %v9870_v16, %v3284_v31 }
 0x52a   : > { %v3287_v2 = vmul.f32 %v9865_v13, %v3152_v41  ;;  %7280 = vmatmul.mubr.f32.gmra.mrb[174].mxu0 %v3415_v26  ;;  %v3417_v0 = vmax.f32 %v3353_v47, 0.0 }
 0x52b   : > { %v3286_v35 = vmul.f32 %v9865_v13, %v3147_v28  ;;  %v7162_v6 = vpop.f32.mrb[116].mxu1  ;;  %v3416_v48 = vmax.f32 %v3352_v34, 0.0 }
 0x52c   : > { %v3162_v8 = vadd.f32 %v7162_v6, %v9861_v5  ;;  %v3156_v4 = vpop.f32.mrb[117].mxu1  ;;  %v3355_v63 = vadd.f32 %v9870_v16, %v3287_v2 }
 0x52d   : > { %v3157_v9 = vadd.f32 %v3156_v4, %v9861_v5  ;;  %7282 = vmatprep.mubr.f32.mxu0 %v3416_v48  ;;  %v3354_v27 = vadd.f32 %v9870_v16, %v3286_v35 }
 0x52e   : > { %v3289_v32 = vmul.f32 %v9865_v13, %v3162_v8  ;;  %7283 = vmatmul.mubr.f32.gmra.mrb[176].mxu0 %v3417_v0  ;;  %v3419_v15 = vmax.f32 %v3355_v63, 0.0 }
 0x52f   : > { %v3288_v51 = vmul.f32 %v9865_v13, %v3157_v9  ;;  %v7165_v20 = vpop.f32.mrb[118].mxu1  ;;  %v3418_v62 = vmax.f32 %v3354_v27, 0.0 }
 0x530   : > { %v3172_v49 = vadd.f32 %v7165_v20, %v9861_v5  ;;  %v3166_v3 = vpop.f32.mrb[119].mxu1  ;;  %v3357_v17 = vadd.f32 %v9870_v16, %v3289_v32 }
 0x531   : > { %v3167_v19 = vadd.f32 %v3166_v3, %v9861_v5  ;;  %7285 = vmatprep.mubr.f32.mxu0 %v3418_v62  ;;  %v3356_v22 = vadd.f32 %v9870_v16, %v3288_v51  ;;  %v4429_v51 = vld [vmem:[#allocation15 + $0x8] sm:$0xff]  ;;  %v4430_v62 = vld [vmem:[#allocation15 + $0x10] sm:$0xff] }
 0x532   : > { %v3291_v21 = vmul.f32 %v9865_v13, %v3172_v49  ;;  %7286 = vmatmul.mubr.f32.gmra.mrb[178].mxu0 %v3419_v15  ;;  %v3421_v54 = vmax.f32 %v3357_v17, 0.0  ;;  %v4431_v49 = vld [vmem:[#allocation15 + $0x18] sm:$0xff] }
 0x533   : > { %v3290_v23 = vmul.f32 %v9865_v13, %v3167_v19  ;;  %v7168_v24 = vpop.f32.mrb[120].mxu1  ;;  %v3420_v25 = vmax.f32 %v3356_v22, 0.0  ;;  %v7886_v3 = vpack.c.bf16 %v4431_v49, %v4430_v62 }
 0x534   : > { %v3182_v52 = vadd.f32 %v7168_v24, %v9861_v5  ;;  %v3176_v53 = vpop.f32.mrb[121].mxu1  ;;  %v3359_v55 = vadd.f32 %v9870_v16, %v3291_v21 }
 0x535   : > { %v3177_v58 = vadd.f32 %v3176_v53, %v9861_v5  ;;  %7288 = vmatprep.mubr.f32.mxu0 %v3420_v25  ;;  %v3358_v59 = vadd.f32 %v9870_v16, %v3290_v23 }
 0x536   : > { %v3293_v56 = vmul.f32 %v9865_v13, %v3182_v52  ;;  %7289 = vmatmul.mubr.f32.gmra.mrb[180].mxu0 %v3421_v54  ;;  %v3423_v57 = vmax.f32 %v3359_v55, 0.0 }
 0x537   : > { %v3292_v60 = vmul.f32 %v9865_v13, %v3177_v58  ;;  %v7171_v61 = vpop.f32.mrb[122].mxu1  ;;  %v3422_v10 = vmax.f32 %v3358_v59, 0.0 }
 0x538   : > { %v3192_v38 = vadd.f32 %v7171_v61, %v9861_v5  ;;  %v3186_v39 = vpop.f32.mrb[123].mxu1  ;;  %v3361_v37 = vadd.f32 %v9870_v16, %v3293_v56  ;;  %v4432_v56 = vld [vmem:[#allocation15 + $0x20] sm:$0xff]  ;;  %v4434_v61 = vld [vmem:[#allocation15 + $0x30] sm:$0xff] }
 0x539   : > { %v3187_v40 = vadd.f32 %v3186_v39, %v9861_v5  ;;  %7291 = vmatprep.mubr.f32.mxu0 %v3422_v10  ;;  %v3360_v43 = vadd.f32 %v9870_v16, %v3292_v60  ;;  %v4433_v60 = vld [vmem:[#allocation15 + $0x28] sm:$0xff] }
 0x53a   : > { %v3295_v44 = vmul.f32 %v9865_v13, %v3192_v38  ;;  %7292 = vmatmul.mubr.f32.gmra.mrb[182].mxu0 %v3423_v57  ;;  %v3425_v7 = vmax.f32 %v3361_v37, 0.0  ;;  %v7890_v57 = vpack.c.bf16 %v4433_v60, %v4432_v56  ;;  %v4435_v37 = vld [vmem:[#allocation15 + $0x38] sm:$0xff] }
 0x53b   : > { %v3294_v1 = vmul.f32 %v9865_v13, %v3187_v40  ;;  %v7174_v45 = vpop.f32.mrb[124].mxu1  ;;  %v3424_v14 = vmax.f32 %v3360_v43, 0.0 }
 0x53c   : > { %v3202_v46 = vadd.f32 %v7174_v45, %v9861_v5  ;;  %v3196_v29 = vpop.f32.mrb[125].mxu1  ;;  %v3363_v30 = vadd.f32 %v9870_v16, %v3295_v44  ;;  %v7894_v45 = vpack.c.bf16 %v4435_v37, %v4434_v61 }
 0x53d   : > { %v3197_v31 = vadd.f32 %v3196_v29, %v9861_v5  ;;  %7294 = vmatprep.mubr.f32.mxu0 %v3424_v14  ;;  %v3362_v33 = vadd.f32 %v9870_v16, %v3294_v1  ;;  %v4436_v14 = vld [vmem:[#allocation15 + $0x40] sm:$0xff] }
 0x53e   : > { %v3297_v36 = vmul.f32 %v9865_v13, %v3202_v46  ;;  %7295 = vmatmul.mubr.f32.gmra.mrb[184].mxu0 %v3425_v7  ;;  %v3427_v34 = vmax.f32 %v3363_v30, 0.0  ;;  %v4437_v46 = vld [vmem:[#allocation15 + $0x48] sm:$0xff] }
 0x53f   : > { %v3296_v41 = vmul.f32 %v9865_v13, %v3197_v31  ;;  %v7177_v42 = vpop.f32.mrb[126].mxu1  ;;  %v3426_v26 = vmax.f32 %v3362_v33, 0.0 }
 0x540   : > { %v3212_v47 = vadd.f32 %v7177_v42, %v9861_v5  ;;  %v3206_v28 = vpop.f32.mrb[127].mxu1  ;;  %v3365_v2 = vadd.f32 %v9870_v16, %v3297_v36 }
 0x541   : > { %v3207_v35 = vadd.f32 %v3206_v28, %v9861_v5  ;;  %7297 = vmatprep.mubr.f32.mxu0 %v3426_v26  ;;  %v3364_v6 = vadd.f32 %v9870_v16, %v3296_v41  ;;  %v4428_v5 = vld [vmem:[#allocation15] sm:$0xff]  ;;  %v7898_v41 = vpack.c.bf16 %v4437_v46, %v4436_v14 }
 0x542   : > { %v3299_v48 = vmul.f32 %v9865_v13, %v3212_v47  ;;  %7298 = vmatmul.mubr.f32.gmra.mrb[186].mxu0 %v3427_v34  ;;  %v3429_v0 = vmax.f32 %v3365_v2, 0.0  ;;  %v7882_v20 = vpack.c.bf16 %v4429_v51, %v4428_v5  ;;  %v4438_v34 = vld [vmem:[#allocation15 + $0x50] sm:$0xff]  ;;  %v4439_v2 = vld [vmem:[#allocation15 + $0x58] sm:$0xff]  ;;  %v4440_v51 = vld [vmem:[#allocation15 + $0x60] sm:$0xff] }
 0x543   : > { %v3298_v8 = vmul.f32 %v9865_v13, %v3207_v35  ;;  %v3428_v4 = vmax.f32 %v3364_v6, 0.0  ;;  %v10066_v13 = vld [vmem:[%s11118_s17] sm:$0xff] }
 0x544   : > { %v3367_v63 = vadd.f32 %v9870_v16, %v3299_v48  ;;  %7883 = vmatprep.subr.bf16.mxu0 %v7882_v20  ;;  %v10074_v15 = vrot.slane %v10066_v13, %v11114_v12  ;;  %v10079_v22 = vrot.slane %v10066_v13, %v11115_v18 }
 0x545   : > { %7300 = vmatprep.mubr.f32.mxu0 %v3428_v4  ;;  %v3366_v9 = vadd.f32 %v9870_v16, %v3298_v8  ;;  %7885 = vmatpush3.bf16.msra.mxu0 %v7882_v20  ;;  %v10070_v16 = vrot.slane %v9857_v50, %v9225_v11  ;;  %v4441_v20 = vld [vmem:[#allocation15 + $0x68] sm:$0xff] }
 0x546   : > { %7301 = vmatmul.mubr.f32.gmra.mrb[188].mxu0 %v3429_v0  ;;  %v3431_v32 = vmax.f32 %v3367_v63, 0.0  ;;  %7887 = vmatprep.subr.bf16.mxu0 %v7886_v3  ;;  %v7902_v63 = vpack.c.bf16 %v4439_v2, %v4438_v34 }
 0x547   : > { %v3430_v27 = vmax.f32 %v3366_v9, 0.0 }
 0x549   : > { %7303 = vmatprep.mubr.f32.mxu0 %v3430_v27  ;;  %7889 = vmatpush3.bf16.msra.mxu0 %v7886_v3 }
 0x54a   : > { %7304 = vmatmul.mubr.f32.gmra.mrb[190].mxu0 %v3431_v32  ;;  %7891 = vmatprep.subr.bf16.mxu0 %v7890_v57 }
 0x54d   : > { %7893 = vmatpush3.bf16.msra.mxu0 %v7890_v57 }
 0x54e   : > { %7895 = vmatprep.subr.bf16.mxu0 %v7894_v45 }
 0x551   : > { %7897 = vmatpush3.bf16.msra.mxu0 %v7894_v45 }
 0x552   : > { %7899 = vmatprep.subr.bf16.mxu0 %v7898_v41 }
 0x555   : > { %7901 = vmatpush3.bf16.msra.mxu0 %v7898_v41 }
 0x556   : > { %7903 = vmatprep.subr.bf16.mxu0 %v7902_v63 }
 0x559   : > { %7905 = vmatpush3.bf16.msra.mxu0 %v7902_v63 }
 0x5a1   : > { %v7212_v17 = vpop.f32.mrb[128].mxu0 }
 0x5a2   : > { %v3508_v19 = vadd.f32 %v7212_v17, %v10070_v16  ;;  %v3502_v21 = vpop.f32.mrb[129].mxu0 }
 0x5a3   : > { %v3503_v23 = vadd.f32 %v3502_v21, %v10070_v16 }
 0x5a4   : > { %v3843_v24 = vmul.f32 %v10074_v15, %v3508_v19 }
 0x5a5   : > { %v3842_v50 = vmul.f32 %v10074_v15, %v3503_v23  ;;  %v7215_v25 = vpop.f32.mrb[130].mxu0  ;;  %v7906_v23 = vpack.c.bf16 %v4441_v20, %v4440_v51 }
 0x5a6   : > { %v3911_v52 = vadd.f32 %v10079_v22, %v3843_v24  ;;  %v3518_v53 = vadd.f32 %v7215_v25, %v10070_v16  ;;  %v3512_v54 = vpop.f32.mrb[131].mxu0 }
 0x5a7   : > { %v3513_v55 = vadd.f32 %v3512_v54, %v10070_v16  ;;  %v3910_v58 = vadd.f32 %v10079_v22, %v3842_v50  ;;  %v4443_v54 = vld [vmem:[#allocation15 + $0x78] sm:$0xff]  ;;  %7907 = vmatprep.subr.bf16.mxu0 %v7906_v23 }
 0x5a8   : > { %v3845_v59 = vmul.f32 %v10074_v15, %v3518_v53  ;;  %v3975_v40 = vmax.f32 %v3911_v52, 0.0  ;;  %v4442_v53 = vld [vmem:[#allocation15 + $0x70] sm:$0xff]  ;;  %7909 = vmatpush3.bf16.msra.mxu0 %v7906_v23 }
 0x5a9   : > { %v3844_v10 = vmul.f32 %v10074_v15, %v3513_v55  ;;  %v7218_v38 = vpop.f32.mrb[132].mxu0  ;;  %v3974_v39 = vmax.f32 %v3910_v58, 0.0 }
 0x5aa   : > { %v3528_v43 = vadd.f32 %v7218_v38, %v10070_v16  ;;  %v3522_v44 = vpop.f32.mrb[133].mxu0  ;;  %v3913_v1 = vadd.f32 %v10079_v22, %v3845_v59 }
 0x5ab   : > { %v3523_v29 = vadd.f32 %v3522_v44, %v10070_v16  ;;  %7338 = vmatprep.mubr.f32.mxu1 %v3974_v39  ;;  %v3912_v7 = vadd.f32 %v10079_v22, %v3844_v10  ;;  %v7910_v10 = vpack.c.bf16 %v4443_v54, %v4442_v53 }
 0x5ac   : > { %v3847_v30 = vmul.f32 %v10074_v15, %v3528_v43  ;;  %7339 = vmatmul.mubr.f32.vlgmr.msra.gmra.mrb[128].mxu1 %v3975_v40  ;;  %v3977_v47 = vmax.f32 %v3913_v1, 0.0 }
 0x5ad   : > { %v3846_v31 = vmul.f32 %v10074_v15, %v3523_v29  ;;  %v7221_v33 = vpop.f32.mrb[134].mxu0  ;;  %v3976_v36 = vmax.f32 %v3912_v7, 0.0  ;;  %7911 = vmatprep.subr.bf16.mxu0 %v7910_v10 }
 0x5ae   : > { %v3538_v42 = vadd.f32 %v7221_v33, %v10070_v16  ;;  %v3532_v26 = vpop.f32.mrb[135].mxu0  ;;  %v3915_v28 = vadd.f32 %v10079_v22, %v3847_v30  ;;  %7913 = vmatpush3.bf16.msra.mxu0 %v7910_v10 }
 0x5af   : > { %v3533_v35 = vadd.f32 %v3532_v26, %v10070_v16  ;;  %7341 = vmatprep.mubr.f32.mxu1 %v3976_v36  ;;  %v3914_v6 = vadd.f32 %v10079_v22, %v3846_v31 }
 0x5b0   : > { %v3849_v48 = vmul.f32 %v10074_v15, %v3538_v42  ;;  %7342 = vmatmul.mubr.f32.gmra.mrb[130].mxu1 %v3977_v47  ;;  %v3979_v32 = vmax.f32 %v3915_v28, 0.0 }
 0x5b1   : > { %v3848_v8 = vmul.f32 %v10074_v15, %v3533_v35  ;;  %v7224_v4 = vpop.f32.mrb[136].mxu0  ;;  %v3978_v0 = vmax.f32 %v3914_v6, 0.0 }
 0x5b2   : > { %v3548_v9 = vadd.f32 %v7224_v4, %v10070_v16  ;;  %v3542_v27 = vpop.f32.mrb[137].mxu0  ;;  %v3917_v5 = vadd.f32 %v10079_v22, %v3849_v48 }
 0x5b3   : > { %v3543_v62 = vadd.f32 %v3542_v27, %v10070_v16  ;;  %7344 = vmatprep.mubr.f32.mxu1 %v3978_v0  ;;  %v3916_v49 = vadd.f32 %v10079_v22, %v3848_v8 }
 0x5b4   : > { %v3851_v3 = vmul.f32 %v10074_v15, %v3548_v9  ;;  %7345 = vmatmul.mubr.f32.gmra.mrb[132].mxu1 %v3979_v32  ;;  %v3981_v25 = vmax.f32 %v3917_v5, 0.0 }
 0x5b5   : > { %v3850_v17 = vmul.f32 %v10074_v15, %v3543_v62  ;;  %v7227_v19 = vpop.f32.mrb[138].mxu0  ;;  %v3980_v21 = vmax.f32 %v3916_v49, 0.0 }
 0x5b6   : > { %v3558_v24 = vadd.f32 %v7227_v19, %v10070_v16  ;;  %v3552_v50 = vpop.f32.mrb[139].mxu0  ;;  %v3919_v52 = vadd.f32 %v10079_v22, %v3851_v3 }
 0x5b7   : > { %v3553_v55 = vadd.f32 %v3552_v50, %v10070_v16  ;;  %7347 = vmatprep.mubr.f32.mxu1 %v3980_v21  ;;  %v3918_v58 = vadd.f32 %v10079_v22, %v3850_v17 }
 0x5b8   : > { %v3853_v59 = vmul.f32 %v10074_v15, %v3558_v24  ;;  %7348 = vmatmul.mubr.f32.gmra.mrb[134].mxu1 %v3981_v25  ;;  %v3983_v57 = vmax.f32 %v3919_v52, 0.0 }
 0x5b9   : > { %v3852_v56 = vmul.f32 %v10074_v15, %v3553_v55  ;;  %v7230_v60 = vpop.f32.mrb[140].mxu0  ;;  %v3982_v61 = vmax.f32 %v3918_v58, 0.0 }
 0x5ba   : > { %v3568_v38 = vadd.f32 %v7230_v60, %v10070_v16  ;;  %v3562_v39 = vpop.f32.mrb[141].mxu0  ;;  %v3921_v37 = vadd.f32 %v10079_v22, %v3853_v59 }
 0x5bb   : > { %v3563_v40 = vadd.f32 %v3562_v39, %v10070_v16  ;;  %7350 = vmatprep.mubr.f32.mxu1 %v3982_v61  ;;  %v3920_v43 = vadd.f32 %v10079_v22, %v3852_v56 }
 0x5bc   : > { %v3855_v44 = vmul.f32 %v10074_v15, %v3568_v38  ;;  %7351 = vmatmul.mubr.f32.gmra.mrb[136].mxu1 %v3983_v57  ;;  %v3985_v7 = vmax.f32 %v3921_v37, 0.0 }
 0x5bd   : > { %v3854_v1 = vmul.f32 %v10074_v15, %v3563_v40  ;;  %v7233_v45 = vpop.f32.mrb[142].mxu0  ;;  %v3984_v14 = vmax.f32 %v3920_v43, 0.0 }
 0x5be   : > { %v3578_v46 = vadd.f32 %v7233_v45, %v10070_v16  ;;  %v3572_v29 = vpop.f32.mrb[143].mxu0  ;;  %v3923_v30 = vadd.f32 %v10079_v22, %v3855_v44 }
 0x5bf   : > { %v3573_v31 = vadd.f32 %v3572_v29, %v10070_v16  ;;  %7353 = vmatprep.mubr.f32.mxu1 %v3984_v14  ;;  %v3922_v33 = vadd.f32 %v10079_v22, %v3854_v1 }
 0x5c0   : > { %v3857_v36 = vmul.f32 %v10074_v15, %v3578_v46  ;;  %7354 = vmatmul.mubr.f32.gmra.mrb[138].mxu1 %v3985_v7  ;;  %v3987_v34 = vmax.f32 %v3923_v30, 0.0 }
 0x5c1   : > { %v3856_v41 = vmul.f32 %v10074_v15, %v3573_v31  ;;  %v7236_v42 = vpop.f32.mrb[144].mxu0  ;;  %v3986_v26 = vmax.f32 %v3922_v33, 0.0 }
 0x5c2   : > { %v3588_v47 = vadd.f32 %v7236_v42, %v10070_v16  ;;  %v3582_v28 = vpop.f32.mrb[145].mxu0  ;;  %v3925_v2 = vadd.f32 %v10079_v22, %v3857_v36 }
 0x5c3   : > { %v3583_v35 = vadd.f32 %v3582_v28, %v10070_v16  ;;  %7356 = vmatprep.mubr.f32.mxu1 %v3986_v26  ;;  %v3924_v6 = vadd.f32 %v10079_v22, %v3856_v41 }
 0x5c4   : > { %v3859_v48 = vmul.f32 %v10074_v15, %v3588_v47  ;;  %7357 = vmatmul.mubr.f32.gmra.mrb[140].mxu1 %v3987_v34  ;;  %v3989_v27 = vmax.f32 %v3925_v2, 0.0 }
 0x5c5   : > { %v3858_v8 = vmul.f32 %v10074_v15, %v3583_v35  ;;  %v7239_v4 = vpop.f32.mrb[146].mxu0  ;;  %v3988_v0 = vmax.f32 %v3924_v6, 0.0 }
 0x5c6   : > { %v3598_v63 = vadd.f32 %v7239_v4, %v10070_v16  ;;  %v3592_v9 = vpop.f32.mrb[147].mxu0  ;;  %v3927_v32 = vadd.f32 %v10079_v22, %v3859_v48 }
 0x5c7   : > { %v3593_v5 = vadd.f32 %v3592_v9, %v10070_v16  ;;  %7359 = vmatprep.mubr.f32.mxu1 %v3988_v0  ;;  %v3926_v51 = vadd.f32 %v10079_v22, %v3858_v8 }
 0x5c8   : > { %v3861_v20 = vmul.f32 %v10074_v15, %v3598_v63  ;;  %7360 = vmatmul.mubr.f32.gmra.mrb[142].mxu1 %v3989_v27  ;;  %v3991_v21 = vmax.f32 %v3927_v32, 0.0 }
 0x5c9   : > { %v3860_v62 = vmul.f32 %v10074_v15, %v3593_v5  ;;  %v7242_v49 = vpop.f32.mrb[148].mxu0  ;;  %v3990_v3 = vmax.f32 %v3926_v51, 0.0 }
 0x5ca   : > { %v3608_v17 = vadd.f32 %v7242_v49, %v10070_v16  ;;  %v3602_v19 = vpop.f32.mrb[149].mxu0  ;;  %v3929_v23 = vadd.f32 %v10079_v22, %v3861_v20 }
 0x5cb   : > { %v3603_v24 = vadd.f32 %v3602_v19, %v10070_v16  ;;  %7362 = vmatprep.mubr.f32.mxu1 %v3990_v3  ;;  %v3928_v50 = vadd.f32 %v10079_v22, %v3860_v62 }
 0x5cc   : > { %v3863_v25 = vmul.f32 %v10074_v15, %v3608_v17  ;;  %7363 = vmatmul.mubr.f32.gmra.mrb[144].mxu1 %v3991_v21  ;;  %v3993_v59 = vmax.f32 %v3929_v23, 0.0 }
 0x5cd   : > { %v3862_v52 = vmul.f32 %v10074_v15, %v3603_v24  ;;  %v7245_v53 = vpop.f32.mrb[150].mxu0  ;;  %v3992_v54 = vmax.f32 %v3928_v50, 0.0 }
 0x5ce   : > { %v3618_v55 = vadd.f32 %v7245_v53, %v10070_v16  ;;  %v3612_v58 = vpop.f32.mrb[151].mxu0  ;;  %v3931_v56 = vadd.f32 %v10079_v22, %v3863_v25 }
 0x5cf   : > { %v3613_v60 = vadd.f32 %v3612_v58, %v10070_v16  ;;  %7365 = vmatprep.mubr.f32.mxu1 %v3992_v54  ;;  %v3930_v61 = vadd.f32 %v10079_v22, %v3862_v52 }
 0x5d0   : > { %v3865_v10 = vmul.f32 %v10074_v15, %v3618_v55  ;;  %7366 = vmatmul.mubr.f32.gmra.mrb[146].mxu1 %v3993_v59  ;;  %v3995_v43 = vmax.f32 %v3931_v56, 0.0 }
 0x5d1   : > { %v3864_v38 = vmul.f32 %v10074_v15, %v3613_v60  ;;  %v7248_v39 = vpop.f32.mrb[152].mxu0  ;;  %v3994_v57 = vmax.f32 %v3930_v61, 0.0 }
 0x5d2   : > { %v3628_v37 = vadd.f32 %v7248_v39, %v10070_v16  ;;  %v3622_v40 = vpop.f32.mrb[153].mxu0  ;;  %v3933_v44 = vadd.f32 %v10079_v22, %v3865_v10 }
 0x5d3   : > { %v3623_v1 = vadd.f32 %v3622_v40, %v10070_v16  ;;  %7368 = vmatprep.mubr.f32.mxu1 %v3994_v57  ;;  %v3932_v45 = vadd.f32 %v10079_v22, %v3864_v38 }
 0x5d4   : > { %v3867_v14 = vmul.f32 %v10074_v15, %v3628_v37  ;;  %7369 = vmatmul.mubr.f32.gmra.mrb[148].mxu1 %v3995_v43  ;;  %v3997_v33 = vmax.f32 %v3933_v44, 0.0 }
 0x5d5   : > { %v3866_v46 = vmul.f32 %v10074_v15, %v3623_v1  ;;  %v7251_v29 = vpop.f32.mrb[154].mxu0  ;;  %v3996_v7 = vmax.f32 %v3932_v45, 0.0 }
 0x5d6   : > { %v3638_v30 = vadd.f32 %v7251_v29, %v10070_v16  ;;  %v3632_v31 = vpop.f32.mrb[155].mxu0  ;;  %v3935_v36 = vadd.f32 %v10079_v22, %v3867_v14 }
 0x5d7   : > { %v3633_v41 = vadd.f32 %v3632_v31, %v10070_v16  ;;  %7371 = vmatprep.mubr.f32.mxu1 %v3996_v7  ;;  %v3934_v42 = vadd.f32 %v10079_v22, %v3866_v46 }
 0x5d8   : > { %v3869_v26 = vmul.f32 %v10074_v15, %v3638_v30  ;;  %7372 = vmatmul.mubr.f32.gmra.mrb[150].mxu1 %v3997_v33  ;;  %v3999_v6 = vmax.f32 %v3935_v36, 0.0 }
 0x5d9   : > { %v3868_v47 = vmul.f32 %v10074_v15, %v3633_v41  ;;  %v7254_v28 = vpop.f32.mrb[156].mxu0  ;;  %v3998_v34 = vmax.f32 %v3934_v42, 0.0 }
 0x5da   : > { %v3648_v2 = vadd.f32 %v7254_v28, %v10070_v16  ;;  %v3642_v35 = vpop.f32.mrb[157].mxu0  ;;  %v3937_v48 = vadd.f32 %v10079_v22, %v3869_v26 }
 0x5db   : > { %v3643_v8 = vadd.f32 %v3642_v35, %v10070_v16  ;;  %7374 = vmatprep.mubr.f32.mxu1 %v3998_v34  ;;  %v3936_v4 = vadd.f32 %v10079_v22, %v3868_v47 }
 0x5dc   : > { %v3871_v0 = vmul.f32 %v10074_v15, %v3648_v2  ;;  %7375 = vmatmul.mubr.f32.gmra.mrb[152].mxu1 %v3999_v6  ;;  %v4001_v51 = vmax.f32 %v3937_v48, 0.0 }
 0x5dd   : > { %v3870_v63 = vmul.f32 %v10074_v15, %v3643_v8  ;;  %v7257_v9 = vpop.f32.mrb[158].mxu0  ;;  %v4000_v27 = vmax.f32 %v3936_v4, 0.0 }
 0x5de   : > { %v3658_v32 = vadd.f32 %v7257_v9, %v10070_v16  ;;  %v3652_v5 = vpop.f32.mrb[159].mxu0  ;;  %v3939_v20 = vadd.f32 %v10079_v22, %v3871_v0 }
 0x5df   : > { %v3653_v62 = vadd.f32 %v3652_v5, %v10070_v16  ;;  %7377 = vmatprep.mubr.f32.mxu1 %v4000_v27  ;;  %v3938_v49 = vadd.f32 %v10079_v22, %v3870_v63 }
 0x5e0   : > { %v3873_v3 = vmul.f32 %v10074_v15, %v3658_v32  ;;  %7378 = vmatmul.mubr.f32.gmra.mrb[154].mxu1 %v4001_v51  ;;  %v4003_v50 = vmax.f32 %v3939_v20, 0.0 }
 0x5e1   : > { %v3872_v17 = vmul.f32 %v10074_v15, %v3653_v62  ;;  %v7260_v19 = vpop.f32.mrb[160].mxu0  ;;  %v4002_v21 = vmax.f32 %v3938_v49, 0.0 }
 0x5e2   : > { %v3668_v23 = vadd.f32 %v7260_v19, %v10070_v16  ;;  %v3662_v24 = vpop.f32.mrb[161].mxu0  ;;  %v3941_v25 = vadd.f32 %v10079_v22, %v3873_v3 }
 0x5e3   : > { %v3663_v52 = vadd.f32 %v3662_v24, %v10070_v16  ;;  %7380 = vmatprep.mubr.f32.mxu1 %v4002_v21  ;;  %v3940_v53 = vadd.f32 %v10079_v22, %v3872_v17 }
 0x5e4   : > { %v3875_v54 = vmul.f32 %v10074_v15, %v3668_v23  ;;  %7381 = vmatmul.mubr.f32.gmra.mrb[156].mxu1 %v4003_v50  ;;  %v4005_v61 = vmax.f32 %v3941_v25, 0.0 }
 0x5e5   : > { %v3874_v55 = vmul.f32 %v10074_v15, %v3663_v52  ;;  %v7263_v58 = vpop.f32.mrb[162].mxu0  ;;  %v4004_v59 = vmax.f32 %v3940_v53, 0.0 }
 0x5e6   : > { %v3678_v56 = vadd.f32 %v7263_v58, %v10070_v16  ;;  %v3672_v60 = vpop.f32.mrb[163].mxu0  ;;  %v3943_v10 = vadd.f32 %v10079_v22, %v3875_v54 }
 0x5e7   : > { %v3673_v38 = vadd.f32 %v3672_v60, %v10070_v16  ;;  %7383 = vmatprep.mubr.f32.mxu1 %v4004_v59  ;;  %v3942_v39 = vadd.f32 %v10079_v22, %v3874_v55 }
 0x5e8   : > { %v3877_v57 = vmul.f32 %v10074_v15, %v3678_v56  ;;  %7384 = vmatmul.mubr.f32.gmra.mrb[158].mxu1 %v4005_v61  ;;  %v4007_v45 = vmax.f32 %v3943_v10, 0.0 }
 0x5e9   : > { %v3876_v37 = vmul.f32 %v10074_v15, %v3673_v38  ;;  %v7266_v40 = vpop.f32.mrb[164].mxu0  ;;  %v4006_v43 = vmax.f32 %v3942_v39, 0.0 }
 0x5ea   : > { %v3688_v44 = vadd.f32 %v7266_v40, %v10070_v16  ;;  %v3682_v1 = vpop.f32.mrb[165].mxu0  ;;  %v3945_v14 = vadd.f32 %v10079_v22, %v3877_v57 }
 0x5eb   : > { %v3683_v46 = vadd.f32 %v3682_v1, %v10070_v16  ;;  %7386 = vmatprep.mubr.f32.mxu1 %v4006_v43  ;;  %v3944_v29 = vadd.f32 %v10079_v22, %v3876_v37 }
 0x5ec   : > { %v3879_v7 = vmul.f32 %v10074_v15, %v3688_v44  ;;  %7387 = vmatmul.mubr.f32.gmra.mrb[160].mxu1 %v4007_v45  ;;  %v4009_v42 = vmax.f32 %v3945_v14, 0.0 }
 0x5ed   : > { %v3878_v30 = vmul.f32 %v10074_v15, %v3683_v46  ;;  %v7269_v31 = vpop.f32.mrb[166].mxu0  ;;  %v4008_v33 = vmax.f32 %v3944_v29, 0.0 }
 0x5ee   : > { %v3698_v36 = vadd.f32 %v7269_v31, %v10070_v16  ;;  %v3692_v41 = vpop.f32.mrb[167].mxu0  ;;  %v3947_v26 = vadd.f32 %v10079_v22, %v3879_v7 }
 0x5ef   : > { %v3693_v47 = vadd.f32 %v3692_v41, %v10070_v16  ;;  %7389 = vmatprep.mubr.f32.mxu1 %v4008_v33  ;;  %v3946_v28 = vadd.f32 %v10079_v22, %v3878_v30 }
 0x5f0   : > { %v3881_v34 = vmul.f32 %v10074_v15, %v3698_v36  ;;  %7390 = vmatmul.mubr.f32.gmra.mrb[162].mxu1 %v4009_v42  ;;  %v4011_v4 = vmax.f32 %v3947_v26, 0.0 }
 0x5f1   : > { %v3880_v2 = vmul.f32 %v10074_v15, %v3693_v47  ;;  %v7272_v35 = vpop.f32.mrb[168].mxu0  ;;  %v4010_v6 = vmax.f32 %v3946_v28, 0.0 }
 0x5f2   : > { %v3708_v48 = vadd.f32 %v7272_v35, %v10070_v16  ;;  %v3702_v8 = vpop.f32.mrb[169].mxu0  ;;  %v3949_v0 = vadd.f32 %v10079_v22, %v3881_v34 }
 0x5f3   : > { %v3703_v63 = vadd.f32 %v3702_v8, %v10070_v16  ;;  %7392 = vmatprep.mubr.f32.mxu1 %v4010_v6  ;;  %v3948_v9 = vadd.f32 %v10079_v22, %v3880_v2 }
 0x5f4   : > { %v3883_v27 = vmul.f32 %v10074_v15, %v3708_v48  ;;  %7393 = vmatmul.mubr.f32.gmra.mrb[164].mxu1 %v4011_v4  ;;  %v4013_v49 = vmax.f32 %v3949_v0, 0.0 }
 0x5f5   : > { %v3882_v32 = vmul.f32 %v10074_v15, %v3703_v63  ;;  %v7275_v5 = vpop.f32.mrb[170].mxu0  ;;  %v4012_v51 = vmax.f32 %v3948_v9, 0.0 }
 0x5f6   : > { %v3718_v20 = vadd.f32 %v7275_v5, %v10070_v16  ;;  %v3712_v62 = vpop.f32.mrb[171].mxu0  ;;  %v3951_v3 = vadd.f32 %v10079_v22, %v3883_v27 }
 0x5f7   : > { %v3713_v17 = vadd.f32 %v3712_v62, %v10070_v16  ;;  %7395 = vmatprep.mubr.f32.mxu1 %v4012_v51  ;;  %v3950_v19 = vadd.f32 %v10079_v22, %v3882_v32 }
 0x5f8   : > { %v3885_v21 = vmul.f32 %v10074_v15, %v3718_v20  ;;  %7396 = vmatmul.mubr.f32.gmra.mrb[166].mxu1 %v4013_v49  ;;  %v4015_v53 = vmax.f32 %v3951_v3, 0.0 }
 0x5f9   : > { %v3884_v23 = vmul.f32 %v10074_v15, %v3713_v17  ;;  %v7278_v24 = vpop.f32.mrb[172].mxu0  ;;  %v4014_v50 = vmax.f32 %v3950_v19, 0.0 }
 0x5fa   : > { %v3728_v25 = vadd.f32 %v7278_v24, %v10070_v16  ;;  %v3722_v52 = vpop.f32.mrb[173].mxu0  ;;  %v3953_v54 = vadd.f32 %v10079_v22, %v3885_v21 }
 0x5fb   : > { %v3723_v55 = vadd.f32 %v3722_v52, %v10070_v16  ;;  %7398 = vmatprep.mubr.f32.mxu1 %v4014_v50  ;;  %v3952_v58 = vadd.f32 %v10079_v22, %v3884_v23 }
 0x5fc   : > { %v3887_v59 = vmul.f32 %v10074_v15, %v3728_v25  ;;  %7399 = vmatmul.mubr.f32.gmra.mrb[168].mxu1 %v4015_v53  ;;  %v4017_v39 = vmax.f32 %v3953_v54, 0.0 }
 0x5fd   : > { %v3886_v56 = vmul.f32 %v10074_v15, %v3723_v55  ;;  %v7281_v60 = vpop.f32.mrb[174].mxu0  ;;  %v4016_v61 = vmax.f32 %v3952_v58, 0.0 }
 0x5fe   : > { %v3738_v10 = vadd.f32 %v7281_v60, %v10070_v16  ;;  %v3732_v38 = vpop.f32.mrb[175].mxu0  ;;  %v3955_v57 = vadd.f32 %v10079_v22, %v3887_v59 }
 0x5ff   : > { %v3733_v37 = vadd.f32 %v3732_v38, %v10070_v16  ;;  %7401 = vmatprep.mubr.f32.mxu1 %v4016_v61  ;;  %v3954_v40 = vadd.f32 %v10079_v22, %v3886_v56 }
 0x600   : > { %v3889_v43 = vmul.f32 %v10074_v15, %v3738_v10  ;;  %7402 = vmatmul.mubr.f32.gmra.mrb[170].mxu1 %v4017_v39  ;;  %v4019_v29 = vmax.f32 %v3955_v57, 0.0 }
 0x601   : > { %v3888_v44 = vmul.f32 %v10074_v15, %v3733_v37  ;;  %v7284_v1 = vpop.f32.mrb[176].mxu0  ;;  %v4018_v45 = vmax.f32 %v3954_v40, 0.0 }
 0x602   : > { %v3748_v14 = vadd.f32 %v7284_v1, %v10070_v16  ;;  %v3742_v46 = vpop.f32.mrb[177].mxu0  ;;  %v3957_v7 = vadd.f32 %v10079_v22, %v3889_v43 }
 0x603   : > { %v3743_v30 = vadd.f32 %v3742_v46, %v10070_v16  ;;  %7404 = vmatprep.mubr.f32.mxu1 %v4018_v45  ;;  %v3956_v31 = vadd.f32 %v10079_v22, %v3888_v44 }
 0x604   : > { %v3891_v33 = vmul.f32 %v10074_v15, %v3748_v14  ;;  %7405 = vmatmul.mubr.f32.gmra.mrb[172].mxu1 %v4019_v29  ;;  %v4021_v28 = vmax.f32 %v3957_v7, 0.0 }
 0x605   : > { %v3890_v36 = vmul.f32 %v10074_v15, %v3743_v30  ;;  %v7287_v41 = vpop.f32.mrb[178].mxu0  ;;  %v4020_v42 = vmax.f32 %v3956_v31, 0.0 }
 0x606   : > { %v3758_v26 = vadd.f32 %v7287_v41, %v10070_v16  ;;  %v3752_v47 = vpop.f32.mrb[179].mxu0  ;;  %v3959_v34 = vadd.f32 %v10079_v22, %v3891_v33 }
 0x607   : > { %v3753_v2 = vadd.f32 %v3752_v47, %v10070_v16  ;;  %7407 = vmatprep.mubr.f32.mxu1 %v4020_v42  ;;  %v3958_v35 = vadd.f32 %v10079_v22, %v3890_v36 }
 0x608   : > { %v3893_v6 = vmul.f32 %v10074_v15, %v3758_v26  ;;  %7408 = vmatmul.mubr.f32.gmra.mrb[174].mxu1 %v4021_v28  ;;  %v4023_v9 = vmax.f32 %v3959_v34, 0.0 }
 0x609   : > { %v3892_v48 = vmul.f32 %v10074_v15, %v3753_v2  ;;  %v7290_v8 = vpop.f32.mrb[180].mxu0  ;;  %v4022_v4 = vmax.f32 %v3958_v35, 0.0 }
 0x60a   : > { %v3768_v0 = vadd.f32 %v7290_v8, %v10070_v16  ;;  %v3762_v63 = vpop.f32.mrb[181].mxu0  ;;  %v3961_v27 = vadd.f32 %v10079_v22, %v3893_v6 }
 0x60b   : > { %v3763_v32 = vadd.f32 %v3762_v63, %v10070_v16  ;;  %7410 = vmatprep.mubr.f32.mxu1 %v4022_v4  ;;  %v3960_v5 = vadd.f32 %v10079_v22, %v3892_v48 }
 0x60c   : > { %v3895_v51 = vmul.f32 %v10074_v15, %v3768_v0  ;;  %7411 = vmatmul.mubr.f32.gmra.mrb[176].mxu1 %v4023_v9  ;;  %v4025_v19 = vmax.f32 %v3961_v27, 0.0 }
 0x60d   : > { %v3894_v20 = vmul.f32 %v10074_v15, %v3763_v32  ;;  %v7293_v62 = vpop.f32.mrb[182].mxu0  ;;  %v4024_v49 = vmax.f32 %v3960_v5, 0.0 }
 0x60e   : > { %v3778_v3 = vadd.f32 %v7293_v62, %v10070_v16  ;;  %v3772_v17 = vpop.f32.mrb[183].mxu0  ;;  %v3963_v21 = vadd.f32 %v10079_v22, %v3895_v51 }
 0x60f   : > { %v3773_v23 = vadd.f32 %v3772_v17, %v10070_v16  ;;  %7413 = vmatprep.mubr.f32.mxu1 %v4024_v49  ;;  %v3962_v24 = vadd.f32 %v10079_v22, %v3894_v20  ;;  %v5035_v20 = vld [vmem:[#allocation16 + $0x8] sm:$0xff]  ;;  %v5036_v49 = vld [vmem:[#allocation16 + $0x10] sm:$0xff] }
 0x610   : > { %v3897_v50 = vmul.f32 %v10074_v15, %v3778_v3  ;;  %7414 = vmatmul.mubr.f32.gmra.mrb[178].mxu1 %v4025_v19  ;;  %v4027_v58 = vmax.f32 %v3963_v21, 0.0  ;;  %v5037_v3 = vld [vmem:[#allocation16 + $0x18] sm:$0xff] }
 0x611   : > { %v3896_v25 = vmul.f32 %v10074_v15, %v3773_v23  ;;  %v7296_v52 = vpop.f32.mrb[184].mxu0  ;;  %v4026_v53 = vmax.f32 %v3962_v24, 0.0  ;;  %v7918_v17 = vpack.c.bf16 %v5037_v3, %v5036_v49 }
 0x612   : > { %v3788_v54 = vadd.f32 %v7296_v52, %v10070_v16  ;;  %v3782_v55 = vpop.f32.mrb[185].mxu0  ;;  %v3965_v59 = vadd.f32 %v10079_v22, %v3897_v50 }
 0x613   : > { %v3783_v56 = vadd.f32 %v3782_v55, %v10070_v16  ;;  %7416 = vmatprep.mubr.f32.mxu1 %v4026_v53  ;;  %v3964_v60 = vadd.f32 %v10079_v22, %v3896_v25 }
 0x614   : > { %v3899_v61 = vmul.f32 %v10074_v15, %v3788_v54  ;;  %7417 = vmatmul.mubr.f32.gmra.mrb[180].mxu1 %v4027_v58  ;;  %v4029_v40 = vmax.f32 %v3965_v59, 0.0 }
 0x615   : > { %v3898_v10 = vmul.f32 %v10074_v15, %v3783_v56  ;;  %v7299_v38 = vpop.f32.mrb[186].mxu0  ;;  %v4028_v39 = vmax.f32 %v3964_v60, 0.0 }
 0x616   : > { %v3798_v57 = vadd.f32 %v7299_v38, %v10070_v16  ;;  %v3792_v37 = vpop.f32.mrb[187].mxu0  ;;  %v3967_v43 = vadd.f32 %v10079_v22, %v3899_v61  ;;  %v5038_v61 = vld [vmem:[#allocation16 + $0x20] sm:$0xff]  ;;  %v5040_v38 = vld [vmem:[#allocation16 + $0x30] sm:$0xff] }
 0x617   : > { %v3793_v44 = vadd.f32 %v3792_v37, %v10070_v16  ;;  %7419 = vmatprep.mubr.f32.mxu1 %v4028_v39  ;;  %v3966_v1 = vadd.f32 %v10079_v22, %v3898_v10  ;;  %v5039_v10 = vld [vmem:[#allocation16 + $0x28] sm:$0xff] }
 0x618   : > { %v3901_v45 = vmul.f32 %v10074_v15, %v3798_v57  ;;  %7420 = vmatmul.mubr.f32.gmra.mrb[182].mxu1 %v4029_v40  ;;  %v4031_v31 = vmax.f32 %v3967_v43, 0.0  ;;  %v7922_v40 = vpack.c.bf16 %v5039_v10, %v5038_v61  ;;  %v5041_v43 = vld [vmem:[#allocation16 + $0x38] sm:$0xff] }
 0x619   : > { %v3900_v14 = vmul.f32 %v10074_v15, %v3793_v44  ;;  %v7302_v46 = vpop.f32.mrb[188].mxu0  ;;  %v4030_v29 = vmax.f32 %v3966_v1, 0.0 }
 0x61a   : > { %v3808_v7 = vadd.f32 %v7302_v46, %v10070_v16  ;;  %v3802_v30 = vpop.f32.mrb[189].mxu0  ;;  %v3969_v33 = vadd.f32 %v10079_v22, %v3901_v45  ;;  %v7926_v46 = vpack.c.bf16 %v5041_v43, %v5040_v38 }
 0x61b   : > { %v3803_v36 = vadd.f32 %v3802_v30, %v10070_v16  ;;  %7422 = vmatprep.mubr.f32.mxu1 %v4030_v29  ;;  %v3968_v41 = vadd.f32 %v10079_v22, %v3900_v14  ;;  %v5042_v29 = vld [vmem:[#allocation16 + $0x40] sm:$0xff] }
 0x61c   : > { %v3903_v42 = vmul.f32 %v10074_v15, %v3808_v7  ;;  %7423 = vmatmul.mubr.f32.gmra.mrb[184].mxu1 %v4031_v31  ;;  %v4033_v35 = vmax.f32 %v3969_v33, 0.0  ;;  %v5043_v7 = vld [vmem:[#allocation16 + $0x48] sm:$0xff] }
 0x61d   : > { %v3902_v26 = vmul.f32 %v10074_v15, %v3803_v36  ;;  %v7305_v47 = vpop.f32.mrb[190].mxu0  ;;  %v4032_v28 = vmax.f32 %v3968_v41, 0.0 }
 0x61e   : > { %v3818_v34 = vadd.f32 %v7305_v47, %v10070_v16  ;;  %v3812_v2 = vpop.f32.mrb[191].mxu0  ;;  %v3971_v6 = vadd.f32 %v10079_v22, %v3903_v42 }
 0x61f   : > { %v3813_v48 = vadd.f32 %v3812_v2, %v10070_v16  ;;  %7425 = vmatprep.mubr.f32.mxu1 %v4032_v28  ;;  %v3970_v8 = vadd.f32 %v10079_v22, %v3902_v26  ;;  %v5034_v16 = vld [vmem:[#allocation16] sm:$0xff]  ;;  %v7930_v26 = vpack.c.bf16 %v5043_v7, %v5042_v29 }
 0x620   : > { %v3905_v4 = vmul.f32 %v10074_v15, %v3818_v34  ;;  %7426 = vmatmul.mubr.f32.gmra.mrb[186].mxu1 %v4033_v35  ;;  %v4035_v9 = vmax.f32 %v3971_v6, 0.0  ;;  %v7914_v62 = vpack.c.bf16 %v5035_v20, %v5034_v16  ;;  %v5044_v35 = vld [vmem:[#allocation16 + $0x50] sm:$0xff]  ;;  %v5045_v6 = vld [vmem:[#allocation16 + $0x58] sm:$0xff]  ;;  %v5046_v20 = vld [vmem:[#allocation16 + $0x60] sm:$0xff] }
 0x621   : > { %v3904_v0 = vmul.f32 %v10074_v15, %v3813_v48  ;;  %v4034_v63 = vmax.f32 %v3970_v8, 0.0  ;;  %v10275_v15 = vld [vmem:[%s11119_s2] sm:$0xff] }
 0x622   : > { %v3973_v27 = vadd.f32 %v10079_v22, %v3905_v4  ;;  %7915 = vmatprep.subr.bf16.mxu1 %v7914_v62  ;;  %v10283_v19 = vrot.slane %v10275_v15, %v11114_v12  ;;  %v10288_v24 = vrot.slane %v10275_v15, %v11115_v18 }
 0x623   : > { %7428 = vmatprep.mubr.f32.mxu1 %v4034_v63  ;;  %v3972_v32 = vadd.f32 %v10079_v22, %v3904_v0  ;;  %7917 = vmatpush3.bf16.msra.mxu1 %v7914_v62  ;;  %v10279_v22 = vrot.slane %v10066_v13, %v9225_v11  ;;  %v5047_v62 = vld [vmem:[#allocation16 + $0x68] sm:$0xff] }
 0x624   : > { %7429 = vmatmul.mubr.f32.gmra.mrb[188].mxu1 %v4035_v9  ;;  %v4037_v51 = vmax.f32 %v3973_v27, 0.0  ;;  %7919 = vmatprep.subr.bf16.mxu1 %v7918_v17  ;;  %v7934_v27 = vpack.c.bf16 %v5045_v6, %v5044_v35 }
 0x625   : > { %v4036_v5 = vmax.f32 %v3972_v32, 0.0 }
 0x627   : > { %7431 = vmatprep.mubr.f32.mxu1 %v4036_v5  ;;  %7921 = vmatpush3.bf16.msra.mxu1 %v7918_v17 }
 0x628   : > { %7432 = vmatmul.mubr.f32.gmra.mrb[190].mxu1 %v4037_v51  ;;  %7923 = vmatprep.subr.bf16.mxu1 %v7922_v40 }
 0x62b   : > { %7925 = vmatpush3.bf16.msra.mxu1 %v7922_v40 }
 0x62c   : > { %7927 = vmatprep.subr.bf16.mxu1 %v7926_v46 }
 0x62f   : > { %7929 = vmatpush3.bf16.msra.mxu1 %v7926_v46 }
 0x630   : > { %7931 = vmatprep.subr.bf16.mxu1 %v7930_v26 }
 0x633   : > { %7933 = vmatpush3.bf16.msra.mxu1 %v7930_v26 }
 0x634   : > { %7935 = vmatprep.subr.bf16.mxu1 %v7934_v27 }
 0x637   : > { %7937 = vmatpush3.bf16.msra.mxu1 %v7934_v27 }
 0x67f   : > { %v7340_v21 = vpop.f32.mrb[128].mxu1 }
 0x680   : > { %v4114_v23 = vadd.f32 %v7340_v21, %v10279_v22  ;;  %v4108_v50 = vpop.f32.mrb[129].mxu1 }
 0x681   : > { %v4109_v25 = vadd.f32 %v4108_v50, %v10279_v22 }
 0x682   : > { %v4449_v52 = vmul.f32 %v10283_v19, %v4114_v23 }
 0x683   : > { %v4448_v13 = vmul.f32 %v10283_v19, %v4109_v25  ;;  %v7343_v53 = vpop.f32.mrb[130].mxu1  ;;  %v7938_v25 = vpack.c.bf16 %v5047_v62, %v5046_v20 }
 0x684   : > { %v4517_v54 = vadd.f32 %v10288_v24, %v4449_v52  ;;  %v4124_v55 = vadd.f32 %v7343_v53, %v10279_v22  ;;  %v4118_v58 = vpop.f32.mrb[131].mxu1 }
 0x685   : > { %v4119_v59 = vadd.f32 %v4118_v58, %v10279_v22  ;;  %v4516_v56 = vadd.f32 %v10288_v24, %v4448_v13  ;;  %v5049_v58 = vld [vmem:[#allocation16 + $0x78] sm:$0xff]  ;;  %7939 = vmatprep.subr.bf16.mxu1 %v7938_v25 }
 0x686   : > { %v4451_v60 = vmul.f32 %v10283_v19, %v4124_v55  ;;  %v4581_v44 = vmax.f32 %v4517_v54, 0.0  ;;  %v5048_v55 = vld [vmem:[#allocation16 + $0x70] sm:$0xff]  ;;  %7941 = vmatpush3.bf16.msra.mxu1 %v7938_v25 }
 0x687   : > { %v4450_v39 = vmul.f32 %v10283_v19, %v4119_v59  ;;  %v7346_v57 = vpop.f32.mrb[132].mxu1  ;;  %v4580_v37 = vmax.f32 %v4516_v56, 0.0 }
 0x688   : > { %v4134_v1 = vadd.f32 %v7346_v57, %v10279_v22  ;;  %v4128_v45 = vpop.f32.mrb[133].mxu1  ;;  %v4519_v14 = vadd.f32 %v10288_v24, %v4451_v60 }
 0x689   : > { %v4129_v30 = vadd.f32 %v4128_v45, %v10279_v22  ;;  %7466 = vmatprep.mubr.f32.mxu0 %v4580_v37  ;;  %v4518_v31 = vadd.f32 %v10288_v24, %v4450_v39  ;;  %v7942_v39 = vpack.c.bf16 %v5049_v58, %v5048_v55 }
 0x68a   : > { %v4453_v33 = vmul.f32 %v10283_v19, %v4134_v1  ;;  %7467 = vmatmul.mubr.f32.vlgmr.msra.gmra.mrb[192].mxu0 %v4581_v44  ;;  %v4583_v34 = vmax.f32 %v4519_v14, 0.0 }
 0x68b   : > { %v4452_v36 = vmul.f32 %v10283_v19, %v4129_v30  ;;  %v7349_v41 = vpop.f32.mrb[134].mxu1  ;;  %v4582_v42 = vmax.f32 %v4518_v31, 0.0  ;;  %7943 = vmatprep.subr.bf16.mxu1 %v7942_v39 }
 0x68c   : > { %v4144_v47 = vadd.f32 %v7349_v41, %v10279_v22  ;;  %v4138_v28 = vpop.f32.mrb[135].mxu1  ;;  %v4521_v2 = vadd.f32 %v10288_v24, %v4453_v33  ;;  %7945 = vmatpush3.bf16.msra.mxu1 %v7942_v39 }
 0x68d   : > { %v4139_v48 = vadd.f32 %v4138_v28, %v10279_v22  ;;  %7469 = vmatprep.mubr.f32.mxu0 %v4582_v42  ;;  %v4520_v8 = vadd.f32 %v10288_v24, %v4452_v36 }
 0x68e   : > { %v4455_v4 = vmul.f32 %v10283_v19, %v4144_v47  ;;  %7470 = vmatmul.mubr.f32.gmra.mrb[194].mxu0 %v4583_v34  ;;  %v4585_v51 = vmax.f32 %v4521_v2, 0.0 }
 0x68f   : > { %v4454_v0 = vmul.f32 %v10283_v19, %v4139_v48  ;;  %v7352_v63 = vpop.f32.mrb[136].mxu1  ;;  %v4584_v9 = vmax.f32 %v4520_v8, 0.0 }
 0x690   : > { %v4154_v32 = vadd.f32 %v7352_v63, %v10279_v22  ;;  %v4148_v5 = vpop.f32.mrb[137].mxu1  ;;  %v4523_v16 = vadd.f32 %v10288_v24, %v4455_v4 }
 0x691   : > { %v4149_v49 = vadd.f32 %v4148_v5, %v10279_v22  ;;  %7472 = vmatprep.mubr.f32.mxu0 %v4584_v9  ;;  %v4522_v3 = vadd.f32 %v10288_v24, %v4454_v0 }
 0x692   : > { %v4457_v17 = vmul.f32 %v10283_v19, %v4154_v32  ;;  %7473 = vmatmul.mubr.f32.gmra.mrb[196].mxu0 %v4585_v51  ;;  %v4587_v53 = vmax.f32 %v4523_v16, 0.0 }
 0x693   : > { %v4456_v21 = vmul.f32 %v10283_v19, %v4149_v49  ;;  %v7355_v23 = vpop.f32.mrb[138].mxu1  ;;  %v4586_v50 = vmax.f32 %v4522_v3, 0.0 }
 0x694   : > { %v4164_v52 = vadd.f32 %v7355_v23, %v10279_v22  ;;  %v4158_v13 = vpop.f32.mrb[139].mxu1  ;;  %v4525_v54 = vadd.f32 %v10288_v24, %v4457_v17 }
 0x695   : > { %v4159_v59 = vadd.f32 %v4158_v13, %v10279_v22  ;;  %7475 = vmatprep.mubr.f32.mxu0 %v4586_v50  ;;  %v4524_v56 = vadd.f32 %v10288_v24, %v4456_v21 }
 0x696   : > { %v4459_v60 = vmul.f32 %v10283_v19, %v4164_v52  ;;  %7476 = vmatmul.mubr.f32.gmra.mrb[198].mxu0 %v4587_v53  ;;  %v4589_v40 = vmax.f32 %v4525_v54, 0.0 }
 0x697   : > { %v4458_v61 = vmul.f32 %v10283_v19, %v4159_v59  ;;  %v7358_v10 = vpop.f32.mrb[140].mxu1  ;;  %v4588_v38 = vmax.f32 %v4524_v56, 0.0 }
 0x698   : > { %v4174_v57 = vadd.f32 %v7358_v10, %v10279_v22  ;;  %v4168_v37 = vpop.f32.mrb[141].mxu1  ;;  %v4527_v43 = vadd.f32 %v10288_v24, %v4459_v60 }
 0x699   : > { %v4169_v44 = vadd.f32 %v4168_v37, %v10279_v22  ;;  %7478 = vmatprep.mubr.f32.mxu0 %v4588_v38  ;;  %v4526_v1 = vadd.f32 %v10288_v24, %v4458_v61 }
 0x69a   : > { %v4461_v45 = vmul.f32 %v10283_v19, %v4174_v57  ;;  %7479 = vmatmul.mubr.f32.gmra.mrb[200].mxu0 %v4589_v40  ;;  %v4591_v31 = vmax.f32 %v4527_v43, 0.0 }
 0x69b   : > { %v4460_v14 = vmul.f32 %v10283_v19, %v4169_v44  ;;  %v7361_v46 = vpop.f32.mrb[142].mxu1  ;;  %v4590_v29 = vmax.f32 %v4526_v1, 0.0 }
 0x69c   : > { %v4184_v7 = vadd.f32 %v7361_v46, %v10279_v22  ;;  %v4178_v30 = vpop.f32.mrb[143].mxu1  ;;  %v4529_v33 = vadd.f32 %v10288_v24, %v4461_v45 }
 0x69d   : > { %v4179_v36 = vadd.f32 %v4178_v30, %v10279_v22  ;;  %7481 = vmatprep.mubr.f32.mxu0 %v4590_v29  ;;  %v4528_v41 = vadd.f32 %v10288_v24, %v4460_v14 }
 0x69e   : > { %v4463_v42 = vmul.f32 %v10283_v19, %v4184_v7  ;;  %7482 = vmatmul.mubr.f32.gmra.mrb[202].mxu0 %v4591_v31  ;;  %v4593_v35 = vmax.f32 %v4529_v33, 0.0 }
 0x69f   : > { %v4462_v26 = vmul.f32 %v10283_v19, %v4179_v36  ;;  %v7364_v47 = vpop.f32.mrb[144].mxu1  ;;  %v4592_v28 = vmax.f32 %v4528_v41, 0.0 }
 0x6a0   : > { %v4194_v34 = vadd.f32 %v7364_v47, %v10279_v22  ;;  %v4188_v2 = vpop.f32.mrb[145].mxu1  ;;  %v4531_v6 = vadd.f32 %v10288_v24, %v4463_v42 }
 0x6a1   : > { %v4189_v48 = vadd.f32 %v4188_v2, %v10279_v22  ;;  %7484 = vmatprep.mubr.f32.mxu0 %v4592_v28  ;;  %v4530_v8 = vadd.f32 %v10288_v24, %v4462_v26 }
 0x6a2   : > { %v4465_v4 = vmul.f32 %v10283_v19, %v4194_v34  ;;  %7485 = vmatmul.mubr.f32.gmra.mrb[204].mxu0 %v4593_v35  ;;  %v4595_v5 = vmax.f32 %v4531_v6, 0.0 }
 0x6a3   : > { %v4464_v0 = vmul.f32 %v10283_v19, %v4189_v48  ;;  %v7367_v63 = vpop.f32.mrb[146].mxu1  ;;  %v4594_v9 = vmax.f32 %v4530_v8, 0.0 }
 0x6a4   : > { %v4204_v27 = vadd.f32 %v7367_v63, %v10279_v22  ;;  %v4198_v32 = vpop.f32.mrb[147].mxu1  ;;  %v4533_v51 = vadd.f32 %v10288_v24, %v4465_v4 }
 0x6a5   : > { %v4199_v16 = vadd.f32 %v4198_v32, %v10279_v22  ;;  %7487 = vmatprep.mubr.f32.mxu0 %v4594_v9  ;;  %v4532_v20 = vadd.f32 %v10288_v24, %v4464_v0 }
 0x6a6   : > { %v4467_v62 = vmul.f32 %v10283_v19, %v4204_v27  ;;  %7488 = vmatmul.mubr.f32.gmra.mrb[206].mxu0 %v4595_v5  ;;  %v4597_v50 = vmax.f32 %v4533_v51, 0.0 }
 0x6a7   : > { %v4466_v49 = vmul.f32 %v10283_v19, %v4199_v16  ;;  %v7370_v3 = vpop.f32.mrb[148].mxu1  ;;  %v4596_v17 = vmax.f32 %v4532_v20, 0.0 }
 0x6a8   : > { %v4214_v21 = vadd.f32 %v7370_v3, %v10279_v22  ;;  %v4208_v23 = vpop.f32.mrb[149].mxu1  ;;  %v4535_v25 = vadd.f32 %v10288_v24, %v4467_v62 }
 0x6a9   : > { %v4209_v52 = vadd.f32 %v4208_v23, %v10279_v22  ;;  %7490 = vmatprep.mubr.f32.mxu0 %v4596_v17  ;;  %v4534_v13 = vadd.f32 %v10288_v24, %v4466_v49 }
 0x6aa   : > { %v4469_v53 = vmul.f32 %v10283_v19, %v4214_v21  ;;  %7491 = vmatmul.mubr.f32.gmra.mrb[208].mxu0 %v4597_v50  ;;  %v4599_v60 = vmax.f32 %v4535_v25, 0.0 }
 0x6ab   : > { %v4468_v54 = vmul.f32 %v10283_v19, %v4209_v52  ;;  %v7373_v55 = vpop.f32.mrb[150].mxu1  ;;  %v4598_v58 = vmax.f32 %v4534_v13, 0.0 }
 0x6ac   : > { %v4224_v59 = vadd.f32 %v7373_v55, %v10279_v22  ;;  %v4218_v56 = vpop.f32.mrb[151].mxu1  ;;  %v4537_v61 = vadd.f32 %v10288_v24, %v4469_v53 }
 0x6ad   : > { %v4219_v10 = vadd.f32 %v4218_v56, %v10279_v22  ;;  %7493 = vmatprep.mubr.f32.mxu0 %v4598_v58  ;;  %v4536_v38 = vadd.f32 %v10288_v24, %v4468_v54 }
 0x6ae   : > { %v4471_v39 = vmul.f32 %v10283_v19, %v4224_v59  ;;  %7494 = vmatmul.mubr.f32.gmra.mrb[210].mxu0 %v4599_v60  ;;  %v4601_v1 = vmax.f32 %v4537_v61, 0.0 }
 0x6af   : > { %v4470_v57 = vmul.f32 %v10283_v19, %v4219_v10  ;;  %v7376_v37 = vpop.f32.mrb[152].mxu1  ;;  %v4600_v40 = vmax.f32 %v4536_v38, 0.0 }
 0x6b0   : > { %v4234_v43 = vadd.f32 %v7376_v37, %v10279_v22  ;;  %v4228_v44 = vpop.f32.mrb[153].mxu1  ;;  %v4539_v45 = vadd.f32 %v10288_v24, %v4471_v39 }
 0x6b1   : > { %v4229_v14 = vadd.f32 %v4228_v44, %v10279_v22  ;;  %7496 = vmatprep.mubr.f32.mxu0 %v4600_v40  ;;  %v4538_v46 = vadd.f32 %v10288_v24, %v4470_v57 }
 0x6b2   : > { %v4473_v29 = vmul.f32 %v10283_v19, %v4234_v43  ;;  %7497 = vmatmul.mubr.f32.gmra.mrb[212].mxu0 %v4601_v1  ;;  %v4603_v41 = vmax.f32 %v4539_v45, 0.0 }
 0x6b3   : > { %v4472_v7 = vmul.f32 %v10283_v19, %v4229_v14  ;;  %v7379_v30 = vpop.f32.mrb[154].mxu1  ;;  %v4602_v31 = vmax.f32 %v4538_v46, 0.0 }
 0x6b4   : > { %v4244_v33 = vadd.f32 %v7379_v30, %v10279_v22  ;;  %v4238_v36 = vpop.f32.mrb[155].mxu1  ;;  %v4541_v42 = vadd.f32 %v10288_v24, %v4473_v29 }
 0x6b5   : > { %v4239_v26 = vadd.f32 %v4238_v36, %v10279_v22  ;;  %7499 = vmatprep.mubr.f32.mxu0 %v4602_v31  ;;  %v4540_v47 = vadd.f32 %v10288_v24, %v4472_v7 }
 0x6b6   : > { %v4475_v28 = vmul.f32 %v10283_v19, %v4244_v33  ;;  %7500 = vmatmul.mubr.f32.gmra.mrb[214].mxu0 %v4603_v41  ;;  %v4605_v8 = vmax.f32 %v4541_v42, 0.0 }
 0x6b7   : > { %v4474_v34 = vmul.f32 %v10283_v19, %v4239_v26  ;;  %v7382_v2 = vpop.f32.mrb[156].mxu1  ;;  %v4604_v35 = vmax.f32 %v4540_v47, 0.0 }
 0x6b8   : > { %v4254_v6 = vadd.f32 %v7382_v2, %v10279_v22  ;;  %v4248_v48 = vpop.f32.mrb[157].mxu1  ;;  %v4543_v4 = vadd.f32 %v10288_v24, %v4475_v28 }
 0x6b9   : > { %v4249_v0 = vadd.f32 %v4248_v48, %v10279_v22  ;;  %7502 = vmatprep.mubr.f32.mxu0 %v4604_v35  ;;  %v4542_v63 = vadd.f32 %v10288_v24, %v4474_v34 }
 0x6ba   : > { %v4477_v9 = vmul.f32 %v10283_v19, %v4254_v6  ;;  %7503 = vmatmul.mubr.f32.gmra.mrb[216].mxu0 %v4605_v8  ;;  %v4607_v20 = vmax.f32 %v4543_v4, 0.0 }
 0x6bb   : > { %v4476_v27 = vmul.f32 %v10283_v19, %v4249_v0  ;;  %v7385_v32 = vpop.f32.mrb[158].mxu1  ;;  %v4606_v5 = vmax.f32 %v4542_v63, 0.0 }
 0x6bc   : > { %v4264_v51 = vadd.f32 %v7385_v32, %v10279_v22  ;;  %v4258_v16 = vpop.f32.mrb[159].mxu1  ;;  %v4545_v62 = vadd.f32 %v10288_v24, %v4477_v9 }
 0x6bd   : > { %v4259_v49 = vadd.f32 %v4258_v16, %v10279_v22  ;;  %7505 = vmatprep.mubr.f32.mxu0 %v4606_v5  ;;  %v4544_v3 = vadd.f32 %v10288_v24, %v4476_v27 }
 0x6be   : > { %v4479_v17 = vmul.f32 %v10283_v19, %v4264_v51  ;;  %7506 = vmatmul.mubr.f32.gmra.mrb[218].mxu0 %v4607_v20  ;;  %v4609_v13 = vmax.f32 %v4545_v62, 0.0 }
 0x6bf   : > { %v4478_v21 = vmul.f32 %v10283_v19, %v4259_v49  ;;  %v7388_v23 = vpop.f32.mrb[160].mxu1  ;;  %v4608_v50 = vmax.f32 %v4544_v3, 0.0 }
 0x6c0   : > { %v4274_v25 = vadd.f32 %v7388_v23, %v10279_v22  ;;  %v4268_v52 = vpop.f32.mrb[161].mxu1  ;;  %v4547_v53 = vadd.f32 %v10288_v24, %v4479_v17 }
 0x6c1   : > { %v4269_v54 = vadd.f32 %v4268_v52, %v10279_v22  ;;  %7508 = vmatprep.mubr.f32.mxu0 %v4608_v50  ;;  %v4546_v55 = vadd.f32 %v10288_v24, %v4478_v21 }
 0x6c2   : > { %v4481_v58 = vmul.f32 %v10283_v19, %v4274_v25  ;;  %7509 = vmatmul.mubr.f32.gmra.mrb[220].mxu0 %v4609_v13  ;;  %v4611_v38 = vmax.f32 %v4547_v53, 0.0 }
 0x6c3   : > { %v4480_v59 = vmul.f32 %v10283_v19, %v4269_v54  ;;  %v7391_v56 = vpop.f32.mrb[162].mxu1  ;;  %v4610_v60 = vmax.f32 %v4546_v55, 0.0 }
 0x6c4   : > { %v4284_v61 = vadd.f32 %v7391_v56, %v10279_v22  ;;  %v4278_v10 = vpop.f32.mrb[163].mxu1  ;;  %v4549_v39 = vadd.f32 %v10288_v24, %v4481_v58 }
 0x6c5   : > { %v4279_v57 = vadd.f32 %v4278_v10, %v10279_v22  ;;  %7511 = vmatprep.mubr.f32.mxu0 %v4610_v60  ;;  %v4548_v37 = vadd.f32 %v10288_v24, %v4480_v59 }
 0x6c6   : > { %v4483_v40 = vmul.f32 %v10283_v19, %v4284_v61  ;;  %7512 = vmatmul.mubr.f32.gmra.mrb[222].mxu0 %v4611_v38  ;;  %v4613_v46 = vmax.f32 %v4549_v39, 0.0 }
 0x6c7   : > { %v4482_v43 = vmul.f32 %v10283_v19, %v4279_v57  ;;  %v7394_v44 = vpop.f32.mrb[164].mxu1  ;;  %v4612_v1 = vmax.f32 %v4548_v37, 0.0 }
 0x6c8   : > { %v4294_v45 = vadd.f32 %v7394_v44, %v10279_v22  ;;  %v4288_v14 = vpop.f32.mrb[165].mxu1  ;;  %v4551_v29 = vadd.f32 %v10288_v24, %v4483_v40 }
 0x6c9   : > { %v4289_v7 = vadd.f32 %v4288_v14, %v10279_v22  ;;  %7514 = vmatprep.mubr.f32.mxu0 %v4612_v1  ;;  %v4550_v30 = vadd.f32 %v10288_v24, %v4482_v43 }
 0x6ca   : > { %v4485_v31 = vmul.f32 %v10283_v19, %v4294_v45  ;;  %7515 = vmatmul.mubr.f32.gmra.mrb[224].mxu0 %v4613_v46  ;;  %v4615_v47 = vmax.f32 %v4551_v29, 0.0 }
 0x6cb   : > { %v4484_v33 = vmul.f32 %v10283_v19, %v4289_v7  ;;  %v7397_v36 = vpop.f32.mrb[166].mxu1  ;;  %v4614_v41 = vmax.f32 %v4550_v30, 0.0 }
 0x6cc   : > { %v4304_v42 = vadd.f32 %v7397_v36, %v10279_v22  ;;  %v4298_v26 = vpop.f32.mrb[167].mxu1  ;;  %v4553_v28 = vadd.f32 %v10288_v24, %v4485_v31 }
 0x6cd   : > { %v4299_v34 = vadd.f32 %v4298_v26, %v10279_v22  ;;  %7517 = vmatprep.mubr.f32.mxu0 %v4614_v41  ;;  %v4552_v2 = vadd.f32 %v10288_v24, %v4484_v33 }
 0x6ce   : > { %v4487_v35 = vmul.f32 %v10283_v19, %v4304_v42  ;;  %7518 = vmatmul.mubr.f32.gmra.mrb[226].mxu0 %v4615_v47  ;;  %v4617_v63 = vmax.f32 %v4553_v28, 0.0 }
 0x6cf   : > { %v4486_v6 = vmul.f32 %v10283_v19, %v4299_v34  ;;  %v7400_v48 = vpop.f32.mrb[168].mxu1  ;;  %v4616_v8 = vmax.f32 %v4552_v2, 0.0 }
 0x6d0   : > { %v4314_v4 = vadd.f32 %v7400_v48, %v10279_v22  ;;  %v4308_v0 = vpop.f32.mrb[169].mxu1  ;;  %v4555_v9 = vadd.f32 %v10288_v24, %v4487_v35 }
 0x6d1   : > { %v4309_v27 = vadd.f32 %v4308_v0, %v10279_v22  ;;  %7520 = vmatprep.mubr.f32.mxu0 %v4616_v8  ;;  %v4554_v32 = vadd.f32 %v10288_v24, %v4486_v6 }
 0x6d2   : > { %v4489_v5 = vmul.f32 %v10283_v19, %v4314_v4  ;;  %7521 = vmatmul.mubr.f32.gmra.mrb[228].mxu0 %v4617_v63  ;;  %v4619_v3 = vmax.f32 %v4555_v9, 0.0 }
 0x6d3   : > { %v4488_v51 = vmul.f32 %v10283_v19, %v4309_v27  ;;  %v7403_v16 = vpop.f32.mrb[170].mxu1  ;;  %v4618_v20 = vmax.f32 %v4554_v32, 0.0 }
 0x6d4   : > { %v4324_v62 = vadd.f32 %v7403_v16, %v10279_v22  ;;  %v4318_v49 = vpop.f32.mrb[171].mxu1  ;;  %v4557_v17 = vadd.f32 %v10288_v24, %v4489_v5 }
 0x6d5   : > { %v4319_v21 = vadd.f32 %v4318_v49, %v10279_v22  ;;  %7523 = vmatprep.mubr.f32.mxu0 %v4618_v20  ;;  %v4556_v23 = vadd.f32 %v10288_v24, %v4488_v51 }
 0x6d6   : > { %v4491_v50 = vmul.f32 %v10283_v19, %v4324_v62  ;;  %7524 = vmatmul.mubr.f32.gmra.mrb[230].mxu0 %v4619_v3  ;;  %v4621_v55 = vmax.f32 %v4557_v17, 0.0 }
 0x6d7   : > { %v4490_v25 = vmul.f32 %v10283_v19, %v4319_v21  ;;  %v7406_v52 = vpop.f32.mrb[172].mxu1  ;;  %v4620_v13 = vmax.f32 %v4556_v23, 0.0 }
 0x6d8   : > { %v4334_v53 = vadd.f32 %v7406_v52, %v10279_v22  ;;  %v4328_v54 = vpop.f32.mrb[173].mxu1  ;;  %v4559_v58 = vadd.f32 %v10288_v24, %v4491_v50 }
 0x6d9   : > { %v4329_v59 = vadd.f32 %v4328_v54, %v10279_v22  ;;  %7526 = vmatprep.mubr.f32.mxu0 %v4620_v13  ;;  %v4558_v56 = vadd.f32 %v10288_v24, %v4490_v25 }
 0x6da   : > { %v4493_v60 = vmul.f32 %v10283_v19, %v4334_v53  ;;  %7527 = vmatmul.mubr.f32.gmra.mrb[232].mxu0 %v4621_v55  ;;  %v4623_v37 = vmax.f32 %v4559_v58, 0.0 }
 0x6db   : > { %v4492_v61 = vmul.f32 %v10283_v19, %v4329_v59  ;;  %v7409_v10 = vpop.f32.mrb[174].mxu1  ;;  %v4622_v38 = vmax.f32 %v4558_v56, 0.0 }
 0x6dc   : > { %v4344_v39 = vadd.f32 %v7409_v10, %v10279_v22  ;;  %v4338_v57 = vpop.f32.mrb[175].mxu1  ;;  %v4561_v40 = vadd.f32 %v10288_v24, %v4493_v60 }
 0x6dd   : > { %v4339_v43 = vadd.f32 %v4338_v57, %v10279_v22  ;;  %7529 = vmatprep.mubr.f32.mxu0 %v4622_v38  ;;  %v4560_v44 = vadd.f32 %v10288_v24, %v4492_v61 }
 0x6de   : > { %v4495_v1 = vmul.f32 %v10283_v19, %v4344_v39  ;;  %7530 = vmatmul.mubr.f32.gmra.mrb[234].mxu0 %v4623_v37  ;;  %v4625_v30 = vmax.f32 %v4561_v40, 0.0 }
 0x6df   : > { %v4494_v45 = vmul.f32 %v10283_v19, %v4339_v43  ;;  %v7412_v14 = vpop.f32.mrb[176].mxu1  ;;  %v4624_v46 = vmax.f32 %v4560_v44, 0.0 }
 0x6e0   : > { %v4354_v29 = vadd.f32 %v7412_v14, %v10279_v22  ;;  %v4348_v7 = vpop.f32.mrb[177].mxu1  ;;  %v4563_v31 = vadd.f32 %v10288_v24, %v4495_v1 }
 0x6e1   : > { %v4349_v33 = vadd.f32 %v4348_v7, %v10279_v22  ;;  %7532 = vmatprep.mubr.f32.mxu0 %v4624_v46  ;;  %v4562_v36 = vadd.f32 %v10288_v24, %v4494_v45 }
 0x6e2   : > { %v4497_v41 = vmul.f32 %v10283_v19, %v4354_v29  ;;  %7533 = vmatmul.mubr.f32.gmra.mrb[236].mxu0 %v4625_v30  ;;  %v4627_v2 = vmax.f32 %v4563_v31, 0.0 }
 0x6e3   : > { %v4496_v42 = vmul.f32 %v10283_v19, %v4349_v33  ;;  %v7415_v26 = vpop.f32.mrb[178].mxu1  ;;  %v4626_v47 = vmax.f32 %v4562_v36, 0.0 }
 0x6e4   : > { %v4364_v28 = vadd.f32 %v7415_v26, %v10279_v22  ;;  %v4358_v34 = vpop.f32.mrb[179].mxu1  ;;  %v4565_v35 = vadd.f32 %v10288_v24, %v4497_v41 }
 0x6e5   : > { %v4359_v6 = vadd.f32 %v4358_v34, %v10279_v22  ;;  %7535 = vmatprep.mubr.f32.mxu0 %v4626_v47  ;;  %v4564_v48 = vadd.f32 %v10288_v24, %v4496_v42 }
 0x6e6   : > { %v4499_v8 = vmul.f32 %v10283_v19, %v4364_v28  ;;  %7536 = vmatmul.mubr.f32.gmra.mrb[238].mxu0 %v4627_v2  ;;  %v4629_v32 = vmax.f32 %v4565_v35, 0.0 }
 0x6e7   : > { %v4498_v4 = vmul.f32 %v10283_v19, %v4359_v6  ;;  %v7418_v0 = vpop.f32.mrb[180].mxu1  ;;  %v4628_v63 = vmax.f32 %v4564_v48, 0.0 }
 0x6e8   : > { %v4374_v9 = vadd.f32 %v7418_v0, %v10279_v22  ;;  %v4368_v27 = vpop.f32.mrb[181].mxu1  ;;  %v4567_v5 = vadd.f32 %v10288_v24, %v4499_v8 }
 0x6e9   : > { %v4369_v51 = vadd.f32 %v4368_v27, %v10279_v22  ;;  %7538 = vmatprep.mubr.f32.mxu0 %v4628_v63  ;;  %v4566_v16 = vadd.f32 %v10288_v24, %v4498_v4 }
 0x6ea   : > { %v4501_v20 = vmul.f32 %v10283_v19, %v4374_v9  ;;  %7539 = vmatmul.mubr.f32.gmra.mrb[240].mxu0 %v4629_v32  ;;  %v4631_v23 = vmax.f32 %v4567_v5, 0.0 }
 0x6eb   : > { %v4500_v62 = vmul.f32 %v10283_v19, %v4369_v51  ;;  %v7421_v49 = vpop.f32.mrb[182].mxu1  ;;  %v4630_v3 = vmax.f32 %v4566_v16, 0.0 }
 0x6ec   : > { %v4384_v17 = vadd.f32 %v7421_v49, %v10279_v22  ;;  %v4378_v21 = vpop.f32.mrb[183].mxu1  ;;  %v4569_v50 = vadd.f32 %v10288_v24, %v4501_v20 }
 0x6ed   : > { %v4379_v25 = vadd.f32 %v4378_v21, %v10279_v22  ;;  %7541 = vmatprep.mubr.f32.mxu0 %v4630_v3  ;;  %v4568_v52 = vadd.f32 %v10288_v24, %v4500_v62 }
 0x6ee   : > { %v4503_v13 = vmul.f32 %v10283_v19, %v4384_v17  ;;  %7542 = vmatmul.mubr.f32.gmra.mrb[242].mxu0 %v4631_v23  ;;  %v4633_v56 = vmax.f32 %v4569_v50, 0.0 }
 0x6ef   : > { %v4502_v53 = vmul.f32 %v10283_v19, %v4379_v25  ;;  %v7424_v54 = vpop.f32.mrb[184].mxu1  ;;  %v4632_v55 = vmax.f32 %v4568_v52, 0.0 }
 0x6f0   : > { %v4394_v58 = vadd.f32 %v7424_v54, %v10279_v22  ;;  %v4388_v59 = vpop.f32.mrb[185].mxu1  ;;  %v4571_v60 = vadd.f32 %v10288_v24, %v4503_v13 }
 0x6f1   : > { %v4389_v61 = vadd.f32 %v4388_v59, %v10279_v22  ;;  %7544 = vmatprep.mubr.f32.mxu0 %v4632_v55  ;;  %v4570_v10 = vadd.f32 %v10288_v24, %v4502_v53 }
 0x6f2   : > { %v4505_v38 = vmul.f32 %v10283_v19, %v4394_v58  ;;  %7545 = vmatmul.mubr.f32.gmra.mrb[244].mxu0 %v4633_v56  ;;  %v4635_v44 = vmax.f32 %v4571_v60, 0.0 }
 0x6f3   : > { %v4504_v39 = vmul.f32 %v10283_v19, %v4389_v61  ;;  %v7427_v57 = vpop.f32.mrb[186].mxu1  ;;  %v4634_v37 = vmax.f32 %v4570_v10, 0.0 }
 0x6f4   : > { %v4404_v40 = vadd.f32 %v7427_v57, %v10279_v22  ;;  %v4398_v43 = vpop.f32.mrb[187].mxu1  ;;  %v4573_v1 = vadd.f32 %v10288_v24, %v4505_v38 }
 0x6f5   : > { %v4399_v45 = vadd.f32 %v4398_v43, %v10279_v22  ;;  %7547 = vmatprep.mubr.f32.mxu0 %v4634_v37  ;;  %v4572_v14 = vadd.f32 %v10288_v24, %v4504_v39 }
 0x6f6   : > { %v4507_v46 = vmul.f32 %v10283_v19, %v4404_v40  ;;  %7548 = vmatmul.mubr.f32.gmra.mrb[246].mxu0 %v4635_v44  ;;  %v4637_v36 = vmax.f32 %v4573_v1, 0.0 }
 0x6f7   : > { %v4506_v29 = vmul.f32 %v10283_v19, %v4399_v45  ;;  %v7430_v7 = vpop.f32.mrb[188].mxu1  ;;  %v4636_v30 = vmax.f32 %v4572_v14, 0.0 }
 0x6f8   : > { %v4414_v31 = vadd.f32 %v7430_v7, %v10279_v22  ;;  %v4408_v33 = vpop.f32.mrb[189].mxu1  ;;  %v4575_v41 = vadd.f32 %v10288_v24, %v4507_v46 }
 0x6f9   : > { %v4409_v42 = vadd.f32 %v4408_v33, %v10279_v22  ;;  %7550 = vmatprep.mubr.f32.mxu0 %v4636_v30  ;;  %v4574_v26 = vadd.f32 %v10288_v24, %v4506_v29 }
 0x6fa   : > { %v4509_v47 = vmul.f32 %v10283_v19, %v4414_v31  ;;  %7551 = vmatmul.mubr.f32.gmra.mrb[248].mxu0 %v4637_v36  ;;  %v4639_v48 = vmax.f32 %v4575_v41, 0.0 }
 0x6fb   : > { %v4508_v28 = vmul.f32 %v10283_v19, %v4409_v42  ;;  %v7433_v34 = vpop.f32.mrb[190].mxu1  ;;  %v4638_v2 = vmax.f32 %v4574_v26, 0.0 }
 0x6fc   : > { %v4424_v35 = vadd.f32 %v7433_v34, %v10279_v22  ;;  %v4418_v6 = vpop.f32.mrb[191].mxu1  ;;  %v4577_v8 = vadd.f32 %v10288_v24, %v4509_v47 }
 0x6fd   : > { %v4419_v4 = vadd.f32 %v4418_v6, %v10279_v22  ;;  %7553 = vmatprep.mubr.f32.mxu0 %v4638_v2  ;;  %v4576_v0 = vadd.f32 %v10288_v24, %v4508_v28  ;;  %v10484_v22 = vld [vmem:[%s11120_s21] sm:$0xff] }
 0x6fe   : > { %v4511_v63 = vmul.f32 %v10283_v19, %v4424_v35  ;;  %7554 = vmatmul.mubr.f32.gmra.mrb[250].mxu0 %v4639_v48  ;;  %v4641_v32 = vmax.f32 %v4577_v8, 0.0  ;;  %v10492_v62 = vrot.slane %v10484_v22, %v11114_v12  ;;  %v10497_v3 = vrot.slane %v10484_v22, %v11115_v18 }
 0x6ff   : > { %v4510_v9 = vmul.f32 %v10283_v19, %v4419_v4  ;;  %v4640_v27 = vmax.f32 %v4576_v0, 0.0  ;;  %v10488_v19 = vrot.slane %v10275_v15, %v9225_v11 }
 0x700   : > { %v4579_v5 = vadd.f32 %v10288_v24, %v4511_v63 }
 0x701   : > { %7556 = vmatprep.mubr.f32.mxu0 %v4640_v27  ;;  %v4578_v51 = vadd.f32 %v10288_v24, %v4510_v9 }
 0x702   : > { %7557 = vmatmul.mubr.f32.gmra.mrb[252].mxu0 %v4641_v32  ;;  %v4643_v20 = vmax.f32 %v4579_v5, 0.0 }
 0x703   : > { %v4642_v16 = vmax.f32 %v4578_v51, 0.0 }
 0x705   : > { %7559 = vmatprep.mubr.f32.mxu0 %v4642_v16 }
 0x706   : > { %7560 = vmatmul.mubr.f32.gmra.mrb[254].mxu0 %v4643_v20 }
 0x75d   : > { %v7468_v49 = vpop.f32.mrb[192].mxu0 }
 0x75e   : > { %v4720_v24 = vadd.f32 %v7468_v49, %v10488_v19  ;;  %v4714_v17 = vpop.f32.mrb[193].mxu0 }
 0x75f   : > { %v4715_v21 = vadd.f32 %v4714_v17, %v10488_v19 }
 0x760   : > { %v5055_v23 = vmul.f32 %v10492_v62, %v4720_v24 }
 0x761   : > { %v5054_v50 = vmul.f32 %v10492_v62, %v4715_v21  ;;  %v7471_v15 = vpop.f32.mrb[194].mxu0 }
 0x762   : > { %v5123_v25 = vadd.f32 %v10497_v3, %v5055_v23  ;;  %v4730_v52 = vadd.f32 %v7471_v15, %v10488_v19  ;;  %v4724_v13 = vpop.f32.mrb[195].mxu0 }
 0x763   : > { %v4725_v53 = vadd.f32 %v4724_v13, %v10488_v19  ;;  %v5122_v54 = vadd.f32 %v10497_v3, %v5054_v50 }
 0x764   : > { %v5057_v55 = vmul.f32 %v10492_v62, %v4730_v52  ;;  %v5187_v60 = vmax.f32 %v5123_v25, 0.0 }
 0x765   : > { %v5056_v58 = vmul.f32 %v10492_v62, %v4725_v53  ;;  %v7474_v59 = vpop.f32.mrb[196].mxu0  ;;  %v5186_v56 = vmax.f32 %v5122_v54, 0.0 }
 0x766   : > { %v4740_v61 = vadd.f32 %v7474_v59, %v10488_v19  ;;  %v4734_v10 = vpop.f32.mrb[197].mxu0  ;;  %v5125_v38 = vadd.f32 %v10497_v3, %v5057_v55 }
 0x767   : > { %v4735_v39 = vadd.f32 %v4734_v10, %v10488_v19  ;;  %7594 = vmatprep.mubr.f32.mxu1 %v5186_v56  ;;  %v5124_v57 = vadd.f32 %v10497_v3, %v5056_v58 }
 0x768   : > { %v5059_v37 = vmul.f32 %v10492_v62, %v4740_v61  ;;  %7595 = vmatmul.mubr.f32.vlgmr.msra.gmra.mrb[192].mxu1 %v5187_v60  ;;  %v5189_v14 = vmax.f32 %v5125_v38, 0.0 }
 0x769   : > { %v5058_v40 = vmul.f32 %v10492_v62, %v4735_v39  ;;  %v7477_v43 = vpop.f32.mrb[198].mxu0  ;;  %v5188_v44 = vmax.f32 %v5124_v57, 0.0 }
 0x76a   : > { %v4750_v1 = vadd.f32 %v7477_v43, %v10488_v19  ;;  %v4744_v45 = vpop.f32.mrb[199].mxu0  ;;  %v5127_v46 = vadd.f32 %v10497_v3, %v5059_v37 }
 0x76b   : > { %v4745_v29 = vadd.f32 %v4744_v45, %v10488_v19  ;;  %7597 = vmatprep.mubr.f32.mxu1 %v5188_v44  ;;  %v5126_v7 = vadd.f32 %v10497_v3, %v5058_v40 }
 0x76c   : > { %v5061_v30 = vmul.f32 %v10492_v62, %v4750_v1  ;;  %7598 = vmatmul.mubr.f32.gmra.mrb[194].mxu1 %v5189_v14  ;;  %v5191_v26 = vmax.f32 %v5127_v46, 0.0 }
 0x76d   : > { %v5060_v31 = vmul.f32 %v10492_v62, %v4745_v29  ;;  %v7480_v33 = vpop.f32.mrb[200].mxu0  ;;  %v5190_v36 = vmax.f32 %v5126_v7, 0.0 }
 0x76e   : > { %v4760_v41 = vadd.f32 %v7480_v33, %v10488_v19  ;;  %v4754_v42 = vpop.f32.mrb[201].mxu0  ;;  %v5129_v47 = vadd.f32 %v10497_v3, %v5061_v30 }
 0x76f   : > { %v4755_v28 = vadd.f32 %v4754_v42, %v10488_v19  ;;  %7600 = vmatprep.mubr.f32.mxu1 %v5190_v36  ;;  %v5128_v34 = vadd.f32 %v10497_v3, %v5060_v31 }
 0x770   : > { %v5063_v2 = vmul.f32 %v10492_v62, %v4760_v41  ;;  %7601 = vmatmul.mubr.f32.gmra.mrb[196].mxu1 %v5191_v26  ;;  %v5193_v0 = vmax.f32 %v5129_v47, 0.0 }
 0x771   : > { %v5062_v35 = vmul.f32 %v10492_v62, %v4755_v28  ;;  %v7483_v6 = vpop.f32.mrb[202].mxu0  ;;  %v5192_v48 = vmax.f32 %v5128_v34, 0.0 }
 0x772   : > { %v4770_v8 = vadd.f32 %v7483_v6, %v10488_v19  ;;  %v4764_v4 = vpop.f32.mrb[203].mxu0  ;;  %v5131_v63 = vadd.f32 %v10497_v3, %v5063_v2 }
 0x773   : > { %v4765_v9 = vadd.f32 %v4764_v4, %v10488_v19  ;;  %7603 = vmatprep.mubr.f32.mxu1 %v5192_v48  ;;  %v5130_v27 = vadd.f32 %v10497_v3, %v5062_v35 }
 0x774   : > { %v5065_v32 = vmul.f32 %v10492_v62, %v4770_v8  ;;  %7604 = vmatmul.mubr.f32.gmra.mrb[198].mxu1 %v5193_v0  ;;  %v5195_v24 = vmax.f32 %v5131_v63, 0.0 }
 0x775   : > { %v5064_v5 = vmul.f32 %v10492_v62, %v4765_v9  ;;  %v7486_v51 = vpop.f32.mrb[204].mxu0  ;;  %v5194_v16 = vmax.f32 %v5130_v27, 0.0 }
 0x776   : > { %v4780_v20 = vadd.f32 %v7486_v51, %v10488_v19  ;;  %v4774_v49 = vpop.f32.mrb[205].mxu0  ;;  %v5133_v17 = vadd.f32 %v10497_v3, %v5065_v32 }
 0x777   : > { %v4775_v21 = vadd.f32 %v4774_v49, %v10488_v19  ;;  %7606 = vmatprep.mubr.f32.mxu1 %v5194_v16  ;;  %v5132_v23 = vadd.f32 %v10497_v3, %v5064_v5 }
 0x778   : > { %v5067_v50 = vmul.f32 %v10492_v62, %v4780_v20  ;;  %7607 = vmatmul.mubr.f32.gmra.mrb[200].mxu1 %v5195_v24  ;;  %v5197_v54 = vmax.f32 %v5133_v17, 0.0 }
 0x779   : > { %v5066_v15 = vmul.f32 %v10492_v62, %v4775_v21  ;;  %v7489_v25 = vpop.f32.mrb[206].mxu0  ;;  %v5196_v52 = vmax.f32 %v5132_v23, 0.0 }
 0x77a   : > { %v4790_v13 = vadd.f32 %v7489_v25, %v10488_v19  ;;  %v4784_v53 = vpop.f32.mrb[207].mxu0  ;;  %v5135_v55 = vadd.f32 %v10497_v3, %v5067_v50 }
 0x77b   : > { %v4785_v58 = vadd.f32 %v4784_v53, %v10488_v19  ;;  %7609 = vmatprep.mubr.f32.mxu1 %v5196_v52  ;;  %v5134_v59 = vadd.f32 %v10497_v3, %v5066_v15 }
 0x77c   : > { %v5069_v56 = vmul.f32 %v10492_v62, %v4790_v13  ;;  %7610 = vmatmul.mubr.f32.gmra.mrb[202].mxu1 %v5197_v54  ;;  %v5199_v57 = vmax.f32 %v5135_v55, 0.0 }
 0x77d   : > { %v5068_v60 = vmul.f32 %v10492_v62, %v4785_v58  ;;  %v7492_v61 = vpop.f32.mrb[208].mxu0  ;;  %v5198_v10 = vmax.f32 %v5134_v59, 0.0 }
 0x77e   : > { %v4800_v38 = vadd.f32 %v7492_v61, %v10488_v19  ;;  %v4794_v39 = vpop.f32.mrb[209].mxu0  ;;  %v5137_v37 = vadd.f32 %v10497_v3, %v5069_v56 }
 0x77f   : > { %v4795_v40 = vadd.f32 %v4794_v39, %v10488_v19  ;;  %7612 = vmatprep.mubr.f32.mxu1 %v5198_v10  ;;  %v5136_v43 = vadd.f32 %v10497_v3, %v5068_v60 }
 0x780   : > { %v5071_v44 = vmul.f32 %v10492_v62, %v4800_v38  ;;  %7613 = vmatmul.mubr.f32.gmra.mrb[204].mxu1 %v5199_v57  ;;  %v5201_v7 = vmax.f32 %v5137_v37, 0.0 }
 0x781   : > { %v5070_v1 = vmul.f32 %v10492_v62, %v4795_v40  ;;  %v7495_v45 = vpop.f32.mrb[210].mxu0  ;;  %v5200_v14 = vmax.f32 %v5136_v43, 0.0 }
 0x782   : > { %v4810_v46 = vadd.f32 %v7495_v45, %v10488_v19  ;;  %v4804_v29 = vpop.f32.mrb[211].mxu0  ;;  %v5139_v30 = vadd.f32 %v10497_v3, %v5071_v44 }
 0x783   : > { %v4805_v31 = vadd.f32 %v4804_v29, %v10488_v19  ;;  %7615 = vmatprep.mubr.f32.mxu1 %v5200_v14  ;;  %v5138_v33 = vadd.f32 %v10497_v3, %v5070_v1 }
 0x784   : > { %v5073_v36 = vmul.f32 %v10492_v62, %v4810_v46  ;;  %7616 = vmatmul.mubr.f32.gmra.mrb[206].mxu1 %v5201_v7  ;;  %v5203_v34 = vmax.f32 %v5139_v30, 0.0 }
 0x785   : > { %v5072_v41 = vmul.f32 %v10492_v62, %v4805_v31  ;;  %v7498_v42 = vpop.f32.mrb[212].mxu0  ;;  %v5202_v26 = vmax.f32 %v5138_v33, 0.0 }
 0x786   : > { %v4820_v47 = vadd.f32 %v7498_v42, %v10488_v19  ;;  %v4814_v28 = vpop.f32.mrb[213].mxu0  ;;  %v5141_v2 = vadd.f32 %v10497_v3, %v5073_v36 }
 0x787   : > { %v4815_v35 = vadd.f32 %v4814_v28, %v10488_v19  ;;  %7618 = vmatprep.mubr.f32.mxu1 %v5202_v26  ;;  %v5140_v6 = vadd.f32 %v10497_v3, %v5072_v41 }
 0x788   : > { %v5075_v48 = vmul.f32 %v10492_v62, %v4820_v47  ;;  %7619 = vmatmul.mubr.f32.gmra.mrb[208].mxu1 %v5203_v34  ;;  %v5205_v27 = vmax.f32 %v5141_v2, 0.0 }
 0x789   : > { %v5074_v8 = vmul.f32 %v10492_v62, %v4815_v35  ;;  %v7501_v4 = vpop.f32.mrb[214].mxu0  ;;  %v5204_v0 = vmax.f32 %v5140_v6, 0.0 }
 0x78a   : > { %v4830_v63 = vadd.f32 %v7501_v4, %v10488_v19  ;;  %v4824_v9 = vpop.f32.mrb[215].mxu0  ;;  %v5143_v32 = vadd.f32 %v10497_v3, %v5075_v48 }
 0x78b   : > { %v4825_v5 = vadd.f32 %v4824_v9, %v10488_v19  ;;  %7621 = vmatprep.mubr.f32.mxu1 %v5204_v0  ;;  %v5142_v51 = vadd.f32 %v10497_v3, %v5074_v8 }
 0x78c   : > { %v5077_v16 = vmul.f32 %v10492_v62, %v4830_v63  ;;  %7622 = vmatmul.mubr.f32.gmra.mrb[210].mxu1 %v5205_v27  ;;  %v5207_v23 = vmax.f32 %v5143_v32, 0.0 }
 0x78d   : > { %v5076_v20 = vmul.f32 %v10492_v62, %v4825_v5  ;;  %v7504_v49 = vpop.f32.mrb[216].mxu0  ;;  %v5206_v24 = vmax.f32 %v5142_v51, 0.0 }
 0x78e   : > { %v4840_v17 = vadd.f32 %v7504_v49, %v10488_v19  ;;  %v4834_v21 = vpop.f32.mrb[217].mxu0  ;;  %v5145_v50 = vadd.f32 %v10497_v3, %v5077_v16 }
 0x78f   : > { %v4835_v15 = vadd.f32 %v4834_v21, %v10488_v19  ;;  %7624 = vmatprep.mubr.f32.mxu1 %v5206_v24  ;;  %v5144_v25 = vadd.f32 %v10497_v3, %v5076_v20 }
 0x790   : > { %v5079_v52 = vmul.f32 %v10492_v62, %v4840_v17  ;;  %7625 = vmatmul.mubr.f32.gmra.mrb[212].mxu1 %v5207_v23  ;;  %v5209_v59 = vmax.f32 %v5145_v50, 0.0 }
 0x791   : > { %v5078_v13 = vmul.f32 %v10492_v62, %v4835_v15  ;;  %v7507_v53 = vpop.f32.mrb[218].mxu0  ;;  %v5208_v54 = vmax.f32 %v5144_v25, 0.0 }
 0x792   : > { %v4850_v55 = vadd.f32 %v7507_v53, %v10488_v19  ;;  %v4844_v58 = vpop.f32.mrb[219].mxu0  ;;  %v5147_v56 = vadd.f32 %v10497_v3, %v5079_v52 }
 0x793   : > { %v4845_v60 = vadd.f32 %v4844_v58, %v10488_v19  ;;  %7627 = vmatprep.mubr.f32.mxu1 %v5208_v54  ;;  %v5146_v61 = vadd.f32 %v10497_v3, %v5078_v13 }
 0x794   : > { %v5081_v10 = vmul.f32 %v10492_v62, %v4850_v55  ;;  %7628 = vmatmul.mubr.f32.gmra.mrb[214].mxu1 %v5209_v59  ;;  %v5211_v43 = vmax.f32 %v5147_v56, 0.0 }
 0x795   : > { %v5080_v38 = vmul.f32 %v10492_v62, %v4845_v60  ;;  %v7510_v39 = vpop.f32.mrb[220].mxu0  ;;  %v5210_v57 = vmax.f32 %v5146_v61, 0.0 }
 0x796   : > { %v4860_v37 = vadd.f32 %v7510_v39, %v10488_v19  ;;  %v4854_v40 = vpop.f32.mrb[221].mxu0  ;;  %v5149_v44 = vadd.f32 %v10497_v3, %v5081_v10 }
 0x797   : > { %v4855_v1 = vadd.f32 %v4854_v40, %v10488_v19  ;;  %7630 = vmatprep.mubr.f32.mxu1 %v5210_v57  ;;  %v5148_v45 = vadd.f32 %v10497_v3, %v5080_v38 }
 0x798   : > { %v5083_v14 = vmul.f32 %v10492_v62, %v4860_v37  ;;  %7631 = vmatmul.mubr.f32.gmra.mrb[216].mxu1 %v5211_v43  ;;  %v5213_v33 = vmax.f32 %v5149_v44, 0.0 }
 0x799   : > { %v5082_v46 = vmul.f32 %v10492_v62, %v4855_v1  ;;  %v7513_v29 = vpop.f32.mrb[222].mxu0  ;;  %v5212_v7 = vmax.f32 %v5148_v45, 0.0 }
 0x79a   : > { %v4870_v30 = vadd.f32 %v7513_v29, %v10488_v19  ;;  %v4864_v31 = vpop.f32.mrb[223].mxu0  ;;  %v5151_v36 = vadd.f32 %v10497_v3, %v5083_v14 }
 0x79b   : > { %v4865_v41 = vadd.f32 %v4864_v31, %v10488_v19  ;;  %7633 = vmatprep.mubr.f32.mxu1 %v5212_v7  ;;  %v5150_v42 = vadd.f32 %v10497_v3, %v5082_v46 }
 0x79c   : > { %v5085_v26 = vmul.f32 %v10492_v62, %v4870_v30  ;;  %7634 = vmatmul.mubr.f32.gmra.mrb[218].mxu1 %v5213_v33  ;;  %v5215_v6 = vmax.f32 %v5151_v36, 0.0 }
 0x79d   : > { %v5084_v47 = vmul.f32 %v10492_v62, %v4865_v41  ;;  %v7516_v28 = vpop.f32.mrb[224].mxu0  ;;  %v5214_v34 = vmax.f32 %v5150_v42, 0.0 }
 0x79e   : > { %v4880_v2 = vadd.f32 %v7516_v28, %v10488_v19  ;;  %v4874_v35 = vpop.f32.mrb[225].mxu0  ;;  %v5153_v48 = vadd.f32 %v10497_v3, %v5085_v26 }
 0x79f   : > { %v4875_v8 = vadd.f32 %v4874_v35, %v10488_v19  ;;  %7636 = vmatprep.mubr.f32.mxu1 %v5214_v34  ;;  %v5152_v4 = vadd.f32 %v10497_v3, %v5084_v47 }
 0x7a0   : > { %v5087_v0 = vmul.f32 %v10492_v62, %v4880_v2  ;;  %7637 = vmatmul.mubr.f32.gmra.mrb[220].mxu1 %v5215_v6  ;;  %v5217_v51 = vmax.f32 %v5153_v48, 0.0 }
 0x7a1   : > { %v5086_v63 = vmul.f32 %v10492_v62, %v4875_v8  ;;  %v7519_v9 = vpop.f32.mrb[226].mxu0  ;;  %v5216_v27 = vmax.f32 %v5152_v4, 0.0 }
 0x7a2   : > { %v4890_v32 = vadd.f32 %v7519_v9, %v10488_v19  ;;  %v4884_v5 = vpop.f32.mrb[227].mxu0  ;;  %v5155_v16 = vadd.f32 %v10497_v3, %v5087_v0 }
 0x7a3   : > { %v4885_v20 = vadd.f32 %v4884_v5, %v10488_v19  ;;  %7639 = vmatprep.mubr.f32.mxu1 %v5216_v27  ;;  %v5154_v49 = vadd.f32 %v10497_v3, %v5086_v63 }
 0x7a4   : > { %v5089_v24 = vmul.f32 %v10492_v62, %v4890_v32  ;;  %7640 = vmatmul.mubr.f32.gmra.mrb[222].mxu1 %v5217_v51  ;;  %v5219_v25 = vmax.f32 %v5155_v16, 0.0 }
 0x7a5   : > { %v5088_v17 = vmul.f32 %v10492_v62, %v4885_v20  ;;  %v7522_v21 = vpop.f32.mrb[228].mxu0  ;;  %v5218_v23 = vmax.f32 %v5154_v49, 0.0 }
 0x7a6   : > { %v4900_v50 = vadd.f32 %v7522_v21, %v10488_v19  ;;  %v4894_v15 = vpop.f32.mrb[229].mxu0  ;;  %v5157_v52 = vadd.f32 %v10497_v3, %v5089_v24 }
 0x7a7   : > { %v4895_v13 = vadd.f32 %v4894_v15, %v10488_v19  ;;  %7642 = vmatprep.mubr.f32.mxu1 %v5218_v23  ;;  %v5156_v53 = vadd.f32 %v10497_v3, %v5088_v17 }
 0x7a8   : > { %v5091_v54 = vmul.f32 %v10492_v62, %v4900_v50  ;;  %7643 = vmatmul.mubr.f32.gmra.mrb[224].mxu1 %v5219_v25  ;;  %v5221_v61 = vmax.f32 %v5157_v52, 0.0 }
 0x7a9   : > { %v5090_v55 = vmul.f32 %v10492_v62, %v4895_v13  ;;  %v7525_v58 = vpop.f32.mrb[230].mxu0  ;;  %v5220_v59 = vmax.f32 %v5156_v53, 0.0 }
 0x7aa   : > { %v4910_v56 = vadd.f32 %v7525_v58, %v10488_v19  ;;  %v4904_v60 = vpop.f32.mrb[231].mxu0  ;;  %v5159_v10 = vadd.f32 %v10497_v3, %v5091_v54 }
 0x7ab   : > { %v4905_v38 = vadd.f32 %v4904_v60, %v10488_v19  ;;  %7645 = vmatprep.mubr.f32.mxu1 %v5220_v59  ;;  %v5158_v39 = vadd.f32 %v10497_v3, %v5090_v55 }
 0x7ac   : > { %v5093_v57 = vmul.f32 %v10492_v62, %v4910_v56  ;;  %7646 = vmatmul.mubr.f32.gmra.mrb[226].mxu1 %v5221_v61  ;;  %v5223_v45 = vmax.f32 %v5159_v10, 0.0 }
 0x7ad   : > { %v5092_v37 = vmul.f32 %v10492_v62, %v4905_v38  ;;  %v7528_v40 = vpop.f32.mrb[232].mxu0  ;;  %v5222_v43 = vmax.f32 %v5158_v39, 0.0 }
 0x7ae   : > { %v4920_v44 = vadd.f32 %v7528_v40, %v10488_v19  ;;  %v4914_v1 = vpop.f32.mrb[233].mxu0  ;;  %v5161_v14 = vadd.f32 %v10497_v3, %v5093_v57 }
 0x7af   : > { %v4915_v46 = vadd.f32 %v4914_v1, %v10488_v19  ;;  %7648 = vmatprep.mubr.f32.mxu1 %v5222_v43  ;;  %v5160_v29 = vadd.f32 %v10497_v3, %v5092_v37 }
 0x7b0   : > { %v5095_v7 = vmul.f32 %v10492_v62, %v4920_v44  ;;  %7649 = vmatmul.mubr.f32.gmra.mrb[228].mxu1 %v5223_v45  ;;  %v5225_v42 = vmax.f32 %v5161_v14, 0.0 }
 0x7b1   : > { %v5094_v30 = vmul.f32 %v10492_v62, %v4915_v46  ;;  %v7531_v31 = vpop.f32.mrb[234].mxu0  ;;  %v5224_v33 = vmax.f32 %v5160_v29, 0.0 }
 0x7b2   : > { %v4930_v36 = vadd.f32 %v7531_v31, %v10488_v19  ;;  %v4924_v41 = vpop.f32.mrb[235].mxu0  ;;  %v5163_v26 = vadd.f32 %v10497_v3, %v5095_v7 }
 0x7b3   : > { %v4925_v47 = vadd.f32 %v4924_v41, %v10488_v19  ;;  %7651 = vmatprep.mubr.f32.mxu1 %v5224_v33  ;;  %v5162_v28 = vadd.f32 %v10497_v3, %v5094_v30 }
 0x7b4   : > { %v5097_v34 = vmul.f32 %v10492_v62, %v4930_v36  ;;  %7652 = vmatmul.mubr.f32.gmra.mrb[230].mxu1 %v5225_v42  ;;  %v5227_v4 = vmax.f32 %v5163_v26, 0.0 }
 0x7b5   : > { %v5096_v2 = vmul.f32 %v10492_v62, %v4925_v47  ;;  %v7534_v35 = vpop.f32.mrb[236].mxu0  ;;  %v5226_v6 = vmax.f32 %v5162_v28, 0.0 }
 0x7b6   : > { %v4940_v48 = vadd.f32 %v7534_v35, %v10488_v19  ;;  %v4934_v8 = vpop.f32.mrb[237].mxu0  ;;  %v5165_v0 = vadd.f32 %v10497_v3, %v5097_v34 }
 0x7b7   : > { %v4935_v63 = vadd.f32 %v4934_v8, %v10488_v19  ;;  %7654 = vmatprep.mubr.f32.mxu1 %v5226_v6  ;;  %v5164_v9 = vadd.f32 %v10497_v3, %v5096_v2 }
 0x7b8   : > { %v5099_v27 = vmul.f32 %v10492_v62, %v4940_v48  ;;  %7655 = vmatmul.mubr.f32.gmra.mrb[232].mxu1 %v5227_v4  ;;  %v5229_v49 = vmax.f32 %v5165_v0, 0.0 }
 0x7b9   : > { %v5098_v32 = vmul.f32 %v10492_v62, %v4935_v63  ;;  %v7537_v5 = vpop.f32.mrb[238].mxu0  ;;  %v5228_v51 = vmax.f32 %v5164_v9, 0.0 }
 0x7ba   : > { %v4950_v16 = vadd.f32 %v7537_v5, %v10488_v19  ;;  %v4944_v20 = vpop.f32.mrb[239].mxu0  ;;  %v5167_v24 = vadd.f32 %v10497_v3, %v5099_v27 }
 0x7bb   : > { %v4945_v17 = vadd.f32 %v4944_v20, %v10488_v19  ;;  %7657 = vmatprep.mubr.f32.mxu1 %v5228_v51  ;;  %v5166_v21 = vadd.f32 %v10497_v3, %v5098_v32 }
 0x7bc   : > { %v5101_v23 = vmul.f32 %v10492_v62, %v4950_v16  ;;  %7658 = vmatmul.mubr.f32.gmra.mrb[234].mxu1 %v5229_v49  ;;  %v5231_v53 = vmax.f32 %v5167_v24, 0.0 }
 0x7bd   : > { %v5100_v50 = vmul.f32 %v10492_v62, %v4945_v17  ;;  %v7540_v15 = vpop.f32.mrb[240].mxu0  ;;  %v5230_v25 = vmax.f32 %v5166_v21, 0.0 }
 0x7be   : > { %v4960_v52 = vadd.f32 %v7540_v15, %v10488_v19  ;;  %v4954_v13 = vpop.f32.mrb[241].mxu0  ;;  %v5169_v54 = vadd.f32 %v10497_v3, %v5101_v23 }
 0x7bf   : > { %v4955_v55 = vadd.f32 %v4954_v13, %v10488_v19  ;;  %7660 = vmatprep.mubr.f32.mxu1 %v5230_v25  ;;  %v5168_v58 = vadd.f32 %v10497_v3, %v5100_v50 }
 0x7c0   : > { %v5103_v59 = vmul.f32 %v10492_v62, %v4960_v52  ;;  %7661 = vmatmul.mubr.f32.gmra.mrb[236].mxu1 %v5231_v53  ;;  %v5233_v39 = vmax.f32 %v5169_v54, 0.0 }
 0x7c1   : > { %v5102_v56 = vmul.f32 %v10492_v62, %v4955_v55  ;;  %v7543_v60 = vpop.f32.mrb[242].mxu0  ;;  %v5232_v61 = vmax.f32 %v5168_v58, 0.0 }
 0x7c2   : > { %v4970_v10 = vadd.f32 %v7543_v60, %v10488_v19  ;;  %v4964_v38 = vpop.f32.mrb[243].mxu0  ;;  %v5171_v57 = vadd.f32 %v10497_v3, %v5103_v59 }
 0x7c3   : > { %v4965_v37 = vadd.f32 %v4964_v38, %v10488_v19  ;;  %7663 = vmatprep.mubr.f32.mxu1 %v5232_v61  ;;  %v5170_v40 = vadd.f32 %v10497_v3, %v5102_v56 }
 0x7c4   : > { %v5105_v43 = vmul.f32 %v10492_v62, %v4970_v10  ;;  %7664 = vmatmul.mubr.f32.gmra.mrb[238].mxu1 %v5233_v39  ;;  %v5235_v29 = vmax.f32 %v5171_v57, 0.0 }
 0x7c5   : > { %v5104_v44 = vmul.f32 %v10492_v62, %v4965_v37  ;;  %v7546_v1 = vpop.f32.mrb[244].mxu0  ;;  %v5234_v45 = vmax.f32 %v5170_v40, 0.0 }
 0x7c6   : > { %v4980_v14 = vadd.f32 %v7546_v1, %v10488_v19  ;;  %v4974_v46 = vpop.f32.mrb[245].mxu0  ;;  %v5173_v7 = vadd.f32 %v10497_v3, %v5105_v43 }
 0x7c7   : > { %v4975_v30 = vadd.f32 %v4974_v46, %v10488_v19  ;;  %7666 = vmatprep.mubr.f32.mxu1 %v5234_v45  ;;  %v5172_v31 = vadd.f32 %v10497_v3, %v5104_v44 }
 0x7c8   : > { %v5107_v33 = vmul.f32 %v10492_v62, %v4980_v14  ;;  %7667 = vmatmul.mubr.f32.gmra.mrb[240].mxu1 %v5235_v29  ;;  %v5237_v28 = vmax.f32 %v5173_v7, 0.0 }
 0x7c9   : > { %v5106_v36 = vmul.f32 %v10492_v62, %v4975_v30  ;;  %v7549_v41 = vpop.f32.mrb[246].mxu0  ;;  %v5236_v42 = vmax.f32 %v5172_v31, 0.0 }
 0x7ca   : > { %v4990_v26 = vadd.f32 %v7549_v41, %v10488_v19  ;;  %v4984_v47 = vpop.f32.mrb[247].mxu0  ;;  %v5175_v34 = vadd.f32 %v10497_v3, %v5107_v33 }
 0x7cb   : > { %v4985_v2 = vadd.f32 %v4984_v47, %v10488_v19  ;;  %7669 = vmatprep.mubr.f32.mxu1 %v5236_v42  ;;  %v5174_v35 = vadd.f32 %v10497_v3, %v5106_v36 }
 0x7cc   : > { %v5109_v6 = vmul.f32 %v10492_v62, %v4990_v26  ;;  %7670 = vmatmul.mubr.f32.gmra.mrb[242].mxu1 %v5237_v28  ;;  %v5239_v9 = vmax.f32 %v5175_v34, 0.0 }
 0x7cd   : > { %v5108_v48 = vmul.f32 %v10492_v62, %v4985_v2  ;;  %v7552_v8 = vpop.f32.mrb[248].mxu0  ;;  %v5238_v4 = vmax.f32 %v5174_v35, 0.0 }
 0x7ce   : > { %v5000_v0 = vadd.f32 %v7552_v8, %v10488_v19  ;;  %v4994_v63 = vpop.f32.mrb[249].mxu0  ;;  %v5177_v27 = vadd.f32 %v10497_v3, %v5109_v6 }
 0x7cf   : > { %v4995_v32 = vadd.f32 %v4994_v63, %v10488_v19  ;;  %7672 = vmatprep.mubr.f32.mxu1 %v5238_v4  ;;  %v5176_v5 = vadd.f32 %v10497_v3, %v5108_v48 }
 0x7d0   : > { %v5111_v51 = vmul.f32 %v10492_v62, %v5000_v0  ;;  %7673 = vmatmul.mubr.f32.gmra.mrb[244].mxu1 %v5239_v9  ;;  %v5241_v21 = vmax.f32 %v5177_v27, 0.0 }
 0x7d1   : > { %v5110_v16 = vmul.f32 %v10492_v62, %v4995_v32  ;;  %v7555_v20 = vpop.f32.mrb[250].mxu0  ;;  %v5240_v49 = vmax.f32 %v5176_v5, 0.0 }
 0x7d2   : > { %v5010_v24 = vadd.f32 %v7555_v20, %v10488_v19  ;;  %v5004_v17 = vpop.f32.mrb[251].mxu0  ;;  %v5179_v23 = vadd.f32 %v10497_v3, %v5111_v51 }
 0x7d3   : > { %v5005_v50 = vadd.f32 %v5004_v17, %v10488_v19  ;;  %7675 = vmatprep.mubr.f32.mxu1 %v5240_v49  ;;  %v5178_v15 = vadd.f32 %v10497_v3, %v5110_v16 }
 0x7d4   : > { %v5113_v25 = vmul.f32 %v10492_v62, %v5010_v24  ;;  %7676 = vmatmul.mubr.f32.gmra.mrb[246].mxu1 %v5241_v21  ;;  %v5243_v58 = vmax.f32 %v5179_v23, 0.0 }
 0x7d5   : > { %v5112_v52 = vmul.f32 %v10492_v62, %v5005_v50  ;;  %v7558_v13 = vpop.f32.mrb[252].mxu0  ;;  %v5242_v53 = vmax.f32 %v5178_v15, 0.0 }
 0x7d6   : > { %v5020_v54 = vadd.f32 %v7558_v13, %v10488_v19  ;;  %v5014_v55 = vpop.f32.mrb[253].mxu0  ;;  %v5181_v59 = vadd.f32 %v10497_v3, %v5113_v25 }
 0x7d7   : > { %v5015_v56 = vadd.f32 %v5014_v55, %v10488_v19  ;;  %7678 = vmatprep.mubr.f32.mxu1 %v5242_v53  ;;  %v5180_v60 = vadd.f32 %v10497_v3, %v5112_v52 }
 0x7d8   : > { %v5115_v61 = vmul.f32 %v10492_v62, %v5020_v54  ;;  %7679 = vmatmul.mubr.f32.gmra.mrb[248].mxu1 %v5243_v58  ;;  %v5245_v40 = vmax.f32 %v5181_v59, 0.0 }
 0x7d9   : > { %v5114_v10 = vmul.f32 %v10492_v62, %v5015_v56  ;;  %v7561_v38 = vpop.f32.mrb[254].mxu0  ;;  %v5244_v39 = vmax.f32 %v5180_v60, 0.0 }
 0x7da   : > { %v5030_v57 = vadd.f32 %v7561_v38, %v10488_v19  ;;  %v5024_v37 = vpop.f32.mrb[255].mxu0  ;;  %v5183_v43 = vadd.f32 %v10497_v3, %v5115_v61 }
 0x7db   : > { %v5025_v44 = vadd.f32 %v5024_v37, %v10488_v19  ;;  %7681 = vmatprep.mubr.f32.mxu1 %v5244_v39  ;;  %v5182_v1 = vadd.f32 %v10497_v3, %v5114_v10  ;;  %v5639_v19 = vld [vmem:[%s11122_s15] sm:$0xff] }
 0x7dc   : > { %v5117_v45 = vmul.f32 %v10492_v62, %v5030_v57  ;;  %7682 = vmatmul.mubr.f32.gmra.mrb[250].mxu1 %v5245_v40  ;;  %v5247_v29 = vmax.f32 %v5183_v43, 0.0  ;;  %v10700_v36 = vrot.slane %v5639_v19, %v11114_v12  ;;  %v10704_v42 = vrot.slane %v5639_v19, %v11115_v18 }
 0x7dd   : > { %v5116_v14 = vmul.f32 %v10492_v62, %v5025_v44  ;;  %v5246_v46 = vmax.f32 %v5182_v1, 0.0  ;;  %v10697_v62 = vrot.slane %v10484_v22, %v9225_v11 }
 0x7de   : > { %v5185_v7 = vadd.f32 %v10497_v3, %v5117_v45 }
 0x7df   : > { %7684 = vmatprep.mubr.f32.mxu1 %v5246_v46  ;;  %v5184_v30 = vadd.f32 %v10497_v3, %v5116_v14 }
 0x7e0   : > { %7685 = vmatmul.mubr.f32.gmra.mrb[252].mxu1 %v5247_v29  ;;  %v5249_v33 = vmax.f32 %v5185_v7, 0.0 }
 0x7e1   : > { %v5248_v31 = vmax.f32 %v5184_v30, 0.0 }
 0x7e3   : > { %7687 = vmatprep.mubr.f32.mxu1 %v5248_v31 }
 0x7e4   : > { %7688 = vmatmul.mubr.f32.gmra.mrb[254].mxu1 %v5249_v33 }
 0x83b   : > { %v7596_v3 = vpop.f32.mrb[192].mxu1 }
 0x83c   : > { %v5326_v41 = vadd.f32 %v7596_v3, %v10697_v62  ;;  %v5320_v26 = vpop.f32.mrb[193].mxu1 }
 0x83d   : > { %v5321_v47 = vadd.f32 %v5320_v26, %v10697_v62 }
 0x83e   : > { %v5645_v28 = vmul.f32 %v10700_v36, %v5326_v41 }
 0x83f   : > { %v5644_v11 = vmul.f32 %v10700_v36, %v5321_v47  ;;  %v7599_v12 = vpop.f32.mrb[194].mxu1 }
 0x840   : > { %v5713_v18 = vadd.f32 %v10704_v42, %v5645_v28  ;;  %v5336_v22 = vadd.f32 %v7599_v12, %v10697_v62  ;;  %v5330_v34 = vpop.f32.mrb[195].mxu1 }
 0x841   : > { %v5712_v2 = vadd.f32 %v10704_v42, %v5644_v11  ;;  %v5331_v35 = vadd.f32 %v5330_v34, %v10697_v62 }
 0x842   : > { %5778 = vst.msk [vmem:[%s10711_s27 + $0x8] sm:$0xff] %vm5776_vm0, %v5713_v18  ;;  %v5647_v6 = vmul.f32 %v10700_v36, %v5336_v22 }
 0x843   : > { %5777 = vst.msk [vmem:[%s10711_s27] sm:$0xff] %vm5776_vm0, %v5712_v2  ;;  %v5646_v48 = vmul.f32 %v10700_v36, %v5331_v35  ;;  %v7602_v8 = vpop.f32.mrb[196].mxu1 }
 0x844   : > { %v5715_v4 = vadd.f32 %v10704_v42, %v5647_v6  ;;  %v5346_v0 = vadd.f32 %v7602_v8, %v10697_v62  ;;  %v5340_v63 = vpop.f32.mrb[197].mxu1 }
 0x845   : > { %v5714_v9 = vadd.f32 %v10704_v42, %v5646_v48  ;;  %v5341_v27 = vadd.f32 %v5340_v63, %v10697_v62 }
 0x846   : > { %5780 = vst.msk [vmem:[%s10711_s27 + $0x18] sm:$0xff] %vm5776_vm0, %v5715_v4  ;;  %v5649_v32 = vmul.f32 %v10700_v36, %v5346_v0 }
 0x847   : > { %5779 = vst.msk [vmem:[%s10711_s27 + $0x10] sm:$0xff] %vm5776_vm0, %v5714_v9  ;;  %v5648_v5 = vmul.f32 %v10700_v36, %v5341_v27  ;;  %v7605_v51 = vpop.f32.mrb[198].mxu1 }
 0x848   : > { %v5717_v16 = vadd.f32 %v10704_v42, %v5649_v32  ;;  %v5356_v20 = vadd.f32 %v7605_v51, %v10697_v62  ;;  %v5350_v49 = vpop.f32.mrb[199].mxu1 }
 0x849   : > { %v5716_v24 = vadd.f32 %v10704_v42, %v5648_v5  ;;  %v5351_v17 = vadd.f32 %v5350_v49, %v10697_v62 }
 0x84a   : > { %5782 = vst.msk [vmem:[%s10711_s27 + $0x28] sm:$0xff] %vm5776_vm0, %v5717_v16  ;;  %v5651_v21 = vmul.f32 %v10700_v36, %v5356_v20 }
 0x84b   : > { %5781 = vst.msk [vmem:[%s10711_s27 + $0x20] sm:$0xff] %vm5776_vm0, %v5716_v24  ;;  %v5650_v23 = vmul.f32 %v10700_v36, %v5351_v17  ;;  %v7608_v50 = vpop.f32.mrb[200].mxu1 }
 0x84c   : > { %v5719_v15 = vadd.f32 %v10704_v42, %v5651_v21  ;;  %v5366_v25 = vadd.f32 %v7608_v50, %v10697_v62  ;;  %v5360_v52 = vpop.f32.mrb[201].mxu1 }
 0x84d   : > { %v5718_v13 = vadd.f32 %v10704_v42, %v5650_v23  ;;  %v5361_v53 = vadd.f32 %v5360_v52, %v10697_v62 }
 0x84e   : > { %5784 = vst.msk [vmem:[%s10711_s27 + $0x38] sm:$0xff] %vm5776_vm0, %v5719_v15  ;;  %v5653_v54 = vmul.f32 %v10700_v36, %v5366_v25 }
 0x84f   : > { %5783 = vst.msk [vmem:[%s10711_s27 + $0x30] sm:$0xff] %vm5776_vm0, %v5718_v13  ;;  %v5652_v55 = vmul.f32 %v10700_v36, %v5361_v53  ;;  %v7611_v58 = vpop.f32.mrb[202].mxu1 }
 0x850   : > { %v5721_v59 = vadd.f32 %v10704_v42, %v5653_v54  ;;  %v5376_v56 = vadd.f32 %v7611_v58, %v10697_v62  ;;  %v5370_v60 = vpop.f32.mrb[203].mxu1 }
 0x851   : > { %v5720_v61 = vadd.f32 %v10704_v42, %v5652_v55  ;;  %v5371_v10 = vadd.f32 %v5370_v60, %v10697_v62 }
 0x852   : > { %5786 = vst.msk [vmem:[%s10711_s27 + $0x48] sm:$0xff] %vm5776_vm0, %v5721_v59  ;;  %v5655_v38 = vmul.f32 %v10700_v36, %v5376_v56 }
 0x853   : > { %5785 = vst.msk [vmem:[%s10711_s27 + $0x40] sm:$0xff] %vm5776_vm0, %v5720_v61  ;;  %v5654_v39 = vmul.f32 %v10700_v36, %v5371_v10  ;;  %v7614_v57 = vpop.f32.mrb[204].mxu1 }
 0x854   : > { %v5723_v37 = vadd.f32 %v10704_v42, %v5655_v38  ;;  %v5386_v40 = vadd.f32 %v7614_v57, %v10697_v62  ;;  %v5380_v43 = vpop.f32.mrb[205].mxu1 }
 0x855   : > { %v5722_v44 = vadd.f32 %v10704_v42, %v5654_v39  ;;  %v5381_v1 = vadd.f32 %v5380_v43, %v10697_v62 }
 0x856   : > { %5788 = vst.msk [vmem:[%s10711_s27 + $0x58] sm:$0xff] %vm5776_vm0, %v5723_v37  ;;  %v5657_v45 = vmul.f32 %v10700_v36, %v5386_v40 }
 0x857   : > { %5787 = vst.msk [vmem:[%s10711_s27 + $0x50] sm:$0xff] %vm5776_vm0, %v5722_v44  ;;  %v5656_v14 = vmul.f32 %v10700_v36, %v5381_v1  ;;  %v7617_v46 = vpop.f32.mrb[206].mxu1 }
 0x858   : > { %v5725_v29 = vadd.f32 %v10704_v42, %v5657_v45  ;;  %v5396_v7 = vadd.f32 %v7617_v46, %v10697_v62  ;;  %v5390_v30 = vpop.f32.mrb[207].mxu1 }
 0x859   : > { %v5724_v31 = vadd.f32 %v10704_v42, %v5656_v14  ;;  %v5391_v33 = vadd.f32 %v5390_v30, %v10697_v62 }
 0x85a   : > { %5790 = vst.msk [vmem:[%s10711_s27 + $0x68] sm:$0xff] %vm5776_vm0, %v5725_v29  ;;  %v5659_v19 = vmul.f32 %v10700_v36, %v5396_v7 }
 0x85b   : > { %5789 = vst.msk [vmem:[%s10711_s27 + $0x60] sm:$0xff] %vm5776_vm0, %v5724_v31  ;;  %v5658_v3 = vmul.f32 %v10700_v36, %v5391_v33  ;;  %v7620_v41 = vpop.f32.mrb[208].mxu1 }
 0x85c   : > { %v5727_v26 = vadd.f32 %v10704_v42, %v5659_v19  ;;  %v5406_v47 = vadd.f32 %v7620_v41, %v10697_v62  ;;  %v5400_v28 = vpop.f32.mrb[209].mxu1 }
 0x85d   : > { %v5726_v11 = vadd.f32 %v10704_v42, %v5658_v3  ;;  %v5401_v12 = vadd.f32 %v5400_v28, %v10697_v62 }
 0x85e   : > { %5792 = vst.msk [vmem:[%s10711_s27 + $0x78] sm:$0xff] %vm5776_vm0, %v5727_v26  ;;  %v5661_v18 = vmul.f32 %v10700_v36, %v5406_v47 }
 0x85f   : > { %5791 = vst.msk [vmem:[%s10711_s27 + $0x70] sm:$0xff] %vm5776_vm0, %v5726_v11  ;;  %v5660_v22 = vmul.f32 %v10700_v36, %v5401_v12  ;;  %v7623_v34 = vpop.f32.mrb[210].mxu1 }
 0x860   : > { %v5729_v2 = vadd.f32 %v10704_v42, %v5661_v18  ;;  %v5416_v35 = vadd.f32 %v7623_v34, %v10697_v62  ;;  %v5410_v6 = vpop.f32.mrb[211].mxu1 }
 0x861   : > { %v5728_v48 = vadd.f32 %v10704_v42, %v5660_v22  ;;  %v5411_v8 = vadd.f32 %v5410_v6, %v10697_v62 }
 0x862   : > { %5794 = vst.msk [vmem:[%s10711_s27 + $0x88] sm:$0xff] %vm5776_vm0, %v5729_v2  ;;  %v5663_v4 = vmul.f32 %v10700_v36, %v5416_v35 }
 0x863   : > { %5793 = vst.msk [vmem:[%s10711_s27 + $0x80] sm:$0xff] %vm5776_vm0, %v5728_v48  ;;  %v5662_v0 = vmul.f32 %v10700_v36, %v5411_v8  ;;  %v7626_v63 = vpop.f32.mrb[212].mxu1 }
 0x864   : > { %v5731_v9 = vadd.f32 %v10704_v42, %v5663_v4  ;;  %v5426_v27 = vadd.f32 %v7626_v63, %v10697_v62  ;;  %v5420_v32 = vpop.f32.mrb[213].mxu1 }
 0x865   : > { %v5730_v5 = vadd.f32 %v10704_v42, %v5662_v0  ;;  %v5421_v51 = vadd.f32 %v5420_v32, %v10697_v62 }
 0x866   : > { %5796 = vst.msk [vmem:[%s10711_s27 + $0x98] sm:$0xff] %vm5776_vm0, %v5731_v9  ;;  %v5665_v16 = vmul.f32 %v10700_v36, %v5426_v27 }
 0x867   : > { %5795 = vst.msk [vmem:[%s10711_s27 + $0x90] sm:$0xff] %vm5776_vm0, %v5730_v5  ;;  %v5664_v20 = vmul.f32 %v10700_v36, %v5421_v51  ;;  %v7629_v49 = vpop.f32.mrb[214].mxu1 }
 0x868   : > { %v5733_v24 = vadd.f32 %v10704_v42, %v5665_v16  ;;  %v5436_v17 = vadd.f32 %v7629_v49, %v10697_v62  ;;  %v5430_v21 = vpop.f32.mrb[215].mxu1 }
 0x869   : > { %v5732_v23 = vadd.f32 %v10704_v42, %v5664_v20  ;;  %v5431_v50 = vadd.f32 %v5430_v21, %v10697_v62 }
 0x86a   : > { %5798 = vst.msk [vmem:[%s10711_s27 + $0xa8] sm:$0xff] %vm5776_vm0, %v5733_v24  ;;  %v5667_v15 = vmul.f32 %v10700_v36, %v5436_v17 }
 0x86b   : > { %5797 = vst.msk [vmem:[%s10711_s27 + $0xa0] sm:$0xff] %vm5776_vm0, %v5732_v23  ;;  %v5666_v25 = vmul.f32 %v10700_v36, %v5431_v50  ;;  %v7632_v52 = vpop.f32.mrb[216].mxu1 }
 0x86c   : > { %v5735_v13 = vadd.f32 %v10704_v42, %v5667_v15  ;;  %v5446_v53 = vadd.f32 %v7632_v52, %v10697_v62  ;;  %v5440_v54 = vpop.f32.mrb[217].mxu1 }
 0x86d   : > { %v5734_v55 = vadd.f32 %v10704_v42, %v5666_v25  ;;  %v5441_v58 = vadd.f32 %v5440_v54, %v10697_v62 }
 0x86e   : > { %5800 = vst.msk [vmem:[%s10711_s27 + $0xb8] sm:$0xff] %vm5776_vm0, %v5735_v13  ;;  %v5669_v59 = vmul.f32 %v10700_v36, %v5446_v53 }
 0x86f   : > { %5799 = vst.msk [vmem:[%s10711_s27 + $0xb0] sm:$0xff] %vm5776_vm0, %v5734_v55  ;;  %v5668_v56 = vmul.f32 %v10700_v36, %v5441_v58  ;;  %v7635_v60 = vpop.f32.mrb[218].mxu1 }
 0x870   : > { %v5737_v61 = vadd.f32 %v10704_v42, %v5669_v59  ;;  %v5456_v10 = vadd.f32 %v7635_v60, %v10697_v62  ;;  %v5450_v38 = vpop.f32.mrb[219].mxu1 }
 0x871   : > { %v5736_v39 = vadd.f32 %v10704_v42, %v5668_v56  ;;  %v5451_v57 = vadd.f32 %v5450_v38, %v10697_v62 }
 0x872   : > { %5802 = vst.msk [vmem:[%s10711_s27 + $0xc8] sm:$0xff] %vm5776_vm0, %v5737_v61  ;;  %v5671_v37 = vmul.f32 %v10700_v36, %v5456_v10 }
 0x873   : > { %5801 = vst.msk [vmem:[%s10711_s27 + $0xc0] sm:$0xff] %vm5776_vm0, %v5736_v39  ;;  %v5670_v40 = vmul.f32 %v10700_v36, %v5451_v57  ;;  %v7638_v43 = vpop.f32.mrb[220].mxu1 }
 0x874   : > { %v5739_v44 = vadd.f32 %v10704_v42, %v5671_v37  ;;  %v5466_v1 = vadd.f32 %v7638_v43, %v10697_v62  ;;  %v5460_v45 = vpop.f32.mrb[221].mxu1 }
 0x875   : > { %v5738_v14 = vadd.f32 %v10704_v42, %v5670_v40  ;;  %v5461_v46 = vadd.f32 %v5460_v45, %v10697_v62 }
 0x876   : > { %5804 = vst.msk [vmem:[%s10711_s27 + $0xd8] sm:$0xff] %vm5776_vm0, %v5739_v44  ;;  %v5673_v29 = vmul.f32 %v10700_v36, %v5466_v1 }
 0x877   : > { %5803 = vst.msk [vmem:[%s10711_s27 + $0xd0] sm:$0xff] %vm5776_vm0, %v5738_v14  ;;  %v5672_v7 = vmul.f32 %v10700_v36, %v5461_v46  ;;  %v7641_v30 = vpop.f32.mrb[222].mxu1 }
 0x878   : > { %v5741_v31 = vadd.f32 %v10704_v42, %v5673_v29  ;;  %v5476_v33 = vadd.f32 %v7641_v30, %v10697_v62  ;;  %v5470_v19 = vpop.f32.mrb[223].mxu1 }
 0x879   : > { %v5740_v3 = vadd.f32 %v10704_v42, %v5672_v7  ;;  %v5471_v41 = vadd.f32 %v5470_v19, %v10697_v62 }
 0x87a   : > { %5806 = vst.msk [vmem:[%s10711_s27 + $0xe8] sm:$0xff] %vm5776_vm0, %v5741_v31  ;;  %v5675_v26 = vmul.f32 %v10700_v36, %v5476_v33 }
 0x87b   : > { %5805 = vst.msk [vmem:[%s10711_s27 + $0xe0] sm:$0xff] %vm5776_vm0, %v5740_v3  ;;  %v5674_v47 = vmul.f32 %v10700_v36, %v5471_v41  ;;  %v7644_v28 = vpop.f32.mrb[224].mxu1 }
 0x87c   : > { %v5743_v11 = vadd.f32 %v10704_v42, %v5675_v26  ;;  %v5486_v12 = vadd.f32 %v7644_v28, %v10697_v62  ;;  %v5480_v18 = vpop.f32.mrb[225].mxu1 }
 0x87d   : > { %v5742_v22 = vadd.f32 %v10704_v42, %v5674_v47  ;;  %v5481_v34 = vadd.f32 %v5480_v18, %v10697_v62 }
 0x87e   : > { %5808 = vst.msk [vmem:[%s10711_s27 + $0xf8] sm:$0xff] %vm5776_vm0, %v5743_v11  ;;  %v5677_v2 = vmul.f32 %v10700_v36, %v5486_v12 }
 0x87f   : > { %5807 = vst.msk [vmem:[%s10711_s27 + $0xf0] sm:$0xff] %vm5776_vm0, %v5742_v22  ;;  %v5676_v35 = vmul.f32 %v10700_v36, %v5481_v34  ;;  %v7647_v6 = vpop.f32.mrb[226].mxu1 }
 0x880   : > { %v5745_v48 = vadd.f32 %v10704_v42, %v5677_v2  ;;  %v5496_v8 = vadd.f32 %v7647_v6, %v10697_v62  ;;  %v5490_v4 = vpop.f32.mrb[227].mxu1 }
 0x881   : > { %v5744_v0 = vadd.f32 %v10704_v42, %v5676_v35  ;;  %v5491_v63 = vadd.f32 %v5490_v4, %v10697_v62 }
 0x882   : > { %5810 = vst.msk [vmem:[%s10711_s27 + $0x108] sm:$0xff] %vm5776_vm0, %v5745_v48  ;;  %v5679_v9 = vmul.f32 %v10700_v36, %v5496_v8 }
 0x883   : > { %5809 = vst.msk [vmem:[%s10711_s27 + $0x100] sm:$0xff] %vm5776_vm0, %v5744_v0  ;;  %v5678_v27 = vmul.f32 %v10700_v36, %v5491_v63  ;;  %v7650_v32 = vpop.f32.mrb[228].mxu1 }
 0x884   : > { %v5747_v5 = vadd.f32 %v10704_v42, %v5679_v9  ;;  %v5506_v51 = vadd.f32 %v7650_v32, %v10697_v62  ;;  %v5500_v16 = vpop.f32.mrb[229].mxu1 }
 0x885   : > { %v5746_v20 = vadd.f32 %v10704_v42, %v5678_v27  ;;  %v5501_v49 = vadd.f32 %v5500_v16, %v10697_v62 }
 0x886   : > { %5812 = vst.msk [vmem:[%s10711_s27 + $0x118] sm:$0xff] %vm5776_vm0, %v5747_v5  ;;  %v5681_v24 = vmul.f32 %v10700_v36, %v5506_v51 }
 0x887   : > { %5811 = vst.msk [vmem:[%s10711_s27 + $0x110] sm:$0xff] %vm5776_vm0, %v5746_v20  ;;  %v5680_v17 = vmul.f32 %v10700_v36, %v5501_v49  ;;  %v7653_v21 = vpop.f32.mrb[230].mxu1 }
 0x888   : > { %v5749_v23 = vadd.f32 %v10704_v42, %v5681_v24  ;;  %v5516_v50 = vadd.f32 %v7653_v21, %v10697_v62  ;;  %v5510_v15 = vpop.f32.mrb[231].mxu1 }
 0x889   : > { %v5748_v25 = vadd.f32 %v10704_v42, %v5680_v17  ;;  %v5511_v52 = vadd.f32 %v5510_v15, %v10697_v62 }
 0x88a   : > { %5814 = vst.msk [vmem:[%s10711_s27 + $0x128] sm:$0xff] %vm5776_vm0, %v5749_v23  ;;  %v5683_v13 = vmul.f32 %v10700_v36, %v5516_v50 }
 0x88b   : > { %5813 = vst.msk [vmem:[%s10711_s27 + $0x120] sm:$0xff] %vm5776_vm0, %v5748_v25  ;;  %v5682_v53 = vmul.f32 %v10700_v36, %v5511_v52  ;;  %v7656_v54 = vpop.f32.mrb[232].mxu1 }
 0x88c   : > { %v5751_v55 = vadd.f32 %v10704_v42, %v5683_v13  ;;  %v5526_v58 = vadd.f32 %v7656_v54, %v10697_v62  ;;  %v5520_v59 = vpop.f32.mrb[233].mxu1 }
 0x88d   : > { %v5750_v56 = vadd.f32 %v10704_v42, %v5682_v53  ;;  %v5521_v60 = vadd.f32 %v5520_v59, %v10697_v62 }
 0x88e   : > { %5816 = vst.msk [vmem:[%s10711_s27 + $0x138] sm:$0xff] %vm5776_vm0, %v5751_v55  ;;  %v5685_v61 = vmul.f32 %v10700_v36, %v5526_v58 }
 0x88f   : > { %5815 = vst.msk [vmem:[%s10711_s27 + $0x130] sm:$0xff] %vm5776_vm0, %v5750_v56  ;;  %v5684_v10 = vmul.f32 %v10700_v36, %v5521_v60  ;;  %v7659_v38 = vpop.f32.mrb[234].mxu1 }
 0x890   : > { %v5753_v39 = vadd.f32 %v10704_v42, %v5685_v61  ;;  %v5536_v57 = vadd.f32 %v7659_v38, %v10697_v62  ;;  %v5530_v37 = vpop.f32.mrb[235].mxu1 }
 0x891   : > { %v5752_v40 = vadd.f32 %v10704_v42, %v5684_v10  ;;  %v5531_v43 = vadd.f32 %v5530_v37, %v10697_v62 }
 0x892   : > { %5818 = vst.msk [vmem:[%s10711_s27 + $0x148] sm:$0xff] %vm5776_vm0, %v5753_v39  ;;  %v5687_v44 = vmul.f32 %v10700_v36, %v5536_v57 }
 0x893   : > { %5817 = vst.msk [vmem:[%s10711_s27 + $0x140] sm:$0xff] %vm5776_vm0, %v5752_v40  ;;  %v5686_v1 = vmul.f32 %v10700_v36, %v5531_v43  ;;  %v7662_v45 = vpop.f32.mrb[236].mxu1 }
 0x894   : > { %v5755_v14 = vadd.f32 %v10704_v42, %v5687_v44  ;;  %v5546_v46 = vadd.f32 %v7662_v45, %v10697_v62  ;;  %v5540_v29 = vpop.f32.mrb[237].mxu1 }
 0x895   : > { %v5754_v7 = vadd.f32 %v10704_v42, %v5686_v1  ;;  %v5541_v30 = vadd.f32 %v5540_v29, %v10697_v62 }
 0x896   : > { %5820 = vst.msk [vmem:[%s10711_s27 + $0x158] sm:$0xff] %vm5776_vm0, %v5755_v14  ;;  %v5689_v31 = vmul.f32 %v10700_v36, %v5546_v46 }
 0x897   : > { %5819 = vst.msk [vmem:[%s10711_s27 + $0x150] sm:$0xff] %vm5776_vm0, %v5754_v7  ;;  %v5688_v33 = vmul.f32 %v10700_v36, %v5541_v30  ;;  %v7665_v19 = vpop.f32.mrb[238].mxu1 }
 0x898   : > { %v5757_v3 = vadd.f32 %v10704_v42, %v5689_v31  ;;  %v5556_v41 = vadd.f32 %v7665_v19, %v10697_v62  ;;  %v5550_v26 = vpop.f32.mrb[239].mxu1 }
 0x899   : > { %v5756_v47 = vadd.f32 %v10704_v42, %v5688_v33  ;;  %v5551_v28 = vadd.f32 %v5550_v26, %v10697_v62 }
 0x89a   : > { %5822 = vst.msk [vmem:[%s10711_s27 + $0x168] sm:$0xff] %vm5776_vm0, %v5757_v3  ;;  %v5691_v11 = vmul.f32 %v10700_v36, %v5556_v41 }
 0x89b   : > { %5821 = vst.msk [vmem:[%s10711_s27 + $0x160] sm:$0xff] %vm5776_vm0, %v5756_v47  ;;  %v5690_v12 = vmul.f32 %v10700_v36, %v5551_v28  ;;  %v7668_v18 = vpop.f32.mrb[240].mxu1 }
 0x89c   : > { %v5759_v22 = vadd.f32 %v10704_v42, %v5691_v11  ;;  %v5566_v34 = vadd.f32 %v7668_v18, %v10697_v62  ;;  %v5560_v2 = vpop.f32.mrb[241].mxu1 }
 0x89d   : > { %v5758_v35 = vadd.f32 %v10704_v42, %v5690_v12  ;;  %v5561_v6 = vadd.f32 %v5560_v2, %v10697_v62 }
 0x89e   : > { %5824 = vst.msk [vmem:[%s10711_s27 + $0x178] sm:$0xff] %vm5776_vm0, %v5759_v22  ;;  %v5693_v48 = vmul.f32 %v10700_v36, %v5566_v34 }
 0x89f   : > { %5823 = vst.msk [vmem:[%s10711_s27 + $0x170] sm:$0xff] %vm5776_vm0, %v5758_v35  ;;  %v5692_v8 = vmul.f32 %v10700_v36, %v5561_v6  ;;  %v7671_v4 = vpop.f32.mrb[242].mxu1 }
 0x8a0   : > { %v5761_v0 = vadd.f32 %v10704_v42, %v5693_v48  ;;  %v5576_v63 = vadd.f32 %v7671_v4, %v10697_v62  ;;  %v5570_v9 = vpop.f32.mrb[243].mxu1 }
 0x8a1   : > { %v5760_v27 = vadd.f32 %v10704_v42, %v5692_v8  ;;  %v5571_v32 = vadd.f32 %v5570_v9, %v10697_v62 }
 0x8a2   : > { %5826 = vst.msk [vmem:[%s10711_s27 + $0x188] sm:$0xff] %vm5776_vm0, %v5761_v0  ;;  %v5695_v5 = vmul.f32 %v10700_v36, %v5576_v63 }
 0x8a3   : > { %5825 = vst.msk [vmem:[%s10711_s27 + $0x180] sm:$0xff] %vm5776_vm0, %v5760_v27  ;;  %v5694_v51 = vmul.f32 %v10700_v36, %v5571_v32  ;;  %v7674_v16 = vpop.f32.mrb[244].mxu1 }
 0x8a4   : > { %v5763_v20 = vadd.f32 %v10704_v42, %v5695_v5  ;;  %v5586_v49 = vadd.f32 %v7674_v16, %v10697_v62  ;;  %v5580_v24 = vpop.f32.mrb[245].mxu1 }
 0x8a5   : > { %v5762_v17 = vadd.f32 %v10704_v42, %v5694_v51  ;;  %v5581_v21 = vadd.f32 %v5580_v24, %v10697_v62 }
 0x8a6   : > { %5828 = vst.msk [vmem:[%s10711_s27 + $0x198] sm:$0xff] %vm5776_vm0, %v5763_v20  ;;  %v5697_v23 = vmul.f32 %v10700_v36, %v5586_v49 }
 0x8a7   : > { %5827 = vst.msk [vmem:[%s10711_s27 + $0x190] sm:$0xff] %vm5776_vm0, %v5762_v17  ;;  %v5696_v50 = vmul.f32 %v10700_v36, %v5581_v21  ;;  %v7677_v15 = vpop.f32.mrb[246].mxu1 }
 0x8a8   : > { %v5765_v25 = vadd.f32 %v10704_v42, %v5697_v23  ;;  %v5596_v52 = vadd.f32 %v7677_v15, %v10697_v62  ;;  %v5590_v13 = vpop.f32.mrb[247].mxu1 }
 0x8a9   : > { %v5764_v53 = vadd.f32 %v10704_v42, %v5696_v50  ;;  %v5591_v54 = vadd.f32 %v5590_v13, %v10697_v62 }
 0x8aa   : > { %5830 = vst.msk [vmem:[%s10711_s27 + $0x1a8] sm:$0xff] %vm5776_vm0, %v5765_v25  ;;  %v5699_v55 = vmul.f32 %v10700_v36, %v5596_v52 }
 0x8ab   : > { %5829 = vst.msk [vmem:[%s10711_s27 + $0x1a0] sm:$0xff] %vm5776_vm0, %v5764_v53  ;;  %v5698_v58 = vmul.f32 %v10700_v36, %v5591_v54  ;;  %v7680_v59 = vpop.f32.mrb[248].mxu1 }
 0x8ac   : > { %v5767_v56 = vadd.f32 %v10704_v42, %v5699_v55  ;;  %v5606_v60 = vadd.f32 %v7680_v59, %v10697_v62  ;;  %v5600_v61 = vpop.f32.mrb[249].mxu1 }
 0x8ad   : > { %v5766_v10 = vadd.f32 %v10704_v42, %v5698_v58  ;;  %v5601_v38 = vadd.f32 %v5600_v61, %v10697_v62 }
 0x8ae   : > { %5832 = vst.msk [vmem:[%s10711_s27 + $0x1b8] sm:$0xff] %vm5776_vm0, %v5767_v56  ;;  %v5701_v39 = vmul.f32 %v10700_v36, %v5606_v60 }
 0x8af   : > { %5831 = vst.msk [vmem:[%s10711_s27 + $0x1b0] sm:$0xff] %vm5776_vm0, %v5766_v10  ;;  %v5700_v57 = vmul.f32 %v10700_v36, %v5601_v38  ;;  %v7683_v37 = vpop.f32.mrb[250].mxu1 }
 0x8b0   : > { %v5769_v40 = vadd.f32 %v10704_v42, %v5701_v39  ;;  %v5616_v43 = vadd.f32 %v7683_v37, %v10697_v62  ;;  %v5610_v44 = vpop.f32.mrb[251].mxu1 }
 0x8b1   : > { %v5768_v1 = vadd.f32 %v10704_v42, %v5700_v57  ;;  %v5611_v45 = vadd.f32 %v5610_v44, %v10697_v62 }
 0x8b2   : > { %5834 = vst.msk [vmem:[%s10711_s27 + $0x1c8] sm:$0xff] %vm5776_vm0, %v5769_v40  ;;  %v5703_v14 = vmul.f32 %v10700_v36, %v5616_v43 }
 0x8b3   : > { %5833 = vst.msk [vmem:[%s10711_s27 + $0x1c0] sm:$0xff] %vm5776_vm0, %v5768_v1  ;;  %v5702_v46 = vmul.f32 %v10700_v36, %v5611_v45  ;;  %v7686_v29 = vpop.f32.mrb[252].mxu1 }
 0x8b4   : > { %v5771_v7 = vadd.f32 %v10704_v42, %v5703_v14  ;;  %v5626_v30 = vadd.f32 %v7686_v29, %v10697_v62  ;;  %v5620_v31 = vpop.f32.mrb[253].mxu1 }
 0x8b5   : > { %v5770_v33 = vadd.f32 %v10704_v42, %v5702_v46  ;;  %v5621_v19 = vadd.f32 %v5620_v31, %v10697_v62 }
 0x8b6   : > { %5836 = vst.msk [vmem:[%s10711_s27 + $0x1d8] sm:$0xff] %vm5776_vm0, %v5771_v7  ;;  %v5705_v3 = vmul.f32 %v10700_v36, %v5626_v30 }
 0x8b7   : > { %5835 = vst.msk [vmem:[%s10711_s27 + $0x1d0] sm:$0xff] %vm5776_vm0, %v5770_v33  ;;  %v5704_v41 = vmul.f32 %v10700_v36, %v5621_v19  ;;  %v7689_v26 = vpop.f32.mrb[254].mxu1 }
 0x8b8   : > { %v5773_v47 = vadd.f32 %v10704_v42, %v5705_v3  ;;  %v5636_v28 = vadd.f32 %v7689_v26, %v10697_v62  ;;  %v5630_v11 = vpop.f32.mrb[255].mxu1 }
 0x8b9   : > { %v5772_v12 = vadd.f32 %v10704_v42, %v5704_v41  ;;  %v5631_v18 = vadd.f32 %v5630_v11, %v10697_v62 }
 0x8ba   : > { %5838 = vst.msk [vmem:[%s10711_s27 + $0x1e8] sm:$0xff] %vm5776_vm0, %v5773_v47  ;;  %v5707_v22 = vmul.f32 %v10700_v36, %v5636_v28 }
 0x8bb   : > { %5837 = vst.msk [vmem:[%s10711_s27 + $0x1e0] sm:$0xff] %vm5776_vm0, %v5772_v12  ;;  %v5706_v34 = vmul.f32 %v10700_v36, %v5631_v18 }
 0x8bc   : > { %v5775_v2 = vadd.f32 %v10704_v42, %v5707_v22 }
 0x8bd   : > { %v5774_v35 = vadd.f32 %v10704_v42, %v5706_v34 }
 0x8be   : > { %5840 = vst.msk [vmem:[%s10711_s27 + $0x1f8] sm:$0xff] %vm5776_vm0, %v5775_v2 }
 0x8bf   : > { %5839 = vst.msk [vmem:[%s10711_s27 + $0x1f0] sm:$0xff] %vm5776_vm0, %v5774_v35 }
 0x8c0 PF: > { %p33_p5 = scmp.ge.s32.totalorder %s8771_s23, 4   ;;  %s11124_s27 = smov %s8406_s28 }
 0x8c1   : > { %s11125_s28 = smov %s8410_s29  ;;  %s11126_s29 = smov %s8782_s8 }
 0x8c2   : > { %s11127_s30 = smov %s8771_s23  ;;  %35 = sbr.rel (!%p33_p5) target bundleno = 21 (0x15), region = 168 }
 0x8c9   :  { %5863 = vsyncpa [#allocation3], 1 }
 0x8ca   :  { %5865 = vsyncpa [#allocation3 + $0x1], 1 }
 0x8cb   :  { %5866 = vsyncpa [#allocation5], 1 }
 0x8cc   :  { %5867 = vsyncpa [#allocation8], 1 }
 0x8cd   :  { %5868 = vsyncpa [#allocation11], 1 }
 0x8ce   :  { %5869 = vsyncpa [#allocation14], 1 }
 0x8cf   :  { %5870 = vsyncpa [#allocation17], 1 }

</bundles_post_ra>
